<compile_context>
chip_gen: v6e
topology: v6e:2x2x1
jax: 0.10.0
libtpu: 0.0.40
codegen_flags: <defaults>
</compile_context>

<pallas_src>
from functools import partial

import numpy as np
import jax
import jax.numpy as jnp
from jax.experimental import pallas as pl
from jax.experimental.pallas import tpu as pltpu

_EPS = 1e-5
_LANE = 128
_ROW_TILE_CAP = 1024
_VMEM_LIMIT = 48 * 1024 * 1024


# ----------------------------------------------------------------------------
# small helpers
# ----------------------------------------------------------------------------
def _pad_up(n, m):
    return ((n + m - 1) // m) * m


def _pad_last(a, target):
    pad = target - a.shape[-1]
    if pad == 0:
        return a
    cfg = [(0, 0)] * (a.ndim - 1) + [(0, pad)]
    return jnp.pad(a, cfg)


def _pad_axis(a, axis, target):
    pad = target - a.shape[axis]
    if pad == 0:
        return a
    cfg = [(0, 0)] * a.ndim
    cfg[axis] = (0, pad)
    return jnp.pad(a, cfg)


def _pick_row_tile(p, cap=_ROW_TILE_CAP):
    """Largest multiple-of-8 divisor of p not exceeding cap (else p itself)."""
    start = (min(cap, p) // 8) * 8
    for cand in range(start, 0, -8):
        if p % cand == 0:
            return cand
    return p


def _cparams(n_axes=1):
    return pltpu.CompilerParams(
        dimension_semantics=("parallel",) * n_axes,
        vmem_limit_bytes=_VMEM_LIMIT)


def _tile_stats(y):
    """(2, C) = [sum over rows, sum of squares over rows] of an f32 tile."""
    return jnp.concatenate(
        [jnp.sum(y, axis=0, keepdims=True),
         jnp.sum(y * y, axis=0, keepdims=True)], axis=0)


def _affine_from_stats(stats, count, gamma, beta):
    """Fold training-mode BN into per-channel scale/shift from tile stats."""
    total = jnp.sum(stats, axis=0)                      # (2, C)
    mean = total[0] / count
    var = jnp.maximum(total[1] / count - mean * mean, 0.0)
    scale = gamma[0] * jax.lax.rsqrt(var + _EPS)
    shift = beta[0] - mean * scale
    return scale.reshape(1, -1), shift.reshape(1, -1)


# ----------------------------------------------------------------------------
# Kernels
# ----------------------------------------------------------------------------
def _conv1x1_stats_kernel(x_ref, w_ref, y_ref, st_ref):
    # conv1: y = x @ w1, plus per-tile BN statistics of y.
    y = jnp.dot(x_ref[...].astype(jnp.bfloat16), w_ref[...],
                preferred_element_type=jnp.float32)
    y_ref[...] = y.astype(y_ref.dtype)
    st_ref[0] = _tile_stats(y)


def _gconv3x3_kernel(ph_ref, sc_ref, sh_ref, w_ref, y_ref, st_ref,
                     *, stride, h_in, w_in, h_out, w_out):
    # conv2: grouped 3x3, stride, pad=1 — computed per image from the
    # stride-phase-decomposed padded conv1 output. BN1 affine + ReLU is folded
    # in here (zero padding is restored via a border mask).
    C = w_ref.shape[-1]
    s = stride
    hph, wph = ph_ref.shape[1], ph_ref.shape[2]
    sc = sc_ref[...].reshape(1, 1, C)
    sh = sh_ref[...].reshape(1, 1, C)

    h_phases = []
    for a in range(s):
        for b in range(s):
            yph = ph_ref[a * s + b]                          # (hph, wph, C)
            h = jnp.maximum(yph * sc + sh, 0.0)
            ri = jax.lax.broadcasted_iota(jnp.int32, (hph, wph, 1), 0) * s + a
            ci = jax.lax.broadcasted_iota(jnp.int32, (hph, wph, 1), 1) * s + b
            valid = (ri >= 1) & (ri <= h_in) & (ci >= 1) & (ci <= w_in)
            h_phases.append(jnp.where(valid, h, 0.0))

    acc = jnp.zeros((h_out * w_out, C), jnp.float32)
    for kh in range(3):
        for kw in range(3):
            hp = h_phases[(kh % s) * s + (kw % s)]
            oi, oj = kh // s, kw // s
            wnd = hp[oi:oi + h_out, oj:oj + w_out, :]        # contiguous slice
            lhs = wnd.reshape(h_out * w_out, C).astype(jnp.bfloat16)
            acc = acc + jnp.dot(lhs, w_ref[kh * 3 + kw],
                                preferred_element_type=jnp.float32)

    y_ref[0] = acc.astype(y_ref.dtype)
    st_ref[0] = _tile_stats(acc)


def _conv3_ds_kernel(y2_ref, sc_ref, sh_ref, w3_ref, xs_ref, wd_ref,
                     y3_ref, st3_ref, r_ref, std_ref):
    # conv3 (with BN2 affine + ReLU folded in) fused with the strided 1x1
    # downsample conv; emits BN3 and BN_downsample statistics.
    h2 = jnp.maximum(y2_ref[...] * sc_ref[...] + sh_ref[...], 0.0)
    y3 = jnp.dot(h2.astype(jnp.bfloat16), w3_ref[...],
                 preferred_element_type=jnp.float32)
    r = jnp.dot(xs_ref[...].astype(jnp.bfloat16), wd_ref[...],
                preferred_element_type=jnp.float32)
    y3_ref[...] = y3.astype(y3_ref.dtype)
    r_ref[...] = r.astype(r_ref.dtype)
    st3_ref[0] = _tile_stats(y3)
    std_ref[0] = _tile_stats(r)


def _conv3_kernel(y2_ref, sc_ref, sh_ref, w3_ref, y3_ref, st3_ref):
    h2 = jnp.maximum(y2_ref[...] * sc_ref[...] + sh_ref[...], 0.0)
    y3 = jnp.dot(h2.astype(jnp.bfloat16), w3_ref[...],
                 preferred_element_type=jnp.float32)
    y3_ref[...] = y3.astype(y3_ref.dtype)
    st3_ref[0] = _tile_stats(y3)


def _residual_act_kernel(y3_ref, s3_ref, b3_ref, r_ref, sr_ref, br_ref, o_ref):
    out = (y3_ref[...] * s3_ref[...] + b3_ref[...]
           + r_ref[...] * sr_ref[...] + br_ref[...])
    o_ref[...] = jnp.maximum(out, 0.0).astype(o_ref.dtype)


# ----------------------------------------------------------------------------
# pallas_call wrappers
# ----------------------------------------------------------------------------
def _conv1_call(xf, w):
    p, cin = xf.shape
    cout = w.shape[1]
    tm = _pick_row_tile(p)
    nt = p // tm
    return pl.pallas_call(
        _conv1x1_stats_kernel,
        out_shape=(jax.ShapeDtypeStruct((p, cout), jnp.bfloat16),
                   jax.ShapeDtypeStruct((nt, 2, cout), jnp.float32)),
        grid=(nt,),
        in_specs=[pl.BlockSpec((tm, cin), lambda i: (i, 0)),
                  pl.BlockSpec((cin, cout), lambda i: (0, 0))],
        out_specs=(pl.BlockSpec((tm, cout), lambda i: (i, 0)),
                   pl.BlockSpec((1, 2, cout), lambda i: (i, 0, 0))),
        compiler_params=_cparams(1),
    )(xf, w)


def _conv2_call(phases, sc1, sh1, w2d, *, n, stride, h_in, w_in, h_out, w_out):
    s2 = stride * stride
    hph, wph, cc = phases.shape[1], phases.shape[2], phases.shape[3]
    kernel = partial(_gconv3x3_kernel, stride=stride, h_in=h_in, w_in=w_in,
                     h_out=h_out, w_out=w_out)
    return pl.pallas_call(
        kernel,
        out_shape=(jax.ShapeDtypeStruct((n, h_out * w_out, cc), jnp.bfloat16),
                   jax.ShapeDtypeStruct((n, 2, cc), jnp.float32)),
        grid=(n,),
        in_specs=[pl.BlockSpec((s2, hph, wph, cc), lambda i: (i, 0, 0, 0)),
                  pl.BlockSpec((1, cc), lambda i: (0, 0)),
                  pl.BlockSpec((1, cc), lambda i: (0, 0)),
                  pl.BlockSpec((9, cc, cc), lambda i: (0, 0, 0))],
        out_specs=(pl.BlockSpec((1, h_out * w_out, cc), lambda i: (i, 0, 0)),
                   pl.BlockSpec((1, 2, cc), lambda i: (i, 0, 0))),
        compiler_params=_cparams(1),
    )(phases, sc1, sh1, w2d)


# ----------------------------------------------------------------------------
# Forward pass
# ----------------------------------------------------------------------------
def bottleneck_forward(x_nchw, params, *, stride, groups):
    x = jnp.transpose(x_nchw, (0, 2, 3, 1)).astype(jnp.float32)  # NHWC
    N, H, W, cin = x.shape
    width = params["w1"].shape[1]
    out_c = params["w3"].shape[1]
    has_ds = (stride != 1) or (cin != out_c)

    cin_p = _pad_up(cin, _LANE)
    wid_p = _pad_up(width, _LANE)
    oc_p = _pad_up(out_c, _LANE)
    bf16 = jnp.bfloat16

    # ---- weight / BN-param prep (lane-padded, bf16 weights) ----
    w1 = _pad_axis(_pad_last(params["w1"], wid_p), 0, cin_p).astype(bf16)
    cin_g = width // groups
    cout_g = params["w2"].shape[3]
    w2d = jnp.zeros((9, width, width), jnp.float32)
    for g in range(groups):  # block-diagonal densification of grouped weights
        w2d = w2d.at[:, g * cin_g:(g + 1) * cin_g,
                     g * cout_g:(g + 1) * cout_g].set(params["w2"][:, g])
    w2d = _pad_axis(_pad_last(w2d, wid_p), 1, wid_p).astype(bf16)
    w3 = _pad_axis(_pad_last(params["w3"], oc_p), 0, wid_p).astype(bf16)

    g1 = _pad_last(params["g1"], wid_p); b1 = _pad_last(params["b1"], wid_p)
    g2 = _pad_last(params["g2"], wid_p); b2 = _pad_last(params["b2"], wid_p)
    g3 = _pad_last(params["g3"], oc_p); b3 = _pad_last(params["b3"], oc_p)

    # ---- conv1 (1x1) + BN1 statistics ----
    p1 = N * H * W
    xf = _pad_last(x.reshape(p1, cin), cin_p)
    y1, st1 = _conv1_call(xf, w1)
    sc1, sh1 = _affine_from_stats(st1, p1, g1, b1)

    # ---- conv2 (3x3, grouped, strided): phase decomposition, no HBM im2col ----
    s = stride
    h_out = (H - 1) // s + 1
    w_out = (W - 1) // s + 1
    hp_, wp_ = H + 2, W + 2
    he, we = _pad_up(hp_, s), _pad_up(wp_, s)
    ypad = jnp.pad(y1.reshape(N, H, W, wid_p),
                   ((0, 0), (1, 1 + he - hp_), (1, 1 + we - wp_), (0, 0)))
    phase_list = [ypad[:, a::s, b::s, :] for a in range(s) for b in range(s)]
    phases = jnp.stack(phase_list, axis=1).reshape(
        N * s * s, he // s, we // s, wid_p)
    y2, st2 = _conv2_call(phases, sc1, sh1, w2d, n=N, stride=s,
                          h_in=H, w_in=W, h_out=h_out, w_out=w_out)
    p2 = N * h_out * w_out
    sc2, sh2 = _affine_from_stats(st2, p2, g2, b2)

    # ---- conv3 (1x1) [+ fused strided downsample conv] + BN3/BNd statistics ----
    y2f = y2.reshape(p2, wid_p)
    tm2 = _pick_row_tile(p2)
    nt2 = p2 // tm2
    if has_ds:
        wd = _pad_axis(_pad_last(params["wd"], oc_p), 0, cin_p).astype(bf16)
        gd = _pad_last(params["gd"], oc_p); bd = _pad_last(params["bd"], oc_p)
        xsf = _pad_last(x[:, ::s, ::s, :].reshape(p2, cin), cin_p)
        y3, st3, r, std = pl.pallas_call(
            _conv3_ds_kernel,
            out_shape=(jax.ShapeDtypeStruct((p2, oc_p), jnp.bfloat16),
                       jax.ShapeDtypeStruct((nt2, 2, oc_p), jnp.float32),
                       jax.ShapeDtypeStruct((p2, oc_p), jnp.bfloat16),
                       jax.ShapeDtypeStruct((nt2, 2, oc_p), jnp.float32)),
            grid=(nt2,),
            in_specs=[pl.BlockSpec((tm2, wid_p), lambda i: (i, 0)),
                      pl.BlockSpec((1, wid_p), lambda i: (0, 0)),
                      pl.BlockSpec((1, wid_p), lambda i: (0, 0)),
                      pl.BlockSpec((wid_p, oc_p), lambda i: (0, 0)),
                      pl.BlockSpec((tm2, cin_p), lambda i: (i, 0)),
                      pl.BlockSpec((cin_p, oc_p), lambda i: (0, 0))],
            out_specs=(pl.BlockSpec((tm2, oc_p), lambda i: (i, 0)),
                       pl.BlockSpec((1, 2, oc_p), lambda i: (i, 0, 0)),
                       pl.BlockSpec((tm2, oc_p), lambda i: (i, 0)),
                       pl.BlockSpec((1, 2, oc_p), lambda i: (i, 0, 0))),
            compiler_params=_cparams(1),
        )(y2f, sc2, sh2, w3, xsf, wd)
        sc3, sh3 = _affine_from_stats(st3, p2, g3, b3)
        scd, shd = _affine_from_stats(std, p2, gd, bd)
    else:
        y3, st3 = pl.pallas_call(
            _conv3_kernel,
            out_shape=(jax.ShapeDtypeStruct((p2, oc_p), jnp.bfloat16),
                       jax.ShapeDtypeStruct((nt2, 2, oc_p), jnp.float32)),
            grid=(nt2,),
            in_specs=[pl.BlockSpec((tm2, wid_p), lambda i: (i, 0)),
                      pl.BlockSpec((1, wid_p), lambda i: (0, 0)),
                      pl.BlockSpec((1, wid_p), lambda i: (0, 0)),
                      pl.BlockSpec((wid_p, oc_p), lambda i: (0, 0))],
            out_specs=(pl.BlockSpec((tm2, oc_p), lambda i: (i, 0)),
                       pl.BlockSpec((1, 2, oc_p), lambda i: (i, 0, 0))),
            compiler_params=_cparams(1),
        )(y2f, sc2, sh2, w3)
        sc3, sh3 = _affine_from_stats(st3, p2, g3, b3)
        r = _pad_last(x.reshape(p2, cin), oc_p)       # identity residual
        scd = jnp.ones((1, oc_p), jnp.float32)
        shd = jnp.zeros((1, oc_p), jnp.float32)

    # ---- BN3/BNd affine + residual add + final ReLU ----
    out = pl.pallas_call(
        _residual_act_kernel,
        out_shape=jax.ShapeDtypeStruct((p2, oc_p), jnp.float32),
        grid=(nt2,),
        in_specs=[pl.BlockSpec((tm2, oc_p), lambda i: (i, 0)),
                  pl.BlockSpec((1, oc_p), lambda i: (0, 0)),
                  pl.BlockSpec((1, oc_p), lambda i: (0, 0)),
                  pl.BlockSpec((tm2, oc_p), lambda i: (i, 0)),
                  pl.BlockSpec((1, oc_p), lambda i: (0, 0)),
                  pl.BlockSpec((1, oc_p), lambda i: (0, 0))],
        out_specs=pl.BlockSpec((tm2, oc_p), lambda i: (i, 0)),
        compiler_params=_cparams(1),
    )(y3, sc3, sh3, r, scd, shd)

    out = out[:, :out_c].reshape(N, h_out, w_out, out_c)
    return jnp.transpose(out, (0, 3, 1, 2))           # NHWC -> NCHW


# ----------------------------------------------------------------------------
# Pure-JAX reference (f32 everywhere) mirroring the PyTorch module
# ----------------------------------------------------------------------------
def _reference_forward(x_nchw, params, *, stride, groups):
    x = jnp.transpose(x_nchw, (0, 2, 3, 1)).astype(jnp.float32)
    N, H, W, cin = x.shape
    width = params["w1"].shape[1]
    out_c = params["w3"].shape[1]

    def bn(y, g, b):
        m = jnp.mean(y, axis=0, keepdims=True)
        v = jnp.mean((y - m) ** 2, axis=0, keepdims=True)
        return (y - m) * jax.lax.rsqrt(v + _EPS) * g + b

    h = jnp.maximum(bn(x.reshape(-1, cin) @ params["w1"],
                       params["g1"], params["b1"]), 0.0)
    hpad = jnp.pad(h.reshape(N, H, W, width), ((0, 0), (1, 1), (1, 1), (0, 0)))
    s = stride
    Ho, Wo = (H - 1) // s + 1, (W - 1) // s + 1
    cin_g = width // groups
    cout_g = params["w2"].shape[3]
    y2 = jnp.zeros((N * Ho * Wo, width), jnp.float32)
    for kh in range(3):
        for kw in range(3):
            wnd = hpad[:, kh:kh + (Ho - 1) * s + 1:s,
                       kw:kw + (Wo - 1) * s + 1:s, :].reshape(N * Ho * Wo, width)
            for g in range(groups):
                y2 = y2.at[:, g * cout_g:(g + 1) * cout_g].add(
                    wnd[:, g * cin_g:(g + 1) * cin_g] @ params["w2"][kh * 3 + kw, g])
    h2 = jnp.maximum(bn(y2, params["g2"], params["b2"]), 0.0)
    y3 = bn(h2 @ params["w3"], params["g3"], params["b3"])
    if s != 1 or cin != out_c:
        xs = x[:, ::s, ::s, :].reshape(N * Ho * Wo, cin)
        res = bn(xs @ params["wd"], params["gd"], params["bd"])
    else:
        res = x.reshape(-1, cin)
    out = jnp.maximum(y3 + res, 0.0).reshape(N, Ho, Wo, out_c)
    return jnp.transpose(out, (0, 3, 1, 2))


# ----------------------------------------------------------------------------
# Deterministic parameter init + smoke test
# ----------------------------------------------------------------------------
if __name__ == "__main__":
    in_planes, planes, stride, groups, width_per_group = 16, 8, 2, 2, 64
    width = int(planes * (width_per_group / 64)) * groups      # 16
    out_c = planes * 4                                         # 32

    key = jax.random.PRNGKey(0)
    ks = jax.random.split(key, 13)

    def bn_params(kg, kb, c):
        g = (1.0 + 0.1 * jax.random.normal(kg, (1, c))).astype(jnp.float32)
        b = (0.1 * jax.random.normal(kb, (1, c))).astype(jnp.float32)
        return g, b

    g1, b1 = bn_params(ks[1], ks[2], width)
    g2, b2 = bn_params(ks[4], ks[5], width)
    g3, b3 = bn_params(ks[7], ks[8], out_c)
    gd, bd = bn_params(ks[10], ks[11], out_c)

    params = dict(
        w1=0.1 * jax.random.normal(ks[0], (in_planes, width), jnp.float32),
        g1=g1, b1=b1,
        w2=0.1 * jax.random.normal(
            ks[3], (9, groups, width // groups, width // groups), jnp.float32),
        g2=g2, b2=b2,
        w3=0.1 * jax.random.normal(ks[6], (width, out_c), jnp.float32),
        g3=g3, b3=b3,
        wd=0.1 * jax.random.normal(ks[9], (in_planes, out_c), jnp.float32),
        gd=gd, bd=bd,
    )

    x = jax.random.normal(ks[12], (8, in_planes, 16, 16), jnp.float32)  # NCHW

    fwd = jax.jit(partial(bottleneck_forward, stride=stride, groups=groups))
    out = fwd(x, params)
    jax.block_until_ready(out)
    assert out.shape == (8, out_c, 8, 8), out.shape

    # Correctness vs f32 reference (kernel uses bf16 matmul operands and bf16
    # intermediate activation storage, hence the loose-but-structural tolerance).
    ref = _reference_forward(x, params, stride=stride, groups=groups)
    np.testing.assert_allclose(np.asarray(out), np.asarray(ref),
                               rtol=1e-1, atol=1e-1)
    print("KERNEL_OK")
</pallas_src>

<mosaic_0001>
module attributes {stable_mosaic.version = 11 : i64} {
  func.func @_conv1x1_stats_kernel(%arg0: i32, %arg1: memref<1024x128xf32, #tpu.memory_space<vmem>>, %arg2: memref<128x128xbf16, #tpu.memory_space<vmem>>, %arg3: memref<1024x128xbf16, #tpu.memory_space<vmem>>, %arg4: memref<1x2x128xf32, #tpu.memory_space<vmem>>) attributes {dimension_semantics = [#tpu.dimension_semantics<parallel>], iteration_bounds = array<i64: 2>, scalar_prefetch = 0 : i64, scratch_operands = 0 : i64, tpu.core_type = #tpu.core_type<tc>, window_params = [{transform_indices = @transform_0, window_bounds = array<i64: 1024, 128>}, {pipeline_mode = #tpu.pipeline_mode<synchronous>, transform_indices = @transform_1, window_bounds = array<i64: 128, 128>}, {transform_indices = @transform_2, window_bounds = array<i64: 1024, 128>}, {transform_indices = @transform_3, window_bounds = array<i64: 1, 2, 128>}]} {
    %c0 = arith.constant 0 : index
    %c0_0 = arith.constant 0 : index
    %0 = vector.load %arg1[%c0, %c0_0] : memref<1024x128xf32, #tpu.memory_space<vmem>>, vector<1024x128xf32>
    %1 = arith.truncf %0 : vector<1024x128xf32> to vector<1024x128xbf16>
    %c0_1 = arith.constant 0 : index
    %c0_2 = arith.constant 0 : index
    %2 = vector.load %arg2[%c0_1, %c0_2] : memref<128x128xbf16, #tpu.memory_space<vmem>>, vector<128x128xbf16>
    %cst = arith.constant dense<0.000000e+00> : vector<1024x128xf32>
    %3 = tpu.matmul %1, %2, %cst {dimension_numbers = #tpu.dot_dimension_numbers<[1], [0], [0], [1], [0, 0, 1, 1], [], []>} : vector<1024x128xbf16>, vector<128x128xbf16>, vector<1024x128xf32> -> vector<1024x128xf32>
    %4 = arith.truncf %3 : vector<1024x128xf32> to vector<1024x128xbf16>
    %c0_3 = arith.constant 0 : index
    %c0_4 = arith.constant 0 : index
    %5 = vector.load %arg3[%c0_3, %c0_4] : memref<1024x128xbf16, #tpu.memory_space<vmem>>, vector<1024x128xbf16>
    tpu.vector_store %arg3[%c0_3, %c0_4], %4 {strides = array<i32>} : memref<1024x128xbf16, #tpu.memory_space<vmem>>, vector<1024x128xbf16>,
    %cst_5 = arith.constant dense<0.000000e+00> : vector<128xf32>
    %6 = vector.multi_reduction <add>, %3, %cst_5 [0] : vector<1024x128xf32> to vector<128xf32>
    %7 = vector.shape_cast %6 : vector<128xf32> to vector<1x128xf32>
    %8 = arith.mulf %3, %3 : vector<1024x128xf32>
    %cst_6 = arith.constant dense<0.000000e+00> : vector<128xf32>
    %9 = vector.multi_reduction <add>, %8, %cst_6 [0] : vector<1024x128xf32> to vector<128xf32>
    %10 = vector.shape_cast %9 : vector<128xf32> to vector<1x128xf32>
    %11 = tpu.concatenate %7, %10 in 0 : vector<1x128xf32>, vector<1x128xf32> -> vector<2x128xf32>
    %c0_7 = arith.constant 0 : index
    %c0_8 = arith.constant 0 : index
    %c0_9 = arith.constant 0 : index
    %12 = vector.load %arg4[%c0_7, %c0_8, %c0_9] : memref<1x2x128xf32, #tpu.memory_space<vmem>>, vector<1x2x128xf32>
    %13 = vector.shape_cast %12 : vector<1x2x128xf32> to vector<2x128xf32>
    %14 = vector.shape_cast %11 : vector<2x128xf32> to vector<1x2x128xf32>
    tpu.vector_store %arg4[%c0_7, %c0_8, %c0_9], %14 {strides = array<i32>} : memref<1x2x128xf32, #tpu.memory_space<vmem>>, vector<1x2x128xf32>,
    return
  }
  func.func @transform_0(%arg0: i32) -> (i32, i32) {
    %c0_i32 = arith.constant 0 : i32
    %c0_i32_0 = arith.constant 0 : i32
    return %arg0, %c0_i32 : i32, i32
  }
  func.func @transform_1(%arg0: i32) -> (i32, i32) {
    %c0_i32 = arith.constant 0 : i32
    %c0_i32_0 = arith.constant 0 : i32
    %c0_i32_1 = arith.constant 0 : i32
    return %c0_i32, %c0_i32_0 : i32, i32
  }
  func.func @transform_2(%arg0: i32) -> (i32, i32) {
    %c0_i32 = arith.constant 0 : i32
    %c0_i32_0 = arith.constant 0 : i32
    return %arg0, %c0_i32 : i32, i32
  }
  func.func @transform_3(%arg0: i32) -> (i32, i32, i32) {
    %c0_i32 = arith.constant 0 : i32
    %c0_i32_0 = arith.constant 0 : i32
    %c0_i32_1 = arith.constant 0 : i32
    return %arg0, %c0_i32, %c0_i32_0 : i32, i32, i32
  }
}

module attributes {stable_mosaic.version = 11 : i64} {
  func.func @_gconv3x3_kernel(%arg0: i32, %arg1: memref<4x9x9x128xbf16, #tpu.memory_space<vmem>>, %arg2: memref<1x128xf32, #tpu.memory_space<vmem>>, %arg3: memref<1x128xf32, #tpu.memory_space<vmem>>, %arg4: memref<9x128x128xbf16, #tpu.memory_space<vmem>>, %arg5: memref<1x64x128xbf16, #tpu.memory_space<vmem>>, %arg6: memref<1x2x128xf32, #tpu.memory_space<vmem>>) attributes {dimension_semantics = [#tpu.dimension_semantics<parallel>], iteration_bounds = array<i64: 8>, scalar_prefetch = 0 : i64, scratch_operands = 0 : i64, tpu.core_type = #tpu.core_type<tc>, window_params = [{transform_indices = @transform_0, window_bounds = array<i64: 4, 9, 9, 128>}, {pipeline_mode = #tpu.pipeline_mode<synchronous>, transform_indices = @transform_1, window_bounds = array<i64: 1, 128>}, {pipeline_mode = #tpu.pipeline_mode<synchronous>, transform_indices = @transform_2, window_bounds = array<i64: 1, 128>}, {pipeline_mode = #tpu.pipeline_mode<synchronous>, transform_indices = @transform_3, window_bounds = array<i64: 9, 128, 128>}, {transform_indices = @transform_4, window_bounds = array<i64: 1, 64, 128>}, {transform_indices = @transform_5, window_bounds = array<i64: 1, 2, 128>}]} {
    %c0 = arith.constant 0 : index
    %c0_0 = arith.constant 0 : index
    %0 = vector.load %arg2[%c0, %c0_0] : memref<1x128xf32, #tpu.memory_space<vmem>>, vector<1x128xf32>
    %1 = vector.shape_cast %0 : vector<1x128xf32> to vector<1x1x128xf32>
    %c0_1 = arith.constant 0 : index
    %c0_2 = arith.constant 0 : index
    %2 = vector.load %arg3[%c0_1, %c0_2] : memref<1x128xf32, #tpu.memory_space<vmem>>, vector<1x128xf32>
    %3 = vector.shape_cast %2 : vector<1x128xf32> to vector<1x1x128xf32>
    %c0_3 = arith.constant 0 : index
    %c0_4 = arith.constant 0 : index
    %c0_5 = arith.constant 0 : index
    %c0_6 = arith.constant 0 : index
    %4 = vector.load %arg1[%c0_3, %c0_4, %c0_5, %c0_6] : memref<4x9x9x128xbf16, #tpu.memory_space<vmem>>, vector<1x9x9x128xbf16>
    %5 = vector.shape_cast %4 : vector<1x9x9x128xbf16> to vector<9x9x128xbf16>
    %6 = arith.extf %5 : vector<9x9x128xbf16> to vector<9x9x128xf32>
    %7 = vector.broadcast %1 : vector<1x1x128xf32> to vector<9x9x128xf32>
    %8 = arith.mulf %6, %7 : vector<9x9x128xf32>
    %9 = vector.broadcast %3 : vector<1x1x128xf32> to vector<9x9x128xf32>
    %10 = arith.addf %8, %9 : vector<9x9x128xf32>
    %cst = arith.constant 0.000000e+00 : f32
    %11 = vector.broadcast %cst : f32 to vector<9x9x128xf32>
    %12 = arith.maximumf %10, %11 : vector<9x9x128xf32>
    %13 = tpu.iota {dimensions = array<i32: 0>} : vector<9x9x1xi32>
    %c2_i32 = arith.constant 2 : i32
    %14 = vector.broadcast %c2_i32 : i32 to vector<9x9x1xi32>
    %15 = arith.muli %13, %14 : vector<9x9x1xi32>
    %c0_i32 = arith.constant 0 : i32
    %16 = vector.broadcast %c0_i32 : i32 to vector<9x9x1xi32>
    %17 = arith.addi %15, %16 : vector<9x9x1xi32>
    %18 = tpu.iota {dimensions = array<i32: 1>} : vector<9x9x1xi32>
    %c2_i32_7 = arith.constant 2 : i32
    %19 = vector.broadcast %c2_i32_7 : i32 to vector<9x9x1xi32>
    %20 = arith.muli %18, %19 : vector<9x9x1xi32>
    %c0_i32_8 = arith.constant 0 : i32
    %21 = vector.broadcast %c0_i32_8 : i32 to vector<9x9x1xi32>
    %22 = arith.addi %20, %21 : vector<9x9x1xi32>
    %c1_i32 = arith.constant 1 : i32
    %23 = vector.broadcast %c1_i32 : i32 to vector<9x9x1xi32>
    %24 = arith.cmpi sge, %17, %23 : vector<9x9x1xi32>
    %c16_i32 = arith.constant 16 : i32
    %25 = vector.broadcast %c16_i32 : i32 to vector<9x9x1xi32>
    %26 = arith.cmpi sle, %17, %25 : vector<9x9x1xi32>
    %27 = arith.andi %24, %26 : vector<9x9x1xi1>
    %c1_i32_9 = arith.constant 1 : i32
    %28 = vector.broadcast %c1_i32_9 : i32 to vector<9x9x1xi32>
    %29 = arith.cmpi sge, %22, %28 : vector<9x9x1xi32>
    %30 = arith.andi %27, %29 : vector<9x9x1xi1>
    %c16_i32_10 = arith.constant 16 : i32
    %31 = vector.broadcast %c16_i32_10 : i32 to vector<9x9x1xi32>
    %32 = arith.cmpi sle, %22, %31 : vector<9x9x1xi32>
    %33 = arith.andi %30, %32 : vector<9x9x1xi1>
    %cst_11 = arith.constant 0.000000e+00 : f32
    %34 = vector.shape_cast %33 : vector<9x9x1xi1> to vector<9x9x1xi1>
    %35 = vector.broadcast %34 : vector<9x9x1xi1> to vector<9x9x128xi1>
    %36 = vector.broadcast %cst_11 : f32 to vector<9x9x128xf32>
    %37 = arith.select %35, %12, %36 : vector<9x9x128xi1>, vector<9x9x128xf32>
    %c1 = arith.constant 1 : index
    %c0_12 = arith.constant 0 : index
    %c0_13 = arith.constant 0 : index
    %c0_14 = arith.constant 0 : index
    %38 = vector.load %arg1[%c1, %c0_12, %c0_13, %c0_14] : memref<4x9x9x128xbf16, #tpu.memory_space<vmem>>, vector<1x9x9x128xbf16>
    %39 = vector.shape_cast %38 : vector<1x9x9x128xbf16> to vector<9x9x128xbf16>
    %40 = arith.extf %39 : vector<9x9x128xbf16> to vector<9x9x128xf32>
    %41 = vector.broadcast %1 : vector<1x1x128xf32> to vector<9x9x128xf32>
    %42 = arith.mulf %40, %41 : vector<9x9x128xf32>
    %43 = vector.broadcast %3 : vector<1x1x128xf32> to vector<9x9x128xf32>
    %44 = arith.addf %42, %43 : vector<9x9x128xf32>
    %cst_15 = arith.constant 0.000000e+00 : f32
    %45 = vector.broadcast %cst_15 : f32 to vector<9x9x128xf32>
    %46 = arith.maximumf %44, %45 : vector<9x9x128xf32>
    %47 = tpu.iota {dimensions = array<i32: 0>} : vector<9x9x1xi32>
    %c2_i32_16 = arith.constant 2 : i32
    %48 = vector.broadcast %c2_i32_16 : i32 to vector<9x9x1xi32>
    %49 = arith.muli %47, %48 : vector<9x9x1xi32>
    %c0_i32_17 = arith.constant 0 : i32
    %50 = vector.broadcast %c0_i32_17 : i32 to vector<9x9x1xi32>
    %51 = arith.addi %49, %50 : vector<9x9x1xi32>
    %52 = tpu.iota {dimensions = array<i32: 1>} : vector<9x9x1xi32>
    %c2_i32_18 = arith.constant 2 : i32
    %53 = vector.broadcast %c2_i32_18 : i32 to vector<9x9x1xi32>
    %54 = arith.muli %52, %53 : vector<9x9x1xi32>
    %c1_i32_19 = arith.constant 1 : i32
    %55 = vector.broadcast %c1_i32_19 : i32 to vector<9x9x1xi32>
    %56 = arith.addi %54, %55 : vector<9x9x1xi32>
    %c1_i32_20 = arith.constant 1 : i32
    %57 = vector.broadcast %c1_i32_20 : i32 to vector<9x9x1xi32>
    %58 = arith.cmpi sge, %51, %57 : vector<9x9x1xi32>
    %c16_i32_21 = arith.constant 16 : i32
    %59 = vector.broadcast %c16_i32_21 : i32 to vector<9x9x1xi32>
    %60 = arith.cmpi sle, %51, %59 : vector<9x9x1xi32>
    %61 = arith.andi %58, %60 : vector<9x9x1xi1>
    %c1_i32_22 = arith.constant 1 : i32
    %62 = vector.broadcast %c1_i32_22 : i32 to vector<9x9x1xi32>
    %63 = arith.cmpi sge, %56, %62 : vector<9x9x1xi32>
    %64 = arith.andi %61, %63 : vector<9x9x1xi1>
    %c16_i32_23 = arith.constant 16 : i32
    %65 = vector.broadcast %c16_i32_23 : i32 to vector<9x9x1xi32>
    %66 = arith.cmpi sle, %56, %65 : vector<9x9x1xi32>
    %67 = arith.andi %64, %66 : vector<9x9x1xi1>
    %cst_24 = arith.constant 0.000000e+00 : f32
    %68 = vector.shape_cast %67 : vector<9x9x1xi1> to vector<9x9x1xi1>
    %69 = vector.broadcast %68 : vector<9x9x1xi1> to vector<9x9x128xi1>
    %70 = vector.broadcast %cst_24 : f32 to vector<9x9x128xf32>
    %71 = arith.select %69, %46, %70 : vector<9x9x128xi1>, vector<9x9x128xf32>
    %c2 = arith.constant 2 : index
    %c0_25 = arith.constant 0 : index
    %c0_26 = arith.constant 0 : index
    %c0_27 = arith.constant 0 : index
    %72 = vector.load %arg1[%c2, %c0_25, %c0_26, %c0_27] : memref<4x9x9x128xbf16, #tpu.memory_space<vmem>>, vector<1x9x9x128xbf16>
    %73 = vector.shape_cast %72 : vector<1x9x9x128xbf16> to vector<9x9x128xbf16>
    %74 = arith.extf %73 : vector<9x9x128xbf16> to vector<9x9x128xf32>
    %75 = vector.broadcast %1 : vector<1x1x128xf32> to vector<9x9x128xf32>
    %76 = arith.mulf %74, %75 : vector<9x9x128xf32>
    %77 = vector.broadcast %3 : vector<1x1x128xf32> to vector<9x9x128xf32>
    %78 = arith.addf %76, %77 : vector<9x9x128xf32>
    %cst_28 = arith.constant 0.000000e+00 : f32
    %79 = vector.broadcast %cst_28 : f32 to vector<9x9x128xf32>
    %80 = arith.maximumf %78, %79 : vector<9x9x128xf32>
    %81 = tpu.iota {dimensions = array<i32: 0>} : vector<9x9x1xi32>
    %c2_i32_29 = arith.constant 2 : i32
    %82 = vector.broadcast %c2_i32_29 : i32 to vector<9x9x1xi32>
    %83 = arith.muli %81, %82 : vector<9x9x1xi32>
    %c1_i32_30 = arith.constant 1 : i32
    %84 = vector.broadcast %c1_i32_30 : i32 to vector<9x9x1xi32>
    %85 = arith.addi %83, %84 : vector<9x9x1xi32>
    %86 = tpu.iota {dimensions = array<i32: 1>} : vector<9x9x1xi32>
    %c2_i32_31 = arith.constant 2 : i32
    %87 = vector.broadcast %c2_i32_31 : i32 to vector<9x9x1xi32>
    %88 = arith.muli %86, %87 : vector<9x9x1xi32>
    %c0_i32_32 = arith.constant 0 : i32
    %89 = vector.broadcast %c0_i32_32 : i32 to vector<9x9x1xi32>
    %90 = arith.addi %88, %89 : vector<9x9x1xi32>
    %c1_i32_33 = arith.constant 1 : i32
    %91 = vector.broadcast %c1_i32_33 : i32 to vector<9x9x1xi32>
    %92 = arith.cmpi sge, %85, %91 : vector<9x9x1xi32>
    %c16_i32_34 = arith.constant 16 : i32
    %93 = vector.broadcast %c16_i32_34 : i32 to vector<9x9x1xi32>
    %94 = arith.cmpi sle, %85, %93 : vector<9x9x1xi32>
    %95 = arith.andi %92, %94 : vector<9x9x1xi1>
    %c1_i32_35 = arith.constant 1 : i32
    %96 = vector.broadcast %c1_i32_35 : i32 to vector<9x9x1xi32>
    %97 = arith.cmpi sge, %90, %96 : vector<9x9x1xi32>
    %98 = arith.andi %95, %97 : vector<9x9x1xi1>
    %c16_i32_36 = arith.constant 16 : i32
    %99 = vector.broadcast %c16_i32_36 : i32 to vector<9x9x1xi32>
    %100 = arith.cmpi sle, %90, %99 : vector<9x9x1xi32>
    %101 = arith.andi %98, %100 : vector<9x9x1xi1>
    %cst_37 = arith.constant 0.000000e+00 : f32
    %102 = vector.shape_cast %101 : vector<9x9x1xi1> to vector<9x9x1xi1>
    %103 = vector.broadcast %102 : vector<9x9x1xi1> to vector<9x9x128xi1>
    %104 = vector.broadcast %cst_37 : f32 to vector<9x9x128xf32>
    %105 = arith.select %103, %80, %104 : vector<9x9x128xi1>, vector<9x9x128xf32>
    %c3 = arith.constant 3 : index
    %c0_38 = arith.constant 0 : index
    %c0_39 = arith.constant 0 : index
    %c0_40 = arith.constant 0 : index
    %106 = vector.load %arg1[%c3, %c0_38, %c0_39, %c0_40] : memref<4x9x9x128xbf16, #tpu.memory_space<vmem>>, vector<1x9x9x128xbf16>
    %107 = vector.shape_cast %106 : vector<1x9x9x128xbf16> to vector<9x9x128xbf16>
    %108 = arith.extf %107 : vector<9x9x128xbf16> to vector<9x9x128xf32>
    %109 = vector.broadcast %1 : vector<1x1x128xf32> to vector<9x9x128xf32>
    %110 = arith.mulf %108, %109 : vector<9x9x128xf32>
    %111 = vector.broadcast %3 : vector<1x1x128xf32> to vector<9x9x128xf32>
    %112 = arith.addf %110, %111 : vector<9x9x128xf32>
    %cst_41 = arith.constant 0.000000e+00 : f32
    %113 = vector.broadcast %cst_41 : f32 to vector<9x9x128xf32>
    %114 = arith.maximumf %112, %113 : vector<9x9x128xf32>
    %115 = tpu.iota {dimensions = array<i32: 0>} : vector<9x9x1xi32>
    %c2_i32_42 = arith.constant 2 : i32
    %116 = vector.broadcast %c2_i32_42 : i32 to vector<9x9x1xi32>
    %117 = arith.muli %115, %116 : vector<9x9x1xi32>
    %c1_i32_43 = arith.constant 1 : i32
    %118 = vector.broadcast %c1_i32_43 : i32 to vector<9x9x1xi32>
    %119 = arith.addi %117, %118 : vector<9x9x1xi32>
    %120 = tpu.iota {dimensions = array<i32: 1>} : vector<9x9x1xi32>
    %c2_i32_44 = arith.constant 2 : i32
    %121 = vector.broadcast %c2_i32_44 : i32 to vector<9x9x1xi32>
    %122 = arith.muli %120, %121 : vector<9x9x1xi32>
    %c1_i32_45 = arith.constant 1 : i32
    %123 = vector.broadcast %c1_i32_45 : i32 to vector<9x9x1xi32>
    %124 = arith.addi %122, %123 : vector<9x9x1xi32>
    %c1_i32_46 = arith.constant 1 : i32
    %125 = vector.broadcast %c1_i32_46 : i32 to vector<9x9x1xi32>
    %126 = arith.cmpi sge, %119, %125 : vector<9x9x1xi32>
    %c16_i32_47 = arith.constant 16 : i32
    %127 = vector.broadcast %c16_i32_47 : i32 to vector<9x9x1xi32>
    %128 = arith.cmpi sle, %119, %127 : vector<9x9x1xi32>
    %129 = arith.andi %126, %128 : vector<9x9x1xi1>
    %c1_i32_48 = arith.constant 1 : i32
    %130 = vector.broadcast %c1_i32_48 : i32 to vector<9x9x1xi32>
    %131 = arith.cmpi sge, %124, %130 : vector<9x9x1xi32>
    %132 = arith.andi %129, %131 : vector<9x9x1xi1>
    %c16_i32_49 = arith.constant 16 : i32
    %133 = vector.broadcast %c16_i32_49 : i32 to vector<9x9x1xi32>
    %134 = arith.cmpi sle, %124, %133 : vector<9x9x1xi32>
    %135 = arith.andi %132, %134 : vector<9x9x1xi1>
    %cst_50 = arith.constant 0.000000e+00 : f32
    %136 = vector.shape_cast %135 : vector<9x9x1xi1> to vector<9x9x1xi1>
    %137 = vector.broadcast %136 : vector<9x9x1xi1> to vector<9x9x128xi1>
    %138 = vector.broadcast %cst_50 : f32 to vector<9x9x128xf32>
    %139 = arith.select %137, %114, %138 : vector<9x9x128xi1>, vector<9x9x128xf32>
    %cst_51 = arith.constant 0.000000e+00 : f32
    %140 = vector.broadcast %cst_51 : f32 to vector<64x128xf32>
    %141 = vector.extract_strided_slice %37 {offsets = [0, 0, 0], sizes = [8, 8, 128], strides = [1, 1, 1]} : vector<9x9x128xf32> to vector<8x8x128xf32>
    %142 = vector.shape_cast %141 : vector<8x8x128xf32> to vector<64x128xf32>
    %143 = arith.truncf %142 : vector<64x128xf32> to vector<64x128xbf16>
    %c0_52 = arith.constant 0 : index
    %c0_53 = arith.constant 0 : index
    %c0_54 = arith.constant 0 : index
    %144 = vector.load %arg4[%c0_52, %c0_53, %c0_54] : memref<9x128x128xbf16, #tpu.memory_space<vmem>>, vector<1x128x128xbf16>
    %145 = vector.shape_cast %144 : vector<1x128x128xbf16> to vector<128x128xbf16>
    %cst_55 = arith.constant dense<0.000000e+00> : vector<64x128xf32>
    %146 = tpu.matmul %143, %145, %cst_55 {dimension_numbers = #tpu.dot_dimension_numbers<[1], [0], [0], [1], [0, 0, 1, 1], [], []>} : vector<64x128xbf16>, vector<128x128xbf16>, vector<64x128xf32> -> vector<64x128xf32>
    %147 = arith.addf %140, %146 : vector<64x128xf32>
    %148 = vector.extract_strided_slice %71 {offsets = [0, 0, 0], sizes = [8, 8, 128], strides = [1, 1, 1]} : vector<9x9x128xf32> to vector<8x8x128xf32>
    %149 = vector.shape_cast %148 : vector<8x8x128xf32> to vector<64x128xf32>
    %150 = arith.truncf %149 : vector<64x128xf32> to vector<64x128xbf16>
    %c1_56 = arith.constant 1 : index
    %c0_57 = arith.constant 0 : index
    %c0_58 = arith.constant 0 : index
    %151 = vector.load %arg4[%c1_56, %c0_57, %c0_58] : memref<9x128x128xbf16, #tpu.memory_space<vmem>>, vector<1x128x128xbf16>
    %152 = vector.shape_cast %151 : vector<1x128x128xbf16> to vector<128x128xbf16>
    %cst_59 = arith.constant dense<0.000000e+00> : vector<64x128xf32>
    %153 = tpu.matmul %150, %152, %cst_59 {dimension_numbers = #tpu.dot_dimension_numbers<[1], [0], [0], [1], [0, 0, 1, 1], [], []>} : vector<64x128xbf16>, vector<128x128xbf16>, vector<64x128xf32> -> vector<64x128xf32>
    %154 = arith.addf %147, %153 : vector<64x128xf32>
    %155 = vector.extract_strided_slice %37 {offsets = [0, 1, 0], sizes = [8, 8, 128], strides = [1, 1, 1]} : vector<9x9x128xf32> to vector<8x8x128xf32>
    %156 = vector.shape_cast %155 : vector<8x8x128xf32> to vector<64x128xf32>
    %157 = arith.truncf %156 : vector<64x128xf32> to vector<64x128xbf16>
    %c2_60 = arith.constant 2 : index
    %c0_61 = arith.constant 0 : index
    %c0_62 = arith.constant 0 : index
    %158 = vector.load %arg4[%c2_60, %c0_61, %c0_62] : memref<9x128x128xbf16, #tpu.memory_space<vmem>>, vector<1x128x128xbf16>
    %159 = vector.shape_cast %158 : vector<1x128x128xbf16> to vector<128x128xbf16>
    %cst_63 = arith.constant dense<0.000000e+00> : vector<64x128xf32>
    %160 = tpu.matmul %157, %159, %cst_63 {dimension_numbers = #tpu.dot_dimension_numbers<[1], [0], [0], [1], [0, 0, 1, 1], [], []>} : vector<64x128xbf16>, vector<128x128xbf16>, vector<64x128xf32> -> vector<64x128xf32>
    %161 = arith.addf %154, %160 : vector<64x128xf32>
    %162 = vector.extract_strided_slice %105 {offsets = [0, 0, 0], sizes = [8, 8, 128], strides = [1, 1, 1]} : vector<9x9x128xf32> to vector<8x8x128xf32>
    %163 = vector.shape_cast %162 : vector<8x8x128xf32> to vector<64x128xf32>
    %164 = arith.truncf %163 : vector<64x128xf32> to vector<64x128xbf16>
    %c3_64 = arith.constant 3 : index
    %c0_65 = arith.constant 0 : index
    %c0_66 = arith.constant 0 : index
    %165 = vector.load %arg4[%c3_64, %c0_65, %c0_66] : memref<9x128x128xbf16, #tpu.memory_space<vmem>>, vector<1x128x128xbf16>
    %166 = vector.shape_cast %165 : vector<1x128x128xbf16> to vector<128x128xbf16>
    %cst_67 = arith.constant dense<0.000000e+00> : vector<64x128xf32>
    %167 = tpu.matmul %164, %166, %cst_67 {dimension_numbers = #tpu.dot_dimension_numbers<[1], [0], [0], [1], [0, 0, 1, 1], [], []>} : vector<64x128xbf16>, vector<128x128xbf16>, vector<64x128xf32> -> vector<64x128xf32>
    %168 = arith.addf %161, %167 : vector<64x128xf32>
    %169 = vector.extract_strided_slice %139 {offsets = [0, 0, 0], sizes = [8, 8, 128], strides = [1, 1, 1]} : vector<9x9x128xf32> to vector<8x8x128xf32>
    %170 = vector.shape_cast %169 : vector<8x8x128xf32> to vector<64x128xf32>
    %171 = arith.truncf %170 : vector<64x128xf32> to vector<64x128xbf16>
    %c4 = arith.constant 4 : index
    %c0_68 = arith.constant 0 : index
    %c0_69 = arith.constant 0 : index
    %172 = vector.load %arg4[%c4, %c0_68, %c0_69] : memref<9x128x128xbf16, #tpu.memory_space<vmem>>, vector<1x128x128xbf16>
    %173 = vector.shape_cast %172 : vector<1x128x128xbf16> to vector<128x128xbf16>
    %cst_70 = arith.constant dense<0.000000e+00> : vector<64x128xf32>
    %174 = tpu.matmul %171, %173, %cst_70 {dimension_numbers = #tpu.dot_dimension_numbers<[1], [0], [0], [1], [0, 0, 1, 1], [], []>} : vector<64x128xbf16>, vector<128x128xbf16>, vector<64x128xf32> -> vector<64x128xf32>
    %175 = arith.addf %168, %174 : vector<64x128xf32>
    %176 = vector.extract_strided_slice %105 {offsets = [0, 1, 0], sizes = [8, 8, 128], strides = [1, 1, 1]} : vector<9x9x128xf32> to vector<8x8x128xf32>
    %177 = vector.shape_cast %176 : vector<8x8x128xf32> to vector<64x128xf32>
    %178 = arith.truncf %177 : vector<64x128xf32> to vector<64x128xbf16>
    %c5 = arith.constant 5 : index
    %c0_71 = arith.constant 0 : index
    %c0_72 = arith.constant 0 : index
    %179 = vector.load %arg4[%c5, %c0_71, %c0_72] : memref<9x128x128xbf16, #tpu.memory_space<vmem>>, vector<1x128x128xbf16>
    %180 = vector.shape_cast %179 : vector<1x128x128xbf16> to vector<128x128xbf16>
    %cst_73 = arith.constant dense<0.000000e+00> : vector<64x128xf32>
    %181 = tpu.matmul %178, %180, %cst_73 {dimension_numbers = #tpu.dot_dimension_numbers<[1], [0], [0], [1], [0, 0, 1, 1], [], []>} : vector<64x128xbf16>, vector<128x128xbf16>, vector<64x128xf32> -> vector<64x128xf32>
    %182 = arith.addf %175, %181 : vector<64x128xf32>
    %183 = vector.extract_strided_slice %37 {offsets = [1, 0, 0], sizes = [8, 8, 128], strides = [1, 1, 1]} : vector<9x9x128xf32> to vector<8x8x128xf32>
    %184 = vector.shape_cast %183 : vector<8x8x128xf32> to vector<64x128xf32>
    %185 = arith.truncf %184 : vector<64x128xf32> to vector<64x128xbf16>
    %c6 = arith.constant 6 : index
    %c0_74 = arith.constant 0 : index
    %c0_75 = arith.constant 0 : index
    %186 = vector.load %arg4[%c6, %c0_74, %c0_75] : memref<9x128x128xbf16, #tpu.memory_space<vmem>>, vector<1x128x128xbf16>
    %187 = vector.shape_cast %186 : vector<1x128x128xbf16> to vector<128x128xbf16>
    %cst_76 = arith.constant dense<0.000000e+00> : vector<64x128xf32>
    %188 = tpu.matmul %185, %187, %cst_76 {dimension_numbers = #tpu.dot_dimension_numbers<[1], [0], [0], [1], [0, 0, 1, 1], [], []>} : vector<64x128xbf16>, vector<128x128xbf16>, vector<64x128xf32> -> vector<64x128xf32>
    %189 = arith.addf %182, %188 : vector<64x128xf32>
    %190 = vector.extract_strided_slice %71 {offsets = [1, 0, 0], sizes = [8, 8, 128], strides = [1, 1, 1]} : vector<9x9x128xf32> to vector<8x8x128xf32>
    %191 = vector.shape_cast %190 : vector<8x8x128xf32> to vector<64x128xf32>
    %192 = arith.truncf %191 : vector<64x128xf32> to vector<64x128xbf16>
    %c7 = arith.constant 7 : index
    %c0_77 = arith.constant 0 : index
    %c0_78 = arith.constant 0 : index
    %193 = vector.load %arg4[%c7, %c0_77, %c0_78] : memref<9x128x128xbf16, #tpu.memory_space<vmem>>, vector<1x128x128xbf16>
    %194 = vector.shape_cast %193 : vector<1x128x128xbf16> to vector<128x128xbf16>
    %cst_79 = arith.constant dense<0.000000e+00> : vector<64x128xf32>
    %195 = tpu.matmul %192, %194, %cst_79 {dimension_numbers = #tpu.dot_dimension_numbers<[1], [0], [0], [1], [0, 0, 1, 1], [], []>} : vector<64x128xbf16>, vector<128x128xbf16>, vector<64x128xf32> -> vector<64x128xf32>
    %196 = arith.addf %189, %195 : vector<64x128xf32>
    %197 = vector.extract_strided_slice %37 {offsets = [1, 1, 0], sizes = [8, 8, 128], strides = [1, 1, 1]} : vector<9x9x128xf32> to vector<8x8x128xf32>
    %198 = vector.shape_cast %197 : vector<8x8x128xf32> to vector<64x128xf32>
    %199 = arith.truncf %198 : vector<64x128xf32> to vector<64x128xbf16>
    %c8 = arith.constant 8 : index
    %c0_80 = arith.constant 0 : index
    %c0_81 = arith.constant 0 : index
    %200 = vector.load %arg4[%c8, %c0_80, %c0_81] : memref<9x128x128xbf16, #tpu.memory_space<vmem>>, vector<1x128x128xbf16>
    %201 = vector.shape_cast %200 : vector<1x128x128xbf16> to vector<128x128xbf16>
    %cst_82 = arith.constant dense<0.000000e+00> : vector<64x128xf32>
    %202 = tpu.matmul %199, %201, %cst_82 {dimension_numbers = #tpu.dot_dimension_numbers<[1], [0], [0], [1], [0, 0, 1, 1], [], []>} : vector<64x128xbf16>, vector<128x128xbf16>, vector<64x128xf32> -> vector<64x128xf32>
    %203 = arith.addf %196, %202 : vector<64x128xf32>
    %204 = arith.truncf %203 : vector<64x128xf32> to vector<64x128xbf16>
    %c0_83 = arith.constant 0 : index
    %c0_84 = arith.constant 0 : index
    %c0_85 = arith.constant 0 : index
    %205 = vector.load %arg5[%c0_83, %c0_84, %c0_85] : memref<1x64x128xbf16, #tpu.memory_space<vmem>>, vector<1x64x128xbf16>
    %206 = vector.shape_cast %205 : vector<1x64x128xbf16> to vector<64x128xbf16>
    %207 = vector.shape_cast %204 : vector<64x128xbf16> to vector<1x64x128xbf16>
    tpu.vector_store %arg5[%c0_83, %c0_84, %c0_85], %207 {strides = array<i32>} : memref<1x64x128xbf16, #tpu.memory_space<vmem>>, vector<1x64x128xbf16>,
    %cst_86 = arith.constant dense<0.000000e+00> : vector<128xf32>
    %208 = vector.multi_reduction <add>, %203, %cst_86 [0] : vector<64x128xf32> to vector<128xf32>
    %209 = vector.shape_cast %208 : vector<128xf32> to vector<1x128xf32>
    %210 = arith.mulf %203, %203 : vector<64x128xf32>
    %cst_87 = arith.constant dense<0.000000e+00> : vector<128xf32>
    %211 = vector.multi_reduction <add>, %210, %cst_87 [0] : vector<64x128xf32> to vector<128xf32>
    %212 = vector.shape_cast %211 : vector<128xf32> to vector<1x128xf32>
    %213 = tpu.concatenate %209, %212 in 0 : vector<1x128xf32>, vector<1x128xf32> -> vector<2x128xf32>
    %c0_88 = arith.constant 0 : index
    %c0_89 = arith.constant 0 : index
    %c0_90 = arith.constant 0 : index
    %214 = vector.load %arg6[%c0_88, %c0_89, %c0_90] : memref<1x2x128xf32, #tpu.memory_space<vmem>>, vector<1x2x128xf32>
    %215 = vector.shape_cast %214 : vector<1x2x128xf32> to vector<2x128xf32>
    %216 = vector.shape_cast %213 : vector<2x128xf32> to vector<1x2x128xf32>
    tpu.vector_store %arg6[%c0_88, %c0_89, %c0_90], %216 {strides = array<i32>} : memref<1x2x128xf32, #tpu.memory_space<vmem>>, vector<1x2x128xf32>,
    return
  }
  func.func @transform_0(%arg0: i32) -> (i32, i32, i32, i32) {
    %c0_i32 = arith.constant 0 : i32
    %c0_i32_0 = arith.constant 0 : i32
    %c0_i32_1 = arith.constant 0 : i32
    %c0_i32_2 = arith.constant 0 : i32
    return %arg0, %c0_i32, %c0_i32_0, %c0_i32_1 : i32, i32, i32, i32
  }
  func.func @transform_1(%arg0: i32) -> (i32, i32) {
    %c0_i32 = arith.constant 0 : i32
    %c0_i32_0 = arith.constant 0 : i32
    %c0_i32_1 = arith.constant 0 : i32
    return %c0_i32, %c0_i32_0 : i32, i32
  }
  func.func @transform_2(%arg0: i32) -> (i32, i32) {
    %c0_i32 = arith.constant 0 : i32
    %c0_i32_0 = arith.constant 0 : i32
    %c0_i32_1 = arith.constant 0 : i32
    return %c0_i32, %c0_i32_0 : i32, i32
  }
  func.func @transform_3(%arg0: i32) -> (i32, i32, i32) {
    %c0_i32 = arith.constant 0 : i32
    %c0_i32_0 = arith.constant 0 : i32
    %c0_i32_1 = arith.constant 0 : i32
    %c0_i32_2 = arith.constant 0 : i32
    return %c0_i32, %c0_i32_0, %c0_i32_1 : i32, i32, i32
  }
  func.func @transform_4(%arg0: i32) -> (i32, i32, i32) {
    %c0_i32 = arith.constant 0 : i32
    %c0_i32_0 = arith.constant 0 : i32
    %c0_i32_1 = arith.constant 0 : i32
    return %arg0, %c0_i32, %c0_i32_0 : i32, i32, i32
  }
  func.func @transform_5(%arg0: i32) -> (i32, i32, i32) {
    %c0_i32 = arith.constant 0 : i32
    %c0_i32_0 = arith.constant 0 : i32
    %c0_i32_1 = arith.constant 0 : i32
    return %arg0, %c0_i32, %c0_i32_0 : i32, i32, i32
  }
}

module attributes {stable_mosaic.version = 11 : i64} {
  func.func @_conv3_ds_kernel(%arg0: i32, %arg1: memref<512x128xbf16, #tpu.memory_space<vmem>>, %arg2: memref<1x128xf32, #tpu.memory_space<vmem>>, %arg3: memref<1x128xf32, #tpu.memory_space<vmem>>, %arg4: memref<128x128xbf16, #tpu.memory_space<vmem>>, %arg5: memref<512x128xf32, #tpu.memory_space<vmem>>, %arg6: memref<128x128xbf16, #tpu.memory_space<vmem>>, %arg7: memref<512x128xbf16, #tpu.memory_space<vmem>>, %arg8: memref<1x2x128xf32, #tpu.memory_space<vmem>>, %arg9: memref<512x128xbf16, #tpu.memory_space<vmem>>, %arg10: memref<1x2x128xf32, #tpu.memory_space<vmem>>) attributes {dimension_semantics = [#tpu.dimension_semantics<parallel>], iteration_bounds = array<i64: 1>, scalar_prefetch = 0 : i64, scratch_operands = 0 : i64, tpu.core_type = #tpu.core_type<tc>, window_params = [{transform_indices = @transform_0, window_bounds = array<i64: 512, 128>}, {pipeline_mode = #tpu.pipeline_mode<synchronous>, transform_indices = @transform_1, window_bounds = array<i64: 1, 128>}, {pipeline_mode = #tpu.pipeline_mode<synchronous>, transform_indices = @transform_2, window_bounds = array<i64: 1, 128>}, {pipeline_mode = #tpu.pipeline_mode<synchronous>, transform_indices = @transform_3, window_bounds = array<i64: 128, 128>}, {transform_indices = @transform_4, window_bounds = array<i64: 512, 128>}, {pipeline_mode = #tpu.pipeline_mode<synchronous>, transform_indices = @transform_5, window_bounds = array<i64: 128, 128>}, {transform_indices = @transform_6, window_bounds = array<i64: 512, 128>}, {transform_indices = @transform_7, window_bounds = array<i64: 1, 2, 128>}, {transform_indices = @transform_8, window_bounds = array<i64: 512, 128>}, {transform_indices = @transform_9, window_bounds = array<i64: 1, 2, 128>}]} {
    %c0 = arith.constant 0 : index
    %c0_0 = arith.constant 0 : index
    %0 = vector.load %arg1[%c0, %c0_0] : memref<512x128xbf16, #tpu.memory_space<vmem>>, vector<512x128xbf16>
    %c0_1 = arith.constant 0 : index
    %c0_2 = arith.constant 0 : index
    %1 = vector.load %arg2[%c0_1, %c0_2] : memref<1x128xf32, #tpu.memory_space<vmem>>, vector<1x128xf32>
    %2 = arith.extf %0 : vector<512x128xbf16> to vector<512x128xf32>
    %3 = vector.broadcast %1 : vector<1x128xf32> to vector<512x128xf32>
    %4 = arith.mulf %2, %3 : vector<512x128xf32>
    %c0_3 = arith.constant 0 : index
    %c0_4 = arith.constant 0 : index
    %5 = vector.load %arg3[%c0_3, %c0_4] : memref<1x128xf32, #tpu.memory_space<vmem>>, vector<1x128xf32>
    %6 = vector.broadcast %5 : vector<1x128xf32> to vector<512x128xf32>
    %7 = arith.addf %4, %6 : vector<512x128xf32>
    %cst = arith.constant 0.000000e+00 : f32
    %8 = vector.broadcast %cst : f32 to vector<512x128xf32>
    %9 = arith.maximumf %7, %8 : vector<512x128xf32>
    %10 = arith.truncf %9 : vector<512x128xf32> to vector<512x128xbf16>
    %c0_5 = arith.constant 0 : index
    %c0_6 = arith.constant 0 : index
    %11 = vector.load %arg4[%c0_5, %c0_6] : memref<128x128xbf16, #tpu.memory_space<vmem>>, vector<128x128xbf16>
    %cst_7 = arith.constant dense<0.000000e+00> : vector<512x128xf32>
    %12 = tpu.matmul %10, %11, %cst_7 {dimension_numbers = #tpu.dot_dimension_numbers<[1], [0], [0], [1], [0, 0, 1, 1], [], []>} : vector<512x128xbf16>, vector<128x128xbf16>, vector<512x128xf32> -> vector<512x128xf32>
    %c0_8 = arith.constant 0 : index
    %c0_9 = arith.constant 0 : index
    %13 = vector.load %arg5[%c0_8, %c0_9] : memref<512x128xf32, #tpu.memory_space<vmem>>, vector<512x128xf32>
    %14 = arith.truncf %13 : vector<512x128xf32> to vector<512x128xbf16>
    %c0_10 = arith.constant 0 : index
    %c0_11 = arith.constant 0 : index
    %15 = vector.load %arg6[%c0_10, %c0_11] : memref<128x128xbf16, #tpu.memory_space<vmem>>, vector<128x128xbf16>
    %cst_12 = arith.constant dense<0.000000e+00> : vector<512x128xf32>
    %16 = tpu.matmul %14, %15, %cst_12 {dimension_numbers = #tpu.dot_dimension_numbers<[1], [0], [0], [1], [0, 0, 1, 1], [], []>} : vector<512x128xbf16>, vector<128x128xbf16>, vector<512x128xf32> -> vector<512x128xf32>
    %17 = arith.truncf %12 : vector<512x128xf32> to vector<512x128xbf16>
    %c0_13 = arith.constant 0 : index
    %c0_14 = arith.constant 0 : index
    %18 = vector.load %arg7[%c0_13, %c0_14] : memref<512x128xbf16, #tpu.memory_space<vmem>>, vector<512x128xbf16>
    tpu.vector_store %arg7[%c0_13, %c0_14], %17 {strides = array<i32>} : memref<512x128xbf16, #tpu.memory_space<vmem>>, vector<512x128xbf16>,
    %19 = arith.truncf %16 : vector<512x128xf32> to vector<512x128xbf16>
    %c0_15 = arith.constant 0 : index
    %c0_16 = arith.constant 0 : index
    %20 = vector.load %arg9[%c0_15, %c0_16] : memref<512x128xbf16, #tpu.memory_space<vmem>>, vector<512x128xbf16>
    tpu.vector_store %arg9[%c0_15, %c0_16], %19 {strides = array<i32>} : memref<512x128xbf16, #tpu.memory_space<vmem>>, vector<512x128xbf16>,
    %cst_17 = arith.constant dense<0.000000e+00> : vector<128xf32>
    %21 = vector.multi_reduction <add>, %12, %cst_17 [0] : vector<512x128xf32> to vector<128xf32>
    %22 = vector.shape_cast %21 : vector<128xf32> to vector<1x128xf32>
    %23 = arith.mulf %12, %12 : vector<512x128xf32>
    %cst_18 = arith.constant dense<0.000000e+00> : vector<128xf32>
    %24 = vector.multi_reduction <add>, %23, %cst_18 [0] : vector<512x128xf32> to vector<128xf32>
    %25 = vector.shape_cast %24 : vector<128xf32> to vector<1x128xf32>
    %26 = tpu.concatenate %22, %25 in 0 : vector<1x128xf32>, vector<1x128xf32> -> vector<2x128xf32>
    %c0_19 = arith.constant 0 : index
    %c0_20 = arith.constant 0 : index
    %c0_21 = arith.constant 0 : index
    %27 = vector.load %arg8[%c0_19, %c0_20, %c0_21] : memref<1x2x128xf32, #tpu.memory_space<vmem>>, vector<1x2x128xf32>
    %28 = vector.shape_cast %27 : vector<1x2x128xf32> to vector<2x128xf32>
    %29 = vector.shape_cast %26 : vector<2x128xf32> to vector<1x2x128xf32>
    tpu.vector_store %arg8[%c0_19, %c0_20, %c0_21], %29 {strides = array<i32>} : memref<1x2x128xf32, #tpu.memory_space<vmem>>, vector<1x2x128xf32>,
    %cst_22 = arith.constant dense<0.000000e+00> : vector<128xf32>
    %30 = vector.multi_reduction <add>, %16, %cst_22 [0] : vector<512x128xf32> to vector<128xf32>
    %31 = vector.shape_cast %30 : vector<128xf32> to vector<1x128xf32>
    %32 = arith.mulf %16, %16 : vector<512x128xf32>
    %cst_23 = arith.constant dense<0.000000e+00> : vector<128xf32>
    %33 = vector.multi_reduction <add>, %32, %cst_23 [0] : vector<512x128xf32> to vector<128xf32>
    %34 = vector.shape_cast %33 : vector<128xf32> to vector<1x128xf32>
    %35 = tpu.concatenate %31, %34 in 0 : vector<1x128xf32>, vector<1x128xf32> -> vector<2x128xf32>
    %c0_24 = arith.constant 0 : index
    %c0_25 = arith.constant 0 : index
    %c0_26 = arith.constant 0 : index
    %36 = vector.load %arg10[%c0_24, %c0_25, %c0_26] : memref<1x2x128xf32, #tpu.memory_space<vmem>>, vector<1x2x128xf32>
    %37 = vector.shape_cast %36 : vector<1x2x128xf32> to vector<2x128xf32>
    %38 = vector.shape_cast %35 : vector<2x128xf32> to vector<1x2x128xf32>
    tpu.vector_store %arg10[%c0_24, %c0_25, %c0_26], %38 {strides = array<i32>} : memref<1x2x128xf32, #tpu.memory_space<vmem>>, vector<1x2x128xf32>,
    return
  }
  func.func @transform_0(%arg0: i32) -> (i32, i32) {
    %c0_i32 = arith.constant 0 : i32
    %c0_i32_0 = arith.constant 0 : i32
    return %arg0, %c0_i32 : i32, i32
  }
  func.func @transform_1(%arg0: i32) -> (i32, i32) {
    %c0_i32 = arith.constant 0 : i32
    %c0_i32_0 = arith.constant 0 : i32
    %c0_i32_1 = arith.constant 0 : i32
    return %c0_i32, %c0_i32_0 : i32, i32
  }
  func.func @transform_2(%arg0: i32) -> (i32, i32) {
    %c0_i32 = arith.constant 0 : i32
    %c0_i32_0 = arith.constant 0 : i32
    %c0_i32_1 = arith.constant 0 : i32
    return %c0_i32, %c0_i32_0 : i32, i32
  }
  func.func @transform_3(%arg0: i32) -> (i32, i32) {
    %c0_i32 = arith.constant 0 : i32
    %c0_i32_0 = arith.constant 0 : i32
    %c0_i32_1 = arith.constant 0 : i32
    return %c0_i32, %c0_i32_0 : i32, i32
  }
  func.func @transform_4(%arg0: i32) -> (i32, i32) {
    %c0_i32 = arith.constant 0 : i32
    %c0_i32_0 = arith.constant 0 : i32
    return %arg0, %c0_i32 : i32, i32
  }
  func.func @transform_5(%arg0: i32) -> (i32, i32) {
    %c0_i32 = arith.constant 0 : i32
    %c0_i32_0 = arith.constant 0 : i32
    %c0_i32_1 = arith.constant 0 : i32
    return %c0_i32, %c0_i32_0 : i32, i32
  }
  func.func @transform_6(%arg0: i32) -> (i32, i32) {
    %c0_i32 = arith.constant 0 : i32
    %c0_i32_0 = arith.constant 0 : i32
    return %arg0, %c0_i32 : i32, i32
  }
  func.func @transform_7(%arg0: i32) -> (i32, i32, i32) {
    %c0_i32 = arith.constant 0 : i32
    %c0_i32_0 = arith.constant 0 : i32
    %c0_i32_1 = arith.constant 0 : i32
    return %arg0, %c0_i32, %c0_i32_0 : i32, i32, i32
  }
  func.func @transform_8(%arg0: i32) -> (i32, i32) {
    %c0_i32 = arith.constant 0 : i32
    %c0_i32_0 = arith.constant 0 : i32
    return %arg0, %c0_i32 : i32, i32
  }
  func.func @transform_9(%arg0: i32) -> (i32, i32, i32) {
    %c0_i32 = arith.constant 0 : i32
    %c0_i32_0 = arith.constant 0 : i32
    %c0_i32_1 = arith.constant 0 : i32
    return %arg0, %c0_i32, %c0_i32_0 : i32, i32, i32
  }
}

module attributes {stable_mosaic.version = 11 : i64} {
  func.func @_residual_act_kernel(%arg0: i32, %arg1: memref<512x128xbf16, #tpu.memory_space<vmem>>, %arg2: memref<1x128xf32, #tpu.memory_space<vmem>>, %arg3: memref<1x128xf32, #tpu.memory_space<vmem>>, %arg4: memref<512x128xbf16, #tpu.memory_space<vmem>>, %arg5: memref<1x128xf32, #tpu.memory_space<vmem>>, %arg6: memref<1x128xf32, #tpu.memory_space<vmem>>, %arg7: memref<512x128xf32, #tpu.memory_space<vmem>>) attributes {dimension_semantics = [#tpu.dimension_semantics<parallel>], iteration_bounds = array<i64: 1>, scalar_prefetch = 0 : i64, scratch_operands = 0 : i64, tpu.core_type = #tpu.core_type<tc>, window_params = [{transform_indices = @transform_0, window_bounds = array<i64: 512, 128>}, {pipeline_mode = #tpu.pipeline_mode<synchronous>, transform_indices = @transform_1, window_bounds = array<i64: 1, 128>}, {pipeline_mode = #tpu.pipeline_mode<synchronous>, transform_indices = @transform_2, window_bounds = array<i64: 1, 128>}, {transform_indices = @transform_3, window_bounds = array<i64: 512, 128>}, {pipeline_mode = #tpu.pipeline_mode<synchronous>, transform_indices = @transform_4, window_bounds = array<i64: 1, 128>}, {pipeline_mode = #tpu.pipeline_mode<synchronous>, transform_indices = @transform_5, window_bounds = array<i64: 1, 128>}, {transform_indices = @transform_6, window_bounds = array<i64: 512, 128>}]} {
    %c0 = arith.constant 0 : index
    %c0_0 = arith.constant 0 : index
    %0 = vector.load %arg1[%c0, %c0_0] : memref<512x128xbf16, #tpu.memory_space<vmem>>, vector<512x128xbf16>
    %c0_1 = arith.constant 0 : index
    %c0_2 = arith.constant 0 : index
    %1 = vector.load %arg2[%c0_1, %c0_2] : memref<1x128xf32, #tpu.memory_space<vmem>>, vector<1x128xf32>
    %2 = arith.extf %0 : vector<512x128xbf16> to vector<512x128xf32>
    %3 = vector.broadcast %1 : vector<1x128xf32> to vector<512x128xf32>
    %4 = arith.mulf %2, %3 : vector<512x128xf32>
    %c0_3 = arith.constant 0 : index
    %c0_4 = arith.constant 0 : index
    %5 = vector.load %arg3[%c0_3, %c0_4] : memref<1x128xf32, #tpu.memory_space<vmem>>, vector<1x128xf32>
    %6 = vector.broadcast %5 : vector<1x128xf32> to vector<512x128xf32>
    %7 = arith.addf %4, %6 : vector<512x128xf32>
    %c0_5 = arith.constant 0 : index
    %c0_6 = arith.constant 0 : index
    %8 = vector.load %arg4[%c0_5, %c0_6] : memref<512x128xbf16, #tpu.memory_space<vmem>>, vector<512x128xbf16>
    %c0_7 = arith.constant 0 : index
    %c0_8 = arith.constant 0 : index
    %9 = vector.load %arg5[%c0_7, %c0_8] : memref<1x128xf32, #tpu.memory_space<vmem>>, vector<1x128xf32>
    %10 = arith.extf %8 : vector<512x128xbf16> to vector<512x128xf32>
    %11 = vector.broadcast %9 : vector<1x128xf32> to vector<512x128xf32>
    %12 = arith.mulf %10, %11 : vector<512x128xf32>
    %13 = arith.addf %7, %12 : vector<512x128xf32>
    %c0_9 = arith.constant 0 : index
    %c0_10 = arith.constant 0 : index
    %14 = vector.load %arg6[%c0_9, %c0_10] : memref<1x128xf32, #tpu.memory_space<vmem>>, vector<1x128xf32>
    %15 = vector.broadcast %14 : vector<1x128xf32> to vector<512x128xf32>
    %16 = arith.addf %13, %15 : vector<512x128xf32>
    %cst = arith.constant 0.000000e+00 : f32
    %17 = vector.broadcast %cst : f32 to vector<512x128xf32>
    %18 = arith.maximumf %16, %17 : vector<512x128xf32>
    %c0_11 = arith.constant 0 : index
    %c0_12 = arith.constant 0 : index
    %19 = vector.load %arg7[%c0_11, %c0_12] : memref<512x128xf32, #tpu.memory_space<vmem>>, vector<512x128xf32>
    tpu.vector_store %arg7[%c0_11, %c0_12], %18 {strides = array<i32>} : memref<512x128xf32, #tpu.memory_space<vmem>>, vector<512x128xf32>,
    return
  }
  func.func @transform_0(%arg0: i32) -> (i32, i32) {
    %c0_i32 = arith.constant 0 : i32
    %c0_i32_0 = arith.constant 0 : i32
    return %arg0, %c0_i32 : i32, i32
  }
  func.func @transform_1(%arg0: i32) -> (i32, i32) {
    %c0_i32 = arith.constant 0 : i32
    %c0_i32_0 = arith.constant 0 : i32
    %c0_i32_1 = arith.constant 0 : i32
    return %c0_i32, %c0_i32_0 : i32, i32
  }
  func.func @transform_2(%arg0: i32) -> (i32, i32) {
    %c0_i32 = arith.constant 0 : i32
    %c0_i32_0 = arith.constant 0 : i32
    %c0_i32_1 = arith.constant 0 : i32
    return %c0_i32, %c0_i32_0 : i32, i32
  }
  func.func @transform_3(%arg0: i32) -> (i32, i32) {
    %c0_i32 = arith.constant 0 : i32
    %c0_i32_0 = arith.constant 0 : i32
    return %arg0, %c0_i32 : i32, i32
  }
  func.func @transform_4(%arg0: i32) -> (i32, i32) {
    %c0_i32 = arith.constant 0 : i32
    %c0_i32_0 = arith.constant 0 : i32
    %c0_i32_1 = arith.constant 0 : i32
    return %c0_i32, %c0_i32_0 : i32, i32
  }
  func.func @transform_5(%arg0: i32) -> (i32, i32) {
    %c0_i32 = arith.constant 0 : i32
    %c0_i32_0 = arith.constant 0 : i32
    %c0_i32_1 = arith.constant 0 : i32
    return %c0_i32, %c0_i32_0 : i32, i32
  }
  func.func @transform_6(%arg0: i32) -> (i32, i32) {
    %c0_i32 = arith.constant 0 : i32
    %c0_i32_0 = arith.constant 0 : i32
    return %arg0, %c0_i32 : i32, i32
  }
}

</mosaic_0001>

<bundles_post_ra>
// kernel: bottleneck_forward.4
= control target key start
LH: loop header
LB: loop body
LE: loop exit
PB: predicated region body
PF: predicated region fallthrough
CT: control target
= control target key end

     0   :  { %s3046_s12 = smov 0   ;;  %s3679_s0 = inlined_call_operand.vmem [shape: f32[2048,128], index: 0, kind: input, shape index: {}]   ;;  %s3680_s1 = inlined_call_operand.vmem [shape: bf16[128,128], index: 1, kind: input, shape index: {}]   ;;  %s3681_s2 = inlined_call_operand.vmem [shape: bf16[2048,128], index: 2, kind: output, shape index: {0}]   ;;  %s3682_s3 = inlined_call_operand.vmem [shape: f32[2,2,128], index: 3, kind: output, shape index: {1}]  }
   0x1 LB: > { %s3052_s13 = sadd.s32 4294967295, %s3024_s12   ;;  %p2115_p0 = scmp.ge.s32.totalorder %s3024_s12, 1  ;;  %s3024_s12 = sphi %s3046_s12, %s14_s12  }
   0x2   : > { %p141_p1 = scmp.lt.s32.totalorder %s3024_s12, 3 }
   0x4   : > { %p142_p2 = pnand %p2115_p0, %p141_p1 }
   0x6   : > { %145 = sbr.rel (%p142_p2) target bundleno = 513 (0x201), region = 28 }
   0xb   : > { %v3010_v0 = vld [vmem:[%s3680_s1 + $0x38] sm:$0xff]   ;;  %s2116_s16 = sshll.u32 %s3052_s13, 7  ;;  %v3011_v1 = vld [vmem:[%s3680_s1 + $0x30] sm:$0xff]   ;;  %v3012_v2 = vld [vmem:[%s3680_s1 + $0x28] sm:$0xff]   ;;  %p181_p4 = scmp.lt.s32.totalorder %s3052_s13, 1  ;;  %vm2021_vm0 = vcmask 1040384  }
   0xc   : > { %p170_p3 = scmp.lt.s32.totalorder %s2116_s16, 255  ;;  %2842 = vmatprep.subr.bf16.mxu0 %v3010_v0  ;;  %2986 = vmatprep.subr.bf16.mxu1 %v3010_v0  ;;  %v3013_v3 = vld [vmem:[%s3680_s1 + $0x20] sm:$0xff]   ;;  %v3014_v7 = vld [vmem:[%s3680_s1 + $0x18] sm:$0xff]   ;;  %v3015_v8 = vld [vmem:[%s3680_s1 + $0x10] sm:$0xff]  }
   0xd   : > { %2843 = vmatpush3.bf16.msra.mxu0 %v3010_v0  ;;  %2994 = vmatpush3.bf16.msra.mxu1 %v3010_v0  ;;  %v3016_v9 = vld [vmem:[%s3680_s1 + $0x8] sm:$0xff]   ;;  %v3017_v10 = vld [vmem:[%s3680_s1] sm:$0xff]   ;;  %s3766_s13 = smov (!%p181_p4, %s3052_s13), 1 }
   0xe   : > { %s3764_s16 = smov (!%p170_p3, %s2116_s16), 255  ;;  %2844 = vmatprep.subr.bf16.mxu0 %v3011_v1  ;;  %2987 = vmatprep.subr.bf16.mxu1 %v3011_v1  ;;  %s2120_s14 = sshll.u32 %s3766_s13, 1 }
   0xf   : > { %s2117_s21 = sshll.u32 %s3764_s16, 3  ;;  %s2119_s8 = sshll.u32 %s3764_s16, 2 }
  0x10   : > { %s3072_s24 = scalar_lea.vmem %s3679_s0, %s2117_s21  ;;  %s3225_s11 = scalar_lea.vmem %s3681_s2, %s2119_s8 }
  0x11   : > { %2845 = vmatpush3.bf16.msra.mxu0 %v3011_v1  ;;  %2995 = vmatpush3.bf16.msra.mxu1 %v3011_v1  ;;  %v186_v4 = vld [vmem:[%s3072_s24] sm:$0xff]  ;;  %v187_v5 = vld [vmem:[%s3072_s24 + $0x8] sm:$0xff]  ;;  %v188_v11 = vld [vmem:[%s3072_s24 + $0x10] sm:$0xff]  ;;  %s184_s17 = scalar_lea.vmem %s3682_s3, %s2120_s14 }
  0x12   : > { %2846 = vmatprep.subr.bf16.mxu0 %v3012_v2  ;;  %2988 = vmatprep.subr.bf16.mxu1 %v3012_v2  ;;  %v314_v6 = vpack.c.bf16 %v187_v5, %v186_v4  ;;  %v189_v12 = vld [vmem:[%s3072_s24 + $0x18] sm:$0xff]  ;;  %v190_v13 = vld [vmem:[%s3072_s24 + $0x20] sm:$0xff]  ;;  %v191_v14 = vld [vmem:[%s3072_s24 + $0x28] sm:$0xff] }
  0x13   : > { %v250_v15 = vld [vmem:[%s3072_s24 + $0x200] sm:$0xff]  ;;  %v251_v16 = vld [vmem:[%s3072_s24 + $0x208] sm:$0xff]  ;;  %v315_v17 = vpack.c.bf16 %v189_v12, %v188_v11  ;;  %v252_v19 = vld [vmem:[%s3072_s24 + $0x210] sm:$0xff]  ;;  %v316_v22 = vpack.c.bf16 %v191_v14, %v190_v13 }
  0x14   : > { %2858 = vmatprep.mubr.bf16.mxu0 %v314_v6  ;;  %v346_v18 = vpack.c.bf16 %v251_v16, %v250_v15  ;;  %v253_v20 = vld [vmem:[%s3072_s24 + $0x218] sm:$0xff]  ;;  %v254_v21 = vld [vmem:[%s3072_s24 + $0x220] sm:$0xff]  ;;  %v255_v24 = vld [vmem:[%s3072_s24 + $0x228] sm:$0xff] }
  0x15   : > { %2847 = vmatpush3.bf16.msra.mxu0 %v3012_v2  ;;  %2996 = vmatpush3.bf16.msra.mxu1 %v3012_v2  ;;  %v347_v23 = vpack.c.bf16 %v253_v20, %v252_v19  ;;  %v348_v25 = vpack.c.bf16 %v255_v24, %v254_v21  ;;  %v192_v26 = vld [vmem:[%s3072_s24 + $0x30] sm:$0xff]  ;;  %v193_v27 = vld [vmem:[%s3072_s24 + $0x38] sm:$0xff]  ;;  %v194_v28 = vld [vmem:[%s3072_s24 + $0x40] sm:$0xff] }
  0x16   : > { %2848 = vmatprep.subr.bf16.mxu0 %v3013_v3  ;;  %2989 = vmatprep.subr.bf16.mxu1 %v3013_v3  ;;  %v195_v29 = vld [vmem:[%s3072_s24 + $0x48] sm:$0xff]  ;;  %v256_v30 = vld [vmem:[%s3072_s24 + $0x230] sm:$0xff]  ;;  %v257_v31 = vld [vmem:[%s3072_s24 + $0x238] sm:$0xff]  ;;  %v317_v34 = vpack.c.bf16 %v193_v27, %v192_v26 }
  0x17   : > { %2922 = vmatprep.mubr.bf16.mxu1 %v346_v18  ;;  %v258_v32 = vld [vmem:[%s3072_s24 + $0x240] sm:$0xff]  ;;  %v259_v33 = vld [vmem:[%s3072_s24 + $0x248] sm:$0xff]  ;;  %v318_v35 = vpack.c.bf16 %v195_v29, %v194_v28  ;;  %v349_v36 = vpack.c.bf16 %v257_v31, %v256_v30  ;;  %v196_v38 = vld [vmem:[%s3072_s24 + $0x50] sm:$0xff] }
  0x18   : > { %v350_v37 = vpack.c.bf16 %v259_v33, %v258_v32  ;;  %v197_v39 = vld [vmem:[%s3072_s24 + $0x58] sm:$0xff]  ;;  %v198_v40 = vld [vmem:[%s3072_s24 + $0x60] sm:$0xff]  ;;  %v199_v41 = vld [vmem:[%s3072_s24 + $0x68] sm:$0xff] }
  0x19   : > { %2849 = vmatpush3.bf16.msra.mxu0 %v3013_v3  ;;  %2997 = vmatpush3.bf16.msra.mxu1 %v3013_v3  ;;  %v260_v42 = vld [vmem:[%s3072_s24 + $0x250] sm:$0xff]  ;;  %v261_v43 = vld [vmem:[%s3072_s24 + $0x258] sm:$0xff]  ;;  %v262_v44 = vld [vmem:[%s3072_s24 + $0x260] sm:$0xff]  ;;  %v319_v46 = vpack.c.bf16 %v197_v39, %v196_v38  ;;  %v320_v47 = vpack.c.bf16 %v199_v41, %v198_v40 }
  0x1a   : > { %2850 = vmatprep.subr.bf16.mxu0 %v3014_v7  ;;  %2990 = vmatprep.subr.bf16.mxu1 %v3014_v7  ;;  %v263_v45 = vld [vmem:[%s3072_s24 + $0x268] sm:$0xff]  ;;  %v351_v48 = vpack.c.bf16 %v261_v43, %v260_v42  ;;  %v200_v50 = vld [vmem:[%s3072_s24 + $0x70] sm:$0xff]  ;;  %v201_v51 = vld [vmem:[%s3072_s24 + $0x78] sm:$0xff] }
  0x1b   : > { %v352_v49 = vpack.c.bf16 %v263_v45, %v262_v44  ;;  %v202_v52 = vld [vmem:[%s3072_s24 + $0x80] sm:$0xff]  ;;  %v203_v53 = vld [vmem:[%s3072_s24 + $0x88] sm:$0xff]  ;;  %v264_v54 = vld [vmem:[%s3072_s24 + $0x270] sm:$0xff]  ;;  %v321_v58 = vpack.c.bf16 %v201_v51, %v200_v50 }
  0x1c   : > { %v265_v55 = vld [vmem:[%s3072_s24 + $0x278] sm:$0xff]  ;;  %v266_v56 = vld [vmem:[%s3072_s24 + $0x280] sm:$0xff]  ;;  %v267_v57 = vld [vmem:[%s3072_s24 + $0x288] sm:$0xff]  ;;  %v322_v59 = vpack.c.bf16 %v203_v53, %v202_v52 }
  0x1d   : > { %2851 = vmatpush3.bf16.msra.mxu0 %v3014_v7  ;;  %2998 = vmatpush3.bf16.msra.mxu1 %v3014_v7  ;;  %v353_v60 = vpack.c.bf16 %v265_v55, %v264_v54  ;;  %v354_v61 = vpack.c.bf16 %v267_v57, %v266_v56  ;;  %v204_v62 = vld [vmem:[%s3072_s24 + $0x90] sm:$0xff]  ;;  %v205_v63 = vld [vmem:[%s3072_s24 + $0x98] sm:$0xff]  ;;  %v206_v0 = vld [vmem:[%s3072_s24 + $0xa0] sm:$0xff] }
  0x1e   : > { %2852 = vmatprep.subr.bf16.mxu0 %v3015_v8  ;;  %2991 = vmatprep.subr.bf16.mxu1 %v3015_v8  ;;  %v207_v1 = vld [vmem:[%s3072_s24 + $0xa8] sm:$0xff]  ;;  %v268_v2 = vld [vmem:[%s3072_s24 + $0x290] sm:$0xff]  ;;  %v269_v3 = vld [vmem:[%s3072_s24 + $0x298] sm:$0xff]  ;;  %v323_v6 = vpack.c.bf16 %v205_v63, %v204_v62 }
  0x1f   : > { %v270_v4 = vld [vmem:[%s3072_s24 + $0x2a0] sm:$0xff]  ;;  %v271_v5 = vld [vmem:[%s3072_s24 + $0x2a8] sm:$0xff]  ;;  %v324_v7 = vpack.c.bf16 %v207_v1, %v206_v0  ;;  %v209_v11 = vld [vmem:[%s3072_s24 + $0xb8] sm:$0xff] }
  0x20   : > { %v210_v12 = vld [vmem:[%s3072_s24 + $0xc0] sm:$0xff]  ;;  %v211_v13 = vld [vmem:[%s3072_s24 + $0xc8] sm:$0xff]  ;;  %v272_v14 = vld [vmem:[%s3072_s24 + $0x2b0] sm:$0xff] }
  0x21   : > { %2853 = vmatpush3.bf16.msra.mxu0 %v3015_v8  ;;  %2999 = vmatpush3.bf16.msra.mxu1 %v3015_v8  ;;  %v355_v8 = vpack.c.bf16 %v269_v3, %v268_v2  ;;  %v273_v15 = vld [vmem:[%s3072_s24 + $0x2b8] sm:$0xff]  ;;  %v274_v16 = vld [vmem:[%s3072_s24 + $0x2c0] sm:$0xff]  ;;  %v326_v19 = vpack.c.bf16 %v211_v13, %v210_v12  ;;  %v276_v26 = vld [vmem:[%s3072_s24 + $0x2d0] sm:$0xff] }
  0x22   : > { %2854 = vmatprep.subr.bf16.mxu0 %v3016_v9  ;;  %2992 = vmatprep.subr.bf16.mxu1 %v3016_v9  ;;  %v357_v20 = vpack.c.bf16 %v273_v15, %v272_v14  ;;  %v214_v24 = vld [vmem:[%s3072_s24 + $0xe0] sm:$0xff]  ;;  %v277_v27 = vld [vmem:[%s3072_s24 + $0x2d8] sm:$0xff]  ;;  %v279_v29 = vld [vmem:[%s3072_s24 + $0x2e8] sm:$0xff] }
  0x23   : > { %v278_v28 = vld [vmem:[%s3072_s24 + $0x2e0] sm:$0xff]  ;;  %v359_v32 = vpack.c.bf16 %v277_v27, %v276_v26  ;;  %v280_v38 = vld [vmem:[%s3072_s24 + $0x2f0] sm:$0xff]  ;;  %v281_v39 = vld [vmem:[%s3072_s24 + $0x2f8] sm:$0xff] }
  0x24   : > { %v360_v33 = vpack.c.bf16 %v279_v29, %v278_v28  ;;  %v282_v40 = vld [vmem:[%s3072_s24 + $0x300] sm:$0xff]  ;;  %v283_v41 = vld [vmem:[%s3072_s24 + $0x308] sm:$0xff]  ;;  %v361_v44 = vpack.c.bf16 %v281_v39, %v280_v38  ;;  %v284_v50 = vld [vmem:[%s3072_s24 + $0x310] sm:$0xff] }
  0x25   : > { %2855 = vmatpush3.bf16.msra.mxu0 %v3016_v9  ;;  %3000 = vmatpush3.bf16.msra.mxu1 %v3016_v9  ;;  %v356_v9 = vpack.c.bf16 %v271_v5, %v270_v4  ;;  %v362_v45 = vpack.c.bf16 %v283_v41, %v282_v40  ;;  %v285_v51 = vld [vmem:[%s3072_s24 + $0x318] sm:$0xff]  ;;  %v286_v55 = vld [vmem:[%s3072_s24 + $0x320] sm:$0xff]  ;;  %v287_v56 = vld [vmem:[%s3072_s24 + $0x328] sm:$0xff] }
  0x26   : > { %2856 = vmatprep.subr.bf16.mxu0 %v3017_v10  ;;  %2993 = vmatprep.subr.bf16.mxu1 %v3017_v10  ;;  %v363_v54 = vpack.c.bf16 %v285_v51, %v284_v50  ;;  %v364_v57 = vpack.c.bf16 %v287_v56, %v286_v55  ;;  %v288_v62 = vld [vmem:[%s3072_s24 + $0x330] sm:$0xff]  ;;  %v289_v63 = vld [vmem:[%s3072_s24 + $0x338] sm:$0xff]  ;;  %v290_v3 = vld [vmem:[%s3072_s24 + $0x340] sm:$0xff] }
  0x27   : > { %v365_v2 = vpack.c.bf16 %v289_v63, %v288_v62  ;;  %v291_v4 = vld [vmem:[%s3072_s24 + $0x348] sm:$0xff]  ;;  %v294_v15 = vld [vmem:[%s3072_s24 + $0x360] sm:$0xff]  ;;  %v245_v55 = vld [vmem:[%s3072_s24 + $0x1d8] sm:$0xff] }
  0x28   : > { %v366_v5 = vpack.c.bf16 %v291_v4, %v290_v3  ;;  %v298_v27 = vld [vmem:[%s3072_s24 + $0x380] sm:$0xff]  ;;  %v299_v28 = vld [vmem:[%s3072_s24 + $0x388] sm:$0xff]  ;;  %v249_v3 = vld [vmem:[%s3072_s24 + $0x1f8] sm:$0xff] }
  0x29   : > { %2857 = vmatpush3.bf16.msra.mxu0 %v3017_v10  ;;  %3001 = vmatpush3.bf16.msra.mxu1 %v3017_v10  ;;  %v208_v10 = vld [vmem:[%s3072_s24 + $0xb0] sm:$0xff]  ;;  %v370_v29 = vpack.c.bf16 %v299_v28, %v298_v27  ;;  %v302_v39 = vld [vmem:[%s3072_s24 + $0x3a0] sm:$0xff]  ;;  %v303_v40 = vld [vmem:[%s3072_s24 + $0x3a8] sm:$0xff] }
  0x2a   : > { %v325_v18 = vpack.c.bf16 %v209_v11, %v208_v10  ;;  %v292_v10 = vld [vmem:[%s3072_s24 + $0x350] sm:$0xff]  ;;  %v293_v11 = vld [vmem:[%s3072_s24 + $0x358] sm:$0xff]  ;;  %v372_v41 = vpack.c.bf16 %v303_v40, %v302_v39  ;;  %v306_v51 = vld [vmem:[%s3072_s24 + $0x3c0] sm:$0xff] }
  0x2b   : > { %v367_v14 = vpack.c.bf16 %v293_v11, %v292_v10  ;;  %v246_v56 = vld [vmem:[%s3072_s24 + $0x1e0] sm:$0xff]  ;;  %v312_v4 = vld [vmem:[%s3072_s24 + $0x3f0] sm:$0xff] }
  0x2c   : > { %2859 = vmatmul.mubr.bf16.vlgmr.msra.gmra.mxu0 %v315_v17  ;;  %2923 = vmatmul.mubr.bf16.vlgmr.msra.gmra.mxu1 %v347_v23  ;;  %v275_v17 = vld [vmem:[%s3072_s24 + $0x2c8] sm:$0xff]  ;;  %v213_v23 = vld [vmem:[%s3072_s24 + $0xd8] sm:$0xff]  ;;  %v310_v63 = vld [vmem:[%s3072_s24 + $0x3e0] sm:$0xff] }
  0x2d   : > { %2862 = vmatprep.mubr.bf16.mxu0 %v316_v22  ;;  %2926 = vmatprep.mubr.bf16.mxu1 %v348_v25  ;;  %v358_v21 = vpack.c.bf16 %v275_v17, %v274_v16  ;;  %v212_v22 = vld [vmem:[%s3072_s24 + $0xd0] sm:$0xff]  ;;  %v215_v25 = vld [vmem:[%s3072_s24 + $0xe8] sm:$0xff] }
  0x2e   : > { %v327_v30 = vpack.c.bf16 %v213_v23, %v212_v22  ;;  %v328_v31 = vpack.c.bf16 %v215_v25, %v214_v24  ;;  %v295_v16 = vld [vmem:[%s3072_s24 + $0x368] sm:$0xff]  ;;  %v296_v22 = vld [vmem:[%s3072_s24 + $0x370] sm:$0xff]  ;;  %v297_v23 = vld [vmem:[%s3072_s24 + $0x378] sm:$0xff] }
  0x2f   : > { %v368_v17 = vpack.c.bf16 %v295_v16, %v294_v15  ;;  %v369_v26 = vpack.c.bf16 %v297_v23, %v296_v22 }
  0x34   : > { %2863 = vmatmul.mubr.bf16.gmra.mxu0 %v317_v34  ;;  %2927 = vmatmul.mubr.bf16.gmra.mxu1 %v349_v36  ;;  %v216_v34 = vld [vmem:[%s3072_s24 + $0xf0] sm:$0xff]  ;;  %v218_v36 = vld [vmem:[%s3072_s24 + $0x100] sm:$0xff] }
  0x35   : > { %2866 = vmatprep.mubr.bf16.mxu0 %v318_v35  ;;  %2930 = vmatprep.mubr.bf16.mxu1 %v350_v37  ;;  %v217_v35 = vld [vmem:[%s3072_s24 + $0xf8] sm:$0xff]  ;;  %v219_v37 = vld [vmem:[%s3072_s24 + $0x108] sm:$0xff] }
  0x36   : > { %v329_v42 = vpack.c.bf16 %v217_v35, %v216_v34  ;;  %v330_v43 = vpack.c.bf16 %v219_v37, %v218_v36  ;;  %v300_v34 = vld [vmem:[%s3072_s24 + $0x390] sm:$0xff]  ;;  %v301_v35 = vld [vmem:[%s3072_s24 + $0x398] sm:$0xff] }
  0x37   : > { %v371_v38 = vpack.c.bf16 %v301_v35, %v300_v34 }
  0x3c   : > { %2867 = vmatmul.mubr.bf16.gmra.mxu0 %v319_v46  ;;  %2931 = vmatmul.mubr.bf16.gmra.mxu1 %v351_v48  ;;  %v220_v46 = vld [vmem:[%s3072_s24 + $0x110] sm:$0xff]  ;;  %v222_v48 = vld [vmem:[%s3072_s24 + $0x120] sm:$0xff] }
  0x3d   : > { %2870 = vmatprep.mubr.bf16.mxu0 %v320_v47  ;;  %2934 = vmatprep.mubr.bf16.mxu1 %v352_v49  ;;  %v221_v47 = vld [vmem:[%s3072_s24 + $0x118] sm:$0xff]  ;;  %v223_v49 = vld [vmem:[%s3072_s24 + $0x128] sm:$0xff] }
  0x3e   : > { %v331_v52 = vpack.c.bf16 %v221_v47, %v220_v46  ;;  %v332_v53 = vpack.c.bf16 %v223_v49, %v222_v48  ;;  %v304_v46 = vld [vmem:[%s3072_s24 + $0x3b0] sm:$0xff]  ;;  %v305_v47 = vld [vmem:[%s3072_s24 + $0x3b8] sm:$0xff] }
  0x3f   : > { %v373_v50 = vpack.c.bf16 %v305_v47, %v304_v46 }
  0x44   : > { %2871 = vmatmul.mubr.bf16.gmra.mxu0 %v321_v58  ;;  %2935 = vmatmul.mubr.bf16.gmra.mxu1 %v353_v60  ;;  %v224_v58 = vld [vmem:[%s3072_s24 + $0x130] sm:$0xff]  ;;  %v226_v60 = vld [vmem:[%s3072_s24 + $0x140] sm:$0xff] }
  0x45   : > { %2874 = vmatprep.mubr.bf16.mxu0 %v322_v59  ;;  %2938 = vmatprep.mubr.bf16.mxu1 %v354_v61  ;;  %v225_v59 = vld [vmem:[%s3072_s24 + $0x138] sm:$0xff]  ;;  %v227_v61 = vld [vmem:[%s3072_s24 + $0x148] sm:$0xff] }
  0x46   : > { %v333_v0 = vpack.c.bf16 %v225_v59, %v224_v58  ;;  %v334_v1 = vpack.c.bf16 %v227_v61, %v226_v60  ;;  %v308_v58 = vld [vmem:[%s3072_s24 + $0x3d0] sm:$0xff]  ;;  %v309_v59 = vld [vmem:[%s3072_s24 + $0x3d8] sm:$0xff] }
  0x47   : > { %v375_v62 = vpack.c.bf16 %v309_v59, %v308_v58 }
  0x4c   : > { %2875 = vmatmul.mubr.bf16.gmra.mxu0 %v323_v6  ;;  %2939 = vmatmul.mubr.bf16.gmra.mxu1 %v355_v8  ;;  %v228_v6 = vld [vmem:[%s3072_s24 + $0x150] sm:$0xff]  ;;  %v230_v8 = vld [vmem:[%s3072_s24 + $0x160] sm:$0xff] }
  0x4d   : > { %2878 = vmatprep.mubr.bf16.mxu0 %v324_v7  ;;  %2942 = vmatprep.mubr.bf16.mxu1 %v356_v9  ;;  %v229_v7 = vld [vmem:[%s3072_s24 + $0x158] sm:$0xff]  ;;  %v231_v9 = vld [vmem:[%s3072_s24 + $0x168] sm:$0xff] }
  0x4e   : > { %v335_v12 = vpack.c.bf16 %v229_v7, %v228_v6  ;;  %v336_v13 = vpack.c.bf16 %v231_v9, %v230_v8 }
  0x54   : > { %2879 = vmatmul.mubr.bf16.gmra.mxu0 %v325_v18  ;;  %2943 = vmatmul.mubr.bf16.gmra.mxu1 %v357_v20  ;;  %v232_v18 = vld [vmem:[%s3072_s24 + $0x170] sm:$0xff]  ;;  %v234_v20 = vld [vmem:[%s3072_s24 + $0x180] sm:$0xff] }
  0x55   : > { %2882 = vmatprep.mubr.bf16.mxu0 %v326_v19  ;;  %2946 = vmatprep.mubr.bf16.mxu1 %v358_v21  ;;  %v233_v19 = vld [vmem:[%s3072_s24 + $0x178] sm:$0xff]  ;;  %v235_v21 = vld [vmem:[%s3072_s24 + $0x188] sm:$0xff] }
  0x56   : > { %v337_v24 = vpack.c.bf16 %v233_v19, %v232_v18  ;;  %v338_v25 = vpack.c.bf16 %v235_v21, %v234_v20 }
  0x5c   : > { %2883 = vmatmul.mubr.bf16.gmra.mxu0 %v327_v30  ;;  %2947 = vmatmul.mubr.bf16.gmra.mxu1 %v359_v32  ;;  %v236_v30 = vld [vmem:[%s3072_s24 + $0x190] sm:$0xff]  ;;  %v238_v32 = vld [vmem:[%s3072_s24 + $0x1a0] sm:$0xff] }
  0x5d   : > { %2886 = vmatprep.mubr.bf16.mxu0 %v328_v31  ;;  %2950 = vmatprep.mubr.bf16.mxu1 %v360_v33  ;;  %v237_v31 = vld [vmem:[%s3072_s24 + $0x198] sm:$0xff]  ;;  %v239_v33 = vld [vmem:[%s3072_s24 + $0x1a8] sm:$0xff] }
  0x5e   : > { %v339_v36 = vpack.c.bf16 %v237_v31, %v236_v30  ;;  %v340_v37 = vpack.c.bf16 %v239_v33, %v238_v32 }
  0x64   : > { %2887 = vmatmul.mubr.bf16.gmra.mxu0 %v329_v42  ;;  %2951 = vmatmul.mubr.bf16.gmra.mxu1 %v361_v44  ;;  %v240_v42 = vld [vmem:[%s3072_s24 + $0x1b0] sm:$0xff]  ;;  %v242_v44 = vld [vmem:[%s3072_s24 + $0x1c0] sm:$0xff] }
  0x65   : > { %2890 = vmatprep.mubr.bf16.mxu0 %v330_v43  ;;  %2954 = vmatprep.mubr.bf16.mxu1 %v362_v45  ;;  %v241_v43 = vld [vmem:[%s3072_s24 + $0x1b8] sm:$0xff]  ;;  %v243_v45 = vld [vmem:[%s3072_s24 + $0x1c8] sm:$0xff] }
  0x66   : > { %v341_v48 = vpack.c.bf16 %v241_v43, %v240_v42  ;;  %v342_v49 = vpack.c.bf16 %v243_v45, %v242_v44 }
  0x6c   : > { %2891 = vmatmul.mubr.bf16.gmra.mxu0 %v331_v52  ;;  %2955 = vmatmul.mubr.bf16.gmra.mxu1 %v363_v54  ;;  %v307_v52 = vld [vmem:[%s3072_s24 + $0x3c8] sm:$0xff]  ;;  %v244_v54 = vld [vmem:[%s3072_s24 + $0x1d0] sm:$0xff] }
  0x6d   : > { %2894 = vmatprep.mubr.bf16.mxu0 %v332_v53  ;;  %2958 = vmatprep.mubr.bf16.mxu1 %v364_v57  ;;  %v374_v53 = vpack.c.bf16 %v307_v52, %v306_v51  ;;  %v247_v57 = vld [vmem:[%s3072_s24 + $0x1e8] sm:$0xff]  ;;  %v343_v60 = vpack.c.bf16 %v245_v55, %v244_v54 }
  0x6e   : > { %v344_v61 = vpack.c.bf16 %v247_v57, %v246_v56 }
  0x74   : > { %2895 = vmatmul.mubr.bf16.gmra.mxu0 %v333_v0  ;;  %2959 = vmatmul.mubr.bf16.gmra.mxu1 %v365_v2  ;;  %v311_v0 = vld [vmem:[%s3072_s24 + $0x3e8] sm:$0xff]  ;;  %v248_v2 = vld [vmem:[%s3072_s24 + $0x1f0] sm:$0xff] }
  0x75   : > { %2898 = vmatprep.mubr.bf16.mxu0 %v334_v1  ;;  %2962 = vmatprep.mubr.bf16.mxu1 %v366_v5  ;;  %v376_v1 = vpack.c.bf16 %v311_v0, %v310_v63  ;;  %v313_v5 = vld [vmem:[%s3072_s24 + $0x3f8] sm:$0xff]  ;;  %v345_v6 = vpack.c.bf16 %v249_v3, %v248_v2 }
  0x76   : > { %v377_v7 = vpack.c.bf16 %v313_v5, %v312_v4 }
  0x7c   : > { %2899 = vmatmul.mubr.bf16.gmra.mxu0 %v335_v12  ;;  %2963 = vmatmul.mubr.bf16.gmra.mxu1 %v367_v14 }
  0x7d   : > { %2902 = vmatprep.mubr.bf16.mxu0 %v336_v13  ;;  %2966 = vmatprep.mubr.bf16.mxu1 %v368_v17 }
  0x84   : > { %2903 = vmatmul.mubr.bf16.gmra.mxu0 %v337_v24  ;;  %2967 = vmatmul.mubr.bf16.gmra.mxu1 %v369_v26 }
  0x85   : > { %2906 = vmatprep.mubr.bf16.mxu0 %v338_v25  ;;  %2970 = vmatprep.mubr.bf16.mxu1 %v370_v29 }
  0x8c   : > { %2907 = vmatmul.mubr.bf16.gmra.mxu0 %v339_v36  ;;  %2971 = vmatmul.mubr.bf16.gmra.mxu1 %v371_v38 }
  0x8d   : > { %2910 = vmatprep.mubr.bf16.mxu0 %v340_v37  ;;  %2974 = vmatprep.mubr.bf16.mxu1 %v372_v41 }
  0x94   : > { %2911 = vmatmul.mubr.bf16.gmra.mxu0 %v341_v48  ;;  %2975 = vmatmul.mubr.bf16.gmra.mxu1 %v373_v50 }
  0x95   : > { %2914 = vmatprep.mubr.bf16.mxu0 %v342_v49  ;;  %2978 = vmatprep.mubr.bf16.mxu1 %v374_v53 }
  0x9c   : > { %2915 = vmatmul.mubr.bf16.gmra.mxu0 %v343_v60  ;;  %2979 = vmatmul.mubr.bf16.gmra.mxu1 %v375_v62 }
  0x9d   : > { %2918 = vmatprep.mubr.bf16.mxu0 %v344_v61  ;;  %2982 = vmatprep.mubr.bf16.mxu1 %v376_v1 }
  0xa4   : > { %2919 = vmatmul.mubr.bf16.gmra.mxu0 %v345_v6  ;;  %2983 = vmatmul.mubr.bf16.gmra.mxu1 %v377_v7 }
  0xec   : > { %v2860_v8 = vpop.f32.mrf.mxu0  ;;  %v3218_v9 = vpop.f32.mrf.mxu1 }
  0xed   : > { %v1762_v24 = vmul.f32 %v2860_v8, %v2860_v8 }
  0xee   : > { %v476_v10 = vpop.f32.mrf.mxu0  ;;  %v3220_v11 = vpop.f32.mrf.mxu1 }
  0xef   : > { %v1760_v17 = vmul.f32 %v476_v10, %v476_v10 }
  0xf0   : > { %v2861_v12 = vpop.f32.mrf.mxu0  ;;  %v3227_v14 = vpop.f32.mrf.mxu1 }
  0xf1   : > { %v2395_v13 = vpack.c.bf16 %v2861_v12, %v2860_v8  ;;  %v2555_v16 = vpack.c.bf16 %v3227_v14, %v3218_v9  ;;  %v1763_v29 = vmul.f32 %v2861_v12, %v2861_v12 }
  0xf2   : > { %v479_v15 = vpop.f32.mrf.mxu0  ;;  %v3232_v21 = vpop.f32.mrf.mxu1 }
  0xf3   : > { %2707 = vst [vmem:[%s3225_s11 + $0x8] sm:$0xff] %v2395_v13   ;;  %v2390_v18 = vpack.c.bf16 %v479_v15, %v476_v10  ;;  %v1627_v19 = vadd.f32 %v479_v15, %v476_v10  ;;  %v1761_v20 = vmul.f32 %v479_v15, %v479_v15  ;;  %2739 = vst [vmem:[%s3225_s11 + $0x108] sm:$0xff] %v2555_v16  }
  0xf4   : > { %v2864_v22 = vpop.f32.mrf.mxu0  ;;  %v2550_v23 = vpack.c.bf16 %v3232_v21, %v3220_v11  ;;  %v3238_v27 = vpop.f32.mrf.mxu1 }
  0xf5   : > { %2391 = vst [vmem:[%s3225_s11] sm:$0xff] %v2390_v18   ;;  %v1628_v25 = vadd.f32 %v2860_v8, %v1627_v19  ;;  %v1888_v26 = vadd.f32 %v1761_v20, %v1760_v17  ;;  %v1766_v48 = vmul.f32 %v2864_v22, %v2864_v22 }
  0xf6   : > { %v492_v28 = vpop.f32.mrf.mxu0  ;;  %2738 = vst [vmem:[%s3225_s11 + $0x100] sm:$0xff] %v2550_v23   ;;  %v3241_v32 = vpop.f32.mrf.mxu1 }
  0xf7   : > { %v1889_v30 = vadd.f32 %v1888_v26, %v1762_v24  ;;  %v1629_v31 = vadd.f32 %v2861_v12, %v1628_v25  ;;  %v1764_v35 = vmul.f32 %v492_v28, %v492_v28 }
  0xf8   : > { %v2865_v33 = vpop.f32.mrf.mxu0  ;;  %v3243_v38 = vpop.f32.mrf.mxu1 }
  0xf9   : > { %v1630_v34 = vadd.f32 %v1629_v31, %v492_v28  ;;  %v1890_v36 = vadd.f32 %v1889_v30, %v1763_v29  ;;  %v2405_v37 = vpack.c.bf16 %v2865_v33, %v2864_v22  ;;  %v2565_v40 = vpack.c.bf16 %v3243_v38, %v3238_v27 }
  0xfa   : > { %v495_v39 = vpop.f32.mrf.mxu0  ;;  %v3248_v45 = vpop.f32.mrf.mxu1  ;;  %v1767_v53 = vmul.f32 %v2865_v33, %v2865_v33 }
  0xfb   : > { %v1891_v41 = vadd.f32 %v1890_v36, %v1764_v35  ;;  %2709 = vst [vmem:[%s3225_s11 + $0x18] sm:$0xff] %v2405_v37   ;;  %v2400_v42 = vpack.c.bf16 %v495_v39, %v492_v28  ;;  %v1631_v43 = vadd.f32 %v1630_v34, %v495_v39  ;;  %v1765_v44 = vmul.f32 %v495_v39, %v495_v39 }
  0xfc   : > { %v2868_v46 = vpop.f32.mrf.mxu0  ;;  %2741 = vst [vmem:[%s3225_s11 + $0x118] sm:$0xff] %v2565_v40   ;;  %v2560_v47 = vpack.c.bf16 %v3248_v45, %v3241_v32  ;;  %v3254_v51 = vpop.f32.mrf.mxu1 }
  0xfd   : > { %2708 = vst [vmem:[%s3225_s11 + $0x10] sm:$0xff] %v2400_v42   ;;  %v1632_v49 = vadd.f32 %v2864_v22, %v1631_v43  ;;  %v1892_v50 = vadd.f32 %v1891_v41, %v1765_v44  ;;  %v1770_v8 = vmul.f32 %v2868_v46, %v2868_v46 }
  0xfe   : > { %v508_v52 = vpop.f32.mrf.mxu0  ;;  %2740 = vst [vmem:[%s3225_s11 + $0x110] sm:$0xff] %v2560_v47   ;;  %v3257_v56 = vpop.f32.mrf.mxu1 }
  0xff   : > { %v1893_v54 = vadd.f32 %v1892_v50, %v1766_v48  ;;  %v1633_v55 = vadd.f32 %v2865_v33, %v1632_v49  ;;  %v1768_v59 = vmul.f32 %v508_v52, %v508_v52 }
 0x100   : > { %v2869_v57 = vpop.f32.mrf.mxu0  ;;  %v3259_v62 = vpop.f32.mrf.mxu1 }
 0x101   : > { %v1634_v58 = vadd.f32 %v1633_v55, %v508_v52  ;;  %v1894_v60 = vadd.f32 %v1893_v54, %v1767_v53  ;;  %v2415_v61 = vpack.c.bf16 %v2869_v57, %v2868_v46  ;;  %v2575_v0 = vpack.c.bf16 %v3259_v62, %v3254_v51 }
 0x102   : > { %v511_v63 = vpop.f32.mrf.mxu0  ;;  %v3264_v5 = vpop.f32.mrf.mxu1  ;;  %v1771_v16 = vmul.f32 %v2869_v57, %v2869_v57 }
 0x103   : > { %v1895_v1 = vadd.f32 %v1894_v60, %v1768_v59  ;;  %2711 = vst [vmem:[%s3225_s11 + $0x28] sm:$0xff] %v2415_v61   ;;  %v2410_v2 = vpack.c.bf16 %v511_v63, %v508_v52  ;;  %v1635_v3 = vadd.f32 %v1634_v58, %v511_v63  ;;  %v1769_v4 = vmul.f32 %v511_v63, %v511_v63 }
 0x104   : > { %v2872_v6 = vpop.f32.mrf.mxu0  ;;  %2743 = vst [vmem:[%s3225_s11 + $0x128] sm:$0xff] %v2575_v0   ;;  %v2570_v7 = vpack.c.bf16 %v3264_v5, %v3257_v56  ;;  %v3270_v13 = vpop.f32.mrf.mxu1 }
 0x105   : > { %2710 = vst [vmem:[%s3225_s11 + $0x20] sm:$0xff] %v2410_v2   ;;  %v1636_v10 = vadd.f32 %v2868_v46, %v1635_v3  ;;  %v1896_v12 = vadd.f32 %v1895_v1, %v1769_v4  ;;  %v1774_v39 = vmul.f32 %v2872_v6, %v2872_v6 }
 0x106   : > { %v524_v15 = vpop.f32.mrf.mxu0  ;;  %2742 = vst [vmem:[%s3225_s11 + $0x120] sm:$0xff] %v2570_v7   ;;  %v3273_v19 = vpop.f32.mrf.mxu1 }
 0x107   : > { %v1897_v17 = vadd.f32 %v1896_v12, %v1770_v8  ;;  %v1637_v18 = vadd.f32 %v2869_v57, %v1636_v10  ;;  %v1772_v23 = vmul.f32 %v524_v15, %v524_v15 }
 0x108   : > { %v2873_v20 = vpop.f32.mrf.mxu0  ;;  %v3275_v26 = vpop.f32.mrf.mxu1 }
 0x109   : > { %v1638_v22 = vadd.f32 %v1637_v18, %v524_v15  ;;  %v1898_v24 = vadd.f32 %v1897_v17, %v1771_v16  ;;  %v2425_v25 = vpack.c.bf16 %v2873_v20, %v2872_v6  ;;  %v2585_v29 = vpack.c.bf16 %v3275_v26, %v3270_v13 }
 0x10a   : > { %v527_v28 = vpop.f32.mrf.mxu0  ;;  %v3280_v35 = vpop.f32.mrf.mxu1  ;;  %v1775_v44 = vmul.f32 %v2873_v20, %v2873_v20 }
 0x10b   : > { %v1899_v30 = vadd.f32 %v1898_v24, %v1772_v23  ;;  %2713 = vst [vmem:[%s3225_s11 + $0x38] sm:$0xff] %v2425_v25   ;;  %v2420_v31 = vpack.c.bf16 %v527_v28, %v524_v15  ;;  %v1639_v33 = vadd.f32 %v1638_v22, %v527_v28  ;;  %v1773_v34 = vmul.f32 %v527_v28, %v527_v28 }
 0x10c   : > { %v2876_v36 = vpop.f32.mrf.mxu0  ;;  %2745 = vst [vmem:[%s3225_s11 + $0x138] sm:$0xff] %v2585_v29   ;;  %v2580_v37 = vpack.c.bf16 %v3280_v35, %v3273_v19  ;;  %v3286_v42 = vpop.f32.mrf.mxu1 }
 0x10d   : > { %2712 = vst [vmem:[%s3225_s11 + $0x30] sm:$0xff] %v2420_v31   ;;  %v1640_v40 = vadd.f32 %v2872_v6, %v1639_v33  ;;  %v1900_v41 = vadd.f32 %v1899_v30, %v1773_v34  ;;  %v1778_v3 = vmul.f32 %v2876_v36, %v2876_v36 }
 0x10e   : > { %v540_v43 = vpop.f32.mrf.mxu0  ;;  %2744 = vst [vmem:[%s3225_s11 + $0x130] sm:$0xff] %v2580_v37   ;;  %v3289_v48 = vpop.f32.mrf.mxu1 }
 0x10f   : > { %v1901_v46 = vadd.f32 %v1900_v41, %v1774_v39  ;;  %v1641_v47 = vadd.f32 %v2873_v20, %v1640_v40  ;;  %v1776_v52 = vmul.f32 %v540_v43, %v540_v43 }
 0x110   : > { %v2877_v49 = vpop.f32.mrf.mxu0  ;;  %v3291_v55 = vpop.f32.mrf.mxu1 }
 0x111   : > { %v1642_v50 = vadd.f32 %v1641_v47, %v540_v43  ;;  %v1902_v53 = vadd.f32 %v1901_v46, %v1775_v44  ;;  %v2435_v54 = vpack.c.bf16 %v2877_v49, %v2876_v36  ;;  %v2595_v58 = vpack.c.bf16 %v3291_v55, %v3286_v42 }
 0x112   : > { %v543_v57 = vpop.f32.mrf.mxu0  ;;  %v3296_v0 = vpop.f32.mrf.mxu1  ;;  %v1779_v10 = vmul.f32 %v2877_v49, %v2877_v49 }
 0x113   : > { %v1903_v59 = vadd.f32 %v1902_v53, %v1776_v52  ;;  %2715 = vst [vmem:[%s3225_s11 + $0x48] sm:$0xff] %v2435_v54   ;;  %v2430_v60 = vpack.c.bf16 %v543_v57, %v540_v43  ;;  %v1643_v61 = vadd.f32 %v1642_v50, %v543_v57  ;;  %v1777_v63 = vmul.f32 %v543_v57, %v543_v57 }
 0x114   : > { %v2880_v1 = vpop.f32.mrf.mxu0  ;;  %2747 = vst [vmem:[%s3225_s11 + $0x148] sm:$0xff] %v2595_v58   ;;  %v2590_v2 = vpack.c.bf16 %v3296_v0, %v3289_v48  ;;  %v3302_v7 = vpop.f32.mrf.mxu1 }
 0x115   : > { %2714 = vst [vmem:[%s3225_s11 + $0x40] sm:$0xff] %v2430_v60   ;;  %v1644_v4 = vadd.f32 %v2876_v36, %v1643_v61  ;;  %v1904_v6 = vadd.f32 %v1903_v59, %v1777_v63  ;;  %v1782_v39 = vmul.f32 %v2880_v1, %v2880_v1 }
 0x116   : > { %v556_v8 = vpop.f32.mrf.mxu0  ;;  %2746 = vst [vmem:[%s3225_s11 + $0x140] sm:$0xff] %v2590_v2   ;;  %v3305_v16 = vpop.f32.mrf.mxu1 }
 0x117   : > { %v1905_v12 = vadd.f32 %v1904_v6, %v1778_v3  ;;  %v1645_v15 = vadd.f32 %v2877_v49, %v1644_v4  ;;  %v1780_v20 = vmul.f32 %v556_v8, %v556_v8 }
 0x118   : > { %v2881_v17 = vpop.f32.mrf.mxu0  ;;  %v3307_v24 = vpop.f32.mrf.mxu1 }
 0x119   : > { %v1646_v18 = vadd.f32 %v1645_v15, %v556_v8  ;;  %v1906_v22 = vadd.f32 %v1905_v12, %v1779_v10  ;;  %v2445_v23 = vpack.c.bf16 %v2881_v17, %v2880_v1  ;;  %v2605_v28 = vpack.c.bf16 %v3307_v24, %v3302_v7 }
 0x11a   : > { %v559_v25 = vpop.f32.mrf.mxu0  ;;  %v3312_v34 = vpop.f32.mrf.mxu1  ;;  %v1783_v46 = vmul.f32 %v2881_v17, %v2881_v17 }
 0x11b   : > { %v1907_v29 = vadd.f32 %v1906_v22, %v1780_v20  ;;  %2717 = vst [vmem:[%s3225_s11 + $0x58] sm:$0xff] %v2445_v23   ;;  %v2440_v30 = vpack.c.bf16 %v559_v25, %v556_v8  ;;  %v1647_v31 = vadd.f32 %v1646_v18, %v559_v25  ;;  %v1781_v33 = vmul.f32 %v559_v25, %v559_v25 }
 0x11c   : > { %v2884_v36 = vpop.f32.mrf.mxu0  ;;  %2749 = vst [vmem:[%s3225_s11 + $0x158] sm:$0xff] %v2605_v28   ;;  %v2600_v37 = vpack.c.bf16 %v3312_v34, %v3305_v16  ;;  %v3318_v43 = vpop.f32.mrf.mxu1 }
 0x11d   : > { %2716 = vst [vmem:[%s3225_s11 + $0x50] sm:$0xff] %v2440_v30   ;;  %v1648_v40 = vadd.f32 %v2880_v1, %v1647_v31  ;;  %v1908_v41 = vadd.f32 %v1907_v29, %v1781_v33  ;;  %v1786_v10 = vmul.f32 %v2884_v36, %v2884_v36 }
 0x11e   : > { %v572_v44 = vpop.f32.mrf.mxu0  ;;  %2748 = vst [vmem:[%s3225_s11 + $0x150] sm:$0xff] %v2600_v37   ;;  %v3321_v50 = vpop.f32.mrf.mxu1 }
 0x11f   : > { %v1909_v47 = vadd.f32 %v1908_v41, %v1782_v39  ;;  %v1649_v49 = vadd.f32 %v2881_v17, %v1648_v40  ;;  %v1784_v54 = vmul.f32 %v572_v44, %v572_v44 }
 0x120   : > { %v2885_v52 = vpop.f32.mrf.mxu0  ;;  %v3323_v59 = vpop.f32.mrf.mxu1 }
 0x121   : > { %v1650_v53 = vadd.f32 %v1649_v49, %v572_v44  ;;  %v1910_v57 = vadd.f32 %v1909_v47, %v1783_v46  ;;  %v2455_v58 = vpack.c.bf16 %v2885_v52, %v2884_v36  ;;  %v2615_v61 = vpack.c.bf16 %v3323_v59, %v3318_v43 }
 0x122   : > { %v575_v60 = vpop.f32.mrf.mxu0  ;;  %v3328_v4 = vpop.f32.mrf.mxu1  ;;  %v1787_v20 = vmul.f32 %v2885_v52, %v2885_v52 }
 0x123   : > { %v1911_v63 = vadd.f32 %v1910_v57, %v1784_v54  ;;  %2719 = vst [vmem:[%s3225_s11 + $0x68] sm:$0xff] %v2455_v58   ;;  %v2450_v1 = vpack.c.bf16 %v575_v60, %v572_v44  ;;  %v1651_v2 = vadd.f32 %v1650_v53, %v575_v60  ;;  %v1785_v3 = vmul.f32 %v575_v60, %v575_v60 }
 0x124   : > { %v2888_v6 = vpop.f32.mrf.mxu0  ;;  %2751 = vst [vmem:[%s3225_s11 + $0x168] sm:$0xff] %v2615_v61   ;;  %v2610_v8 = vpack.c.bf16 %v3328_v4, %v3321_v50  ;;  %v3334_v17 = vpop.f32.mrf.mxu1 }
 0x125   : > { %2718 = vst [vmem:[%s3225_s11 + $0x60] sm:$0xff] %v2450_v1   ;;  %v1652_v12 = vadd.f32 %v2884_v36, %v1651_v2  ;;  %v1912_v15 = vadd.f32 %v1911_v63, %v1785_v3  ;;  %v1790_v53 = vmul.f32 %v2888_v6, %v2888_v6 }
 0x126   : > { %v588_v18 = vpop.f32.mrf.mxu0  ;;  %2750 = vst [vmem:[%s3225_s11 + $0x160] sm:$0xff] %v2610_v8   ;;  %v3337_v25 = vpop.f32.mrf.mxu1 }
 0x127   : > { %v1913_v22 = vadd.f32 %v1912_v15, %v1786_v10  ;;  %v1653_v23 = vadd.f32 %v2885_v52, %v1652_v12  ;;  %v1788_v30 = vmul.f32 %v588_v18, %v588_v18 }
 0x128   : > { %v2889_v28 = vpop.f32.mrf.mxu0  ;;  %v3339_v37 = vpop.f32.mrf.mxu1 }
 0x129   : > { %v1654_v29 = vadd.f32 %v1653_v23, %v588_v18  ;;  %v1914_v31 = vadd.f32 %v1913_v22, %v1787_v20  ;;  %v2465_v33 = vpack.c.bf16 %v2889_v28, %v2888_v6  ;;  %v2625_v39 = vpack.c.bf16 %v3339_v37, %v3334_v17 }
 0x12a   : > { %v591_v36 = vpop.f32.mrf.mxu0  ;;  %v3344_v47 = vpop.f32.mrf.mxu1  ;;  %v1791_v61 = vmul.f32 %v2889_v28, %v2889_v28 }
 0x12b   : > { %v1915_v40 = vadd.f32 %v1914_v31, %v1788_v30  ;;  %2721 = vst [vmem:[%s3225_s11 + $0x78] sm:$0xff] %v2465_v33   ;;  %v2460_v41 = vpack.c.bf16 %v591_v36, %v588_v18  ;;  %v1655_v44 = vadd.f32 %v1654_v29, %v591_v36  ;;  %v1789_v46 = vmul.f32 %v591_v36, %v591_v36 }
 0x12c   : > { %v2892_v49 = vpop.f32.mrf.mxu0  ;;  %2753 = vst [vmem:[%s3225_s11 + $0x178] sm:$0xff] %v2625_v39   ;;  %v2620_v52 = vpack.c.bf16 %v3344_v47, %v3337_v25  ;;  %v3350_v58 = vpop.f32.mrf.mxu1 }
 0x12d   : > { %2720 = vst [vmem:[%s3225_s11 + $0x70] sm:$0xff] %v2460_v41   ;;  %v1656_v54 = vadd.f32 %v2888_v6, %v1655_v44  ;;  %v1916_v57 = vadd.f32 %v1915_v40, %v1789_v46  ;;  %v1794_v36 = vmul.f32 %v2892_v49, %v2892_v49 }
 0x12e   : > { %v604_v60 = vpop.f32.mrf.mxu0  ;;  %2752 = vst [vmem:[%s3225_s11 + $0x170] sm:$0xff] %v2620_v52   ;;  %v3353_v2 = vpop.f32.mrf.mxu1 }
 0x12f   : > { %v1917_v63 = vadd.f32 %v1916_v57, %v1790_v53  ;;  %v1657_v1 = vadd.f32 %v2889_v28, %v1656_v54  ;;  %v1792_v10 = vmul.f32 %v604_v60, %v604_v60 }
 0x130   : > { %v2893_v3 = vpop.f32.mrf.mxu0  ;;  %v3355_v18 = vpop.f32.mrf.mxu1 }
 0x131   : > { %v1658_v8 = vadd.f32 %v1657_v1, %v604_v60  ;;  %v1918_v12 = vadd.f32 %v1917_v63, %v1791_v61  ;;  %v2475_v15 = vpack.c.bf16 %v2893_v3, %v2892_v49  ;;  %v2635_v20 = vpack.c.bf16 %v3355_v18, %v3350_v58 }
 0x132   : > { %v607_v6 = vpop.f32.mrf.mxu0  ;;  %v3360_v30 = vpop.f32.mrf.mxu1  ;;  %v1795_v46 = vmul.f32 %v2893_v3, %v2893_v3 }
 0x133   : > { %v1919_v22 = vadd.f32 %v1918_v12, %v1792_v10  ;;  %2723 = vst [vmem:[%s3225_s11 + $0x88] sm:$0xff] %v2475_v15   ;;  %v2470_v23 = vpack.c.bf16 %v607_v6, %v604_v60  ;;  %v1659_v28 = vadd.f32 %v1658_v8, %v607_v6  ;;  %v1793_v29 = vmul.f32 %v607_v6, %v607_v6 }
 0x134   : > { %v2896_v31 = vpop.f32.mrf.mxu0  ;;  %2755 = vst [vmem:[%s3225_s11 + $0x188] sm:$0xff] %v2635_v20   ;;  %v2630_v33 = vpack.c.bf16 %v3360_v30, %v3353_v2  ;;  %v3366_v41 = vpop.f32.mrf.mxu1 }
 0x135   : > { %2722 = vst [vmem:[%s3225_s11 + $0x80] sm:$0xff] %v2470_v23   ;;  %v1660_v39 = vadd.f32 %v2892_v49, %v1659_v28  ;;  %v1920_v40 = vadd.f32 %v1919_v22, %v1793_v29  ;;  %v1798_v28 = vmul.f32 %v2896_v31, %v2896_v31 }
 0x136   : > { %v620_v44 = vpop.f32.mrf.mxu0  ;;  %2754 = vst [vmem:[%s3225_s11 + $0x180] sm:$0xff] %v2630_v33   ;;  %v3369_v54 = vpop.f32.mrf.mxu1 }
 0x137   : > { %v1921_v52 = vadd.f32 %v1920_v40, %v1794_v36  ;;  %v1661_v53 = vadd.f32 %v2893_v3, %v1660_v39  ;;  %v1796_v61 = vmul.f32 %v620_v44, %v620_v44 }
 0x138   : > { %v2897_v57 = vpop.f32.mrf.mxu0  ;;  %v3371_v8 = vpop.f32.mrf.mxu1 }
 0x139   : > { %v1662_v60 = vadd.f32 %v1661_v53, %v620_v44  ;;  %v1922_v63 = vadd.f32 %v1921_v52, %v1795_v46  ;;  %v2485_v1 = vpack.c.bf16 %v2897_v57, %v2896_v31  ;;  %v2645_v10 = vpack.c.bf16 %v3371_v8, %v3366_v41 }
 0x13a   : > { %v623_v49 = vpop.f32.mrf.mxu0  ;;  %v3376_v20 = vpop.f32.mrf.mxu1  ;;  %v1799_v40 = vmul.f32 %v2897_v57, %v2897_v57 }
 0x13b   : > { %v1923_v12 = vadd.f32 %v1922_v63, %v1796_v61  ;;  %2725 = vst [vmem:[%s3225_s11 + $0x98] sm:$0xff] %v2485_v1   ;;  %v2480_v15 = vpack.c.bf16 %v623_v49, %v620_v44  ;;  %v1663_v3 = vadd.f32 %v1662_v60, %v623_v49  ;;  %v1797_v6 = vmul.f32 %v623_v49, %v623_v49 }
 0x13c   : > { %v2900_v22 = vpop.f32.mrf.mxu0  ;;  %2757 = vst [vmem:[%s3225_s11 + $0x198] sm:$0xff] %v2645_v10   ;;  %v2640_v23 = vpack.c.bf16 %v3376_v20, %v3369_v54  ;;  %v3382_v36 = vpop.f32.mrf.mxu1 }
 0x13d   : > { %2724 = vst [vmem:[%s3225_s11 + $0x90] sm:$0xff] %v2480_v15   ;;  %v1664_v29 = vadd.f32 %v2896_v31, %v1663_v3  ;;  %v1924_v33 = vadd.f32 %v1923_v12, %v1797_v6  ;;  %3723 = vst [vmem:[#allocation2_spill] sm:$0xff] %v3382_v36 }
 0x13e   : > { %v636_v39 = vpop.f32.mrf.mxu0  ;;  %2756 = vst [vmem:[%s3225_s11 + $0x190] sm:$0xff] %v2640_v23   ;;  %v3385_v52 = vpop.f32.mrf.mxu1 }
 0x13f   : > { %v1925_v44 = vadd.f32 %v1924_v33, %v1798_v28  ;;  %v1665_v46 = vadd.f32 %v2897_v57, %v1664_v29  ;;  %3724 = vst [vmem:[#allocation3_spill] sm:$0xff] %v3385_v52  ;;  %v1800_v61 = vmul.f32 %v636_v39, %v636_v39  ;;  %v1802_v29 = vmul.f32 %v2900_v22, %v2900_v22 }
 0x140   : > { %v2901_v53 = vpop.f32.mrf.mxu0  ;;  %v3387_v49 = vpop.f32.mrf.mxu1 }
 0x141   : > { %v1666_v60 = vadd.f32 %v1665_v46, %v636_v39  ;;  %v1926_v63 = vadd.f32 %v1925_v44, %v1799_v40  ;;  %v2495_v1 = vpack.c.bf16 %v2901_v53, %v2900_v22  ;;  %3725 = vst [vmem:[#allocation4_spill] sm:$0xff] %v3387_v49  ;;  %v2655_v10 = vpack.c.bf16 %v3387_v49, %v3382_v36 }
 0x142   : > { %v639_v31 = vpop.f32.mrf.mxu0  ;;  %v3392_v6 = vpop.f32.mrf.mxu1 }
 0x143   : > { %v1927_v12 = vadd.f32 %v1926_v63, %v1800_v61  ;;  %2727 = vst [vmem:[%s3225_s11 + $0xa8] sm:$0xff] %v2495_v1   ;;  %v2490_v15 = vpack.c.bf16 %v639_v31, %v636_v39  ;;  %v1667_v57 = vadd.f32 %v1666_v60, %v639_v31  ;;  %v1801_v3 = vmul.f32 %v639_v31, %v639_v31 }
 0x144   : > { %3726 = vst [vmem:[#allocation5_spill] sm:$0xff] %v3392_v6  ;;  %v2904_v23 = vpop.f32.mrf.mxu0  ;;  %2759 = vst [vmem:[%s3225_s11 + $0x1a8] sm:$0xff] %v2655_v10   ;;  %v2650_v28 = vpack.c.bf16 %v3392_v6, %v3385_v52  ;;  %v3398_v44 = vpop.f32.mrf.mxu1  ;;  %v1803_v61 = vmul.f32 %v2901_v53, %v2901_v53 }
 0x145   : > { %2726 = vst [vmem:[%s3225_s11 + $0xa0] sm:$0xff] %v2490_v15   ;;  %v1668_v33 = vadd.f32 %v2900_v22, %v1667_v57  ;;  %v1928_v40 = vadd.f32 %v1927_v12, %v1801_v3  ;;  %3727 = vst [vmem:[#allocation6_spill] sm:$0xff] %v3398_v44 }
 0x146   : > { %v652_v46 = vpop.f32.mrf.mxu0  ;;  %2758 = vst [vmem:[%s3225_s11 + $0x1a0] sm:$0xff] %v2650_v28   ;;  %v3401_v63 = vpop.f32.mrf.mxu1 }
 0x147   : > { %v1929_v39 = vadd.f32 %v1928_v40, %v1802_v29  ;;  %v1669_v60 = vadd.f32 %v2901_v53, %v1668_v33  ;;  %3728 = vst [vmem:[#allocation7_spill] sm:$0xff] %v3401_v63  ;;  %v1804_v10 = vmul.f32 %v652_v46, %v652_v46 }
 0x148   : > { %v2905_v1 = vpop.f32.mrf.mxu0  ;;  %v3403_v15 = vpop.f32.mrf.mxu1 }
 0x149   : > { %v1670_v31 = vadd.f32 %v1669_v60, %v652_v46  ;;  %v1930_v49 = vadd.f32 %v1929_v39, %v1803_v61  ;;  %v2505_v36 = vpack.c.bf16 %v2905_v1, %v2904_v23  ;;  %3729 = vst [vmem:[#allocation8_spill] sm:$0xff] %v3403_v15  ;;  %v2665_v12 = vpack.c.bf16 %v3403_v15, %v3398_v44 }
 0x14a   : > { %v655_v22 = vpop.f32.mrf.mxu0  ;;  %v3408_v29 = vpop.f32.mrf.mxu1  ;;  %v1806_v61 = vmul.f32 %v2904_v23, %v2904_v23 }
 0x14b   : > { %v1931_v57 = vadd.f32 %v1930_v49, %v1804_v10  ;;  %2729 = vst [vmem:[%s3225_s11 + $0xb8] sm:$0xff] %v2505_v36   ;;  %v2500_v3 = vpack.c.bf16 %v655_v22, %v652_v46  ;;  %v1671_v53 = vadd.f32 %v1670_v31, %v655_v22  ;;  %v1805_v28 = vmul.f32 %v655_v22, %v655_v22 }
 0x14c   : > { %3730 = vst [vmem:[#allocation9_spill] sm:$0xff] %v3408_v29  ;;  %v2908_v33 = vpop.f32.mrf.mxu0  ;;  %2761 = vst [vmem:[%s3225_s11 + $0x1b8] sm:$0xff] %v2665_v12   ;;  %v2660_v40 = vpack.c.bf16 %v3408_v29, %v3401_v63  ;;  %v3414_v6 = vpop.f32.mrf.mxu1  ;;  %v1807_v36 = vmul.f32 %v2905_v1, %v2905_v1 }
 0x14d   : > { %2728 = vst [vmem:[%s3225_s11 + $0xb0] sm:$0xff] %v2500_v3   ;;  %v1672_v39 = vadd.f32 %v2904_v23, %v1671_v53  ;;  %v1932_v60 = vadd.f32 %v1931_v57, %v1805_v28  ;;  %3731 = vst [vmem:[#allocation10_spill] sm:$0xff] %v3414_v6 }
 0x14e   : > { %v668_v15 = vpop.f32.mrf.mxu0  ;;  %2760 = vst [vmem:[%s3225_s11 + $0x1b0] sm:$0xff] %v2660_v40   ;;  %v3417_v31 = vpop.f32.mrf.mxu1 }
 0x14f   : > { %v1933_v49 = vadd.f32 %v1932_v60, %v1806_v61  ;;  %v1673_v46 = vadd.f32 %v2905_v1, %v1672_v39  ;;  %3732 = vst [vmem:[#allocation11_spill] sm:$0xff] %v3417_v31  ;;  %v1808_v12 = vmul.f32 %v668_v15, %v668_v15 }
 0x150   : > { %v2909_v10 = vpop.f32.mrf.mxu0  ;;  %v3419_v3 = vpop.f32.mrf.mxu1 }
 0x151   : > { %v1674_v22 = vadd.f32 %v1673_v46, %v668_v15  ;;  %v1934_v44 = vadd.f32 %v1933_v49, %v1807_v36  ;;  %v2515_v29 = vpack.c.bf16 %v2909_v10, %v2908_v33  ;;  %3733 = vst [vmem:[#allocation12_spill] sm:$0xff] %v3419_v3  ;;  %v2675_v57 = vpack.c.bf16 %v3419_v3, %v3414_v6 }
 0x152   : > { %v671_v23 = vpop.f32.mrf.mxu0  ;;  %v3424_v61 = vpop.f32.mrf.mxu1  ;;  %v1810_v36 = vmul.f32 %v2908_v33, %v2908_v33 }
 0x153   : > { %v1935_v53 = vadd.f32 %v1934_v44, %v1808_v12  ;;  %2731 = vst [vmem:[%s3225_s11 + $0xc8] sm:$0xff] %v2515_v29   ;;  %v2510_v28 = vpack.c.bf16 %v671_v23, %v668_v15  ;;  %v1675_v1 = vadd.f32 %v1674_v22, %v671_v23  ;;  %v1809_v40 = vmul.f32 %v671_v23, %v671_v23 }
 0x154   : > { %3734 = vst [vmem:[#allocation13_spill] sm:$0xff] %v3424_v61  ;;  %v2912_v39 = vpop.f32.mrf.mxu0  ;;  %2763 = vst [vmem:[%s3225_s11 + $0x1c8] sm:$0xff] %v2675_v57   ;;  %v2670_v60 = vpack.c.bf16 %v3424_v61, %v3417_v31  ;;  %v3430_v63 = vpop.f32.mrf.mxu1  ;;  %v1811_v44 = vmul.f32 %v2909_v10, %v2909_v10 }
 0x155   : > { %2730 = vst [vmem:[%s3225_s11 + $0xc0] sm:$0xff] %v2510_v28   ;;  %v1676_v49 = vadd.f32 %v2908_v33, %v1675_v1  ;;  %v1936_v46 = vadd.f32 %v1935_v53, %v1809_v40  ;;  %3735 = vst [vmem:[#allocation14_spill] sm:$0xff] %v3430_v63 }
 0x156   : > { %v684_v3 = vpop.f32.mrf.mxu0  ;;  %2762 = vst [vmem:[%s3225_s11 + $0x1c0] sm:$0xff] %v2670_v60   ;;  %v3433_v22 = vpop.f32.mrf.mxu1 }
 0x157   : > { %v1937_v15 = vadd.f32 %v1936_v46, %v1810_v36  ;;  %v1677_v29 = vadd.f32 %v2909_v10, %v1676_v49  ;;  %3736 = vst [vmem:[#allocation15_spill] sm:$0xff] %v3433_v22  ;;  %v1812_v57 = vmul.f32 %v684_v3, %v684_v3 }
 0x158   : > { %v2913_v12 = vpop.f32.mrf.mxu0  ;;  %v3435_v28 = vpop.f32.mrf.mxu1 }
 0x159   : > { %v1678_v23 = vadd.f32 %v1677_v29, %v684_v3  ;;  %v1938_v6 = vadd.f32 %v1937_v15, %v1811_v44  ;;  %v2525_v61 = vpack.c.bf16 %v2913_v12, %v2912_v39  ;;  %3737 = vst [vmem:[#allocation16_spill] sm:$0xff] %v3435_v28  ;;  %v2685_v53 = vpack.c.bf16 %v3435_v28, %v3430_v63 }
 0x15a   : > { %v687_v33 = vpop.f32.mrf.mxu0  ;;  %v3440_v36 = vpop.f32.mrf.mxu1  ;;  %v1814_v44 = vmul.f32 %v2912_v39, %v2912_v39 }
 0x15b   : > { %v1939_v1 = vadd.f32 %v1938_v6, %v1812_v57  ;;  %2733 = vst [vmem:[%s3225_s11 + $0xd8] sm:$0xff] %v2525_v61   ;;  %v2520_v40 = vpack.c.bf16 %v687_v33, %v684_v3  ;;  %v1679_v10 = vadd.f32 %v1678_v23, %v687_v33  ;;  %v1813_v60 = vmul.f32 %v687_v33, %v687_v33 }
 0x15c   : > { %3738 = vst [vmem:[#allocation17_spill] sm:$0xff] %v3440_v36  ;;  %v2916_v49 = vpop.f32.mrf.mxu0  ;;  %2765 = vst [vmem:[%s3225_s11 + $0x1d8] sm:$0xff] %v2685_v53   ;;  %v2680_v46 = vpack.c.bf16 %v3440_v36, %v3433_v22  ;;  %v3446_v31 = vpop.f32.mrf.mxu1  ;;  %v1815_v6 = vmul.f32 %v2913_v12, %v2913_v12 }
 0x15d   : > { %2732 = vst [vmem:[%s3225_s11 + $0xd0] sm:$0xff] %v2520_v40   ;;  %v1680_v15 = vadd.f32 %v2912_v39, %v1679_v10  ;;  %v1940_v29 = vadd.f32 %v1939_v1, %v1813_v60  ;;  %3739 = vst [vmem:[#allocation18_spill] sm:$0xff] %v3446_v31 }
 0x15e   : > { %v700_v28 = vpop.f32.mrf.mxu0  ;;  %2764 = vst [vmem:[%s3225_s11 + $0x1d0] sm:$0xff] %v2680_v46   ;;  %v3449_v23 = vpop.f32.mrf.mxu1 }
 0x15f   : > { %v1941_v3 = vadd.f32 %v1940_v29, %v1814_v44  ;;  %v1681_v61 = vadd.f32 %v2913_v12, %v1680_v15  ;;  %3740 = vst [vmem:[#allocation19_spill] sm:$0xff] %v3449_v23  ;;  %v1816_v53 = vmul.f32 %v700_v28, %v700_v28 }
 0x160   : > { %v2917_v57 = vpop.f32.mrf.mxu0  ;;  %v3451_v40 = vpop.f32.mrf.mxu1 }
 0x161   : > { %v1682_v33 = vadd.f32 %v1681_v61, %v700_v28  ;;  %v1942_v63 = vadd.f32 %v1941_v3, %v1815_v6  ;;  %v2535_v36 = vpack.c.bf16 %v2917_v57, %v2916_v49  ;;  %3741 = vst [vmem:[#allocation20_spill] sm:$0xff] %v3451_v40  ;;  %v2695_v1 = vpack.c.bf16 %v3451_v40, %v3446_v31 }
 0x162   : > { %v703_v39 = vpop.f32.mrf.mxu0  ;;  %v3456_v44 = vpop.f32.mrf.mxu1  ;;  %v1818_v6 = vmul.f32 %v2916_v49, %v2916_v49 }
 0x163   : > { %v1943_v10 = vadd.f32 %v1942_v63, %v1816_v53  ;;  %2735 = vst [vmem:[%s3225_s11 + $0xe8] sm:$0xff] %v2535_v36   ;;  %v2530_v60 = vpack.c.bf16 %v703_v39, %v700_v28  ;;  %v1683_v12 = vadd.f32 %v1682_v33, %v703_v39  ;;  %v1817_v46 = vmul.f32 %v703_v39, %v703_v39 }
 0x164   : > { %3742 = vst [vmem:[#allocation21_spill] sm:$0xff] %v3456_v44  ;;  %v2920_v15 = vpop.f32.mrf.mxu0  ;;  %2767 = vst [vmem:[%s3225_s11 + $0x1e8] sm:$0xff] %v2695_v1   ;;  %v2690_v29 = vpack.c.bf16 %v3456_v44, %v3449_v23  ;;  %v3462_v22 = vpop.f32.mrf.mxu1  ;;  %v1819_v63 = vmul.f32 %v2917_v57, %v2917_v57 }
 0x165   : > { %2734 = vst [vmem:[%s3225_s11 + $0xe0] sm:$0xff] %v2530_v60   ;;  %v1684_v3 = vadd.f32 %v2916_v49, %v1683_v12  ;;  %v1944_v61 = vadd.f32 %v1943_v10, %v1817_v46 }
 0x166   : > { %v716_v40 = vpop.f32.mrf.mxu0  ;;  %2766 = vst [vmem:[%s3225_s11 + $0x1e0] sm:$0xff] %v2690_v29   ;;  %v3465_v33 = vpop.f32.mrf.mxu1 }
 0x167   : > { %v1945_v28 = vadd.f32 %v1944_v61, %v1818_v6  ;;  %v1685_v36 = vadd.f32 %v2917_v57, %v1684_v3  ;;  %v1820_v1 = vmul.f32 %v716_v40, %v716_v40  ;;  %v1822_v61 = vmul.f32 %v2920_v15, %v2920_v15 }
 0x168   : > { %v2921_v53 = vpop.f32.mrf.mxu0  ;;  %v3467_v49 = vpop.f32.mrf.mxu1 }
 0x169   : > { %v1686_v39 = vadd.f32 %v1685_v36, %v716_v40  ;;  %v1946_v31 = vadd.f32 %v1945_v28, %v1819_v63  ;;  %v2545_v44 = vpack.c.bf16 %v2921_v53, %v2920_v15  ;;  %v2705_v60 = vpack.c.bf16 %v3467_v49, %v3462_v22 }
 0x16a   : > { %v719_v10 = vpop.f32.mrf.mxu0  ;;  %v3472_v6 = vpop.f32.mrf.mxu1  ;;  %v1823_v36 = vmul.f32 %v2921_v53, %v2921_v53 }
 0x16b   : > { %v1947_v12 = vadd.f32 %v1946_v31, %v1820_v1  ;;  %2737 = vst [vmem:[%s3225_s11 + $0xf8] sm:$0xff] %v2545_v44   ;;  %v2540_v46 = vpack.c.bf16 %v719_v10, %v716_v40  ;;  %v1687_v57 = vadd.f32 %v1686_v39, %v719_v10  ;;  %v1821_v29 = vmul.f32 %v719_v10, %v719_v10 }
 0x16c   : > { %2769 = vst [vmem:[%s3225_s11 + $0x1f8] sm:$0xff] %v2705_v60   ;;  %v2700_v3 = vpack.c.bf16 %v3472_v6, %v3465_v33  ;;  %v1824_v31 = vmul.f32 %v3220_v11, %v3220_v11  ;;  %v1825_v10 = vmul.f32 %v3232_v21, %v3232_v21 }
 0x16d   : > { %2736 = vst [vmem:[%s3225_s11 + $0xf0] sm:$0xff] %v2540_v46   ;;  %v1688_v63 = vadd.f32 %v2920_v15, %v1687_v57  ;;  %v1948_v28 = vadd.f32 %v1947_v12, %v1821_v29  ;;  %v1826_v15 = vmul.f32 %v3218_v9, %v3218_v9 }
 0x16e   : > { %2768 = vst [vmem:[%s3225_s11 + $0x1f0] sm:$0xff] %v2700_v3   ;;  %v1829_v3 = vmul.f32 %v3248_v45, %v3248_v45 }
 0x16f   : > { %v1689_v23 = vadd.f32 %v2921_v53, %v1688_v63  ;;  %v1949_v52 = vadd.f32 %v1948_v28, %v1822_v61  ;;  %v1827_v53 = vmul.f32 %v3227_v14, %v3227_v14 }
 0x171   : > { %v1690_v40 = vadd.f32 %v1689_v23, %v3220_v11  ;;  %v1950_v44 = vadd.f32 %v1949_v52, %v1823_v36  ;;  %v1828_v52 = vmul.f32 %v3241_v32, %v3241_v32 }
 0x173   : > { %v1951_v39 = vadd.f32 %v1950_v44, %v1824_v31  ;;  %v1691_v1 = vadd.f32 %v1690_v40, %v3232_v21  ;;  %v1832_v31 = vmul.f32 %v3257_v56, %v3257_v56 }
 0x175   : > { %v1692_v60 = vadd.f32 %v3218_v9, %v1691_v1  ;;  %v1952_v12 = vadd.f32 %v1951_v39, %v1825_v10  ;;  %v1830_v9 = vmul.f32 %v3238_v27, %v3238_v27  ;;  %v1833_v39 = vmul.f32 %v3264_v5, %v3264_v5 }
 0x177   : > { %v1953_v46 = vadd.f32 %v1952_v12, %v1826_v15  ;;  %v1693_v57 = vadd.f32 %v3227_v14, %v1692_v60  ;;  %v1831_v14 = vmul.f32 %v3243_v38, %v3243_v38  ;;  %v1836_v12 = vmul.f32 %v3273_v19, %v3273_v19 }
 0x179   : > { %v1694_v11 = vadd.f32 %v1693_v57, %v3241_v32  ;;  %v1954_v23 = vadd.f32 %v1953_v46, %v1827_v53  ;;  %v1837_v57 = vmul.f32 %v3280_v35, %v3280_v35 }
 0x17b   : > { %v1955_v29 = vadd.f32 %v1954_v23, %v1828_v52  ;;  %v1695_v21 = vadd.f32 %v1694_v11, %v3248_v45 }
 0x17d   : > { %v1696_v61 = vadd.f32 %v3238_v27, %v1695_v21  ;;  %v1956_v63 = vadd.f32 %v1955_v29, %v1829_v3  ;;  %v1834_v27 = vmul.f32 %v3254_v51, %v3254_v51  ;;  %v1840_v21 = vmul.f32 %v3289_v48, %v3289_v48 }
 0x17f   : > { %v1957_v28 = vadd.f32 %v1956_v63, %v1830_v9  ;;  %v1697_v36 = vadd.f32 %v3243_v38, %v1696_v61  ;;  %v1835_v38 = vmul.f32 %v3259_v62, %v3259_v62  ;;  %v1841_v61 = vmul.f32 %v3296_v0, %v3296_v0 }
 0x181   : > { %v1698_v32 = vadd.f32 %v1697_v36, %v3257_v56  ;;  %v1958_v40 = vadd.f32 %v1957_v28, %v1831_v14 }
 0x183   : > { %v1959_v44 = vadd.f32 %v1958_v40, %v1832_v31  ;;  %v1699_v45 = vadd.f32 %v1698_v32, %v3264_v5  ;;  %v1844_v32 = vmul.f32 %v3305_v16, %v3305_v16 }
 0x185   : > { %v1700_v1 = vadd.f32 %v3254_v51, %v1699_v45  ;;  %v1960_v10 = vadd.f32 %v1959_v44, %v1833_v39  ;;  %v1838_v51 = vmul.f32 %v3270_v13, %v3270_v13  ;;  %v1845_v44 = vmul.f32 %v3312_v34, %v3312_v34 }
 0x187   : > { %v1961_v15 = vadd.f32 %v1960_v10, %v1834_v27  ;;  %v1701_v60 = vadd.f32 %v3259_v62, %v1700_v1  ;;  %v1839_v62 = vmul.f32 %v3275_v26, %v3275_v26  ;;  %v1848_v10 = vmul.f32 %v3321_v50, %v3321_v50 }
 0x189   : > { %v1702_v56 = vadd.f32 %v1701_v60, %v3273_v19  ;;  %v1962_v53 = vadd.f32 %v1961_v15, %v1835_v38  ;;  %v1849_v60 = vmul.f32 %v3328_v4, %v3328_v4 }
 0x18b   : > { %v1963_v46 = vadd.f32 %v1962_v53, %v1836_v12  ;;  %v1703_v5 = vadd.f32 %v1702_v56, %v3280_v35 }
 0x18d   : > { %v1704_v11 = vadd.f32 %v3270_v13, %v1703_v5  ;;  %v1964_v52 = vadd.f32 %v1963_v46, %v1837_v57  ;;  %v1842_v13 = vmul.f32 %v3286_v42, %v3286_v42  ;;  %v1852_v5 = vmul.f32 %v3337_v25, %v3337_v25 }
 0x18f   : > { %v1965_v23 = vadd.f32 %v1964_v52, %v1838_v51  ;;  %v1705_v29 = vadd.f32 %v3275_v26, %v1704_v11  ;;  %v1843_v26 = vmul.f32 %v3291_v55, %v3291_v55  ;;  %v1853_v11 = vmul.f32 %v3344_v47, %v3344_v47 }
 0x191   : > { %v1706_v19 = vadd.f32 %v1705_v29, %v3289_v48  ;;  %v1966_v3 = vadd.f32 %v1965_v23, %v1839_v62 }
 0x193   : > { %v1967_v9 = vadd.f32 %v1966_v3, %v1840_v21  ;;  %v1707_v35 = vadd.f32 %v1706_v19, %v3296_v0  ;;  %v1856_v19 = vmul.f32 %v3353_v2, %v3353_v2 }
 0x195   : > { %v1708_v63 = vadd.f32 %v3286_v42, %v1707_v35  ;;  %v1968_v14 = vadd.f32 %v1967_v9, %v1841_v61  ;;  %v1846_v42 = vmul.f32 %v3302_v7, %v3302_v7  ;;  %v1857_v9 = vmul.f32 %v3360_v30, %v3360_v30 }
 0x197   : > { %v1969_v28 = vadd.f32 %v1968_v14, %v1842_v13  ;;  %v1709_v36 = vadd.f32 %v3291_v55, %v1708_v63  ;;  %v1847_v55 = vmul.f32 %v3307_v24, %v3307_v24  ;;  %v1860_v14 = vmul.f32 %v3369_v54, %v3369_v54 }
 0x199   : > { %v1710_v48 = vadd.f32 %v1709_v36, %v3305_v16  ;;  %v1970_v31 = vadd.f32 %v1969_v28, %v1843_v26  ;;  %v1861_v36 = vmul.f32 %v3376_v20, %v3376_v20 }
 0x19b   : > { %v1971_v40 = vadd.f32 %v1970_v31, %v1844_v32  ;;  %v1711_v0 = vadd.f32 %v1710_v48, %v3312_v34 }
 0x19d   : > { %v1712_v45 = vadd.f32 %v3302_v7, %v1711_v0  ;;  %v1972_v39 = vadd.f32 %v1971_v40, %v1845_v44  ;;  %v1850_v7 = vmul.f32 %v3318_v43, %v3318_v43 }
 0x19f   : > { %v1973_v27 = vadd.f32 %v1972_v39, %v1846_v42  ;;  %v1713_v1 = vadd.f32 %v3307_v24, %v1712_v45  ;;  %v1851_v24 = vmul.f32 %v3323_v59, %v3323_v59 }
 0x1a1   : > { %v1714_v16 = vadd.f32 %v1713_v1, %v3321_v50  ;;  %v1974_v38 = vadd.f32 %v1973_v27, %v1847_v55 }
 0x1a3   : > { %v1975_v15 = vadd.f32 %v1974_v38, %v1848_v10  ;;  %v1715_v34 = vadd.f32 %v1714_v16, %v3328_v4  ;;  %v3746_v10 = vld [vmem:[#allocation4_spill] sm:$0xff] }
 0x1a5   : > { %v1716_v56 = vadd.f32 %v3318_v43, %v1715_v34  ;;  %v1976_v12 = vadd.f32 %v1975_v15, %v1849_v60  ;;  %v1854_v43 = vmul.f32 %v3334_v17, %v3334_v17  ;;  %v3747_v34 = vld [vmem:[#allocation7_spill] sm:$0xff] }
 0x1a7   : > { %v1977_v53 = vadd.f32 %v1976_v12, %v1850_v7  ;;  %v1717_v46 = vadd.f32 %v3323_v59, %v1716_v56  ;;  %v1855_v59 = vmul.f32 %v3339_v37, %v3339_v37  ;;  %v1868_v7 = vmul.f32 %v3747_v34, %v3747_v34 }
 0x1a9   : > { %v1718_v50 = vadd.f32 %v1717_v46, %v3337_v25  ;;  %v1978_v57 = vadd.f32 %v1977_v53, %v1851_v24  ;;  %v3748_v24 = vld [vmem:[#allocation9_spill] sm:$0xff] }
 0x1aa   : > { %v1869_v46 = vmul.f32 %v3748_v24, %v3748_v24 }
 0x1ab   : > { %v1979_v51 = vadd.f32 %v1978_v57, %v1852_v5  ;;  %v1719_v4 = vadd.f32 %v1718_v50, %v3344_v47  ;;  %v3749_v50 = vld [vmem:[#allocation6_spill] sm:$0xff] }
 0x1ac   : > { %v1870_v5 = vmul.f32 %v3749_v50, %v3749_v50 }
 0x1ad   : > { %v1720_v52 = vadd.f32 %v3334_v17, %v1719_v4  ;;  %v1980_v62 = vadd.f32 %v1979_v51, %v1853_v11  ;;  %v1858_v17 = vmul.f32 %v3350_v58, %v3350_v58  ;;  %v3750_v4 = vld [vmem:[#allocation8_spill] sm:$0xff] }
 0x1ae   : > { %v1871_v11 = vmul.f32 %v3750_v4, %v3750_v4 }
 0x1af   : > { %v1981_v23 = vadd.f32 %v1980_v62, %v1854_v43  ;;  %v1721_v29 = vadd.f32 %v3339_v37, %v1720_v52  ;;  %v1859_v37 = vmul.f32 %v3355_v18, %v3355_v18  ;;  %v3751_v62 = vld [vmem:[#allocation11_spill] sm:$0xff] }
 0x1b1   : > { %v1722_v25 = vadd.f32 %v1721_v29, %v3353_v2  ;;  %v1982_v21 = vadd.f32 %v1981_v23, %v1855_v59  ;;  %v1872_v23 = vmul.f32 %v3751_v62, %v3751_v62 }
 0x1b3   : > { %v1983_v3 = vadd.f32 %v1982_v21, %v1856_v19  ;;  %v1723_v47 = vadd.f32 %v1722_v25, %v3360_v30  ;;  %v3752_v19 = vld [vmem:[#allocation13_spill] sm:$0xff] }
 0x1b5   : > { %v1724_v35 = vadd.f32 %v3350_v58, %v1723_v47  ;;  %v1984_v61 = vadd.f32 %v1983_v3, %v1857_v9  ;;  %v1862_v58 = vmul.f32 %v3366_v41, %v3366_v41  ;;  %v1873_v3 = vmul.f32 %v3752_v19, %v3752_v19  ;;  %v3753_v47 = vld [vmem:[#allocation10_spill] sm:$0xff] }
 0x1b6   : > { %v1874_v9 = vmul.f32 %v3753_v47, %v3753_v47 }
 0x1b7   : > { %v1985_v13 = vadd.f32 %v1984_v61, %v1858_v17  ;;  %v1725_v63 = vadd.f32 %v3355_v18, %v1724_v35  ;;  %v1863_v18 = vmul.f32 %v3371_v8, %v3371_v8  ;;  %v3754_v61 = vld [vmem:[#allocation12_spill] sm:$0xff] }
 0x1b9   : > { %v1726_v2 = vadd.f32 %v1725_v63, %v3369_v54  ;;  %v1986_v26 = vadd.f32 %v1985_v13, %v1859_v37  ;;  %v3743_v54 = vld [vmem:[#allocation3_spill] sm:$0xff]  ;;  %v1875_v37 = vmul.f32 %v3754_v61, %v3754_v61 }
 0x1ba   : > { %v1864_v44 = vmul.f32 %v3743_v54, %v3743_v54 }
 0x1bb   : > { %v1987_v28 = vadd.f32 %v1986_v26, %v1860_v14  ;;  %v1727_v30 = vadd.f32 %v1726_v2, %v3376_v20  ;;  %v3744_v20 = vld [vmem:[#allocation5_spill] sm:$0xff]  ;;  %v3755_v2 = vld [vmem:[#allocation15_spill] sm:$0xff] }
 0x1bc   : > { %v1865_v55 = vmul.f32 %v3744_v20, %v3744_v20  ;;  %v1876_v26 = vmul.f32 %v3755_v2, %v3755_v2 }
 0x1bd   : > { %v1728_v48 = vadd.f32 %v3366_v41, %v1727_v30  ;;  %v1988_v32 = vadd.f32 %v1987_v28, %v1861_v36  ;;  %v3745_v41 = vld [vmem:[#allocation2_spill] sm:$0xff]  ;;  %v3756_v36 = vld [vmem:[#allocation17_spill] sm:$0xff] }
 0x1be   : > { %v1866_v27 = vmul.f32 %v3745_v41, %v3745_v41 }
 0x1bf   : > { %v1989_v31 = vadd.f32 %v1988_v32, %v1862_v58  ;;  %v1729_v40 = vadd.f32 %v3371_v8, %v1728_v48  ;;  %v1867_v8 = vmul.f32 %v3746_v10, %v3746_v10  ;;  %v1877_v48 = vmul.f32 %v3756_v36, %v3756_v36  ;;  %v3757_v32 = vld [vmem:[#allocation14_spill] sm:$0xff] }
 0x1c1   : > { %v1730_v0 = vadd.f32 %v1729_v40, %v3743_v54  ;;  %v1990_v42 = vadd.f32 %v1989_v31, %v1863_v18  ;;  %v1878_v18 = vmul.f32 %v3757_v32, %v3757_v32  ;;  %v3758_v54 = vld [vmem:[#allocation16_spill] sm:$0xff] }
 0x1c3   : > { %v1991_v45 = vadd.f32 %v1990_v42, %v1864_v44  ;;  %v1731_v39 = vadd.f32 %v1730_v0, %v3744_v20  ;;  %v1879_v0 = vmul.f32 %v3758_v54, %v3758_v54 }
 0x1c5   : > { %v1732_v1 = vadd.f32 %v3745_v41, %v1731_v39  ;;  %v1992_v16 = vadd.f32 %v1991_v45, %v1865_v55  ;;  %v3759_v45 = vld [vmem:[#allocation19_spill] sm:$0xff] }
 0x1c6   : > { %v1880_v39 = vmul.f32 %v3759_v45, %v3759_v45 }
 0x1c7   : > { %v1993_v38 = vadd.f32 %v1992_v16, %v1866_v27  ;;  %v1733_v15 = vadd.f32 %v3746_v10, %v1732_v1  ;;  %v3760_v27 = vld [vmem:[#allocation21_spill] sm:$0xff]  ;;  %v3761_v10 = vld [vmem:[#allocation18_spill] sm:$0xff] }
 0x1c8   : > { %v1881_v16 = vmul.f32 %v3760_v27, %v3760_v27 }
 0x1c9   : > { %v1734_v60 = vadd.f32 %v1733_v15, %v3747_v34  ;;  %v1994_v56 = vadd.f32 %v1993_v38, %v1867_v8  ;;  %v1882_v8 = vmul.f32 %v3761_v10, %v3761_v10  ;;  %v3762_v34 = vld [vmem:[#allocation20_spill] sm:$0xff] }
 0x1cb   : > { %v1995_v12 = vadd.f32 %v1994_v56, %v1868_v7  ;;  %v1735_v53 = vadd.f32 %v1734_v60, %v3748_v24  ;;  %v1883_v60 = vmul.f32 %v3762_v34, %v3762_v34  ;;  %v1884_v24 = vmul.f32 %v3465_v33, %v3465_v33 }
 0x1cd   : > { %v1736_v57 = vadd.f32 %v3749_v50, %v1735_v53  ;;  %v1996_v51 = vadd.f32 %v1995_v12, %v1869_v46 }
 0x1cf   : > { %v1997_v43 = vadd.f32 %v1996_v51, %v1870_v5  ;;  %v1737_v52 = vadd.f32 %v3750_v4, %v1736_v57  ;;  %v1885_v5 = vmul.f32 %v3472_v6, %v3472_v6  ;;  %v1886_v57 = vmul.f32 %v3462_v22, %v3462_v22 }
 0x1d1   : > { %v1738_v59 = vadd.f32 %v1737_v52, %v3751_v62  ;;  %v1998_v29 = vadd.f32 %v1997_v43, %v1871_v11  ;;  %v1887_v11 = vmul.f32 %v3467_v49, %v3467_v49 }
 0x1d3   : > { %v1999_v25 = vadd.f32 %v1998_v29, %v1872_v23  ;;  %v1739_v21 = vadd.f32 %v1738_v59, %v3752_v19 }
 0x1d5   : > { %v1740_v17 = vadd.f32 %v3753_v47, %v1739_v21  ;;  %v2000_v35 = vadd.f32 %v1999_v25, %v1873_v3 }
 0x1d7   : > { %v2001_v13 = vadd.f32 %v2000_v35, %v1874_v9  ;;  %v1741_v63 = vadd.f32 %v3754_v61, %v1740_v17 }
 0x1d9   : > { %v1742_v14 = vadd.f32 %v1741_v63, %v3755_v2  ;;  %v2002_v28 = vadd.f32 %v2001_v13, %v1875_v37 }
 0x1db   : > { %v2003_v30 = vadd.f32 %v2002_v28, %v1876_v26  ;;  %v1743_v58 = vadd.f32 %v1742_v14, %v3756_v36 }
 0x1dd   : > { %v1744_v31 = vadd.f32 %v3757_v32, %v1743_v58  ;;  %v2004_v40 = vadd.f32 %v2003_v30, %v1877_v48 }
 0x1df   : > { %v2005_v44 = vadd.f32 %v2004_v40, %v1878_v18  ;;  %v1745_v42 = vadd.f32 %v3758_v54, %v1744_v31 }
 0x1e1   : > { %v1746_v20 = vadd.f32 %v1745_v42, %v3759_v45  ;;  %v2006_v55 = vadd.f32 %v2005_v44, %v1879_v0 }
 0x1e3   : > { %v2007_v41 = vadd.f32 %v2006_v55, %v1880_v39  ;;  %v1747_v1 = vadd.f32 %v1746_v20, %v3760_v27 }
 0x1e5   : > { %v1748_v38 = vadd.f32 %v3761_v10, %v1747_v1  ;;  %v2008_v15 = vadd.f32 %v2007_v41, %v1881_v16 }
 0x1e7   : > { %v2009_v7 = vadd.f32 %v2008_v15, %v1882_v8  ;;  %v1749_v56 = vadd.f32 %v3762_v34, %v1748_v38 }
 0x1e9   : > { %v1750_v12 = vadd.f32 %v1749_v56, %v3465_v33  ;;  %v2010_v53 = vadd.f32 %v2009_v7, %v1883_v60 }
 0x1eb   : > { %v2011_v46 = vadd.f32 %v2010_v53, %v1884_v24  ;;  %v1751_v50 = vadd.f32 %v1750_v12, %v3472_v6 }
 0x1ed   : > { %v1752_v51 = vadd.f32 %v3462_v22, %v1751_v50  ;;  %v2012_v4 = vadd.f32 %v2011_v46, %v1885_v5 }
 0x1ef   : > { %v1753_v43 = vadd.f32 %v3467_v49, %v1752_v51  ;;  %v2013_v33 = vadd.f32 %v2012_v4, %v1886_v57 }
 0x1f1   : > { %v1754_v52 = vrot.slane %v1753_v43, 4  ;;  %v2014_v62 = vadd.f32 %v2013_v33, %v1887_v11 }
 0x1f3   : > { %v1755_v59 = vadd.f32 %v1754_v52, %v1753_v43  ;;  %v2015_v23 = vrot.slane %v2014_v62, 4 }
 0x1f5   : > { %v1756_v29 = vrot.slane %v1755_v59, 2  ;;  %v2016_v25 = vadd.f32 %v2015_v23, %v2014_v62 }
 0x1f7   : > { %v1757_v6 = vadd.f32 %v1756_v29, %v1755_v59  ;;  %v2017_v19 = vrot.slane %v2016_v25, 2 }
 0x1f9   : > { %v1758_v21 = vrot.slane %v1757_v6, 1  ;;  %v2018_v3 = vadd.f32 %v2017_v19, %v2016_v25 }
 0x1fb   : > { %v2019_v22 = vrot.slane %v2018_v3, 1  ;;  %v1759_v49 = vadd.f32 %v1758_v21, %v1757_v6 }
 0x1fd   : > { %v2020_v47 = vadd.f32 %v2019_v22, %v2018_v3 }
 0x1ff   : > { %v2022_v9 = vsel %vm2021_vm0, %v1759_v49, %v2020_v47 }
 0x200   : > { %2023 = vst [vmem:[%s184_s17] sm:$0x3] %v2022_v9 }
 0x201 PF: > { %s14_s12 = sadd.s32 1, %s3024_s12  }
 0x202   : > { %p11_p5 = scmp.ge.s32.totalorder %s14_s12, 4  }
 0x204   :  { %13 = sbr.rel (!%p11_p5) target bundleno = 1 (0x1), region = 70 }

// kernel: bottleneck_forward.5
= control target key start
LH: loop header
LB: loop body
LE: loop exit
PB: predicated region body
PF: predicated region fallthrough
CT: control target
= control target key end

     0   :  { %s2952_s18 = smov 0   ;;  %s3766_s0 = inlined_call_operand.vmem [shape: bf16[32,9,9,128], index: 0, kind: input, shape index: {}]   ;;  %s3767_s1 = inlined_call_operand.vmem [shape: f32[1,128], index: 1, kind: input, shape index: {}]   ;;  %s3768_s2 = inlined_call_operand.vmem [shape: f32[1,128], index: 2, kind: input, shape index: {}]   ;;  %s3769_s3 = inlined_call_operand.vmem [shape: bf16[9,128,128], index: 3, kind: input, shape index: {}]   ;;  %s3770_s4 = inlined_call_operand.vmem [shape: bf16[8,64,128], index: 4, kind: output, shape index: {0}]   ;;  %s3771_s5 = inlined_call_operand.vmem [shape: f32[8,2,128], index: 5, kind: output, shape index: {1}]  }
   0x1 LB: > { %s2958_s19 = sadd.s32 4294967295, %s2918_s18   ;;  %p2132_p0 = scmp.ge.s32.totalorder %s2918_s18, 1  ;;  %s2918_s18 = sphi %s2952_s18, %s16_s18  }
   0x2   : > { %p192_p1 = scmp.lt.s32.totalorder %s2918_s18, 9 }
   0x4   : > { %p193_p2 = pnand %p2132_p0, %p192_p1 }
   0x6   : > { %196 = sbr.rel (%p193_p2) target bundleno = 403 (0x193), region = 36 }
   0xb   : > { %v2838_v0 = vld [vmem:[%s3769_s3 + $0x78] sm:$0xff]   ;;  %s2133_s22 = sshll.u32 %s2958_s19, 2  ;;  %v2840_v2 = vld [vmem:[%s3769_s3 + $0x70] sm:$0xff]   ;;  %v346_v4 = vlaneseq  ;;  %v2842_v5 = vld [vmem:[%s3769_s3 + $0x68] sm:$0xff]   ;;  %vm2920_vm6 = vmmov 1   ;;  %v2921_v52 = vmov 0.0  }
   0xc   : > { %v2839_v1 = vld [vmem:[%s3769_s3 + $0x38] sm:$0xff]   ;;  %2595 = vmatprep.subr.bf16.mxu0 %v2838_v0  ;;  %p226_p3 = scmp.lt.s32.totalorder %s2133_s22, 31  ;;  %v2841_v3 = vld [vmem:[%s3769_s3 + $0x30] sm:$0xff]   ;;  %v2843_v6 = vld [vmem:[%s3769_s3 + $0x28] sm:$0xff]   ;;  %v3089_v61 = vrot.slane %v2921_v52, 1  ;;  %vm884_vm13 = vcmask 1046528  }
   0xd   : > { %2619 = vmatprep.subr.bf16.mxu1 %v2839_v1  ;;  %2596 = vmatpush3.bf16.msra.mxu0 %v2838_v0  ;;  %v347_v7 = vshrl.u32 %v346_v4, 7  ;;  %v2844_v8 = vld [vmem:[%s3769_s3 + $0x60] sm:$0xff]   ;;  %v2846_v11 = vld [vmem:[%s3769_s3 + $0x58] sm:$0xff]   ;;  %v2848_v14 = vld [vmem:[%s3769_s3 + $0x50] sm:$0xff]   ;;  %p232_p4 = scmp.lt.s32.totalorder %s2958_s19, 7  ;;  %vm2039_vm15 = vcmask 1040384  }
   0xe   : > { %2620 = vmatpush3.bf16.msra.mxu1 %v2839_v1  ;;  %2597 = vmatprep.subr.bf16.mxu0 %v2840_v2  ;;  %s3815_s22 = smov (!%p226_p3, %s2133_s22), 31  ;;  %v2845_v9 = vld [vmem:[%s3769_s3 + $0x20] sm:$0xff]   ;;  %v2847_v12 = vld [vmem:[%s3769_s3 + $0x18] sm:$0xff]   ;;  %v2849_v15 = vld [vmem:[%s3769_s3 + $0x10] sm:$0xff]  }
   0xf   : > { %2621 = vmatprep.subr.bf16.mxu1 %v2841_v3  ;;  %s2827_s12 = smul.u32 72, %s3815_s22  ;;  %v349_v10 = vmul.u32 2, %v347_v7  ;;  %v3004_v16 = vadd.s32 8, %v347_v7  ;;  %v3009_v17 = vld [vmem:[%s3767_s1] ss:$0 sm:$0xff]  ;;  %v2850_v28 = vld [vmem:[%s3769_s3 + $0x48] sm:$0xff]  }
  0x10   : > { %v3017_v25 = vld [vmem:[%s3768_s2] ss:$0 sm:$0xff]  ;;  %v2851_v32 = vld [vmem:[%s3769_s3 + $0x8] sm:$0xff]   ;;  %v2854_v58 = vld [vmem:[%s3769_s3 + $0xb8] sm:$0xff]   ;;  %s3817_s19 = smov (!%p232_p4, %s2958_s19), 7 }
  0x11   : > { %2598 = vmatpush3.bf16.msra.mxu0 %v2840_v2  ;;  %s2996_s21 = scalar_lea.vmem %s3766_s0, %s2827_s12  ;;  %v435_v13 = vadd.s32 1, %v349_v10  ;;  %vm351_vm2 = vcmp.ge.s32.totalorder %v349_v10, 1  ;;  %vm357_vm3 = vcmp.le.s32.totalorder %v349_v10, 16  ;;  %v2852_v43 = vld [vmem:[%s3769_s3 + $0x40] sm:$0xff]   ;;  %v350_v59 = vmul.u32 2, %v3004_v16  ;;  %v2855_v0 = vld [vmem:[%s3769_s3 + $0xf8] sm:$0xff]  }
  0x12   : > { %2622 = vmatpush3.bf16.msra.mxu1 %v2841_v3  ;;  %2599 = vmatprep.subr.bf16.mxu0 %v2842_v5  ;;  %v2141_v18 = vld [vmem:[%s2996_s21 + $0x50] ss:$8 sps:$4 sm:$0xff]   ;;  %v246_v19 = vld [vmem:[%s2996_s21 + $0x8] ss:$88 sps:$4 sm:$0xff]   ;;  %vm3050_vm5 = vmand %vm351_vm2, %vm357_vm3  ;;  %s2455_s16 = sshll.u32 %s3817_s19, 5  ;;  %s2137_s23 = sshll.u32 %s3817_s19, 1 }
  0x13   : > { %2623 = vmatprep.subr.bf16.mxu1 %v2843_v6  ;;  %v400_v20 = vunpack.c.l.bf16 %v2141_v18  ;;  %v401_v21 = vunpack.c.h.bf16 %v2141_v18  ;;  %v264_v22 = vunpack.c.l.bf16 %v246_v19  ;;  %v402_v23 = vunpack.c.h.bf16 %v246_v19  ;;  %v248_v24 = vld [vmem:[%s2996_s21 + $0x10] ss:$8 sps:$4 sm:$0xff]   ;;  %v2853_v48 = vld [vmem:[%s3769_s3] sm:$0xff]   ;;  %vm2217_vm8 = vmpackc.low %vm3050_vm5, %vm2920_vm6  ;;  %s236_s22 = scalar_lea.vmem %s3770_s4, %s2455_s16  ;;  %s240_s26 = scalar_lea.vmem %s3771_s5, %s2137_s23 }
  0x14   : > { %vm436_vm0 = vcmp.ge.s32.totalorder %v435_v13, 1  ;;  %vm439_vm1 = vcmp.le.s32.totalorder %v435_v13, 16  ;;  %v266_v26 = vunpack.c.l.bf16 %v248_v24  ;;  %v268_v27 = vunpack.c.h.bf16 %v248_v24  ;;  %vm3106_vm10 = vmpackc.low %vm3050_vm5, %vm3050_vm5  ;;  %v2856_v4 = vld [vmem:[%s3769_s3 + $0xb0] sm:$0xff]   ;;  %v247_v49 = vld [vmem:[%s2996_s21 + $0xc] sm:$0x1] }
  0x15   : > { %2600 = vmatpush3.bf16.msra.mxu0 %v2842_v5  ;;  %v409_v29 = vmul.f32 %v3009_v17, %v400_v20  ;;  %v410_v30 = vmul.f32 %v3009_v17, %v401_v21  ;;  %v288_v31 = vmul.f32 %v3009_v17, %v264_v22  ;;  %v411_v33 = vmul.f32 %v3009_v17, %v402_v23  ;;  %vm3035_vm4 = vmand %vm436_vm0, %vm439_vm1  ;;  %v2144_v7 = vld [vmem:[%s2996_s21 + $0x68] ss:$8 sps:$4 sm:$0xff]  }
  0x16   : > { %2624 = vmatpush3.bf16.msra.mxu1 %v2843_v6  ;;  %2601 = vmatprep.subr.bf16.mxu0 %v2844_v8  ;;  %v290_v34 = vmul.f32 %v3009_v17, %v266_v26  ;;  %v292_v35 = vmul.f32 %v3009_v17, %v268_v27  ;;  %vm3061_vm7 = vmpackc.low %vm3035_vm4, %vm2920_vm6  ;;  %v403_v10 = vunpack.c.l.bf16 %v2144_v7  ;;  %vm3133_vm11 = vcmp.ge.s32.totalorder %v350_v59, 1  ;;  %v2907_v60 = vld [vmem:[%s3769_s3 + $0x210] sm:$0xff]   ;;  %v2908_v2 = vld [vmem:[%s3769_s3 + $0x208] sm:$0xff]  }
  0x17   : > { %2625 = vmatprep.subr.bf16.mxu1 %v2845_v9  ;;  %v418_v36 = vadd.f32 %v3017_v25, %v409_v29  ;;  %v419_v37 = vadd.f32 %v3017_v25, %v410_v30  ;;  %v312_v39 = vadd.f32 %v3017_v25, %v288_v31  ;;  %v3041_v40 = vadd.f32 %v3017_v25, %v411_v33  ;;  %vm3085_vm9 = vmpackc.low %vm3035_vm4, %vm3035_vm4 }
  0x18   : > { %v314_v41 = vadd.f32 %v3017_v25, %v290_v34  ;;  %v316_v42 = vadd.f32 %v3017_v25, %v292_v35  ;;  %v412_v21 = vmul.f32 %v3009_v17, %v403_v10  ;;  %vm3137_vm12 = vcmp.le.s32.totalorder %v350_v59, 16  ;;  %v2860_v59 = vld [vmem:[%s3769_s3 + $0xa0] sm:$0xff]  }
  0x19   : > { %2602 = vmatpush3.bf16.msra.mxu0 %v2844_v8  ;;  %v427_v45 = vmax.f32 %v418_v36, 0.0  ;;  %v428_v46 = vmax.f32 %v419_v37, 0.0  ;;  %v3054_v47 = vmax.f32 %v312_v39, 0.0  ;;  %v429_v50 = vmax.f32 %v3041_v40, 0.0  ;;  %v252_v8 = vld [vmem:[%s2996_s21 + $0x20] ss:$8 sps:$4 sm:$0xff]   ;;  %vm3237_vm14 = vmand %vm3133_vm11, %vm3137_vm12 }
  0x1a   : > { %2626 = vmatpush3.bf16.msra.mxu1 %v2845_v9  ;;  %2603 = vmatprep.subr.bf16.mxu0 %v2846_v11  ;;  %v3066_v51 = vmax.f32 %v314_v41, 0.0  ;;  %v3073_v56 = vmax.f32 %v316_v42, 0.0  ;;  %v2146_v9 = vld [vmem:[%s2996_s21 + $0x78] ss:$8 sps:$4 sm:$0xff]   ;;  %v272_v13 = vunpack.c.h.bf16 %v252_v8  ;;  %v421_v33 = vadd.f32 %v3017_v25, %v412_v21  ;;  %v2859_v37 = vld [vmem:[%s3769_s3 + $0xe8] sm:$0xff]  }
  0x1b   : > { %2627 = vmatprep.subr.bf16.mxu1 %v2847_v12  ;;  %v2198_v53 = vpack.c.bf16 %v427_v45, %v2921_v52  ;;  %v3068_v54 = vpack.c.bf16 %v428_v46, %v427_v45  ;;  %v2218_v55 = vpack.c.bf16 %v3054_v47, %v2921_v52  ;;  %v2201_v1 = vpack.c.bf16 %v429_v50, %v428_v46 }
  0x1c   : > { %v375_v57 = vsel %vm3050_vm5, %v3066_v51, 0.0  ;;  %v377_v63 = vsel %vm3050_vm5, %v3073_v56, 0.0  ;;  %v373_v5 = vsel %vm3050_vm5, %v3054_v47, 0.0  ;;  %v2221_v6 = vpack.c.bf16 %v3073_v56, %v3066_v51 }
  0x1d   : > { %2604 = vmatpush3.bf16.msra.mxu0 %v2846_v11  ;;  %2611 = vmatprep.mubr.msk.bf16.mxu0 %vm3061_vm7, %v2198_v53  ;;  %v3110_v3 = vrot.slane %v375_v57, 1  ;;  %v404_v11 = vunpack.c.h.bf16 %v2144_v7  ;;  %v405_v16 = vunpack.c.l.bf16 %v2146_v9  ;;  %v406_v18 = vunpack.c.h.bf16 %v2146_v9  ;;  %v2861_v7 = vld [vmem:[%s3769_s3 + $0xe0] sm:$0xff]  }
  0x1e   : > { %2628 = vmatpush3.bf16.msra.mxu1 %v2847_v12  ;;  %2605 = vmatprep.subr.bf16.mxu0 %v2848_v14  ;;  %v270_v12 = vunpack.c.l.bf16 %v252_v8  ;;  %v296_v24 = vmul.f32 %v3009_v17, %v272_v13  ;;  %v3156_v36 = vrot.slane %v373_v5, 1  ;;  %v251_v5 = vld [vmem:[%s2996_s21 + $0x1c] sm:$0x1]  ;;  %v265_v9 = vunpack.c.l.bf16 %v247_v49 }
  0x1f   : > { %2629 = vmatprep.subr.bf16.mxu1 %v2849_v15  ;;  %2635 = vmatprep.mubr.msk.bf16.mxu1 %vm2217_vm8, %v2218_v55  ;;  %v413_v22 = vmul.f32 %v3009_v17, %v404_v11  ;;  %v414_v29 = vmul.f32 %v3009_v17, %v405_v16  ;;  %v415_v30 = vmul.f32 %v3009_v17, %v406_v18  ;;  %v269_v11 = vunpack.c.l.bf16 %v251_v5 }
  0x20   : > { %v294_v23 = vmul.f32 %v3009_v17, %v270_v12  ;;  %v320_v38 = vadd.f32 %v3017_v25, %v296_v24  ;;  %v289_v16 = vmul.f32 %v3009_v17, %v265_v9  ;;  %v253_v24 = vld [vmem:[%s2996_s21 + $0x24] sm:$0x1] }
  0x21   : > { %2606 = vmatpush3.bf16.msra.mxu0 %v2848_v14  ;;  %v256_v14 = vld [vmem:[%s2996_s21 + $0x30] ss:$8 sps:$4 sm:$0xff]   ;;  %v3153_v34 = vadd.f32 %v3017_v25, %v413_v22  ;;  %v3163_v39 = vadd.f32 %v3017_v25, %v414_v29  ;;  %v3166_v41 = vadd.f32 %v3017_v25, %v415_v30  ;;  %v293_v22 = vmul.f32 %v3009_v17, %v269_v11 }
  0x22   : > { %2630 = vmatpush3.bf16.msra.mxu1 %v2849_v15  ;;  %2607 = vmatprep.subr.bf16.mxu0 %v2850_v28  ;;  %v2857_v15 = vld [vmem:[%s3769_s3 + $0xf0] sm:$0xff]   ;;  %v274_v19 = vunpack.c.l.bf16 %v256_v14  ;;  %v276_v20 = vunpack.c.h.bf16 %v256_v14  ;;  %v318_v35 = vadd.f32 %v3017_v25, %v294_v23  ;;  %v3174_v52 = vmax.f32 %v320_v38, 0.0  ;;  %v2153_v14 = vld [vmem:[%s2996_s21 + $0xa0] ss:$8 sps:$4 sm:$0xff]   ;;  %v2863_v30 = vld [vmem:[%s3769_s3 + $0xd8] sm:$0xff]  }
  0x23   : > { %2631 = vmatprep.subr.bf16.mxu1 %v2851_v32  ;;  %v3774_v45 = vmax.f32 %v3153_v34, 0.0  ;;  %v3773_v53 = vmax.f32 %v3163_v39, 0.0  ;;  %v3772_v55 = vmax.f32 %v3166_v41, 0.0  ;;  %v476_v18 = vunpack.c.l.bf16 %v2153_v14 }
  0x24   : > { %v298_v31 = vmul.f32 %v3009_v17, %v274_v19  ;;  %v300_v42 = vmul.f32 %v3009_v17, %v276_v20  ;;  %v3170_v46 = vmax.f32 %v318_v35, 0.0  ;;  %v478_v19 = vunpack.c.h.bf16 %v2153_v14  ;;  %v2862_v20 = vld [vmem:[%s3769_s3 + $0x98] sm:$0xff]   ;;  %v255_v35 = vld [vmem:[%s2996_s21 + $0x2c] sm:$0x1] }
  0x25   : > { %2608 = vmatpush3.bf16.msra.mxu0 %v2850_v28  ;;  %v3143_v28 = vrot.slane %v377_v63, 1  ;;  %v2207_v40 = vpack.c.bf16 %v3772_v55, %v3773_v53 }
  0x26   : > { %2632 = vmatpush3.bf16.msra.mxu1 %v2851_v32  ;;  %2609 = vmatprep.subr.bf16.mxu0 %v2852_v43  ;;  %v2858_v32 = vld [vmem:[%s3769_s3 + $0xa8] sm:$0xff]   ;;  %v324_v57 = vadd.f32 %v3017_v25, %v300_v42  ;;  %v2224_v8 = vpack.c.bf16 %v3174_v52, %v3170_v46  ;;  %v379_v29 = vsel %vm3050_vm5, %v3170_v46, 0.0  ;;  %v494_v49 = vmul.f32 %v3009_v17, %v478_v19  ;;  %v261_v19 = vld [vmem:[%s2996_s21 + $0x44] sm:$0x1] }
  0x27   : > { %2633 = vmatprep.subr.bf16.mxu1 %v2853_v48 }
  0x29   : > { %2610 = vmatpush3.bf16.msra.mxu0 %v2852_v43  ;;  %v430_v43 = vmax.f32 %v421_v33, 0.0  ;;  %v492_v33 = vmul.f32 %v3009_v17, %v476_v18  ;;  %v259_v18 = vld [vmem:[%s2996_s21 + $0x3c] sm:$0x1] }
  0x2a   : > { %2634 = vmatpush3.bf16.msra.mxu1 %v2853_v48  ;;  %2643 = vmatprep.subr.bf16.mxu0 %v2854_v58  ;;  %v322_v48 = vadd.f32 %v3017_v25, %v298_v31  ;;  %v313_v31 = vadd.f32 %v3017_v25, %v289_v16  ;;  %v257_v16 = vld [vmem:[%s2996_s21 + $0x34] sm:$0x1] }
  0x2b   : > { %2667 = vmatprep.subr.bf16.mxu1 %v2855_v0  ;;  %v2204_v63 = vpack.c.bf16 %v3774_v45, %v430_v43 }
  0x2c   : > { %2612 = vmatmul.mubr.msk.bf16.vlgmr.msra.gmra.mxu0 %vm3085_vm9, %v2201_v1  ;;  %v331_v27 = vmax.f32 %v313_v31, 0.0  ;;  %v2866_v31 = vld [vmem:[%s3769_s3 + $0x88] sm:$0xff]  }
  0x2d   : > { %2636 = vmatmul.mubr.msk.bf16.vlgmr.msra.gmra.mxu1 %vm3106_vm10, %v2221_v6  ;;  %2644 = vmatpush3.bf16.msra.mxu0 %v2854_v58  ;;  %v249_v58 = vld [vmem:[%s2996_s21 + $0x14] sm:$0x1]  ;;  %v2149_v6 = vld [vmem:[%s2996_s21 + $0x90] ss:$8 sps:$4 sm:$0xff]  }
  0x2e   : > { %2668 = vmatpush3.bf16.msra.mxu1 %v2855_v0  ;;  %2645 = vmatprep.subr.bf16.mxu0 %v2856_v4  ;;  %v3187_v0 = vpack.c.bf16 %v430_v43, %v429_v50  ;;  %v3204_v50 = vmax.f32 %v324_v57, 0.0  ;;  %v267_v10 = vunpack.c.l.bf16 %v249_v58  ;;  %v472_v12 = vunpack.c.l.bf16 %v2149_v6 }
  0x2f   : > { %2669 = vmatprep.subr.bf16.mxu1 %v2857_v15  ;;  %2615 = vmatprep.mubr.msk.bf16.mxu0 %vm3085_vm9, %v2204_v63  ;;  %v474_v13 = vunpack.c.h.bf16 %v2149_v6  ;;  %v317_v43 = vadd.f32 %v3017_v25, %v293_v22  ;;  %v3253_v57 = vadd.f32 %v3017_v25, %v492_v33  ;;  %v273_v58 = vunpack.c.l.bf16 %v255_v35  ;;  %v2864_v63 = vld [vmem:[%s3769_s3 + $0x90] sm:$0xff]  }
  0x30   : > { %2639 = vmatprep.mubr.msk.bf16.mxu1 %vm3106_vm10, %v2224_v8  ;;  %v291_v21 = vmul.f32 %v3009_v17, %v267_v10  ;;  %v488_v23 = vmul.f32 %v3009_v17, %v472_v12  ;;  %v3260_v8 = vadd.f32 %v3017_v25, %v494_v49  ;;  %v260_v35 = vld [vmem:[%s2996_s21 + $0x40] ss:$112 sps:$4 sm:$0xff]   ;;  %v897_v49 = vrot.slane %v379_v29, 1 }
  0x31   : > { %2646 = vmatpush3.bf16.msra.mxu0 %v2856_v4  ;;  %v3191_v4 = vmax.f32 %v322_v48, 0.0  ;;  %v335_v6 = vmax.f32 %v317_v43, 0.0  ;;  %v524_v10 = vmax.f32 %v3253_v57, 0.0 }
  0x32   : > { %2670 = vmatpush3.bf16.msra.mxu1 %v2857_v15  ;;  %2647 = vmatprep.subr.bf16.mxu0 %v2858_v32  ;;  %v315_v42 = vadd.f32 %v3017_v25, %v291_v21  ;;  %v3246_v48 = vadd.f32 %v3017_v25, %v488_v23 }
  0x33   : > { %2671 = vmatprep.subr.bf16.mxu1 %v2859_v37  ;;  %v2227_v15 = vpack.c.bf16 %v3204_v50, %v3191_v4  ;;  %v378_v14 = vsel %vm3237_vm14, %v335_v6, 0.0  ;;  %v277_v6 = vunpack.c.l.bf16 %v259_v18 }
  0x34   : > { %2616 = vmatmul.mubr.msk.bf16.gmra.mxu0 %vm3085_vm9, %v2207_v40  ;;  %v333_v5 = vmax.f32 %v315_v42, 0.0  ;;  %v374_v40 = vsel %vm3237_vm14, %v331_v27, 0.0  ;;  %v895_v22 = vrot.slane %v378_v14, 1  ;;  %v2159_v14 = vld [vmem:[%s2996_s21 + $0xb8] ss:$8 sps:$4 sm:$0xff]  }
  0x35   : > { %2648 = vmatpush3.bf16.msra.mxu0 %v2858_v32  ;;  %v490_v32 = vmul.f32 %v3009_v17, %v474_v13  ;;  %2640 = vmatmul.mubr.msk.bf16.gmra.mxu1 %vm3106_vm10, %v2227_v15  ;;  %v889_v12 = vrot.slane %v374_v40, 1  ;;  %v526_v15 = vmax.f32 %v3260_v8, 0.0  ;;  %v278_v40 = vunpack.c.l.bf16 %v260_v35 }
  0x36   : > { %2672 = vmatpush3.bf16.msra.mxu1 %v2859_v37  ;;  %2649 = vmatprep.subr.bf16.mxu0 %v2860_v59  ;;  %v271_v37 = vunpack.c.l.bf16 %v253_v24  ;;  %v376_v13 = vsel %vm3237_vm14, %v333_v5, 0.0  ;;  %v297_v24 = vmul.f32 %v3009_v17, %v273_v58  ;;  %v3312_v43 = vsel %vm884_vm13, %v3143_v28, %v895_v22  ;;  %v2870_v22 = vld [vmem:[%s3769_s3 + $0x138] sm:$0xff]  }
  0x37   : > { %2673 = vmatprep.subr.bf16.mxu1 %v2861_v7  ;;  %v3250_v26 = vadd.f32 %v3017_v25, %v490_v32  ;;  %v892_v21 = vrot.slane %v376_v13, 1  ;;  %v3288_v32 = vsel %vm884_vm13, %v3156_v36, %v889_v12  ;;  %v275_v28 = vunpack.c.l.bf16 %v257_v16  ;;  %v2869_v16 = vld [vmem:[%s3769_s3 + $0xc0] sm:$0xff]  }
  0x38   : > { %v295_v11 = vmul.f32 %v3009_v17, %v271_v37  ;;  %v2867_v37 = vld [vmem:[%s3769_s3 + $0xc8] sm:$0xff]   ;;  %v917_v36 = vpack.c.bf16 %v3288_v32, %v3089_v61  ;;  %v321_v58 = vadd.f32 %v3017_v25, %v297_v24  ;;  %v383_v13 = vsel %vm3050_vm5, %v3191_v4, 0.0 }
  0x39   : > { %2650 = vmatpush3.bf16.msra.mxu0 %v2860_v59  ;;  %v520_v59 = vmax.f32 %v3246_v48, 0.0  ;;  %v522_v9 = vmax.f32 %v3250_v26, 0.0  ;;  %v3308_v42 = vsel %vm884_vm13, %v3110_v3, %v892_v21  ;;  %v2868_v3 = vld [vmem:[%s3769_s3 + $0x80] sm:$0xff]   ;;  %v299_v18 = vmul.f32 %v3009_v17, %v275_v28  ;;  %v2878_v48 = vld [vmem:[%s3769_s3 + $0x118] sm:$0xff]   ;;  %v3485_v26 = vld [vmem:[%s2996_s21 + $0x88] ss:$136 sps:$4 sm:$0xff]  }
  0x3a   : > { %2674 = vmatpush3.bf16.msra.mxu1 %v2861_v7  ;;  %2651 = vmatprep.subr.bf16.mxu0 %v2862_v20  ;;  %v2865_v7 = vld [vmem:[%s3769_s3 + $0xd0] sm:$0xff]   ;;  %v319_v33 = vadd.f32 %v3017_v25, %v295_v11  ;;  %v918_v27 = vpack.c.bf16 %v3312_v43, %v3308_v42  ;;  %v279_v11 = vunpack.c.l.bf16 %v261_v19  ;;  %v339_v29 = vmax.f32 %v321_v58, 0.0 }
  0x3b   : > { %2675 = vmatprep.subr.bf16.mxu1 %v2863_v30  ;;  %v2278_v23 = vpack.c.bf16 %v522_v9, %v520_v59  ;;  %2659 = vmatprep.mubr.bf16.mxu0 %v917_v36  ;;  %v301_v19 = vmul.f32 %v3009_v17, %v277_v6  ;;  %v302_v21 = vmul.f32 %v3009_v17, %v278_v40  ;;  %v2871_v36 = vld [vmem:[%s3769_s3 + $0x178] sm:$0xff]  }
  0x3c   : > { %v337_v5 = vmax.f32 %v319_v33, 0.0  ;;  %v303_v24 = vmul.f32 %v3009_v17, %v279_v11  ;;  %v903_v33 = vrot.slane %v383_v13, 1  ;;  %v323_v28 = vadd.f32 %v3017_v25, %v299_v18 }
  0x3d   : > { %2652 = vmatpush3.bf16.msra.mxu0 %v2862_v20  ;;  %v3294_v20 = vpack.c.bf16 %v526_v15, %v524_v10  ;;  %2683 = vmatprep.mubr.msk.bf16.mxu1 %vm3106_vm10, %v2278_v23  ;;  %v382_v23 = vsel %vm3237_vm14, %v339_v29, 0.0  ;;  %v325_v6 = vadd.f32 %v3017_v25, %v301_v19  ;;  %v3354_v11 = vadd.f32 %v3017_v25, %v302_v21 }
  0x3e   : > { %2676 = vmatpush3.bf16.msra.mxu1 %v2863_v30  ;;  %2653 = vmatprep.subr.bf16.mxu0 %v2864_v63  ;;  %v381_v30 = vsel %vm3050_vm5, %v3174_v52, 0.0  ;;  %v380_v12 = vsel %vm3237_vm14, %v337_v5, 0.0  ;;  %v901_v5 = vrot.slane %v382_v23, 1  ;;  %v480_v29 = vunpack.c.h.bf16 %v260_v35  ;;  %v2872_v35 = vld [vmem:[%s3769_s3 + $0x130] sm:$0xff]  }
  0x3f   : > { %2677 = vmatprep.subr.bf16.mxu1 %v2865_v7  ;;  %v900_v61 = vrot.slane %v381_v30, 1  ;;  %v343_v13 = vmax.f32 %v325_v6, 0.0 }
  0x40   : > { %v496_v19 = vmul.f32 %v3009_v17, %v480_v29 }
  0x41   : > { %2654 = vmatpush3.bf16.msra.mxu0 %v2864_v63  ;;  %v385_v63 = vsel %vm3050_vm5, %v3204_v50, 0.0  ;;  %v386_v23 = vsel %vm3237_vm14, %v343_v13, 0.0 }
  0x42   : > { %2678 = vmatpush3.bf16.msra.mxu1 %v2865_v7  ;;  %2655 = vmatprep.subr.bf16.mxu0 %v2866_v31  ;;  %v898_v7 = vrot.slane %v380_v12, 1  ;;  %v906_v30 = vrot.slane %v385_v63, 1  ;;  %v341_v12 = vmax.f32 %v323_v28, 0.0  ;;  %v482_v63 = vunpack.c.l.bf16 %v2159_v14 }
  0x43   : > { %2679 = vmatprep.subr.bf16.mxu1 %v2867_v37  ;;  %v484_v28 = vunpack.c.h.bf16 %v2159_v14  ;;  %v907_v29 = vrot.slane %v386_v23, 1  ;;  %v3384_v14 = vadd.f32 %v3017_v25, %v496_v19 }
  0x44   : > { %v3347_v58 = vsel %vm884_vm13, %v897_v49, %v898_v7  ;;  %v3358_v49 = vsel %vm884_vm13, %v900_v61, %v901_v5  ;;  %v3775_v7 = vmax.f32 %v3354_v11, 0.0  ;;  %v2873_v61 = vld [vmem:[%s3769_s3 + $0x170] sm:$0xff]   ;;  %v384_v21 = vsel %vm3237_vm14, %v341_v12, 0.0  ;;  %v2163_v5 = vld [vmem:[%s2996_s21 + $0xc8] ss:$16 sps:$4 sm:$0xff]  }
  0x45   : > { %2656 = vmatpush3.bf16.msra.mxu0 %v2866_v31  ;;  %v327_v31 = vadd.f32 %v3017_v25, %v303_v24  ;;  %v498_v24 = vmul.f32 %v3009_v17, %v482_v63  ;;  %v2166_v12 = vld [vmem:[%s2996_s21 + $0xe0] ss:$8 sps:$4 sm:$0xff]   ;;  %v500_v23 = vmul.f32 %v3009_v17, %v484_v28  ;;  %v528_v19 = vmax.f32 %v3384_v14, 0.0  ;;  %v2150_v28 = vld [vmem:[%s2996_s21 + $0x94] sm:$0x1] }
  0x46   : > { %2680 = vmatpush3.bf16.msra.mxu1 %v2867_v37  ;;  %2657 = vmatprep.subr.bf16.mxu0 %v2868_v3  ;;  %v919_v37 = vpack.c.bf16 %v3358_v49, %v3347_v58  ;;  %v473_v1 = vunpack.c.l.bf16 %v2150_v28 }
  0x47   : > { %2681 = vmatprep.subr.bf16.mxu1 %v2869_v16  ;;  %v345_v18 = vmax.f32 %v327_v31, 0.0  ;;  %v904_v31 = vrot.slane %v384_v21, 1  ;;  %v486_v21 = vunpack.c.l.bf16 %v2163_v5 }
  0x49   : > { %2658 = vmatpush3.bf16.msra.mxu0 %v2868_v3  ;;  %v387_v3 = vsel %vm3050_vm5, %v3775_v7, 0.0  ;;  %v388_v6 = vsel %vm3237_vm14, %v345_v18, 0.0  ;;  %v3393_v63 = vsel %vm884_vm13, %v903_v33, %v904_v31  ;;  %v3396_v18 = vsel %vm884_vm13, %v906_v30, %v907_v29  ;;  %v2874_v30 = vld [vmem:[%s3769_s3 + $0x128] sm:$0xff]   ;;  %v2152_v31 = vld [vmem:[%s2996_s21 + $0x9c] sm:$0x1] }
  0x4a   : > { %2682 = vmatpush3.bf16.msra.mxu1 %v2869_v16  ;;  %2691 = vmatprep.subr.bf16.mxu0 %v2870_v22  ;;  %v1819_v13 = vrot.slane %v387_v3, 1  ;;  %v1820_v40 = vrot.slane %v388_v6, 1  ;;  %v3387_v16 = vadd.f32 %v3017_v25, %v498_v24  ;;  %v3400_v3 = vld [vmem:[%s2996_s21 + $0xf0] ss:$8 sps:$4 sm:$0xff]   ;;  %v3420_v6 = vadd.f32 %v3017_v25, %v500_v23  ;;  %v2875_v29 = vld [vmem:[%s3769_s3 + $0x168] sm:$0xff]  }
  0x4b   : > { %2715 = vmatprep.subr.bf16.mxu1 %v2871_v36  ;;  %v475_v53 = vunpack.c.l.bf16 %v2152_v31  ;;  %v2170_v7 = vld [vmem:[%s2996_s21 + $0x100] ss:$8 sps:$4 sm:$0xff]  }
  0x4c   : > { %2660 = vmatmul.mubr.bf16.vlgmr.msra.gmra.mxu0 %v918_v27  ;;  %v920_v27 = vpack.c.bf16 %v3396_v18, %v3393_v63  ;;  %v3408_v33 = vsel %vm884_vm13, %v1819_v13, %v1820_v40  ;;  %v530_v24 = vmax.f32 %v3387_v16, 0.0  ;;  %v561_v40 = vunpack.c.h.bf16 %v2163_v5 }
  0x4d   : > { %2684 = vmatmul.mubr.msk.bf16.vlgmr.msra.gmra.mxu1 %vm3106_vm10, %v3294_v20  ;;  %2692 = vmatpush3.bf16.msra.mxu0 %v2870_v22  ;;  %v502_v22 = vmul.f32 %v3009_v17, %v486_v21  ;;  %v562_v13 = vunpack.c.l.bf16 %v2166_v12  ;;  %v563_v20 = vunpack.c.h.bf16 %v2166_v12  ;;  %v564_v21 = vunpack.c.l.bf16 %v3400_v3 }
  0x4e   : > { %2716 = vmatpush3.bf16.msra.mxu1 %v2871_v36  ;;  %2693 = vmatprep.subr.bf16.mxu0 %v2872_v35  ;;  %v2284_v36 = vpack.c.bf16 %v530_v24, %v528_v19  ;;  %v3777_v5 = vmax.f32 %v3420_v6, 0.0 }
  0x4f   : > { %2717 = vmatprep.subr.bf16.mxu1 %v2873_v61  ;;  %2663 = vmatprep.mubr.bf16.mxu0 %v919_v37  ;;  %v3432_v23 = vadd.f32 %v3017_v25, %v502_v22  ;;  %v569_v37 = vmul.f32 %v3009_v17, %v561_v40  ;;  %v570_v62 = vmul.f32 %v3009_v17, %v562_v13  ;;  %v536_v13 = vsel %vm3050_vm5, %v520_v59, 0.0  ;;  %v2879_v59 = vld [vmem:[%s3769_s3 + $0x158] sm:$0xff]  }
  0x50   : > { %2687 = vmatprep.mubr.msk.bf16.mxu1 %vm3106_vm10, %v2284_v36  ;;  %v571_v55 = vmul.f32 %v3009_v17, %v563_v20  ;;  %v572_v12 = vmul.f32 %v3009_v17, %v564_v21  ;;  %v489_v40 = vmul.f32 %v3009_v17, %v473_v1  ;;  %v2877_v20 = vld [vmem:[%s3769_s3 + $0x160] sm:$0xff]   ;;  %v491_v36 = vmul.f32 %v3009_v17, %v475_v53  ;;  %v2156_v53 = vld [vmem:[%s2996_s21 + $0xac] sm:$0x1] }
  0x51   : > { %2694 = vmatpush3.bf16.msra.mxu0 %v2872_v35  ;;  %v3776_v22 = vmax.f32 %v3432_v23, 0.0  ;;  %v2876_v35 = vld [vmem:[%s3769_s3 + $0x120] sm:$0xff]   ;;  %v577_v28 = vadd.f32 %v3017_v25, %v569_v37  ;;  %v578_v31 = vadd.f32 %v3017_v25, %v570_v62 }
  0x52   : > { %2718 = vmatpush3.bf16.msra.mxu1 %v2873_v61  ;;  %2695 = vmatprep.subr.bf16.mxu0 %v2874_v30  ;;  %v3452_v61 = vadd.f32 %v3017_v25, %v571_v55  ;;  %v2154_v21 = vld [vmem:[%s2996_s21 + $0xa4] sm:$0x1]  ;;  %v3465_v62 = vadd.f32 %v3017_v25, %v572_v12  ;;  %v505_v55 = vadd.f32 %v3017_v25, %v489_v40  ;;  %v538_v12 = vsel %vm3050_vm5, %v522_v9, 0.0  ;;  %v2880_v9 = vld [vmem:[%s3769_s3 + $0x110] sm:$0xff]  }
  0x53   : > { %2719 = vmatprep.subr.bf16.mxu1 %v2875_v29  ;;  %v2287_v1 = vpack.c.bf16 %v3776_v22, %v3777_v5  ;;  %v585_v37 = vmax.f32 %v577_v28, 0.0  ;;  %v507_v45 = vadd.f32 %v3017_v25, %v491_v36  ;;  %v477_v40 = vunpack.c.l.bf16 %v2154_v21 }
  0x54   : > { %2664 = vmatmul.mubr.bf16.gmra.mxu0 %v920_v27  ;;  %v586_v27 = vmax.f32 %v578_v31, 0.0  ;;  %v521_v28 = vmax.f32 %v505_v55, 0.0  ;;  %v1359_v36 = vrot.slane %v536_v13, 1  ;;  %v479_v5 = vunpack.c.l.bf16 %v2156_v53 }
  0x55   : > { %2696 = vmatpush3.bf16.msra.mxu0 %v2874_v30  ;;  %v587_v30 = vmax.f32 %v3452_v61, 0.0  ;;  %2688 = vmatmul.mubr.msk.bf16.gmra.mxu1 %vm3106_vm10, %v2287_v1  ;;  %v523_v31 = vmax.f32 %v507_v45, 0.0  ;;  %v1362_v55 = vrot.slane %v538_v12, 1  ;;  %v493_v1 = vmul.f32 %v3009_v17, %v477_v40  ;;  %v2881_v45 = vld [vmem:[%s3769_s3 + $0x150] sm:$0xff]  }
  0x56   : > { %2720 = vmatpush3.bf16.msra.mxu1 %v2875_v29  ;;  %2697 = vmatprep.subr.bf16.mxu0 %v2876_v35  ;;  %v2314_v22 = vpack.c.bf16 %v586_v27, %v585_v37  ;;  %v588_v29 = vmax.f32 %v3465_v62, 0.0  ;;  %v537_v21 = vsel %vm3237_vm14, %v521_v28, 0.0  ;;  %v495_v53 = vmul.f32 %v3009_v17, %v479_v5 }
  0x57   : > { %2721 = vmatprep.subr.bf16.mxu1 %v2877_v20  ;;  %v539_v13 = vsel %vm3237_vm14, %v523_v31, 0.0  ;;  %v1360_v37 = vrot.slane %v537_v21, 1  ;;  %v540_v27 = vsel %vm3050_vm5, %v524_v10, 0.0  ;;  %v509_v28 = vadd.f32 %v3017_v25, %v493_v1  ;;  %v2160_v21 = vld [vmem:[%s2996_s21 + $0xbc] sm:$0x1] }
  0x58   : > { %2707 = vmatprep.mubr.msk.bf16.mxu0 %vm3085_vm9, %v2314_v22  ;;  %v1363_v12 = vrot.slane %v539_v13, 1  ;;  %v542_v22 = vsel %vm3050_vm5, %v526_v15, 0.0  ;;  %v565_v40 = vunpack.c.h.bf16 %v3400_v3  ;;  %v511_v57 = vadd.f32 %v3017_v25, %v495_v53  ;;  %v2883_v3 = vld [vmem:[%s3769_s3 + $0x148] sm:$0xff]  }
  0x59   : > { %2698 = vmatpush3.bf16.msra.mxu0 %v2876_v35  ;;  %v2158_v35 = vld [vmem:[%s2996_s21 + $0xb4] sm:$0x1]  ;;  %v1361_v5 = vsel %vm884_vm13, %v1359_v36, %v1360_v37  ;;  %v566_v31 = vunpack.c.l.bf16 %v2170_v7  ;;  %v567_v10 = vunpack.c.h.bf16 %v2170_v7  ;;  %v525_v8 = vmax.f32 %v509_v28, 0.0 }
  0x5a   : > { %2722 = vmatpush3.bf16.msra.mxu1 %v2877_v20  ;;  %2699 = vmatprep.subr.bf16.mxu0 %v2878_v48  ;;  %v2882_v20 = vld [vmem:[%s3769_s3 + $0x108] sm:$0xff]   ;;  %v1364_v1 = vsel %vm884_vm13, %v1362_v55, %v1363_v12  ;;  %v573_v13 = vmul.f32 %v3009_v17, %v565_v40  ;;  %v568_v15 = vunpack.c.h.bf16 %v3485_v26  ;;  %v527_v37 = vmax.f32 %v511_v57, 0.0 }
  0x5b   : > { %2723 = vmatprep.subr.bf16.mxu1 %v2879_v59  ;;  %v1391_v36 = vpack.c.bf16 %v1364_v1, %v1361_v5  ;;  %v1365_v7 = vrot.slane %v540_v27, 1  ;;  %v574_v53 = vmul.f32 %v3009_v17, %v566_v31  ;;  %v541_v55 = vsel %vm3237_vm14, %v525_v8, 0.0  ;;  %v2162_v8 = vld [vmem:[%s2996_s21 + $0xc4] sm:$0x1] }
  0x5c   : > { %v1368_v12 = vrot.slane %v542_v22, 1  ;;  %v581_v28 = vadd.f32 %v3017_v25, %v573_v13  ;;  %v481_v40 = vunpack.c.l.bf16 %v2158_v35  ;;  %v1366_v5 = vrot.slane %v541_v55, 1  ;;  %v3536_v22 = vld [vmem:[%s3767_s1] ss:$0 sm:$0xff] }
  0x5d   : > { %2700 = vmatpush3.bf16.msra.mxu0 %v2878_v48  ;;  %2731 = vmatprep.mubr.bf16.mxu1 %v1391_v36  ;;  %v543_v48 = vsel %vm3237_vm14, %v527_v37, 0.0  ;;  %v582_v27 = vadd.f32 %v3017_v25, %v574_v53  ;;  %v575_v57 = vmul.f32 %v3009_v17, %v567_v10  ;;  %v576_v35 = vmul.f32 %v3536_v22, %v568_v15  ;;  %v2884_v17 = vld [vmem:[%s3769_s3 + $0x100] sm:$0xff]  }
  0x5e   : > { %2724 = vmatpush3.bf16.msra.mxu1 %v2879_v59  ;;  %2701 = vmatprep.subr.bf16.mxu0 %v2880_v9  ;;  %v1369_v59 = vrot.slane %v543_v48, 1  ;;  %v589_v31 = vmax.f32 %v581_v28, 0.0  ;;  %v483_v1 = vunpack.c.l.bf16 %v2160_v21  ;;  %v3541_v13 = vsel %vm884_vm13, %v1365_v7, %v1366_v5  ;;  %v2164_v21 = vld [vmem:[%s2996_s21 + $0xcc] sm:$0x1]  ;;  %v2911_v7 = vld [vmem:[%s3768_s2] ss:$0 sm:$0xff] }
  0x5f   : > { %2725 = vmatprep.subr.bf16.mxu1 %v2881_v45  ;;  %v590_v36 = vmax.f32 %v582_v27, 0.0  ;;  %v497_v25 = vmul.f32 %v3536_v22, %v481_v40  ;;  %v2317_v15 = vpack.c.bf16 %v588_v29, %v587_v30  ;;  %v3564_v53 = vadd.f32 %v2911_v7, %v575_v57  ;;  %v2886_v48 = vld [vmem:[%s3769_s3 + $0x1b8] sm:$0xff]  }
  0x60   : > { %v1370_v10 = vsel %vm884_vm13, %v1368_v12, %v1369_v59  ;;  %v499_v37 = vmul.f32 %v3536_v22, %v483_v1  ;;  %v584_v28 = vadd.f32 %v2911_v7, %v576_v35  ;;  %v485_v29 = vunpack.c.l.bf16 %v2162_v8 }
  0x61   : > { %2702 = vmatpush3.bf16.msra.mxu0 %v2880_v9  ;;  %v544_v9 = vsel %vm3050_vm5, %v528_v19, 0.0  ;;  %v513_v14 = vadd.f32 %v2911_v7, %v497_v25  ;;  %v546_v19 = vsel %vm3050_vm5, %v530_v24, 0.0  ;;  %v1392_v55 = vpack.c.bf16 %v1370_v10, %v3541_v13 }
  0x62   : > { %2726 = vmatpush3.bf16.msra.mxu1 %v2881_v45  ;;  %2703 = vmatprep.subr.bf16.mxu0 %v2882_v20  ;;  %v2885_v45 = vld [vmem:[%s3769_s3 + $0x140] sm:$0xff]   ;;  %v2320_v12 = vpack.c.bf16 %v590_v36, %v589_v31  ;;  %v515_v61 = vadd.f32 %v2911_v7, %v499_v37  ;;  %v1371_v30 = vrot.slane %v544_v9, 1  ;;  %v487_v40 = vunpack.c.l.bf16 %v2164_v21 }
  0x63   : > { %2727 = vmatprep.subr.bf16.mxu1 %v2883_v3  ;;  %v529_v62 = vmax.f32 %v513_v14, 0.0  ;;  %v1374_v5 = vrot.slane %v546_v19, 1  ;;  %v3794_v24 = vmax.f32 %v3420_v6, 0.0  ;;  %v501_v59 = vmul.f32 %v3536_v22, %v485_v29 }
  0x64   : > { %v531_v16 = vmax.f32 %v515_v61, 0.0  ;;  %v503_v31 = vmul.f32 %v3536_v22, %v487_v40  ;;  %v3795_v6 = vmax.f32 %v3432_v23, 0.0  ;;  %v3796_v13 = vmax.f32 %v3354_v11, 0.0  ;;  %v2888_v11 = vld [vmem:[%s3769_s3 + $0x1b0] sm:$0xff]  }
  0x65   : > { %2704 = vmatpush3.bf16.msra.mxu0 %v2882_v20  ;;  %v548_v27 = vsel %vm3050_vm5, %v3794_v24, 0.0  ;;  %v2380_v20 = vpack.c.bf16 %v3191_v4, %v3174_v52  ;;  %v545_v57 = vsel %vm3237_vm14, %v529_v62, 0.0  ;;  %v3797_v25 = vmax.f32 %v3153_v34, 0.0  ;;  %v2909_v52 = vld [vmem:[%s3769_s3 + $0x200] sm:$0xff]  }
  0x66   : > { %2728 = vmatpush3.bf16.msra.mxu1 %v2883_v3  ;;  %2705 = vmatprep.subr.bf16.mxu0 %v2884_v17  ;;  %v2887_v3 = vld [vmem:[%s3769_s3 + $0x1f8] sm:$0xff]   ;;  %v550_v35 = vsel %vm3050_vm5, %v3795_v6, 0.0  ;;  %v547_v1 = vsel %vm3237_vm14, %v531_v16, 0.0  ;;  %v1372_v8 = vrot.slane %v545_v57, 1  ;;  %v3596_v36 = vpack.c.bf16 %v3796_v13, %v3204_v50 }
  0x67   : > { %2729 = vmatprep.subr.bf16.mxu1 %v2885_v45  ;;  %v3798_v10 = vmax.f32 %v3163_v39, 0.0  ;;  %v1375_v23 = vrot.slane %v547_v1, 1  ;;  %v517_v9 = vadd.f32 %v2911_v7, %v501_v59  ;;  %v519_v44 = vadd.f32 %v2911_v7, %v503_v31  ;;  %v2893_v59 = vld [vmem:[%s3769_s3 + $0x1e0] sm:$0xff]   ;;  %v2895_v31 = vld [vmem:[%s3769_s3 + $0x1d8] sm:$0xff]   ;;  %v2897_v1 = vld [vmem:[%s3769_s3 + $0x1d0] sm:$0xff]  }
  0x68   : > { %v407_v21 = vunpack.c.l.bf16 %v3485_v26  ;;  %v591_v50 = vmax.f32 %v3564_v53, 0.0  ;;  %v1373_v34 = vsel %vm884_vm13, %v1371_v30, %v1372_v8  ;;  %v1823_v39 = vpack.c.bf16 %v3308_v42, %v3288_v32  ;;  %v2889_v26 = vld [vmem:[%s3769_s3 + $0x1f0] sm:$0xff]   ;;  %v2901_v8 = vld [vmem:[%s3769_s3 + $0x1c0] sm:$0xff]   ;;  %v2902_v13 = vld [vmem:[%s3769_s3 + $0x238] sm:$0xff]  }
  0x69   : > { %v3602_v37 = vpack.c.bf16 %v3798_v10, %v3797_v25  ;;  %2706 = vmatpush3.bf16.msra.mxu0 %v2884_v17  ;;  %v1825_v17 = vpack.c.bf16 %v3393_v63, %v3358_v49  ;;  %v533_v14 = vmax.f32 %v517_v9, 0.0  ;;  %v535_v19 = vmax.f32 %v519_v44, 0.0  ;;  %v2903_v25 = vld [vmem:[%s3769_s3 + $0x230] sm:$0xff]  }
  0x6a   : > { %2730 = vmatpush3.bf16.msra.mxu1 %v2885_v45  ;;  %2739 = vmatprep.subr.bf16.mxu0 %v2886_v48  ;;  %v1376_v45 = vsel %vm884_vm13, %v1374_v5, %v1375_v23  ;;  %v416_v61 = vmul.f32 %v3536_v22, %v407_v21  ;;  %v592_v53 = vmax.f32 %v584_v28, 0.0  ;;  %v1377_v30 = vrot.slane %v548_v27, 1  ;;  %v2890_v22 = vld [vmem:[%s3769_s3 + $0x1a8] sm:$0xff]  }
  0x6b   : > { %2763 = vmatprep.subr.bf16.mxu1 %v2887_v3  ;;  %v1393_v62 = vpack.c.bf16 %v1376_v45, %v1373_v34  ;;  %v1380_v29 = vrot.slane %v550_v35, 1  ;;  %v549_v40 = vsel %vm3237_vm14, %v533_v14, 0.0  ;;  %v551_v16 = vsel %vm3237_vm14, %v535_v19, 0.0  ;;  %v2896_v35 = vld [vmem:[%s3769_s3 + $0x190] sm:$0xff]   ;;  %v2904_v23 = vld [vmem:[%s3769_s3 + $0x228] sm:$0xff]  }
  0x6c   : > { %2708 = vmatmul.mubr.msk.bf16.vlgmr.msra.gmra.mxu0 %vm3085_vm9, %v2317_v15  ;;  %v425_v5 = vadd.f32 %v2911_v7, %v416_v61  ;;  %v1378_v15 = vrot.slane %v549_v40, 1  ;;  %v1381_v28 = vrot.slane %v551_v16, 1  ;;  %v2323_v38 = vpack.c.bf16 %v592_v53, %v591_v50 }
  0x6d   : > { %2732 = vmatmul.mubr.bf16.vlgmr.msra.gmra.mxu1 %v1392_v55  ;;  %2740 = vmatpush3.bf16.msra.mxu0 %v2886_v48  ;;  %v2891_v55 = vld [vmem:[%s3769_s3 + $0x1e8] sm:$0xff]   ;;  %v3800_v6 = vpack.c.bf16 %v3066_v51, %v3054_v47  ;;  %v3801_v10 = vpack.c.bf16 %v3170_v46, %v3073_v56  ;;  %v2905_v56 = vld [vmem:[%s3769_s3 + $0x220] sm:$0xff]   ;;  %v2906_v46 = vld [vmem:[%s3769_s3 + $0x218] sm:$0xff]   ;;  %v3803_v4 = vpack.c.bf16 %v3408_v33, %v3396_v18 }
  0x6e   : > { %2764 = vmatpush3.bf16.msra.mxu1 %v2887_v3  ;;  %2741 = vmatprep.subr.bf16.mxu0 %v2888_v11  ;;  %v434_v48 = vmax.f32 %v425_v5, 0.0  ;;  %v1379_v7 = vsel %vm884_vm13, %v1377_v30, %v1378_v15  ;;  %v1382_v24 = vsel %vm884_vm13, %v1380_v29, %v1381_v28  ;;  %v3799_v3 = vmax.f32 %v3166_v41, 0.0  ;;  %v2894_v41 = vld [vmem:[%s3769_s3 + $0x198] sm:$0xff]   ;;  %v2898_v47 = vld [vmem:[%s3769_s3 + $0x188] sm:$0xff]  }
  0x6f   : > { %2765 = vmatprep.subr.bf16.mxu1 %v2889_v26  ;;  %2711 = vmatprep.mubr.msk.bf16.mxu0 %vm3085_vm9, %v2320_v12  ;;  %v1394_v27 = vpack.c.bf16 %v1382_v24, %v1379_v7  ;;  %v2892_v12 = vld [vmem:[%s3769_s3 + $0x1a0] sm:$0xff]   ;;  %v2899_v51 = vld [vmem:[%s3769_s3 + $0x1c8] sm:$0xff]  }
  0x70   : > { %2735 = vmatprep.mubr.bf16.mxu1 %v1393_v62  ;;  %v2419_v57 = vpack.c.bf16 %v434_v48, %v3799_v3 }
  0x71   : > { %2742 = vmatpush3.bf16.msra.mxu0 %v2888_v11 }
  0x72   : > { %2766 = vmatpush3.bf16.msra.mxu1 %v2889_v26  ;;  %2743 = vmatprep.subr.bf16.mxu0 %v2890_v22 }
  0x73   : > { %2767 = vmatprep.subr.bf16.mxu1 %v2891_v55 }
  0x74   : > { %2712 = vmatmul.mubr.msk.bf16.gmra.mxu0 %vm3085_vm9, %v2323_v38 }
  0x75   : > { %2744 = vmatpush3.bf16.msra.mxu0 %v2890_v22  ;;  %2736 = vmatmul.mubr.bf16.gmra.mxu1 %v1394_v27 }
  0x76   : > { %2768 = vmatpush3.bf16.msra.mxu1 %v2891_v55  ;;  %2745 = vmatprep.subr.bf16.mxu0 %v2892_v12 }
  0x77   : > { %2769 = vmatprep.subr.bf16.mxu1 %v2893_v59  ;;  %2755 = vmatprep.mubr.msk.bf16.mxu0 %vm3106_vm10, %v3800_v6 }
  0x78   : > { %2779 = vmatprep.mubr.msk.bf16.mxu1 %vm3085_vm9, %v3068_v54  ;;  %v2900_v54 = vld [vmem:[%s3769_s3 + $0x180] sm:$0xff]  }
  0x79   : > { %2746 = vmatpush3.bf16.msra.mxu0 %v2892_v12 }
  0x7a   : > { %2770 = vmatpush3.bf16.msra.mxu1 %v2893_v59  ;;  %2747 = vmatprep.subr.bf16.mxu0 %v2894_v41 }
  0x7b   : > { %2771 = vmatprep.subr.bf16.mxu1 %v2895_v31 }
  0x7d   : > { %2748 = vmatpush3.bf16.msra.mxu0 %v2894_v41 }
  0x7e   : > { %2772 = vmatpush3.bf16.msra.mxu1 %v2895_v31  ;;  %2749 = vmatprep.subr.bf16.mxu0 %v2896_v35 }
  0x7f   : > { %2773 = vmatprep.subr.bf16.mxu1 %v2897_v1 }
  0x81   : > { %2750 = vmatpush3.bf16.msra.mxu0 %v2896_v35 }
  0x82   : > { %2774 = vmatpush3.bf16.msra.mxu1 %v2897_v1  ;;  %2751 = vmatprep.subr.bf16.mxu0 %v2898_v47 }
  0x83   : > { %2775 = vmatprep.subr.bf16.mxu1 %v2899_v51 }
  0x85   : > { %2752 = vmatpush3.bf16.msra.mxu0 %v2898_v47 }
  0x86   : > { %2776 = vmatpush3.bf16.msra.mxu1 %v2899_v51  ;;  %2753 = vmatprep.subr.bf16.mxu0 %v2900_v54 }
  0x87   : > { %2777 = vmatprep.subr.bf16.mxu1 %v2901_v8 }
  0x89   : > { %2754 = vmatpush3.bf16.msra.mxu0 %v2900_v54 }
  0x8a   : > { %2778 = vmatpush3.bf16.msra.mxu1 %v2901_v8  ;;  %2787 = vmatprep.subr.bf16.mxu0 %v2902_v13 }
  0x8b   : > { %2811 = vmatprep.subr.bf16.mxu1 %v2902_v13 }
  0x8c   : > { %2756 = vmatmul.mubr.msk.bf16.vlgmr.msra.gmra.mxu0 %vm3106_vm10, %v3801_v10 }
  0x8d   : > { %2780 = vmatmul.mubr.msk.bf16.vlgmr.msra.gmra.mxu1 %vm3085_vm9, %v3187_v0  ;;  %2788 = vmatpush3.bf16.msra.mxu0 %v2902_v13  ;;  %v3802_v0 = vpack.c.bf16 %v3347_v58, %v3312_v43 }
  0x8e   : > { %2819 = vmatpush3.bf16.msra.mxu1 %v2902_v13  ;;  %2789 = vmatprep.subr.bf16.mxu0 %v2903_v25 }
  0x8f   : > { %2812 = vmatprep.subr.bf16.mxu1 %v2903_v25  ;;  %2759 = vmatprep.mubr.msk.bf16.mxu0 %vm3106_vm10, %v2380_v20 }
  0x90   : > { %2783 = vmatprep.mubr.msk.bf16.mxu1 %vm3085_vm9, %v3602_v37 }
  0x91   : > { %2790 = vmatpush3.bf16.msra.mxu0 %v2903_v25 }
  0x92   : > { %2820 = vmatpush3.bf16.msra.mxu1 %v2903_v25  ;;  %2791 = vmatprep.subr.bf16.mxu0 %v2904_v23 }
  0x93   : > { %2813 = vmatprep.subr.bf16.mxu1 %v2904_v23 }
  0x94   : > { %2760 = vmatmul.mubr.msk.bf16.gmra.mxu0 %vm3106_vm10, %v3596_v36 }
  0x95   : > { %2792 = vmatpush3.bf16.msra.mxu0 %v2904_v23  ;;  %2784 = vmatmul.mubr.msk.bf16.gmra.mxu1 %vm3085_vm9, %v2419_v57 }
  0x96   : > { %2821 = vmatpush3.bf16.msra.mxu1 %v2904_v23  ;;  %2793 = vmatprep.subr.bf16.mxu0 %v2905_v56 }
  0x97   : > { %2814 = vmatprep.subr.bf16.mxu1 %v2905_v56  ;;  %2803 = vmatprep.mubr.bf16.mxu0 %v1823_v39 }
  0x98   : > { %2807 = vmatprep.mubr.bf16.mxu1 %v1825_v17 }
  0x99   : > { %2794 = vmatpush3.bf16.msra.mxu0 %v2905_v56 }
  0x9a   : > { %2822 = vmatpush3.bf16.msra.mxu1 %v2905_v56  ;;  %2795 = vmatprep.subr.bf16.mxu0 %v2906_v46 }
  0x9b   : > { %2815 = vmatprep.subr.bf16.mxu1 %v2906_v46 }
  0x9d   : > { %2796 = vmatpush3.bf16.msra.mxu0 %v2906_v46 }
  0x9e   : > { %2823 = vmatpush3.bf16.msra.mxu1 %v2906_v46  ;;  %2797 = vmatprep.subr.bf16.mxu0 %v2907_v60 }
  0x9f   : > { %2816 = vmatprep.subr.bf16.mxu1 %v2907_v60 }
  0xa1   : > { %2798 = vmatpush3.bf16.msra.mxu0 %v2907_v60 }
  0xa2   : > { %2824 = vmatpush3.bf16.msra.mxu1 %v2907_v60  ;;  %2799 = vmatprep.subr.bf16.mxu0 %v2908_v2 }
  0xa3   : > { %2817 = vmatprep.subr.bf16.mxu1 %v2908_v2 }
  0xa5   : > { %2800 = vmatpush3.bf16.msra.mxu0 %v2908_v2 }
  0xa6   : > { %2825 = vmatpush3.bf16.msra.mxu1 %v2908_v2  ;;  %2801 = vmatprep.subr.bf16.mxu0 %v2909_v52 }
  0xa7   : > { %2818 = vmatprep.subr.bf16.mxu1 %v2909_v52 }
  0xa9   : > { %2802 = vmatpush3.bf16.msra.mxu0 %v2909_v52 }
  0xaa   : > { %2826 = vmatpush3.bf16.msra.mxu1 %v2909_v52 }
  0xac   : > { %2804 = vmatmul.mubr.bf16.vlgmr.msra.gmra.mxu0 %v3802_v0 }
  0xad   : > { %2808 = vmatmul.mubr.bf16.vlgmr.msra.gmra.mxu1 %v3803_v4 }
  0xec   : > { %v2613_v32 = vpop.f32.mrf.mxu0 }
  0xed   : > { %v2637_v42 = vpop.f32.mrf.mxu1 }
  0xee   : > { %v724_v49 = vpop.f32.mrf.mxu0  ;;  %v846_v23 = vadd.f32 %v2637_v42, %v2613_v32 }
  0xef   : > { %v837_v63 = vpop.f32.mrf.mxu1 }
  0xf0   : > { %v2614_v20 = vpop.f32.mrf.mxu0  ;;  %v838_v56 = vadd.f32 %v837_v63, %v724_v49 }
  0xf1   : > { %v2638_v36 = vpop.f32.mrf.mxu1 }
  0xf2   : > { %v727_v37 = vpop.f32.mrf.mxu0  ;;  %v849_v46 = vadd.f32 %v2638_v36, %v2614_v20 }
  0xf3   : > { %v840_v9 = vpop.f32.mrf.mxu1 }
  0xf4   : > { %v2617_v44 = vpop.f32.mrf.mxu0  ;;  %v841_v0 = vadd.f32 %v840_v9, %v727_v37 }
  0xf5   : > { %v2641_v21 = vpop.f32.mrf.mxu1 }
  0xf6   : > { %v740_v11 = vpop.f32.mrf.mxu0  ;;  %v862_v60 = vadd.f32 %v2641_v21, %v2617_v44 }
  0xf7   : > { %v853_v50 = vpop.f32.mrf.mxu1 }
  0xf8   : > { %v2618_v34 = vpop.f32.mrf.mxu0 }
  0xf9   : > { %v2642_v39 = vpop.f32.mrf.mxu1 }
  0xfa   : > { %v743_v43 = vpop.f32.mrf.mxu0  ;;  %v865_v2 = vadd.f32 %v2642_v39, %v2618_v34 }
  0xfb   : > { %v856_v58 = vpop.f32.mrf.mxu1 }
 0x10c   : > { %v2661_v17 = vpop.f32.mrf.mxu0 }
 0x10d   : > { %v2685_v26 = vpop.f32.mrf.mxu1  ;;  %v1053_v4 = vadd.f32 %v2661_v17, %v846_v23 }
 0x10e   : > { %v1020_v18 = vpop.f32.mrf.mxu0 }
 0x10f   : > { %v1162_v33 = vpop.f32.mrf.mxu1  ;;  %v1195_v21 = vadd.f32 %v2685_v26, %v1053_v4 }
 0x110   : > { %v2662_v45 = vpop.f32.mrf.mxu0 }
 0x111   : > { %v2686_v14 = vpop.f32.mrf.mxu1 }
 0x112   : > { %v1023_v19 = vpop.f32.mrf.mxu0 }
 0x113   : > { %v1165_v61 = vpop.f32.mrf.mxu1  ;;  %v1052_v49 = vadd.f32 %v1023_v19, %v841_v0 }
 0x114   : > { %v2665_v53 = vpop.f32.mrf.mxu0 }
 0x115   : > { %v2689_v62 = vpop.f32.mrf.mxu1  ;;  %v1057_v32 = vadd.f32 %v2665_v53, %v862_v60  ;;  %v1194_v17 = vadd.f32 %v1165_v61, %v1052_v49 }
 0x116   : > { %v1036_v30 = vpop.f32.mrf.mxu0 }
 0x117   : > { %v1178_v29 = vpop.f32.mrf.mxu1  ;;  %v1199_v9 = vadd.f32 %v2689_v62, %v1057_v32 }
 0x118   : > { %v2666_v40 = vpop.f32.mrf.mxu0 }
 0x119   : > { %v2690_v16 = vpop.f32.mrf.mxu1  ;;  %v1058_v42 = vadd.f32 %v2666_v40, %v865_v2 }
 0x11a   : > { %v1039_v5 = vpop.f32.mrf.mxu0 }
 0x11b   : > { %v1181_v22 = vpop.f32.mrf.mxu1  ;;  %v1200_v37 = vadd.f32 %v2690_v16, %v1058_v42 }
 0x12c   : > { %v2709_v15 = vpop.f32.mrf.mxu0 }
 0x12d   : > { %v2733_v28 = vpop.f32.mrf.mxu1  ;;  %v1337_v23 = vadd.f32 %v2709_v15, %v1195_v21 }
 0x12e   : > { %v1304_v55 = vpop.f32.mrf.mxu0 }
 0x12f   : > { %v1494_v48 = vpop.f32.mrf.mxu1 }
 0x130   : > { %v2710_v38 = vpop.f32.mrf.mxu0 }
 0x131   : > { %v2734_v7 = vpop.f32.mrf.mxu1 }
 0x132   : > { %v1307_v24 = vpop.f32.mrf.mxu0 }
 0x133   : > { %v1497_v27 = vpop.f32.mrf.mxu1  ;;  %v1336_v19 = vadd.f32 %v1307_v24, %v1194_v17 }
 0x134   : > { %v2713_v3 = vpop.f32.mrf.mxu0 }
 0x135   : > { %v2737_v57 = vpop.f32.mrf.mxu1 }
 0x136   : > { %v1320_v12 = vpop.f32.mrf.mxu0 }
 0x137   : > { %v3734_v59 = vpop.f32.mrf.mxu1 }
 0x138   : > { %3804 = vst [vmem:[#allocation2_spill] sm:$0xff] %v3734_v59  ;;  %v2714_v41 = vpop.f32.mrf.mxu0  ;;  %v1051_v59 = vadd.f32 %v1020_v18, %v838_v56 }
 0x139   : > { %v2738_v31 = vpop.f32.mrf.mxu1 }
 0x13a   : > { %v1323_v6 = vpop.f32.mrf.mxu0  ;;  %v1193_v44 = vadd.f32 %v1162_v33, %v1051_v59 }
 0x13b   : > { %v1513_v35 = vpop.f32.mrf.mxu1 }
 0x13c   : > { %v1335_v18 = vadd.f32 %v1304_v55, %v1193_v44 }
 0x14c   : > { %v2757_v1 = vpop.f32.mrf.mxu0 }
 0x14d   : > { %v3736_v47 = vpop.f32.mrf.mxu1 }
 0x14e   : > { %3805 = vst [vmem:[#allocation3_spill] sm:$0xff] %v3736_v47  ;;  %v1636_v51 = vpop.f32.mrf.mxu0  ;;  %v1054_v47 = vadd.f32 %v2662_v45, %v849_v46 }
 0x14f   : > { %v3738_v54 = vpop.f32.mrf.mxu1 }
 0x150   : > { %3806 = vst [vmem:[#allocation4_spill] sm:$0xff] %v3738_v54  ;;  %v2758_v8 = vpop.f32.mrf.mxu0  ;;  %v1196_v34 = vadd.f32 %v2686_v14, %v1054_v47  ;;  %v1527_v14 = vadd.f32 %v2733_v28, %v1337_v23 }
 0x151   : > { %v3740_v13 = vpop.f32.mrf.mxu1 }
 0x152   : > { %3807 = vst [vmem:[#allocation5_spill] sm:$0xff] %v3740_v13  ;;  %v1639_v25 = vpop.f32.mrf.mxu0  ;;  %v854_v13 = vadd.f32 %v853_v50, %v740_v11  ;;  %v1338_v45 = vadd.f32 %v2710_v38, %v1196_v34  ;;  %v1341_v50 = vadd.f32 %v2713_v3, %v1199_v9  ;;  %v1669_v15 = vadd.f32 %v2757_v1, %v1527_v14  ;;  %v3809_v38 = vld [vmem:[#allocation2_spill] sm:$0xff] }
 0x153   : > { %v3742_v10 = vpop.f32.mrf.mxu1 }
 0x154   : > { %3808 = vst [vmem:[#allocation6_spill] sm:$0xff] %v3742_v10  ;;  %v2761_v52 = vpop.f32.mrf.mxu0  ;;  %v857_v10 = vadd.f32 %v856_v58, %v743_v43  ;;  %v1055_v63 = vadd.f32 %v1036_v30, %v854_v13  ;;  %v1342_v43 = vadd.f32 %v2714_v41, %v1200_v37  ;;  %v1525_v30 = vadd.f32 %v1494_v48, %v1335_v18 }
 0x155   : > { %v2785_v54 = vpop.f32.mrf.mxu1  ;;  %v1528_v62 = vadd.f32 %v2734_v7, %v1338_v45  ;;  %v1531_v40 = vadd.f32 %v2737_v57, %v1341_v50 }
 0x156   : > { %v1056_v20 = vadd.f32 %v1039_v5, %v857_v10  ;;  %v1652_v36 = vpop.f32.mrf.mxu0  ;;  %v1197_v56 = vadd.f32 %v1178_v29, %v1055_v63  ;;  %v1532_v61 = vadd.f32 %v2738_v31, %v1342_v43  ;;  %v1526_v5 = vadd.f32 %v1497_v27, %v1336_v19  ;;  %v3810_v27 = vld [vmem:[#allocation3_spill] sm:$0xff] }
 0x157   : > { %v1794_v39 = vpop.f32.mrf.mxu1  ;;  %v1667_v29 = vadd.f32 %v1636_v51, %v1525_v30  ;;  %v3811_v1 = vld [vmem:[#allocation4_spill] sm:$0xff] }
 0x158   : > { %v1198_v11 = vadd.f32 %v1181_v22, %v1056_v20  ;;  %v2762_v58 = vpop.f32.mrf.mxu0  ;;  %v1339_v26 = vadd.f32 %v1320_v12, %v1197_v56  ;;  %v1670_v22 = vadd.f32 %v2758_v8, %v1528_v62  ;;  %v1673_v12 = vadd.f32 %v2761_v52, %v1531_v40 }
 0x159   : > { %v2786_v53 = vpop.f32.mrf.mxu1  ;;  %v1674_v59 = vadd.f32 %v2762_v58, %v1532_v61  ;;  %v1668_v48 = vadd.f32 %v1639_v25, %v1526_v5  ;;  %v1809_v47 = vadd.f32 %v3811_v1, %v1667_v29  ;;  %v3812_v51 = vld [vmem:[#allocation5_spill] sm:$0xff] }
 0x15a   : > { %v1340_v33 = vadd.f32 %v1323_v6, %v1198_v11  ;;  %v1655_v16 = vpop.f32.mrf.mxu0  ;;  %v1529_v24 = vadd.f32 %v3809_v38, %v1339_v26  ;;  %v1811_v6 = vadd.f32 %v3810_v27, %v1669_v15  ;;  %v1812_v8 = vadd.f32 %v3812_v51, %v1670_v22 }
 0x15b   : > { %v1797_v55 = vpop.f32.mrf.mxu1  ;;  %v1815_v10 = vadd.f32 %v2785_v54, %v1673_v12  ;;  %v1816_v46 = vadd.f32 %v2786_v53, %v1674_v59 }
 0x15c   : > { %v1530_v3 = vadd.f32 %v1513_v35, %v1340_v33  ;;  %v1671_v57 = vadd.f32 %v1652_v36, %v1529_v24  ;;  %v3813_v35 = vld [vmem:[#allocation6_spill] sm:$0xff] }
 0x15d   : > { %v1810_v2 = vadd.f32 %v3813_v35, %v1668_v48 }
 0x15e   : > { %v1672_v41 = vadd.f32 %v1655_v16, %v1530_v3  ;;  %v1813_v32 = vadd.f32 %v1794_v39, %v1671_v57 }
 0x160   : > { %v1814_v42 = vadd.f32 %v1797_v55, %v1672_v41 }
 0x16c   : > { %v2805_v28 = vpop.f32.mrf.mxu0 }
 0x16d   : > { %v2809_v7 = vpop.f32.mrf.mxu1  ;;  %v1959_v52 = vadd.f32 %v2805_v28, %v1811_v6 }
 0x16e   : > { %v1926_v31 = vpop.f32.mrf.mxu0  ;;  %v1963_v49 = vadd.f32 %v2809_v7, %v1815_v10 }
 0x16f   : > { %v1942_v13 = vpop.f32.mrf.mxu1  ;;  %v1957_v0 = vadd.f32 %v1926_v31, %v1809_v47  ;;  %v2020_v45 = vmul.f32 %v1959_v52, %v1959_v52 }
 0x170   : > { %v2806_v60 = vpop.f32.mrf.mxu0  ;;  %v1961_v44 = vadd.f32 %v1942_v13, %v1813_v32  ;;  %v2024_v62 = vmul.f32 %v1963_v49, %v1963_v49 }
 0x171   : > { %v1960_v25 = vadd.f32 %v2806_v60, %v1812_v8  ;;  %v2810_v4 = vpop.f32.mrf.mxu1  ;;  %v2018_v37 = vmul.f32 %v1957_v0, %v1957_v0 }
 0x172   : > { %v1964_v63 = vadd.f32 %v2810_v4, %v1816_v46  ;;  %v1929_v20 = vpop.f32.mrf.mxu0  ;;  %v2022_v19 = vmul.f32 %v1961_v44, %v1961_v44 }
 0x173   : > { %v2472_v36 = vpack.c.bf16 %v1960_v25, %v1959_v52  ;;  %v1958_v21 = vadd.f32 %v1929_v20, %v1810_v2  ;;  %v1945_v54 = vpop.f32.mrf.mxu1  ;;  %v2021_v50 = vmul.f32 %v1960_v25, %v1960_v25 }
 0x174   : > { %v2482_v34 = vpack.c.bf16 %v1964_v63, %v1963_v49  ;;  %v1962_v9 = vadd.f32 %v1945_v54, %v1814_v42  ;;  %v2025_v16 = vmul.f32 %v1964_v63, %v1964_v63 }
 0x175   : > { %2484 = vst [vmem:[%s236_s22 + $0x8] sm:$0xff] %v2472_v36   ;;  %v2467_v17 = vpack.c.bf16 %v1958_v21, %v1957_v0  ;;  %v2005_v23 = vadd.f32 %v1958_v21, %v1957_v0  ;;  %v2019_v18 = vmul.f32 %v1958_v21, %v1958_v21 }
 0x176   : > { %2486 = vst [vmem:[%s236_s22 + $0x18] sm:$0xff] %v2482_v34   ;;  %v2477_v39 = vpack.c.bf16 %v1962_v9, %v1961_v44  ;;  %v2023_v14 = vmul.f32 %v1962_v9, %v1962_v9 }
 0x177   : > { %2468 = vst [vmem:[%s236_s22] sm:$0xff] %v2467_v17   ;;  %v2006_v56 = vadd.f32 %v2005_v23, %v1959_v52  ;;  %v2026_v11 = vadd.f32 %v2019_v18, %v2018_v37 }
 0x178   : > { %2485 = vst [vmem:[%s236_s22 + $0x10] sm:$0xff] %v2477_v39  }
 0x179   : > { %v2027_v43 = vadd.f32 %v2026_v11, %v2020_v45  ;;  %v2007_v58 = vadd.f32 %v2006_v56, %v1960_v25 }
 0x17b   : > { %v2008_v53 = vadd.f32 %v2007_v58, %v1961_v44  ;;  %v2028_v26 = vadd.f32 %v2027_v43, %v2021_v50 }
 0x17d   : > { %v2009_v33 = vadd.f32 %v2008_v53, %v1962_v9  ;;  %v2029_v30 = vadd.f32 %v2028_v26, %v2022_v19 }
 0x17f   : > { %v2010_v40 = vadd.f32 %v2009_v33, %v1963_v49  ;;  %v2030_v61 = vadd.f32 %v2029_v30, %v2023_v14 }
 0x181   : > { %v2011_v5 = vadd.f32 %v2010_v40, %v1964_v63  ;;  %v2031_v15 = vadd.f32 %v2030_v61, %v2024_v62 }
 0x183   : > { %v2012_v29 = vrot.slane %v2011_v5, 4  ;;  %v2032_v22 = vadd.f32 %v2031_v15, %v2025_v16 }
 0x185   : > { %v2013_v55 = vadd.f32 %v2012_v29, %v2011_v5  ;;  %v2033_v38 = vrot.slane %v2032_v22, 4 }
 0x187   : > { %v2014_v24 = vrot.slane %v2013_v55, 2  ;;  %v2034_v3 = vadd.f32 %v2033_v38, %v2032_v22 }
 0x189   : > { %v2015_v12 = vadd.f32 %v2014_v24, %v2013_v55  ;;  %v2035_v59 = vrot.slane %v2034_v3, 2 }
 0x18b   : > { %v2016_v28 = vrot.slane %v2015_v12, 1  ;;  %v2036_v48 = vadd.f32 %v2035_v59, %v2034_v3 }
 0x18d   : > { %v2037_v7 = vrot.slane %v2036_v48, 1  ;;  %v2017_v57 = vadd.f32 %v2016_v28, %v2015_v12 }
 0x18f   : > { %v2038_v41 = vadd.f32 %v2037_v7, %v2036_v48 }
 0x191   : > { %v2040_v31 = vsel %vm2039_vm15, %v2017_v57, %v2038_v41 }
 0x192   : > { %2041 = vst [vmem:[%s240_s26] sm:$0x3] %v2040_v31 }
 0x193 PF: > { %s16_s18 = sadd.s32 1, %s2918_s18  }
 0x194   : > { %p13_p5 = scmp.ge.s32.totalorder %s16_s18, 10  }
 0x196   :  { %15 = sbr.rel (!%p13_p5) target bundleno = 1 (0x1), region = 89 }

// kernel: bottleneck_forward.7
= control target key start
LH: loop header
LB: loop body
LE: loop exit
PB: predicated region body
PF: predicated region fallthrough
CT: control target
= control target key end

     0   :  { %s1652_s0 = inlined_call_operand.vmem [shape: bf16[512,128], index: 0, kind: input, shape index: {}]   ;;  %s1653_s1 = inlined_call_operand.vmem [shape: f32[1,128], index: 1, kind: input, shape index: {}]   ;;  %s1654_s2 = inlined_call_operand.vmem [shape: f32[1,128], index: 2, kind: input, shape index: {}]   ;;  %s1655_s3 = inlined_call_operand.vmem [shape: bf16[512,128], index: 3, kind: input, shape index: {}]   ;;  %s1656_s4 = inlined_call_operand.vmem [shape: f32[1,128], index: 4, kind: input, shape index: {}]   ;;  %s1657_s5 = inlined_call_operand.vmem [shape: f32[1,128], index: 5, kind: input, shape index: {}]   ;;  %s1658_s6 = inlined_call_operand.hbm [shape: f32[512,128], index: 6, kind: output, shape index: {}]  }
   0x1   :  { %v777_v0 = vld [vmem:[%s1652_s0] sm:$0xff]   ;;  %v1032_v9 = vld [vmem:[%s1652_s0 + $0x8] sm:$0xff]   ;;  %v1033_v15 = vld [vmem:[%s1652_s0 + $0x10] sm:$0xff]  }
   0x2   :  { %v1167_v1 = vld [vmem:[%s1653_s1] ss:$0 sm:$0xff]  ;;  %v778_v2 = vunpack.c.l.bf16 %v777_v0  ;;  %v779_v5 = vunpack.c.h.bf16 %v777_v0  ;;  %v1063_v10 = vld [vmem:[%s1655_s3 + $0x8] sm:$0xff]   ;;  %v782_v13 = vunpack.c.l.bf16 %v1032_v9  ;;  %v1064_v16 = vld [vmem:[%s1655_s3 + $0x10] sm:$0xff]   ;;  %v783_v19 = vunpack.c.h.bf16 %v1032_v9 }
   0x3   :  { %v905_v3 = vld [vmem:[%s1655_s3] sm:$0xff]   ;;  %v910_v14 = vunpack.c.l.bf16 %v1063_v10  ;;  %v911_v20 = vunpack.c.h.bf16 %v1063_v10  ;;  %v786_v28 = vunpack.c.l.bf16 %v1033_v15  ;;  %v914_v29 = vunpack.c.l.bf16 %v1064_v16  ;;  %v1034_v34 = vld [vmem:[%s1652_s0 + $0x18] sm:$0xff]   ;;  %v1036_v9 = vld [vmem:[%s1652_s0 + $0x28] sm:$0xff]  }
   0x4   :  { %v1175_v4 = vld [vmem:[%s1656_s4] ss:$0 sm:$0xff]  ;;  %v906_v7 = vunpack.c.l.bf16 %v905_v3  ;;  %v907_v8 = vunpack.c.h.bf16 %v905_v3  ;;  %v159_v11 = vmul.f32 %v778_v2, %v1167_v1  ;;  %v160_v12 = vmul.f32 %v779_v5, %v1167_v1  ;;  %v1065_v43 = vld [vmem:[%s1655_s3 + $0x18] sm:$0xff]  }
   0x5   :  { %v1180_v6 = vld [vmem:[%s1654_s2] ss:$0 sm:$0xff]  ;;  %v161_v23 = vmul.f32 %v782_v13, %v1167_v1  ;;  %v431_v24 = vmul.f32 %v910_v14, %v1175_v4  ;;  %v162_v26 = vmul.f32 %v783_v19, %v1167_v1  ;;  %v432_v27 = vmul.f32 %v911_v20, %v1175_v4  ;;  %v1067_v14 = vld [vmem:[%s1655_s3 + $0x28] sm:$0xff]  }
   0x6   :  { %v429_v17 = vmul.f32 %v906_v7, %v1175_v4  ;;  %v430_v18 = vmul.f32 %v907_v8, %v1175_v4  ;;  %v230_v21 = vadd.f32 %v1180_v6, %v159_v11  ;;  %v231_v22 = vadd.f32 %v1180_v6, %v160_v12  ;;  %v1205_v25 = vld [vmem:[%s1657_s5] ss:$0 sm:$0xff] }
   0x7   :  { %v232_v32 = vadd.f32 %v1180_v6, %v161_v23  ;;  %v787_v33 = vunpack.c.h.bf16 %v1033_v15  ;;  %v233_v35 = vadd.f32 %v1180_v6, %v162_v26  ;;  %v163_v36 = vmul.f32 %v786_v28, %v1167_v1  ;;  %v1035_v56 = vld [vmem:[%s1652_s0 + $0x20] sm:$0xff]   ;;  %v1037_v28 = vld [vmem:[%s1652_s0 + $0x30] sm:$0xff]  }
   0x8   :  { %v493_v30 = vadd.f32 %v429_v17, %v230_v21  ;;  %v494_v31 = vadd.f32 %v430_v18, %v231_v22  ;;  %v433_v37 = vmul.f32 %v914_v29, %v1175_v4  ;;  %v915_v38 = vunpack.c.h.bf16 %v1064_v16  ;;  %v1066_v61 = vld [vmem:[%s1655_s3 + $0x20] sm:$0xff]  }
   0x9   :  { %v495_v41 = vadd.f32 %v431_v24, %v232_v32  ;;  %v164_v42 = vmul.f32 %v787_v33, %v1167_v1  ;;  %v496_v44 = vadd.f32 %v432_v27, %v233_v35  ;;  %v234_v45 = vadd.f32 %v1180_v6, %v163_v36  ;;  %v1068_v33 = vld [vmem:[%s1655_s3 + $0x30] sm:$0xff]  }
   0xa   :  { %v564_v39 = vadd.f32 %v1205_v25, %v493_v30  ;;  %v565_v40 = vadd.f32 %v1205_v25, %v494_v31  ;;  %v434_v46 = vmul.f32 %v915_v38, %v1175_v4  ;;  %v790_v47 = vunpack.c.l.bf16 %v1034_v34 }
   0xb   :  { %v566_v50 = vadd.f32 %v1205_v25, %v495_v41  ;;  %v235_v51 = vadd.f32 %v1180_v6, %v164_v42  ;;  %v567_v52 = vadd.f32 %v1205_v25, %v496_v44  ;;  %v497_v53 = vadd.f32 %v433_v37, %v234_v45 }
   0xc   :  { %v628_v48 = vmax.f32 %v564_v39, 0.0  ;;  %v629_v49 = vmax.f32 %v565_v40, 0.0  ;;  %v165_v54 = vmul.f32 %v790_v47, %v1167_v1  ;;  %v918_v55 = vunpack.c.l.bf16 %v1065_v43 }
   0xd   :  { %v630_v57 = vmax.f32 %v566_v50, 0.0  ;;  %v498_v58 = vadd.f32 %v434_v46, %v235_v51  ;;  %v791_v59 = vunpack.c.h.bf16 %v1034_v34  ;;  %v919_v60 = vunpack.c.h.bf16 %v1065_v43 }
   0xe   :  { %692 = vst [vmem:[#allocation2] sm:$0xff] %v628_v48  ;;  %693 = vst [vmem:[#allocation2 + $0x8] sm:$0xff] %v629_v49  ;;  %v631_v62 = vmax.f32 %v567_v52, 0.0  ;;  %v568_v63 = vadd.f32 %v1205_v25, %v497_v53  ;;  %v236_v0 = vadd.f32 %v1180_v6, %v165_v54  ;;  %v435_v2 = vmul.f32 %v918_v55, %v1175_v4 }
   0xf   :  { %694 = vst [vmem:[#allocation2 + $0x10] sm:$0xff] %v630_v57  ;;  %v569_v3 = vadd.f32 %v1205_v25, %v498_v58  ;;  %v166_v5 = vmul.f32 %v791_v59, %v1167_v1  ;;  %v436_v7 = vmul.f32 %v919_v60, %v1175_v4  ;;  %v794_v8 = vunpack.c.l.bf16 %v1035_v56 }
  0x10   :  { %695 = vst [vmem:[#allocation2 + $0x18] sm:$0xff] %v631_v62  ;;  %v632_v10 = vmax.f32 %v568_v63, 0.0  ;;  %v499_v11 = vadd.f32 %v435_v2, %v236_v0  ;;  %v922_v12 = vunpack.c.l.bf16 %v1066_v61  ;;  %v795_v13 = vunpack.c.h.bf16 %v1035_v56 }
  0x11   :  { %v633_v15 = vmax.f32 %v569_v3, 0.0  ;;  %v237_v16 = vadd.f32 %v1180_v6, %v166_v5  ;;  %v167_v17 = vmul.f32 %v794_v8, %v1167_v1  ;;  %v923_v18 = vunpack.c.h.bf16 %v1066_v61 }
  0x12   :  { %696 = vst [vmem:[#allocation2 + $0x20] sm:$0xff] %v632_v10  ;;  %v570_v19 = vadd.f32 %v1205_v25, %v499_v11  ;;  %v437_v20 = vmul.f32 %v922_v12, %v1175_v4  ;;  %v168_v21 = vmul.f32 %v795_v13, %v1167_v1  ;;  %v798_v22 = vunpack.c.l.bf16 %v1036_v9 }
  0x13   :  { %697 = vst [vmem:[#allocation2 + $0x28] sm:$0xff] %v633_v15  ;;  %v500_v23 = vadd.f32 %v436_v7, %v237_v16  ;;  %v238_v24 = vadd.f32 %v1180_v6, %v167_v17  ;;  %v438_v26 = vmul.f32 %v923_v18, %v1175_v4  ;;  %v926_v27 = vunpack.c.l.bf16 %v1067_v14 }
  0x14   :  { %v634_v29 = vmax.f32 %v570_v19, 0.0  ;;  %v239_v30 = vadd.f32 %v1180_v6, %v168_v21  ;;  %v169_v31 = vmul.f32 %v798_v22, %v1167_v1  ;;  %v799_v32 = vunpack.c.h.bf16 %v1036_v9 }
  0x15   :  { %v571_v34 = vadd.f32 %v1205_v25, %v500_v23  ;;  %v501_v35 = vadd.f32 %v437_v20, %v238_v24  ;;  %v439_v36 = vmul.f32 %v926_v27, %v1175_v4  ;;  %v927_v37 = vunpack.c.h.bf16 %v1067_v14 }
  0x16   :  { %698 = vst [vmem:[#allocation2 + $0x30] sm:$0xff] %v634_v29  ;;  %v502_v38 = vadd.f32 %v438_v26, %v239_v30  ;;  %v240_v39 = vadd.f32 %v1180_v6, %v169_v31  ;;  %v170_v40 = vmul.f32 %v799_v32, %v1167_v1  ;;  %v802_v41 = vunpack.c.l.bf16 %v1037_v28 }
  0x17   :  { %11 = vsyncpa [#allocation3], 0  ;;  %v635_v42 = vmax.f32 %v571_v34, 0.0  ;;  %v572_v43 = vadd.f32 %v1205_v25, %v501_v35  ;;  %v440_v44 = vmul.f32 %v927_v37, %v1175_v4  ;;  %v930_v45 = vunpack.c.l.bf16 %v1068_v33  ;;  %v1038_v50 = vld [vmem:[%s1652_s0 + $0x38] sm:$0xff]   ;;  %v1039_v0 = vld [vmem:[%s1652_s0 + $0x40] sm:$0xff]  }
  0x18   :  { %v573_v46 = vadd.f32 %v1205_v25, %v502_v38  ;;  %v503_v47 = vadd.f32 %v439_v36, %v240_v39  ;;  %v241_v48 = vadd.f32 %v1180_v6, %v170_v40  ;;  %v171_v49 = vmul.f32 %v802_v41, %v1167_v1  ;;  %v1069_v51 = vld [vmem:[%s1655_s3 + $0x38] sm:$0xff]   ;;  %v1070_v8 = vld [vmem:[%s1655_s3 + $0x40] sm:$0xff]   ;;  %v1040_v21 = vld [vmem:[%s1652_s0 + $0x48] sm:$0xff]  }
  0x19   :  { %699 = vst [vmem:[#allocation2 + $0x38] sm:$0xff] %v635_v42  ;;  %v636_v52 = vmax.f32 %v572_v43, 0.0  ;;  %v441_v53 = vmul.f32 %v930_v45, %v1175_v4  ;;  %v803_v54 = vunpack.c.h.bf16 %v1037_v28  ;;  %v931_v55 = vunpack.c.h.bf16 %v1068_v33  ;;  %v1071_v27 = vld [vmem:[%s1655_s3 + $0x48] sm:$0xff]   ;;  %v1072_v45 = vld [vmem:[%s1655_s3 + $0x50] sm:$0xff]  }
  0x1a   :  { %v637_v56 = vmax.f32 %v573_v46, 0.0  ;;  %v574_v57 = vadd.f32 %v1205_v25, %v503_v47  ;;  %v504_v58 = vadd.f32 %v440_v44, %v241_v48  ;;  %v242_v59 = vadd.f32 %v1180_v6, %v171_v49  ;;  %v1041_v44 = vld [vmem:[%s1652_s0 + $0x50] sm:$0xff]  }
  0x1b   :  { %700 = vst [vmem:[#allocation2 + $0x40] sm:$0xff] %v636_v52  ;;  %v172_v60 = vmul.f32 %v803_v54, %v1167_v1  ;;  %v442_v61 = vmul.f32 %v931_v55, %v1175_v4  ;;  %v806_v62 = vunpack.c.l.bf16 %v1038_v50  ;;  %v934_v63 = vunpack.c.l.bf16 %v1069_v51 }
  0x1c   :  { %701 = vst [vmem:[#allocation2 + $0x48] sm:$0xff] %v637_v56  ;;  %v638_v2 = vmax.f32 %v574_v57, 0.0  ;;  %v575_v3 = vadd.f32 %v1205_v25, %v504_v58  ;;  %v505_v5 = vadd.f32 %v441_v53, %v242_v59  ;;  %v807_v7 = vunpack.c.h.bf16 %v1038_v50  ;;  %v1042_v58 = vld [vmem:[%s1652_s0 + $0x58] sm:$0xff]  }
  0x1d   :  { %v243_v9 = vadd.f32 %v1180_v6, %v172_v60  ;;  %v173_v10 = vmul.f32 %v806_v62, %v1167_v1  ;;  %v443_v11 = vmul.f32 %v934_v63, %v1175_v4  ;;  %v935_v12 = vunpack.c.h.bf16 %v1069_v51  ;;  %v1073_v63 = vld [vmem:[%s1655_s3 + $0x58] sm:$0xff]  }
  0x1e   :  { %702 = vst [vmem:[#allocation2 + $0x50] sm:$0xff] %v638_v2  ;;  %v639_v13 = vmax.f32 %v575_v3, 0.0  ;;  %v576_v14 = vadd.f32 %v1205_v25, %v505_v5  ;;  %v174_v15 = vmul.f32 %v807_v7, %v1167_v1  ;;  %v810_v16 = vunpack.c.l.bf16 %v1039_v0 }
  0x1f   :  { %v506_v17 = vadd.f32 %v442_v61, %v243_v9  ;;  %v244_v18 = vadd.f32 %v1180_v6, %v173_v10  ;;  %v444_v19 = vmul.f32 %v935_v12, %v1175_v4  ;;  %v938_v20 = vunpack.c.l.bf16 %v1070_v8 }
  0x20   :  { %703 = vst [vmem:[#allocation2 + $0x58] sm:$0xff] %v639_v13  ;;  %v640_v22 = vmax.f32 %v576_v14, 0.0  ;;  %v245_v23 = vadd.f32 %v1180_v6, %v174_v15  ;;  %v175_v24 = vmul.f32 %v810_v16, %v1167_v1  ;;  %v811_v26 = vunpack.c.h.bf16 %v1039_v0  ;;  %v1043_v15 = vld [vmem:[%s1652_s0 + $0x60] sm:$0xff]  }
  0x21   :  { %v577_v28 = vadd.f32 %v1205_v25, %v506_v17  ;;  %v507_v29 = vadd.f32 %v443_v11, %v244_v18  ;;  %v445_v30 = vmul.f32 %v938_v20, %v1175_v4  ;;  %v939_v31 = vunpack.c.h.bf16 %v1070_v8  ;;  %v1074_v20 = vld [vmem:[%s1655_s3 + $0x60] sm:$0xff]  }
  0x22   :  { %704 = vst [vmem:[#allocation2 + $0x60] sm:$0xff] %v640_v22  ;;  %v508_v32 = vadd.f32 %v444_v19, %v245_v23  ;;  %v246_v33 = vadd.f32 %v1180_v6, %v175_v24  ;;  %v176_v34 = vmul.f32 %v811_v26, %v1167_v1  ;;  %v814_v35 = vunpack.c.l.bf16 %v1040_v21 }
  0x23   :  { %v641_v36 = vmax.f32 %v577_v28, 0.0  ;;  %v578_v37 = vadd.f32 %v1205_v25, %v507_v29  ;;  %v446_v38 = vmul.f32 %v939_v31, %v1175_v4  ;;  %v942_v39 = vunpack.c.l.bf16 %v1071_v27 }
  0x24   :  { %v579_v40 = vadd.f32 %v1205_v25, %v508_v32  ;;  %v509_v41 = vadd.f32 %v445_v30, %v246_v33  ;;  %v247_v42 = vadd.f32 %v1180_v6, %v176_v34  ;;  %v177_v43 = vmul.f32 %v814_v35, %v1167_v1 }
  0x25   :  { %705 = vst [vmem:[#allocation2 + $0x68] sm:$0xff] %v641_v36  ;;  %v642_v46 = vmax.f32 %v578_v37, 0.0  ;;  %v447_v47 = vmul.f32 %v942_v39, %v1175_v4  ;;  %v815_v48 = vunpack.c.h.bf16 %v1040_v21  ;;  %v943_v49 = vunpack.c.h.bf16 %v1071_v27  ;;  %v1075_v39 = vld [vmem:[%s1655_s3 + $0x68] sm:$0xff]  }
  0x26   :  { %v643_v50 = vmax.f32 %v579_v40, 0.0  ;;  %v580_v51 = vadd.f32 %v1205_v25, %v509_v41  ;;  %v510_v52 = vadd.f32 %v446_v38, %v247_v42  ;;  %v248_v53 = vadd.f32 %v1180_v6, %v177_v43  ;;  %v1044_v38 = vld [vmem:[%s1652_s0 + $0x68] sm:$0xff]  }
  0x27   :  { %706 = vst [vmem:[#allocation2 + $0x70] sm:$0xff] %v642_v46  ;;  %v178_v54 = vmul.f32 %v815_v48, %v1167_v1  ;;  %v448_v55 = vmul.f32 %v943_v49, %v1175_v4  ;;  %v818_v56 = vunpack.c.l.bf16 %v1041_v44  ;;  %v946_v57 = vunpack.c.l.bf16 %v1072_v45 }
  0x28   :  { %707 = vst [vmem:[#allocation2 + $0x78] sm:$0xff] %v643_v50  ;;  %v644_v59 = vmax.f32 %v580_v51, 0.0  ;;  %v581_v60 = vadd.f32 %v1205_v25, %v510_v52  ;;  %v511_v61 = vadd.f32 %v447_v47, %v248_v53  ;;  %v819_v62 = vunpack.c.h.bf16 %v1041_v44  ;;  %v1045_v52 = vld [vmem:[%s1652_s0 + $0x70] sm:$0xff]  }
  0x29   :  { %v249_v0 = vadd.f32 %v1180_v6, %v178_v54  ;;  %v179_v2 = vmul.f32 %v818_v56, %v1167_v1  ;;  %v449_v3 = vmul.f32 %v946_v57, %v1175_v4  ;;  %v947_v5 = vunpack.c.h.bf16 %v1072_v45  ;;  %v1076_v57 = vld [vmem:[%s1655_s3 + $0x70] sm:$0xff]  }
  0x2a   :  { %708 = vst [vmem:[#allocation2 + $0x80] sm:$0xff] %v644_v59  ;;  %v645_v7 = vmax.f32 %v581_v60, 0.0  ;;  %v582_v8 = vadd.f32 %v1205_v25, %v511_v61  ;;  %v180_v9 = vmul.f32 %v819_v62, %v1167_v1  ;;  %v822_v10 = vunpack.c.l.bf16 %v1042_v58 }
  0x2b   :  { %v512_v11 = vadd.f32 %v448_v55, %v249_v0  ;;  %v250_v12 = vadd.f32 %v1180_v6, %v179_v2  ;;  %v450_v13 = vmul.f32 %v947_v5, %v1175_v4  ;;  %v950_v14 = vunpack.c.l.bf16 %v1073_v63 }
  0x2c   :  { %709 = vst [vmem:[#allocation2 + $0x88] sm:$0xff] %v645_v7  ;;  %v646_v16 = vmax.f32 %v582_v8, 0.0  ;;  %v251_v17 = vadd.f32 %v1180_v6, %v180_v9  ;;  %v181_v18 = vmul.f32 %v822_v10, %v1167_v1  ;;  %v823_v19 = vunpack.c.h.bf16 %v1042_v58  ;;  %v1046_v9 = vld [vmem:[%s1652_s0 + $0x78] sm:$0xff]  }
  0x2d   :  { %v583_v21 = vadd.f32 %v1205_v25, %v512_v11  ;;  %v513_v22 = vadd.f32 %v449_v3, %v250_v12  ;;  %v451_v23 = vmul.f32 %v950_v14, %v1175_v4  ;;  %v951_v24 = vunpack.c.h.bf16 %v1073_v63  ;;  %v1077_v14 = vld [vmem:[%s1655_s3 + $0x78] sm:$0xff]  }
  0x2e   :  { %710 = vst [vmem:[#allocation2 + $0x90] sm:$0xff] %v646_v16  ;;  %v514_v26 = vadd.f32 %v450_v13, %v251_v17  ;;  %v252_v27 = vadd.f32 %v1180_v6, %v181_v18  ;;  %v182_v28 = vmul.f32 %v823_v19, %v1167_v1  ;;  %v826_v29 = vunpack.c.l.bf16 %v1043_v15 }
  0x2f   :  { %v647_v30 = vmax.f32 %v583_v21, 0.0  ;;  %v584_v31 = vadd.f32 %v1205_v25, %v513_v22  ;;  %v452_v32 = vmul.f32 %v951_v24, %v1175_v4  ;;  %v954_v33 = vunpack.c.l.bf16 %v1074_v20 }
  0x30   :  { %v585_v34 = vadd.f32 %v1205_v25, %v514_v26  ;;  %v515_v35 = vadd.f32 %v451_v23, %v252_v27  ;;  %v253_v36 = vadd.f32 %v1180_v6, %v182_v28  ;;  %v183_v37 = vmul.f32 %v826_v29, %v1167_v1 }
  0x31   :  { %711 = vst [vmem:[#allocation2 + $0x98] sm:$0xff] %v647_v30  ;;  %v648_v40 = vmax.f32 %v584_v31, 0.0  ;;  %v453_v41 = vmul.f32 %v954_v33, %v1175_v4  ;;  %v827_v42 = vunpack.c.h.bf16 %v1043_v15  ;;  %v955_v43 = vunpack.c.h.bf16 %v1074_v20  ;;  %v1078_v33 = vld [vmem:[%s1655_s3 + $0x80] sm:$0xff]  }
  0x32   :  { %v649_v44 = vmax.f32 %v585_v34, 0.0  ;;  %v586_v45 = vadd.f32 %v1205_v25, %v515_v35  ;;  %v516_v46 = vadd.f32 %v452_v32, %v253_v36  ;;  %v254_v47 = vadd.f32 %v1180_v6, %v183_v37  ;;  %v1047_v32 = vld [vmem:[%s1652_s0 + $0x80] sm:$0xff]  }
  0x33   :  { %712 = vst [vmem:[#allocation2 + $0xa0] sm:$0xff] %v648_v40  ;;  %v184_v48 = vmul.f32 %v827_v42, %v1167_v1  ;;  %v454_v49 = vmul.f32 %v955_v43, %v1175_v4  ;;  %v830_v50 = vunpack.c.l.bf16 %v1044_v38  ;;  %v958_v51 = vunpack.c.l.bf16 %v1075_v39 }
  0x34   :  { %713 = vst [vmem:[#allocation2 + $0xa8] sm:$0xff] %v649_v44  ;;  %v650_v53 = vmax.f32 %v586_v45, 0.0  ;;  %v587_v54 = vadd.f32 %v1205_v25, %v516_v46  ;;  %v517_v55 = vadd.f32 %v453_v41, %v254_v47  ;;  %v831_v56 = vunpack.c.h.bf16 %v1044_v38  ;;  %v1048_v46 = vld [vmem:[%s1652_s0 + $0x88] sm:$0xff]  }
  0x35   :  { %v255_v58 = vadd.f32 %v1180_v6, %v184_v48  ;;  %v185_v59 = vmul.f32 %v830_v50, %v1167_v1  ;;  %v455_v60 = vmul.f32 %v958_v51, %v1175_v4  ;;  %v959_v61 = vunpack.c.h.bf16 %v1075_v39  ;;  %v1079_v51 = vld [vmem:[%s1655_s3 + $0x88] sm:$0xff]  }
  0x36   :  { %714 = vst [vmem:[#allocation2 + $0xb0] sm:$0xff] %v650_v53  ;;  %v651_v62 = vmax.f32 %v587_v54, 0.0  ;;  %v588_v63 = vadd.f32 %v1205_v25, %v517_v55  ;;  %v186_v0 = vmul.f32 %v831_v56, %v1167_v1  ;;  %v834_v2 = vunpack.c.l.bf16 %v1045_v52 }
  0x37   :  { %v518_v3 = vadd.f32 %v454_v49, %v255_v58  ;;  %v256_v5 = vadd.f32 %v1180_v6, %v185_v59  ;;  %v456_v7 = vmul.f32 %v959_v61, %v1175_v4  ;;  %v962_v8 = vunpack.c.l.bf16 %v1076_v57 }
  0x38   :  { %715 = vst [vmem:[#allocation2 + $0xb8] sm:$0xff] %v651_v62  ;;  %v652_v10 = vmax.f32 %v588_v63, 0.0  ;;  %v257_v11 = vadd.f32 %v1180_v6, %v186_v0  ;;  %v187_v12 = vmul.f32 %v834_v2, %v1167_v1  ;;  %v835_v13 = vunpack.c.h.bf16 %v1045_v52  ;;  %v1049_v0 = vld [vmem:[%s1652_s0 + $0x90] sm:$0xff]  }
  0x39   :  { %v589_v15 = vadd.f32 %v1205_v25, %v518_v3  ;;  %v519_v16 = vadd.f32 %v455_v60, %v256_v5  ;;  %v457_v17 = vmul.f32 %v962_v8, %v1175_v4  ;;  %v963_v18 = vunpack.c.h.bf16 %v1076_v57  ;;  %v1080_v8 = vld [vmem:[%s1655_s3 + $0x90] sm:$0xff]  }
  0x3a   :  { %716 = vst [vmem:[#allocation2 + $0xc0] sm:$0xff] %v652_v10  ;;  %v520_v19 = vadd.f32 %v456_v7, %v257_v11  ;;  %v258_v20 = vadd.f32 %v1180_v6, %v187_v12  ;;  %v188_v21 = vmul.f32 %v835_v13, %v1167_v1  ;;  %v838_v22 = vunpack.c.l.bf16 %v1046_v9 }
  0x3b   :  { %v653_v23 = vmax.f32 %v589_v15, 0.0  ;;  %v590_v24 = vadd.f32 %v1205_v25, %v519_v16  ;;  %v458_v26 = vmul.f32 %v963_v18, %v1175_v4  ;;  %v966_v27 = vunpack.c.l.bf16 %v1077_v14 }
  0x3c   :  { %v591_v28 = vadd.f32 %v1205_v25, %v520_v19  ;;  %v521_v29 = vadd.f32 %v457_v17, %v258_v20  ;;  %v259_v30 = vadd.f32 %v1180_v6, %v188_v21  ;;  %v189_v31 = vmul.f32 %v838_v22, %v1167_v1 }
  0x3d   :  { %717 = vst [vmem:[#allocation2 + $0xc8] sm:$0xff] %v653_v23  ;;  %v654_v34 = vmax.f32 %v590_v24, 0.0  ;;  %v459_v35 = vmul.f32 %v966_v27, %v1175_v4  ;;  %v839_v36 = vunpack.c.h.bf16 %v1046_v9  ;;  %v967_v37 = vunpack.c.h.bf16 %v1077_v14  ;;  %v1081_v27 = vld [vmem:[%s1655_s3 + $0x98] sm:$0xff]  }
  0x3e   :  { %v655_v38 = vmax.f32 %v591_v28, 0.0  ;;  %v592_v39 = vadd.f32 %v1205_v25, %v521_v29  ;;  %v522_v40 = vadd.f32 %v458_v26, %v259_v30  ;;  %v260_v41 = vadd.f32 %v1180_v6, %v189_v31  ;;  %v1050_v26 = vld [vmem:[%s1652_s0 + $0x98] sm:$0xff]  }
  0x3f   :  { %718 = vst [vmem:[#allocation2 + $0xd0] sm:$0xff] %v654_v34  ;;  %v190_v42 = vmul.f32 %v839_v36, %v1167_v1  ;;  %v460_v43 = vmul.f32 %v967_v37, %v1175_v4  ;;  %v842_v44 = vunpack.c.l.bf16 %v1047_v32  ;;  %v970_v45 = vunpack.c.l.bf16 %v1078_v33 }
  0x40   :  { %719 = vst [vmem:[#allocation2 + $0xd8] sm:$0xff] %v655_v38  ;;  %v656_v47 = vmax.f32 %v592_v39, 0.0  ;;  %v593_v48 = vadd.f32 %v1205_v25, %v522_v40  ;;  %v523_v49 = vadd.f32 %v459_v35, %v260_v41  ;;  %v843_v50 = vunpack.c.h.bf16 %v1047_v32  ;;  %v1051_v40 = vld [vmem:[%s1652_s0 + $0xa0] sm:$0xff]  }
  0x41   :  { %v261_v52 = vadd.f32 %v1180_v6, %v190_v42  ;;  %v191_v53 = vmul.f32 %v842_v44, %v1167_v1  ;;  %v461_v54 = vmul.f32 %v970_v45, %v1175_v4  ;;  %v971_v55 = vunpack.c.h.bf16 %v1078_v33  ;;  %v1082_v45 = vld [vmem:[%s1655_s3 + $0xa0] sm:$0xff]  }
  0x42   :  { %720 = vst [vmem:[#allocation2 + $0xe0] sm:$0xff] %v656_v47  ;;  %v657_v56 = vmax.f32 %v593_v48, 0.0  ;;  %v594_v57 = vadd.f32 %v1205_v25, %v523_v49  ;;  %v192_v58 = vmul.f32 %v843_v50, %v1167_v1  ;;  %v846_v59 = vunpack.c.l.bf16 %v1048_v46 }
  0x43   :  { %v524_v60 = vadd.f32 %v460_v43, %v261_v52  ;;  %v262_v61 = vadd.f32 %v1180_v6, %v191_v53  ;;  %v462_v62 = vmul.f32 %v971_v55, %v1175_v4  ;;  %v974_v63 = vunpack.c.l.bf16 %v1079_v51 }
  0x44   :  { %721 = vst [vmem:[#allocation2 + $0xe8] sm:$0xff] %v657_v56  ;;  %v658_v2 = vmax.f32 %v594_v57, 0.0  ;;  %v263_v3 = vadd.f32 %v1180_v6, %v192_v58  ;;  %v193_v5 = vmul.f32 %v846_v59, %v1167_v1  ;;  %v847_v7 = vunpack.c.h.bf16 %v1048_v46  ;;  %v1052_v58 = vld [vmem:[%s1652_s0 + $0xa8] sm:$0xff]  }
  0x45   :  { %v595_v9 = vadd.f32 %v1205_v25, %v524_v60  ;;  %v525_v10 = vadd.f32 %v461_v54, %v262_v61  ;;  %v463_v11 = vmul.f32 %v974_v63, %v1175_v4  ;;  %v975_v12 = vunpack.c.h.bf16 %v1079_v51  ;;  %v1083_v63 = vld [vmem:[%s1655_s3 + $0xa8] sm:$0xff]  }
  0x46   :  { %722 = vst [vmem:[#allocation2 + $0xf0] sm:$0xff] %v658_v2  ;;  %v526_v13 = vadd.f32 %v462_v62, %v263_v3  ;;  %v264_v14 = vadd.f32 %v1180_v6, %v193_v5  ;;  %v194_v15 = vmul.f32 %v847_v7, %v1167_v1  ;;  %v850_v16 = vunpack.c.l.bf16 %v1049_v0 }
  0x47   :  { %v659_v17 = vmax.f32 %v595_v9, 0.0  ;;  %v596_v18 = vadd.f32 %v1205_v25, %v525_v10  ;;  %v464_v19 = vmul.f32 %v975_v12, %v1175_v4  ;;  %v978_v20 = vunpack.c.l.bf16 %v1080_v8 }
  0x48   :  { %v597_v21 = vadd.f32 %v1205_v25, %v526_v13  ;;  %v527_v22 = vadd.f32 %v463_v11, %v264_v14  ;;  %v265_v23 = vadd.f32 %v1180_v6, %v194_v15  ;;  %v195_v24 = vmul.f32 %v850_v16, %v1167_v1 }
  0x49   :  { %723 = vst [vmem:[#allocation2 + $0xf8] sm:$0xff] %v659_v17  ;;  %v660_v28 = vmax.f32 %v596_v18, 0.0  ;;  %v465_v29 = vmul.f32 %v978_v20, %v1175_v4  ;;  %v851_v30 = vunpack.c.h.bf16 %v1049_v0  ;;  %v979_v31 = vunpack.c.h.bf16 %v1080_v8  ;;  %v1084_v20 = vld [vmem:[%s1655_s3 + $0xb0] sm:$0xff]  }
  0x4a   :  { %v661_v32 = vmax.f32 %v597_v21, 0.0  ;;  %v598_v33 = vadd.f32 %v1205_v25, %v527_v22  ;;  %v528_v34 = vadd.f32 %v464_v19, %v265_v23  ;;  %v266_v35 = vadd.f32 %v1180_v6, %v195_v24  ;;  %v1053_v19 = vld [vmem:[%s1652_s0 + $0xb0] sm:$0xff]  }
  0x4b   :  { %724 = vst [vmem:[#allocation2 + $0x100] sm:$0xff] %v660_v28  ;;  %v196_v36 = vmul.f32 %v851_v30, %v1167_v1  ;;  %v466_v37 = vmul.f32 %v979_v31, %v1175_v4  ;;  %v854_v38 = vunpack.c.l.bf16 %v1050_v26  ;;  %v982_v39 = vunpack.c.l.bf16 %v1081_v27 }
  0x4c   :  { %725 = vst [vmem:[#allocation2 + $0x108] sm:$0xff] %v661_v32  ;;  %v662_v41 = vmax.f32 %v598_v33, 0.0  ;;  %v599_v42 = vadd.f32 %v1205_v25, %v528_v34  ;;  %v529_v43 = vadd.f32 %v465_v29, %v266_v35  ;;  %v855_v44 = vunpack.c.h.bf16 %v1050_v26  ;;  %v1054_v34 = vld [vmem:[%s1652_s0 + $0xb8] sm:$0xff]  }
  0x4d   :  { %v267_v46 = vadd.f32 %v1180_v6, %v196_v36  ;;  %v197_v47 = vmul.f32 %v854_v38, %v1167_v1  ;;  %v467_v48 = vmul.f32 %v982_v39, %v1175_v4  ;;  %v983_v49 = vunpack.c.h.bf16 %v1081_v27  ;;  %v1085_v39 = vld [vmem:[%s1655_s3 + $0xb8] sm:$0xff]  }
  0x4e   :  { %726 = vst [vmem:[#allocation2 + $0x110] sm:$0xff] %v662_v41  ;;  %v663_v50 = vmax.f32 %v599_v42, 0.0  ;;  %v600_v51 = vadd.f32 %v1205_v25, %v529_v43  ;;  %v198_v52 = vmul.f32 %v855_v44, %v1167_v1  ;;  %v858_v53 = vunpack.c.l.bf16 %v1051_v40 }
  0x4f   :  { %v530_v54 = vadd.f32 %v466_v37, %v267_v46  ;;  %v268_v55 = vadd.f32 %v1180_v6, %v197_v47  ;;  %v468_v56 = vmul.f32 %v983_v49, %v1175_v4  ;;  %v986_v57 = vunpack.c.l.bf16 %v1082_v45 }
  0x50   :  { %727 = vst [vmem:[#allocation2 + $0x118] sm:$0xff] %v663_v50  ;;  %v664_v59 = vmax.f32 %v600_v51, 0.0  ;;  %v269_v60 = vadd.f32 %v1180_v6, %v198_v52  ;;  %v199_v61 = vmul.f32 %v858_v53, %v1167_v1  ;;  %v859_v62 = vunpack.c.h.bf16 %v1051_v40  ;;  %v1055_v52 = vld [vmem:[%s1652_s0 + $0xc0] sm:$0xff]  }
  0x51   :  { %v601_v0 = vadd.f32 %v1205_v25, %v530_v54  ;;  %v531_v2 = vadd.f32 %v467_v48, %v268_v55  ;;  %v469_v3 = vmul.f32 %v986_v57, %v1175_v4  ;;  %v987_v5 = vunpack.c.h.bf16 %v1082_v45  ;;  %v1086_v57 = vld [vmem:[%s1655_s3 + $0xc0] sm:$0xff]  }
  0x52   :  { %728 = vst [vmem:[#allocation2 + $0x120] sm:$0xff] %v664_v59  ;;  %v532_v7 = vadd.f32 %v468_v56, %v269_v60  ;;  %v270_v8 = vadd.f32 %v1180_v6, %v199_v61  ;;  %v200_v9 = vmul.f32 %v859_v62, %v1167_v1  ;;  %v862_v10 = vunpack.c.l.bf16 %v1052_v58 }
  0x53   :  { %v665_v11 = vmax.f32 %v601_v0, 0.0  ;;  %v602_v12 = vadd.f32 %v1205_v25, %v531_v2  ;;  %v470_v13 = vmul.f32 %v987_v5, %v1175_v4  ;;  %v990_v14 = vunpack.c.l.bf16 %v1083_v63 }
  0x54   :  { %v603_v15 = vadd.f32 %v1205_v25, %v532_v7  ;;  %v533_v16 = vadd.f32 %v469_v3, %v270_v8  ;;  %v271_v17 = vadd.f32 %v1180_v6, %v200_v9  ;;  %v201_v18 = vmul.f32 %v862_v10, %v1167_v1 }
  0x55   :  { %729 = vst [vmem:[#allocation2 + $0x128] sm:$0xff] %v665_v11  ;;  %v666_v21 = vmax.f32 %v602_v12, 0.0  ;;  %v471_v22 = vmul.f32 %v990_v14, %v1175_v4  ;;  %v863_v23 = vunpack.c.h.bf16 %v1052_v58  ;;  %v991_v24 = vunpack.c.h.bf16 %v1083_v63  ;;  %v1087_v14 = vld [vmem:[%s1655_s3 + $0xc8] sm:$0xff]  }
  0x56   :  { %v667_v26 = vmax.f32 %v603_v15, 0.0  ;;  %v604_v27 = vadd.f32 %v1205_v25, %v533_v16  ;;  %v534_v28 = vadd.f32 %v470_v13, %v271_v17  ;;  %v272_v29 = vadd.f32 %v1180_v6, %v201_v18  ;;  %v1056_v13 = vld [vmem:[%s1652_s0 + $0xc8] sm:$0xff]  }
  0x57   :  { %730 = vst [vmem:[#allocation2 + $0x130] sm:$0xff] %v666_v21  ;;  %v202_v30 = vmul.f32 %v863_v23, %v1167_v1  ;;  %v472_v31 = vmul.f32 %v991_v24, %v1175_v4  ;;  %v866_v32 = vunpack.c.l.bf16 %v1053_v19  ;;  %v994_v33 = vunpack.c.l.bf16 %v1084_v20 }
  0x58   :  { %731 = vst [vmem:[#allocation2 + $0x138] sm:$0xff] %v667_v26  ;;  %v668_v35 = vmax.f32 %v604_v27, 0.0  ;;  %v605_v36 = vadd.f32 %v1205_v25, %v534_v28  ;;  %v535_v37 = vadd.f32 %v471_v22, %v272_v29  ;;  %v867_v38 = vunpack.c.h.bf16 %v1053_v19  ;;  %v1057_v28 = vld [vmem:[%s1652_s0 + $0xd0] sm:$0xff]  }
  0x59   :  { %v273_v40 = vadd.f32 %v1180_v6, %v202_v30  ;;  %v203_v41 = vmul.f32 %v866_v32, %v1167_v1  ;;  %v473_v42 = vmul.f32 %v994_v33, %v1175_v4  ;;  %v995_v43 = vunpack.c.h.bf16 %v1084_v20  ;;  %v1088_v33 = vld [vmem:[%s1655_s3 + $0xd0] sm:$0xff]  }
  0x5a   :  { %732 = vst [vmem:[#allocation2 + $0x140] sm:$0xff] %v668_v35  ;;  %v669_v44 = vmax.f32 %v605_v36, 0.0  ;;  %v606_v45 = vadd.f32 %v1205_v25, %v535_v37  ;;  %v204_v46 = vmul.f32 %v867_v38, %v1167_v1  ;;  %v870_v47 = vunpack.c.l.bf16 %v1054_v34 }
  0x5b   :  { %v536_v48 = vadd.f32 %v472_v31, %v273_v40  ;;  %v274_v49 = vadd.f32 %v1180_v6, %v203_v41  ;;  %v474_v50 = vmul.f32 %v995_v43, %v1175_v4  ;;  %v998_v51 = vunpack.c.l.bf16 %v1085_v39 }
  0x5c   :  { %733 = vst [vmem:[#allocation2 + $0x148] sm:$0xff] %v669_v44  ;;  %v670_v53 = vmax.f32 %v606_v45, 0.0  ;;  %v275_v54 = vadd.f32 %v1180_v6, %v204_v46  ;;  %v205_v55 = vmul.f32 %v870_v47, %v1167_v1  ;;  %v871_v56 = vunpack.c.h.bf16 %v1054_v34  ;;  %v1058_v46 = vld [vmem:[%s1652_s0 + $0xd8] sm:$0xff]  }
  0x5d   :  { %v607_v58 = vadd.f32 %v1205_v25, %v536_v48  ;;  %v537_v59 = vadd.f32 %v473_v42, %v274_v49  ;;  %v475_v60 = vmul.f32 %v998_v51, %v1175_v4  ;;  %v999_v61 = vunpack.c.h.bf16 %v1085_v39  ;;  %v1554_v49 = vld [vmem:[%s1653_s1] ss:$0 sm:$0xff] }
  0x5e   :  { %734 = vst [vmem:[#allocation2 + $0x150] sm:$0xff] %v670_v53  ;;  %v538_v62 = vadd.f32 %v474_v50, %v275_v54  ;;  %v276_v63 = vadd.f32 %v1180_v6, %v205_v55  ;;  %v206_v0 = vmul.f32 %v871_v56, %v1167_v1  ;;  %v874_v2 = vunpack.c.l.bf16 %v1055_v52  ;;  %v1564_v53 = vld [vmem:[%s1656_s4] ss:$0 sm:$0xff] }
  0x5f   :  { %v671_v3 = vmax.f32 %v607_v58, 0.0  ;;  %v608_v5 = vadd.f32 %v1205_v25, %v537_v59  ;;  %v476_v7 = vmul.f32 %v999_v61, %v1175_v4  ;;  %v1002_v8 = vunpack.c.l.bf16 %v1086_v57  ;;  %v1570_v56 = vld [vmem:[%s1654_s2] ss:$0 sm:$0xff] }
  0x60   :  { %v609_v9 = vadd.f32 %v1205_v25, %v538_v62  ;;  %v539_v10 = vadd.f32 %v475_v60, %v276_v63  ;;  %v277_v11 = vadd.f32 %v1180_v6, %v206_v0  ;;  %v207_v12 = vmul.f32 %v874_v2, %v1167_v1 }
  0x61   :  { %735 = vst [vmem:[#allocation2 + $0x158] sm:$0xff] %v671_v3  ;;  %v672_v15 = vmax.f32 %v608_v5, 0.0  ;;  %v477_v16 = vmul.f32 %v1002_v8, %v1175_v4  ;;  %v875_v17 = vunpack.c.h.bf16 %v1055_v52  ;;  %v1003_v18 = vunpack.c.h.bf16 %v1086_v57  ;;  %v1090_v8 = vld [vmem:[%s1655_s3 + $0xe0] sm:$0xff]  }
  0x62   :  { %v673_v19 = vmax.f32 %v609_v9, 0.0  ;;  %v610_v20 = vadd.f32 %v1205_v25, %v539_v10  ;;  %v540_v21 = vadd.f32 %v476_v7, %v277_v11  ;;  %v278_v22 = vadd.f32 %v1180_v6, %v207_v12  ;;  %v1059_v7 = vld [vmem:[%s1652_s0 + $0xe0] sm:$0xff]  }
  0x63   :  { %736 = vst [vmem:[#allocation2 + $0x160] sm:$0xff] %v672_v15  ;;  %v208_v23 = vmul.f32 %v875_v17, %v1167_v1  ;;  %v478_v24 = vmul.f32 %v1003_v18, %v1175_v4  ;;  %v878_v26 = vunpack.c.l.bf16 %v1056_v13  ;;  %v1006_v27 = vunpack.c.l.bf16 %v1087_v14 }
  0x64   :  { %737 = vst [vmem:[#allocation2 + $0x168] sm:$0xff] %v673_v19  ;;  %v674_v29 = vmax.f32 %v610_v20, 0.0  ;;  %v611_v30 = vadd.f32 %v1205_v25, %v540_v21  ;;  %v541_v31 = vadd.f32 %v477_v16, %v278_v22  ;;  %v879_v32 = vunpack.c.h.bf16 %v1056_v13  ;;  %v1589_v13 = vld [vmem:[%s1657_s5] ss:$0 sm:$0xff]  ;;  %v1060_v21 = vld [vmem:[%s1652_s0 + $0xe8] sm:$0xff]  }
  0x65   :  { %v279_v34 = vadd.f32 %v1180_v6, %v208_v23  ;;  %v209_v35 = vmul.f32 %v878_v26, %v1167_v1  ;;  %v479_v36 = vmul.f32 %v1006_v27, %v1175_v4  ;;  %v1007_v37 = vunpack.c.h.bf16 %v1087_v14  ;;  %v1091_v27 = vld [vmem:[%s1655_s3 + $0xe8] sm:$0xff]  }
  0x66   :  { %738 = vst [vmem:[#allocation2 + $0x170] sm:$0xff] %v674_v29  ;;  %v675_v38 = vmax.f32 %v611_v30, 0.0  ;;  %v612_v39 = vadd.f32 %v1205_v25, %v541_v31  ;;  %v210_v40 = vmul.f32 %v879_v32, %v1167_v1  ;;  %v882_v41 = vunpack.c.l.bf16 %v1057_v28 }
  0x67   :  { %v542_v42 = vadd.f32 %v478_v24, %v279_v34  ;;  %v280_v43 = vadd.f32 %v1180_v6, %v209_v35  ;;  %v480_v44 = vmul.f32 %v1007_v37, %v1175_v4  ;;  %v1010_v45 = vunpack.c.l.bf16 %v1088_v33  ;;  %v1089_v4 = vld [vmem:[%s1655_s3 + $0xd8] sm:$0xff]  }
  0x68   :  { %739 = vst [vmem:[#allocation2 + $0x178] sm:$0xff] %v675_v38  ;;  %v676_v47 = vmax.f32 %v612_v39, 0.0  ;;  %v281_v48 = vadd.f32 %v1180_v6, %v210_v40  ;;  %v211_v1 = vmul.f32 %v1554_v49, %v882_v41  ;;  %v883_v50 = vunpack.c.h.bf16 %v1057_v28  ;;  %v1061_v40 = vld [vmem:[%s1652_s0 + $0xf0] sm:$0xff]  }
  0x69   :  { %v613_v51 = vadd.f32 %v1205_v25, %v542_v42  ;;  %v543_v52 = vadd.f32 %v479_v36, %v280_v43  ;;  %v481_v6 = vmul.f32 %v1564_v53, %v1010_v45  ;;  %v1011_v54 = vunpack.c.h.bf16 %v1088_v33  ;;  %v1092_v45 = vld [vmem:[%s1655_s3 + $0xf0] sm:$0xff]  }
  0x6a   :  { %740 = vst [vmem:[#allocation2 + $0x180] sm:$0xff] %v676_v47  ;;  %v544_v55 = vadd.f32 %v480_v44, %v281_v48  ;;  %v282_v57 = vadd.f32 %v1570_v56, %v211_v1  ;;  %v212_v58 = vmul.f32 %v1554_v49, %v883_v50  ;;  %v886_v59 = vunpack.c.l.bf16 %v1058_v46 }
  0x6b   :  { %v677_v60 = vmax.f32 %v613_v51, 0.0  ;;  %v614_v61 = vadd.f32 %v1205_v25, %v543_v52  ;;  %v482_v62 = vmul.f32 %v1564_v53, %v1011_v54  ;;  %v1014_v63 = vunpack.c.l.bf16 %v1089_v4 }
  0x6c   :  { %v615_v0 = vadd.f32 %v1205_v25, %v544_v55  ;;  %v545_v2 = vadd.f32 %v481_v6, %v282_v57  ;;  %v283_v3 = vadd.f32 %v1570_v56, %v212_v58  ;;  %v213_v5 = vmul.f32 %v1554_v49, %v886_v59 }
  0x6d   :  { %741 = vst [vmem:[#allocation2 + $0x188] sm:$0xff] %v677_v60  ;;  %v678_v9 = vmax.f32 %v614_v61, 0.0  ;;  %v483_v10 = vmul.f32 %v1564_v53, %v1014_v63  ;;  %v887_v11 = vunpack.c.h.bf16 %v1058_v46  ;;  %v1015_v12 = vunpack.c.h.bf16 %v1089_v4  ;;  %v1093_v63 = vld [vmem:[%s1655_s3 + $0xf8] sm:$0xff]  }
  0x6e   :  { %v679_v25 = vmax.f32 %v615_v0, 0.0  ;;  %v616_v14 = vadd.f32 %v1589_v13, %v545_v2  ;;  %v546_v15 = vadd.f32 %v482_v62, %v283_v3  ;;  %v284_v16 = vadd.f32 %v1570_v56, %v213_v5  ;;  %v1062_v62 = vld [vmem:[%s1652_s0 + $0xf8] sm:$0xff]   ;;  %s1123_s0 = smov [#allocation2]  }
  0x6f   :  { %742 = vst [vmem:[#allocation2 + $0x190] sm:$0xff] %v678_v9  ;;  %v214_v17 = vmul.f32 %v1554_v49, %v887_v11  ;;  %v484_v18 = vmul.f32 %v1564_v53, %v1015_v12  ;;  %v890_v19 = vunpack.c.l.bf16 %v1059_v7  ;;  %v1018_v20 = vunpack.c.l.bf16 %v1090_v8  ;;  %s761_s3 = sshll.u32 %s1123_s0, 4  ;;  %s762_s3 = int_to_ptr.vmem [resolvable:$true] %s761_s3 }
  0x70   :  { %743 = vst [vmem:[#allocation2 + $0x198] sm:$0xff] %v679_v25  ;;  %v680_v22 = vmax.f32 %v616_v14, 0.0  ;;  %v617_v23 = vadd.f32 %v1589_v13, %v546_v15  ;;  %v547_v24 = vadd.f32 %v483_v10, %v284_v16  ;;  %v891_v26 = vunpack.c.h.bf16 %v1059_v7  ;;  %s1101_s17 = scalar_lea.vmem %s762_s3, 8192  ;;  %p1106_p1 = scmp.lt.s32.totalorder %s762_s3, %s762_s3 }
  0x71   :  { %v285_v28 = vadd.f32 %v1570_v56, %v214_v17  ;;  %v215_v29 = vmul.f32 %v1554_v49, %v890_v19  ;;  %v485_v30 = vmul.f32 %v1564_v53, %v1018_v20  ;;  %v1019_v31 = vunpack.c.h.bf16 %v1090_v8  ;;  %p1102_p0 = scmp.ne.s32.totalorder %s762_s3, %s1101_s17  ;;  %p1107_p2 = scmp.lt.s32.totalorder %s1101_s17, %s1101_s17 }
  0x72   :  { %744 = vst [vmem:[#allocation2 + $0x1a0] sm:$0xff] %v680_v22  ;;  %v681_v32 = vmax.f32 %v617_v23, 0.0  ;;  %v618_v33 = vadd.f32 %v1589_v13, %v547_v24  ;;  %v216_v34 = vmul.f32 %v1554_v49, %v891_v26  ;;  %v894_v35 = vunpack.c.l.bf16 %v1060_v21 }
  0x73   :  { %v548_v36 = vadd.f32 %v484_v18, %v285_v28  ;;  %v286_v37 = vadd.f32 %v1570_v56, %v215_v29  ;;  %v486_v38 = vmul.f32 %v1564_v53, %v1019_v31  ;;  %v1022_v39 = vunpack.c.l.bf16 %v1091_v27  ;;  %p1108_p3 = por %p1107_p2, %p1106_p1 }
  0x74   :  { %745 = vst [vmem:[#allocation2 + $0x1a8] sm:$0xff] %v681_v32  ;;  %v682_v41 = vmax.f32 %v618_v33, 0.0  ;;  %v287_v42 = vadd.f32 %v1570_v56, %v216_v34  ;;  %v217_v43 = vmul.f32 %v1554_v49, %v894_v35  ;;  %v895_v44 = vunpack.c.h.bf16 %v1060_v21 }
  0x75   :  { %v619_v46 = vadd.f32 %v1589_v13, %v548_v36  ;;  %v549_v47 = vadd.f32 %v485_v30, %v286_v37  ;;  %v487_v48 = vmul.f32 %v1564_v53, %v1022_v39  ;;  %v1023_v1 = vunpack.c.h.bf16 %v1091_v27  ;;  %p1109_p4 = pnand %p1108_p3, %p1102_p0 }
  0x76   :  { %746 = vst [vmem:[#allocation2 + $0x1b0] sm:$0xff] %v682_v41  ;;  %v550_v50 = vadd.f32 %v486_v38, %v287_v42  ;;  %v288_v4 = vadd.f32 %v1570_v56, %v217_v43  ;;  %v218_v51 = vmul.f32 %v1554_v49, %v895_v44  ;;  %v898_v52 = vunpack.c.l.bf16 %v1061_v40 }
  0x77   :  { %v683_v6 = vmax.f32 %v619_v46, 0.0  ;;  %v620_v54 = vadd.f32 %v1589_v13, %v549_v47  ;;  %v488_v55 = vmul.f32 %v1564_v53, %v1023_v1  ;;  %v1026_v57 = vunpack.c.l.bf16 %v1092_v45 }
  0x78   :  { %v621_v58 = vadd.f32 %v1589_v13, %v550_v50  ;;  %v551_v59 = vadd.f32 %v487_v48, %v288_v4  ;;  %v289_v60 = vadd.f32 %v1570_v56, %v218_v51  ;;  %v219_v61 = vmul.f32 %v1554_v49, %v898_v52 }
  0x79   :  { %747 = vst [vmem:[#allocation2 + $0x1b8] sm:$0xff] %v683_v6  ;;  %v684_v0 = vmax.f32 %v620_v54, 0.0  ;;  %v489_v2 = vmul.f32 %v1564_v53, %v1026_v57  ;;  %v899_v3 = vunpack.c.h.bf16 %v1061_v40  ;;  %v1027_v5 = vunpack.c.h.bf16 %v1092_v45 }
  0x7a   :  { %v685_v7 = vmax.f32 %v621_v58, 0.0  ;;  %v622_v8 = vadd.f32 %v1589_v13, %v551_v59  ;;  %v552_v9 = vadd.f32 %v488_v55, %v289_v60  ;;  %v290_v10 = vadd.f32 %v1570_v56, %v219_v61 }
  0x7b   :  { %748 = vst [vmem:[#allocation2 + $0x1c0] sm:$0xff] %v684_v0  ;;  %v220_v11 = vmul.f32 %v1554_v49, %v899_v3  ;;  %v490_v12 = vmul.f32 %v1564_v53, %v1027_v5  ;;  %v902_v25 = vunpack.c.l.bf16 %v1062_v62  ;;  %v1030_v14 = vunpack.c.l.bf16 %v1093_v63 }
  0x7c   :  { %749 = vst [vmem:[#allocation2 + $0x1c8] sm:$0xff] %v685_v7  ;;  %v686_v15 = vmax.f32 %v622_v8, 0.0  ;;  %v623_v16 = vadd.f32 %v1589_v13, %v552_v9  ;;  %v553_v17 = vadd.f32 %v489_v2, %v290_v10  ;;  %v903_v18 = vunpack.c.h.bf16 %v1062_v62 }
  0x7d   :  { %v291_v19 = vadd.f32 %v1570_v56, %v220_v11  ;;  %v221_v20 = vmul.f32 %v1554_v49, %v902_v25  ;;  %v491_v21 = vmul.f32 %v1564_v53, %v1030_v14  ;;  %v1031_v22 = vunpack.c.h.bf16 %v1093_v63 }
  0x7e   :  { %750 = vst [vmem:[#allocation2 + $0x1d0] sm:$0xff] %v686_v15  ;;  %v687_v23 = vmax.f32 %v623_v16, 0.0  ;;  %v624_v24 = vadd.f32 %v1589_v13, %v553_v17  ;;  %v222_v26 = vmul.f32 %v1554_v49, %v903_v18 }
  0x7f   :  { %v554_v27 = vadd.f32 %v490_v12, %v291_v19  ;;  %v292_v28 = vadd.f32 %v1570_v56, %v221_v20  ;;  %v492_v29 = vmul.f32 %v1564_v53, %v1031_v22 }
  0x80   :  { %751 = vst [vmem:[#allocation2 + $0x1d8] sm:$0xff] %v687_v23  ;;  %v688_v30 = vmax.f32 %v624_v24, 0.0  ;;  %v293_v31 = vadd.f32 %v1570_v56, %v222_v26 }
  0x81   :  { %v625_v32 = vadd.f32 %v1589_v13, %v554_v27  ;;  %v555_v33 = vadd.f32 %v491_v21, %v292_v28 }
  0x82   :  { %752 = vst [vmem:[#allocation2 + $0x1e0] sm:$0xff] %v688_v30  ;;  %v556_v34 = vadd.f32 %v492_v29, %v293_v31 }
  0x83   :  { %v689_v35 = vmax.f32 %v625_v32, 0.0  ;;  %v626_v36 = vadd.f32 %v1589_v13, %v555_v33 }
  0x84   :  { %v627_v49 = vadd.f32 %v1589_v13, %v556_v34 }
  0x85   :  { %753 = vst [vmem:[#allocation2 + $0x1e8] sm:$0xff] %v689_v35  ;;  %v690_v37 = vmax.f32 %v626_v36, 0.0 }
  0x86   :  { %v691_v53 = vmax.f32 %v627_v49, 0.0 }
  0x87   :  { %754 = vst [vmem:[#allocation2 + $0x1f0] sm:$0xff] %v690_v37 }
  0x88   :  { %755 = vst [vmem:[#allocation2 + $0x1f8] sm:$0xff] %v691_v53 }
  0x89   :  { %1112 = shalt.err (!%p1109_p4)
}
  0x8a   :  { %s1124_s18 = smov 128   ;;  %s1125_s19 = smov 8  }
  0x8b   :  { %767 = dma.vmem_to_hbm [thread:$0]  %s762_s3, 8192, %s1658_s6, [#allocation3], %s1124_s18, %s1124_s18, %s1125_s19  }
  0x8c   :  { %1121 = dma.done.wait [#allocation3], 8192  }
  0x8d   :  { %1122 = vsyncadd [#allocation3], 4294959104 }
  0x8e   :  { %771 = vsyncpa [#allocation3], 1 }

// kernel: bottleneck_forward.6
= control target key start
LH: loop header
LB: loop body
LE: loop exit
PB: predicated region body
PF: predicated region fallthrough
CT: control target
= control target key end

     0   :  { %vm2038_vm0 = vcmask 1040384   ;;  %s4054_s3 = inlined_call_operand.vmem [shape: bf16[128,128], index: 3, kind: input, shape index: {}]   ;;  %s4055_s5 = inlined_call_operand.vmem [shape: bf16[128,128], index: 5, kind: input, shape index: {}]   ;;  %s4056_s0 = inlined_call_operand.vmem [shape: bf16[512,128], index: 0, kind: input, shape index: {}]   ;;  %s4057_s1 = inlined_call_operand.vmem [shape: f32[1,128], index: 1, kind: input, shape index: {}]   ;;  %s4058_s4 = inlined_call_operand.vmem [shape: f32[512,128], index: 4, kind: input, shape index: {}]   ;;  %s4059_s2 = inlined_call_operand.vmem [shape: f32[1,128], index: 2, kind: input, shape index: {}]   ;;  %s4060_s6 = inlined_call_operand.vmem [shape: bf16[512,128], index: 6, kind: output, shape index: {0}]   ;;  %s4061_s8 = inlined_call_operand.vmem [shape: bf16[512,128], index: 8, kind: output, shape index: {2}]   ;;  %s4062_s7 = inlined_call_operand.vmem [shape: f32[1,2,128], index: 7, kind: output, shape index: {1}]   ;;  %s4063_s9 = inlined_call_operand.vmem [shape: f32[1,2,128], index: 9, kind: output, shape index: {3}]  }
   0x1   :  { %v3316_v0 = vld [vmem:[%s4054_s3 + $0x38] sm:$0xff]   ;;  %v3318_v2 = vld [vmem:[%s4054_s3 + $0x30] sm:$0xff]   ;;  %v3320_v4 = vld [vmem:[%s4054_s3 + $0x28] sm:$0xff]  }
   0x2   :  { %v3317_v1 = vld [vmem:[%s4055_s5 + $0x38] sm:$0xff]   ;;  %3156 = vmatprep.subr.bf16.mxu0 %v3316_v0  ;;  %v3319_v3 = vld [vmem:[%s4055_s5 + $0x30] sm:$0xff]   ;;  %v3321_v5 = vld [vmem:[%s4055_s5 + $0x28] sm:$0xff]  }
   0x3   :  { %3236 = vmatprep.subr.bf16.mxu1 %v3317_v1  ;;  %3157 = vmatpush3.bf16.msra.mxu0 %v3316_v0  ;;  %v3322_v6 = vld [vmem:[%s4054_s3 + $0x20] sm:$0xff]   ;;  %v3324_v8 = vld [vmem:[%s4054_s3 + $0x18] sm:$0xff]   ;;  %v3326_v10 = vld [vmem:[%s4054_s3 + $0x10] sm:$0xff]  }
   0x4   :  { %3237 = vmatpush3.bf16.msra.mxu1 %v3317_v1  ;;  %3158 = vmatprep.subr.bf16.mxu0 %v3318_v2  ;;  %v3323_v7 = vld [vmem:[%s4055_s5 + $0x20] sm:$0xff]   ;;  %v3325_v9 = vld [vmem:[%s4055_s5 + $0x18] sm:$0xff]   ;;  %v3327_v11 = vld [vmem:[%s4055_s5 + $0x10] sm:$0xff]  }
   0x5   :  { %3238 = vmatprep.subr.bf16.mxu1 %v3319_v3  ;;  %v2536_v12 = vld [vmem:[%s4056_s0] sm:$0xff]   ;;  %v748_v17 = vld [vmem:[%s4058_s4 + $0x8] sm:$0xff]  ;;  %v2984_v23 = vld [vmem:[%s4056_s0 + $0x10] sm:$0xff]  }
   0x6   :  { %v3424_v13 = vld [vmem:[%s4057_s1] ss:$0 sm:$0xff]  ;;  %v2537_v14 = vunpack.c.l.bf16 %v2536_v12  ;;  %v2538_v15 = vunpack.c.h.bf16 %v2536_v12  ;;  %v2983_v18 = vld [vmem:[%s4056_s0 + $0x8] sm:$0xff]   ;;  %v2545_v26 = vunpack.c.l.bf16 %v2984_v23  ;;  %v2985_v27 = vld [vmem:[%s4056_s0 + $0x18] sm:$0xff]   ;;  %v2546_v31 = vunpack.c.h.bf16 %v2984_v23 }
   0x7   :  { %3159 = vmatpush3.bf16.msra.mxu0 %v3318_v2  ;;  %v747_v16 = vld [vmem:[%s4058_s4] sm:$0xff]  ;;  %v2541_v21 = vunpack.c.l.bf16 %v2983_v18  ;;  %v2542_v22 = vunpack.c.h.bf16 %v2983_v18  ;;  %v3328_v28 = vld [vmem:[%s4054_s3 + $0x8] sm:$0xff]   ;;  %v2549_v36 = vunpack.c.l.bf16 %v2985_v27  ;;  %v2550_v40 = vunpack.c.h.bf16 %v2985_v27  ;;  %v749_v57 = vld [vmem:[%s4058_s4 + $0x10] sm:$0xff] }
   0x8   :  { %3239 = vmatpush3.bf16.msra.mxu1 %v3319_v3  ;;  %3160 = vmatprep.subr.bf16.mxu0 %v3320_v4  ;;  %v3438_v19 = vld [vmem:[%s4059_s2] ss:$0 sm:$0xff]  ;;  %v811_v20 = vpack.c.bf16 %v748_v17, %v747_v16  ;;  %v163_v24 = vmul.f32 %v2537_v14, %v3424_v13  ;;  %v164_v25 = vmul.f32 %v2538_v15, %v3424_v13  ;;  %v3329_v32 = vld [vmem:[%s4055_s5 + $0x8] sm:$0xff]   ;;  %v750_v58 = vld [vmem:[%s4058_s4 + $0x18] sm:$0xff] }
   0x9   :  { %3240 = vmatprep.subr.bf16.mxu1 %v3321_v5  ;;  %v165_v29 = vmul.f32 %v2541_v21, %v3424_v13  ;;  %v166_v30 = vmul.f32 %v2542_v22, %v3424_v13  ;;  %v167_v35 = vmul.f32 %v2545_v26, %v3424_v13  ;;  %v168_v39 = vmul.f32 %v2546_v31, %v3424_v13  ;;  %v2986_v44 = vld [vmem:[%s4056_s0 + $0x20] sm:$0xff]   ;;  %v2987_v56 = vld [vmem:[%s4056_s0 + $0x28] sm:$0xff]   ;;  %v2988_v62 = vld [vmem:[%s4056_s0 + $0x30] sm:$0xff]  }
   0xa   :  { %v234_v33 = vadd.f32 %v3438_v19, %v163_v24  ;;  %v235_v34 = vadd.f32 %v3438_v19, %v164_v25  ;;  %3252 = vmatprep.mubr.bf16.mxu1 %v811_v20  ;;  %v3330_v45 = vld [vmem:[%s4054_s3] sm:$0xff]   ;;  %v169_v47 = vmul.f32 %v2549_v36, %v3424_v13  ;;  %v170_v51 = vmul.f32 %v2550_v40, %v3424_v13  ;;  %v752_v0 = vld [vmem:[%s4058_s4 + $0x28] sm:$0xff]  ;;  %v2989_v23 = vld [vmem:[%s4056_s0 + $0x38] sm:$0xff]  }
   0xb   :  { %3161 = vmatpush3.bf16.msra.mxu0 %v3320_v4  ;;  %v236_v37 = vadd.f32 %v3438_v19, %v165_v29  ;;  %v237_v38 = vadd.f32 %v3438_v19, %v166_v30  ;;  %v238_v43 = vadd.f32 %v3438_v19, %v167_v35  ;;  %v239_v46 = vadd.f32 %v3438_v19, %v168_v39  ;;  %v3331_v48 = vld [vmem:[%s4055_s5] sm:$0xff]   ;;  %v753_v25 = vld [vmem:[%s4058_s4 + $0x30] sm:$0xff]  ;;  %v754_v26 = vld [vmem:[%s4058_s4 + $0x38] sm:$0xff] }
   0xc   :  { %3241 = vmatpush3.bf16.msra.mxu1 %v3321_v5  ;;  %3162 = vmatprep.subr.bf16.mxu0 %v3322_v6  ;;  %v298_v41 = vmax.f32 %v234_v33, 0.0  ;;  %v299_v42 = vmax.f32 %v235_v34, 0.0  ;;  %v2553_v55 = vunpack.c.l.bf16 %v2986_v44  ;;  %v2554_v59 = vunpack.c.h.bf16 %v2986_v44  ;;  %v751_v63 = vld [vmem:[%s4058_s4 + $0x20] sm:$0xff]  ;;  %v756_v29 = vld [vmem:[%s4058_s4 + $0x48] sm:$0xff] }
   0xd   :  { %3242 = vmatprep.subr.bf16.mxu1 %v3323_v7  ;;  %v300_v50 = vmax.f32 %v236_v37, 0.0  ;;  %v301_v52 = vmax.f32 %v237_v38, 0.0  ;;  %v302_v53 = vmax.f32 %v238_v43, 0.0  ;;  %v303_v54 = vmax.f32 %v239_v46, 0.0  ;;  %v2990_v24 = vld [vmem:[%s4056_s0 + $0x40] sm:$0xff]  }
   0xe   :  { %v362_v49 = vpack.c.bf16 %v299_v42, %v298_v41  ;;  %v240_v60 = vadd.f32 %v3438_v19, %v169_v47  ;;  %v171_v61 = vmul.f32 %v2553_v55, %v3424_v13  ;;  %v241_v1 = vadd.f32 %v3438_v19, %v170_v51  ;;  %v2991_v47 = vld [vmem:[%s4056_s0 + $0x48] sm:$0xff]   ;;  %v758_v51 = vld [vmem:[%s4058_s4 + $0x58] sm:$0xff] }
   0xf   :  { %3163 = vmatpush3.bf16.msra.mxu0 %v3322_v6  ;;  %v172_v2 = vmul.f32 %v2554_v59, %v3424_v13  ;;  %v2557_v3 = vunpack.c.l.bf16 %v2987_v56  ;;  %v2558_v4 = vunpack.c.h.bf16 %v2987_v56  ;;  %v363_v5 = vpack.c.bf16 %v301_v52, %v300_v50  ;;  %v757_v50 = vld [vmem:[%s4058_s4 + $0x50] sm:$0xff]  ;;  %v760_v55 = vld [vmem:[%s4058_s4 + $0x68] sm:$0xff] }
  0x10   :  { %3243 = vmatpush3.bf16.msra.mxu1 %v3323_v7  ;;  %3164 = vmatprep.subr.bf16.mxu0 %v3324_v8  ;;  %v812_v6 = vpack.c.bf16 %v750_v58, %v749_v57  ;;  %v364_v7 = vpack.c.bf16 %v303_v54, %v302_v53  ;;  %v813_v12 = vpack.c.bf16 %v752_v0, %v751_v63  ;;  %v304_v14 = vmax.f32 %v240_v60, 0.0  ;;  %v2992_v52 = vld [vmem:[%s4056_s0 + $0x50] sm:$0xff]   ;;  %v759_v54 = vld [vmem:[%s4058_s4 + $0x60] sm:$0xff] }
  0x11   :  { %3244 = vmatprep.subr.bf16.mxu1 %v3325_v9  ;;  %3172 = vmatprep.mubr.bf16.mxu0 %v362_v49  ;;  %v305_v15 = vmax.f32 %v241_v1, 0.0  ;;  %v173_v16 = vmul.f32 %v2557_v3, %v3424_v13  ;;  %v174_v17 = vmul.f32 %v2558_v4, %v3424_v13  ;;  %v2566_v33 = vunpack.c.h.bf16 %v2989_v23 }
  0x12   :  { %v2569_v34 = vunpack.c.l.bf16 %v2990_v24  ;;  %v2570_v35 = vunpack.c.h.bf16 %v2990_v24  ;;  %v814_v36 = vpack.c.bf16 %v754_v26, %v753_v25  ;;  %v2573_v56 = vunpack.c.l.bf16 %v2991_v47 }
  0x13   :  { %3165 = vmatpush3.bf16.msra.mxu0 %v3324_v8  ;;  %v242_v8 = vadd.f32 %v3438_v19, %v171_v61  ;;  %v365_v27 = vpack.c.bf16 %v305_v15, %v304_v14  ;;  %v244_v30 = vadd.f32 %v3438_v19, %v173_v16  ;;  %v245_v31 = vadd.f32 %v3438_v19, %v174_v17  ;;  %v2994_v15 = vld [vmem:[%s4056_s0 + $0x60] sm:$0xff]   ;;  %v764_v17 = vld [vmem:[%s4058_s4 + $0x88] sm:$0xff] }
  0x14   :  { %3245 = vmatpush3.bf16.msra.mxu1 %v3325_v9  ;;  %3166 = vmatprep.subr.bf16.mxu0 %v3326_v10  ;;  %v243_v9 = vadd.f32 %v3438_v19, %v172_v2  ;;  %v178_v44 = vmul.f32 %v2566_v33, %v3424_v13  ;;  %v180_v46 = vmul.f32 %v2570_v35, %v3424_v13  ;;  %v2574_v57 = vunpack.c.h.bf16 %v2991_v47  ;;  %v763_v16 = vld [vmem:[%s4058_s4 + $0x80] sm:$0xff] }
  0x15   :  { %3246 = vmatprep.subr.bf16.mxu1 %v3327_v11  ;;  %v306_v18 = vmax.f32 %v242_v8, 0.0  ;;  %v308_v41 = vmax.f32 %v244_v30, 0.0  ;;  %v309_v42 = vmax.f32 %v245_v31, 0.0  ;;  %v2577_v0 = vunpack.c.l.bf16 %v2992_v52 }
  0x16   :  { %v307_v20 = vmax.f32 %v243_v9, 0.0  ;;  %v249_v59 = vadd.f32 %v3438_v19, %v178_v44  ;;  %v251_v61 = vadd.f32 %v3438_v19, %v180_v46  ;;  %v2578_v1 = vunpack.c.h.bf16 %v2992_v52  ;;  %v2993_v9 = vld [vmem:[%s4056_s0 + $0x58] sm:$0xff]   ;;  %v767_v44 = vld [vmem:[%s4058_s4 + $0xa0] sm:$0xff] }
  0x17   :  { %3167 = vmatpush3.bf16.msra.mxu0 %v3326_v10  ;;  %v2561_v10 = vunpack.c.l.bf16 %v2988_v62  ;;  %v367_v53 = vpack.c.bf16 %v309_v42, %v308_v41  ;;  %v817_v2 = vpack.c.bf16 %v760_v55, %v759_v54  ;;  %v181_v3 = vmul.f32 %v2573_v56, %v3424_v13  ;;  %v765_v41 = vld [vmem:[%s4058_s4 + $0x90] sm:$0xff]  ;;  %v766_v42 = vld [vmem:[%s4058_s4 + $0x98] sm:$0xff] }
  0x18   :  { %3247 = vmatpush3.bf16.msra.mxu1 %v3327_v11  ;;  %3168 = vmatprep.subr.bf16.mxu0 %v3328_v28  ;;  %v2562_v11 = vunpack.c.h.bf16 %v2988_v62  ;;  %v366_v37 = vpack.c.bf16 %v307_v20, %v306_v18  ;;  %v816_v62 = vpack.c.bf16 %v758_v51, %v757_v50  ;;  %v182_v4 = vmul.f32 %v2574_v57, %v3424_v13 }
  0x19   :  { %3248 = vmatprep.subr.bf16.mxu1 %v3329_v32  ;;  %v175_v21 = vmul.f32 %v2561_v10, %v3424_v13  ;;  %v315_v8 = vmax.f32 %v251_v61, 0.0  ;;  %v761_v10 = vld [vmem:[%s4058_s4 + $0x70] sm:$0xff]  ;;  %v184_v14 = vmul.f32 %v2578_v1, %v3424_v13  ;;  %v252_v18 = vadd.f32 %v3438_v19, %v181_v3  ;;  %v770_v3 = vld [vmem:[%s4058_s4 + $0xb8] sm:$0xff] }
  0x1a   :  { %v176_v22 = vmul.f32 %v2562_v11, %v3424_v13  ;;  %v762_v11 = vld [vmem:[%s4058_s4 + $0x78] sm:$0xff]  ;;  %v253_v20 = vadd.f32 %v3438_v19, %v182_v4  ;;  %v819_v30 = vpack.c.bf16 %v764_v17, %v763_v16  ;;  %v820_v52 = vpack.c.bf16 %v766_v42, %v765_v41  ;;  %v2998_v4 = vld [vmem:[%s4056_s0 + $0x80] sm:$0xff]  }
  0x1b   :  { %3169 = vmatpush3.bf16.msra.mxu0 %v3328_v28  ;;  %v755_v28 = vld [vmem:[%s4058_s4 + $0x40] sm:$0xff]  ;;  %v246_v38 = vadd.f32 %v3438_v19, %v175_v21  ;;  %v2581_v21 = vunpack.c.l.bf16 %v2993_v9  ;;  %v818_v24 = vpack.c.bf16 %v762_v11, %v761_v10  ;;  %v316_v31 = vmax.f32 %v252_v18, 0.0 }
  0x1c   :  { %3249 = vmatpush3.bf16.msra.mxu1 %v3329_v32  ;;  %3170 = vmatprep.subr.bf16.mxu0 %v3330_v45  ;;  %v2565_v32 = vunpack.c.l.bf16 %v2989_v23  ;;  %v247_v39 = vadd.f32 %v3438_v19, %v176_v22  ;;  %v815_v40 = vpack.c.bf16 %v756_v29, %v755_v28  ;;  %v2582_v22 = vunpack.c.h.bf16 %v2993_v9 }
  0x1d   :  { %3250 = vmatprep.subr.bf16.mxu1 %v3331_v48  ;;  %v2585_v28 = vunpack.c.l.bf16 %v2994_v15  ;;  %v2586_v29 = vunpack.c.h.bf16 %v2994_v15  ;;  %v185_v33 = vmul.f32 %v2581_v21, %v3424_v13  ;;  %v2601_v17 = vunpack.c.l.bf16 %v2998_v4 }
  0x1e   :  { %v177_v43 = vmul.f32 %v2565_v32, %v3424_v13  ;;  %v311_v49 = vmax.f32 %v247_v39, 0.0  ;;  %v317_v32 = vmax.f32 %v253_v20, 0.0  ;;  %v2995_v39 = vld [vmem:[%s4056_s0 + $0x68] sm:$0xff]   ;;  %v2602_v18 = vunpack.c.h.bf16 %v2998_v4 }
  0x1f   :  { %3171 = vmatpush3.bf16.msra.mxu0 %v3330_v45  ;;  %v179_v45 = vmul.f32 %v2569_v34, %v3424_v13  ;;  %v186_v34 = vmul.f32 %v2582_v22, %v3424_v13  ;;  %v256_v46 = vadd.f32 %v3438_v19, %v185_v33  ;;  %v775_v33 = vld [vmem:[%s4058_s4 + $0xe0] sm:$0xff] }
  0x20   :  { %3251 = vmatpush3.bf16.msra.mxu1 %v3331_v48  ;;  %v310_v48 = vmax.f32 %v246_v38, 0.0  ;;  %v248_v58 = vadd.f32 %v3438_v19, %v177_v43  ;;  %v188_v38 = vmul.f32 %v2586_v29, %v3424_v13  ;;  %v371_v43 = vpack.c.bf16 %v317_v32, %v316_v31  ;;  %v774_v29 = vld [vmem:[%s4058_s4 + $0xd8] sm:$0xff]  ;;  %v3000_v32 = vld [vmem:[%s4056_s0 + $0x90] sm:$0xff]  }
  0x21   :  { %v250_v60 = vadd.f32 %v3438_v19, %v179_v45  ;;  %v768_v45 = vld [vmem:[%s4058_s4 + $0xa8] sm:$0xff]  ;;  %v257_v47 = vadd.f32 %v3438_v19, %v186_v34  ;;  %v320_v57 = vmax.f32 %v256_v46, 0.0  ;;  %v196_v31 = vmul.f32 %v2602_v18, %v3424_v13 }
  0x22   :  { %3173 = vmatmul.mubr.bf16.vlgmr.msra.gmra.mxu0 %v363_v5  ;;  %v368_v63 = vpack.c.bf16 %v311_v49, %v310_v48  ;;  %v312_v5 = vmax.f32 %v248_v58, 0.0  ;;  %v2589_v48 = vunpack.c.l.bf16 %v2995_v39  ;;  %v2590_v49 = vunpack.c.h.bf16 %v2995_v39  ;;  %v776_v34 = vld [vmem:[%s4058_s4 + $0xe8] sm:$0xff] }
  0x23   :  { %3253 = vmatmul.mubr.bf16.vlgmr.msra.gmra.mxu1 %v812_v6  ;;  %3176 = vmatprep.mubr.bf16.mxu0 %v364_v7  ;;  %v313_v6 = vmax.f32 %v249_v59, 0.0  ;;  %v314_v7 = vmax.f32 %v250_v60, 0.0  ;;  %v259_v55 = vadd.f32 %v3438_v19, %v188_v38  ;;  %v821_v56 = vpack.c.bf16 %v768_v45, %v767_v44 }
  0x24   :  { %3256 = vmatprep.mubr.bf16.mxu1 %v813_v12  ;;  %v183_v12 = vmul.f32 %v2577_v0, %v3424_v13  ;;  %v321_v58 = vmax.f32 %v257_v47, 0.0  ;;  %v189_v59 = vmul.f32 %v2589_v48, %v3424_v13  ;;  %v190_v60 = vmul.f32 %v2590_v49, %v3424_v13 }
  0x25   :  { %v369_v23 = vpack.c.bf16 %v313_v6, %v312_v5  ;;  %v370_v25 = vpack.c.bf16 %v315_v8, %v314_v7  ;;  %v323_v1 = vmax.f32 %v259_v55, 0.0  ;;  %v771_v6 = vld [vmem:[%s4058_s4 + $0xc0] sm:$0xff]  ;;  %v772_v7 = vld [vmem:[%s4058_s4 + $0xc8] sm:$0xff]  ;;  %v2609_v44 = vunpack.c.l.bf16 %v3000_v32  ;;  %v3001_v55 = vld [vmem:[%s4056_s0 + $0x98] sm:$0xff]  }
  0x26   :  { %v254_v26 = vadd.f32 %v3438_v19, %v183_v12  ;;  %v373_v5 = vpack.c.bf16 %v321_v58, %v320_v57  ;;  %v260_v10 = vadd.f32 %v3438_v19, %v189_v59  ;;  %v261_v11 = vadd.f32 %v3438_v19, %v190_v60  ;;  %v777_v57 = vld [vmem:[%s4058_s4 + $0xf0] sm:$0xff]  ;;  %v778_v58 = vld [vmem:[%s4058_s4 + $0xf8] sm:$0xff]  ;;  %v779_v60 = vld [vmem:[%s4058_s4 + $0x100] sm:$0xff] }
  0x27   :  { %v823_v20 = vpack.c.bf16 %v772_v7, %v771_v6  ;;  %v2610_v45 = vunpack.c.h.bf16 %v3000_v32  ;;  %v825_v46 = vpack.c.bf16 %v776_v34, %v775_v33  ;;  %v826_v4 = vpack.c.bf16 %v778_v58, %v777_v57 }
  0x28   :  { %v318_v35 = vmax.f32 %v254_v26, 0.0 }
  0x2a   :  { %3177 = vmatmul.mubr.bf16.gmra.mxu0 %v365_v27  ;;  %v255_v27 = vadd.f32 %v3438_v19, %v184_v14 }
  0x2b   :  { %3257 = vmatmul.mubr.bf16.gmra.mxu1 %v814_v36  ;;  %3180 = vmatprep.mubr.bf16.mxu0 %v366_v37  ;;  %v187_v37 = vmul.f32 %v2585_v28, %v3424_v13  ;;  %v773_v28 = vld [vmem:[%s4058_s4 + $0xd0] sm:$0xff] }
  0x2c   :  { %3260 = vmatprep.mubr.bf16.mxu1 %v815_v40  ;;  %v319_v36 = vmax.f32 %v255_v27, 0.0  ;;  %v2996_v40 = vld [vmem:[%s4056_s0 + $0x70] sm:$0xff]   ;;  %v2999_v27 = vld [vmem:[%s4056_s0 + $0x88] sm:$0xff]  }
  0x2d   :  { %v2593_v50 = vunpack.c.l.bf16 %v2996_v40  ;;  %v2594_v51 = vunpack.c.h.bf16 %v2996_v40  ;;  %v258_v54 = vadd.f32 %v3438_v19, %v187_v37  ;;  %v2605_v37 = vunpack.c.l.bf16 %v2999_v27 }
  0x2e   :  { %v2606_v38 = vunpack.c.h.bf16 %v2999_v27  ;;  %v824_v40 = vpack.c.bf16 %v774_v29, %v773_v28 }
  0x2f   :  { %v191_v61 = vmul.f32 %v2593_v50, %v3424_v13  ;;  %v322_v0 = vmax.f32 %v258_v54, 0.0  ;;  %v197_v49 = vmul.f32 %v2605_v37, %v3424_v13  ;;  %v200_v54 = vmul.f32 %v2610_v45, %v3424_v13  ;;  %v786_v45 = vld [vmem:[%s4058_s4 + $0x138] sm:$0xff] }
  0x30   :  { %v198_v50 = vmul.f32 %v2606_v38, %v3424_v13 }
  0x31   :  { %v262_v12 = vadd.f32 %v3438_v19, %v191_v61  ;;  %v374_v16 = vpack.c.bf16 %v323_v1, %v322_v0  ;;  %v780_v61 = vld [vmem:[%s4058_s4 + $0x108] sm:$0xff]  ;;  %v2613_v0 = vunpack.c.l.bf16 %v3001_v55  ;;  %v2614_v1 = vunpack.c.h.bf16 %v3001_v55 }
  0x32   :  { %3181 = vmatmul.mubr.bf16.gmra.mxu0 %v367_v53  ;;  %v372_v53 = vpack.c.bf16 %v319_v36, %v318_v35  ;;  %v271_v7 = vadd.f32 %v3438_v19, %v200_v54 }
  0x33   :  { %3261 = vmatmul.mubr.bf16.gmra.mxu1 %v816_v62  ;;  %3184 = vmatprep.mubr.bf16.mxu0 %v368_v63  ;;  %v192_v62 = vmul.f32 %v2594_v51, %v3424_v13  ;;  %v2997_v63 = vld [vmem:[%s4056_s0 + $0x78] sm:$0xff]  }
  0x34   :  { %3264 = vmatprep.mubr.bf16.mxu1 %v817_v2  ;;  %v769_v2 = vld [vmem:[%s4058_s4 + $0xb0] sm:$0xff]  ;;  %v2597_v8 = vunpack.c.l.bf16 %v2997_v63  ;;  %v2598_v9 = vunpack.c.h.bf16 %v2997_v63  ;;  %v269_v63 = vadd.f32 %v3438_v19, %v198_v50  ;;  %v335_v18 = vmax.f32 %v271_v7, 0.0  ;;  %v788_v50 = vld [vmem:[%s4058_s4 + $0x148] sm:$0xff] }
  0x35   :  { %v263_v14 = vadd.f32 %v3438_v19, %v192_v62  ;;  %v822_v15 = vpack.c.bf16 %v770_v3, %v769_v2  ;;  %v268_v62 = vadd.f32 %v3438_v19, %v197_v49  ;;  %v787_v49 = vld [vmem:[%s4058_s4 + $0x140] sm:$0xff]  ;;  %v3007_v7 = vld [vmem:[%s4056_s0 + $0xc8] sm:$0xff]  }
  0x36   :  { %v193_v21 = vmul.f32 %v2597_v8, %v3424_v13  ;;  %v194_v22 = vmul.f32 %v2598_v9, %v3424_v13  ;;  %v827_v8 = vpack.c.bf16 %v780_v61, %v779_v60 }
  0x37   :  { %v327_v26 = vmax.f32 %v263_v14, 0.0  ;;  %v332_v9 = vmax.f32 %v268_v62, 0.0  ;;  %v831_v62 = vpack.c.bf16 %v788_v50, %v787_v49 }
  0x38   :  { %v264_v35 = vadd.f32 %v3438_v19, %v193_v21  ;;  %v265_v36 = vadd.f32 %v3438_v19, %v194_v22  ;;  %v782_v21 = vld [vmem:[%s4058_s4 + $0x118] sm:$0xff]  ;;  %v3004_v22 = vld [vmem:[%s4056_s0 + $0xb0] sm:$0xff]  }
  0x39   :  { %v2625_v34 = vunpack.c.l.bf16 %v3004_v22 }
  0x3a   :  { %3185 = vmatmul.mubr.bf16.gmra.mxu0 %v369_v23  ;;  %v324_v23 = vmax.f32 %v260_v10, 0.0  ;;  %v328_v47 = vmax.f32 %v264_v35, 0.0  ;;  %v329_v48 = vmax.f32 %v265_v36, 0.0  ;;  %v333_v10 = vmax.f32 %v269_v63, 0.0 }
  0x3b   :  { %3265 = vmatmul.mubr.bf16.gmra.mxu1 %v818_v24  ;;  %3188 = vmatprep.mubr.bf16.mxu0 %v370_v25  ;;  %v325_v24 = vmax.f32 %v261_v11, 0.0  ;;  %v326_v25 = vmax.f32 %v262_v12, 0.0  ;;  %v201_v11 = vmul.f32 %v2613_v0, %v3424_v13  ;;  %v202_v12 = vmul.f32 %v2614_v1, %v3424_v13 }
  0x3c   :  { %3268 = vmatprep.mubr.bf16.mxu1 %v819_v30  ;;  %v195_v30 = vmul.f32 %v2601_v17, %v3424_v13  ;;  %v377_v59 = vpack.c.bf16 %v329_v48, %v328_v47  ;;  %v2626_v35 = vunpack.c.h.bf16 %v3004_v22  ;;  %v3006_v48 = vld [vmem:[%s4056_s0 + $0xc0] sm:$0xff]  }
  0x3d   :  { %v375_v39 = vpack.c.bf16 %v325_v24, %v324_v23  ;;  %v376_v41 = vpack.c.bf16 %v327_v26, %v326_v25  ;;  %v379_v23 = vpack.c.bf16 %v333_v10, %v332_v9  ;;  %v783_v24 = vld [vmem:[%s4058_s4 + $0x120] sm:$0xff]  ;;  %v784_v25 = vld [vmem:[%s4058_s4 + $0x128] sm:$0xff]  ;;  %v272_v28 = vadd.f32 %v3438_v19, %v201_v11  ;;  %v789_v9 = vld [vmem:[%s4058_s4 + $0x150] sm:$0xff] }
  0x3e   :  { %v266_v42 = vadd.f32 %v3438_v19, %v195_v30  ;;  %v273_v29 = vadd.f32 %v3438_v19, %v202_v12  ;;  %v829_v36 = vpack.c.bf16 %v784_v25, %v783_v24  ;;  %v208_v47 = vmul.f32 %v2626_v35, %v3424_v13  ;;  %v790_v10 = vld [vmem:[%s4058_s4 + $0x158] sm:$0xff]  ;;  %v791_v12 = vld [vmem:[%s4058_s4 + $0x160] sm:$0xff] }
  0x3f   :  { %v2633_v60 = vunpack.c.l.bf16 %v3006_v48  ;;  %v2634_v61 = vunpack.c.h.bf16 %v3006_v48  ;;  %v832_v22 = vpack.c.bf16 %v790_v10, %v789_v9 }
  0x40   :  { %v330_v51 = vmax.f32 %v266_v42, 0.0 }
  0x42   :  { %3189 = vmatmul.mubr.bf16.gmra.mxu0 %v371_v43  ;;  %v267_v43 = vadd.f32 %v3438_v19, %v196_v31 }
  0x43   :  { %3269 = vmatmul.mubr.bf16.gmra.mxu1 %v820_v52  ;;  %3192 = vmatprep.mubr.bf16.mxu0 %v372_v53  ;;  %v199_v53 = vmul.f32 %v2609_v44, %v3424_v13  ;;  %v785_v44 = vld [vmem:[%s4058_s4 + $0x130] sm:$0xff] }
  0x44   :  { %3272 = vmatprep.mubr.bf16.mxu1 %v821_v56  ;;  %v331_v52 = vmax.f32 %v267_v43, 0.0  ;;  %v3002_v56 = vld [vmem:[%s4056_s0 + $0xa0] sm:$0xff]   ;;  %v3005_v43 = vld [vmem:[%s4056_s0 + $0xb8] sm:$0xff]  }
  0x45   :  { %v2617_v2 = vunpack.c.l.bf16 %v3002_v56  ;;  %v2618_v3 = vunpack.c.h.bf16 %v3002_v56  ;;  %v270_v6 = vadd.f32 %v3438_v19, %v199_v53  ;;  %v2629_v53 = vunpack.c.l.bf16 %v3005_v43 }
  0x46   :  { %v2630_v54 = vunpack.c.h.bf16 %v3005_v43  ;;  %v830_v56 = vpack.c.bf16 %v786_v45, %v785_v44 }
  0x47   :  { %v203_v14 = vmul.f32 %v2617_v2, %v3424_v13  ;;  %v334_v17 = vmax.f32 %v270_v6, 0.0  ;;  %v209_v1 = vmul.f32 %v2629_v53, %v3424_v13  ;;  %v212_v6 = vmul.f32 %v2634_v61, %v3424_v13 }
  0x48   :  { %v210_v2 = vmul.f32 %v2630_v54, %v3424_v13 }
  0x49   :  { %v274_v30 = vadd.f32 %v3438_v19, %v203_v14  ;;  %v380_v33 = vpack.c.bf16 %v335_v18, %v334_v17  ;;  %v792_v14 = vld [vmem:[%s4058_s4 + $0x168] sm:$0xff]  ;;  %v2637_v17 = vunpack.c.l.bf16 %v3007_v7  ;;  %v2638_v18 = vunpack.c.h.bf16 %v3007_v7 }
  0x4a   :  { %3193 = vmatmul.mubr.bf16.gmra.mxu0 %v373_v5  ;;  %v378_v5 = vpack.c.bf16 %v331_v52, %v330_v51  ;;  %v283_v25 = vadd.f32 %v3438_v19, %v212_v6 }
  0x4b   :  { %3273 = vmatmul.mubr.bf16.gmra.mxu1 %v822_v15  ;;  %3196 = vmatprep.mubr.bf16.mxu0 %v374_v16  ;;  %v204_v15 = vmul.f32 %v2618_v3, %v3424_v13  ;;  %v3003_v16 = vld [vmem:[%s4056_s0 + $0xa8] sm:$0xff]  }
  0x4c   :  { %3276 = vmatprep.mubr.bf16.mxu1 %v823_v20  ;;  %v781_v20 = vld [vmem:[%s4058_s4 + $0x110] sm:$0xff]  ;;  %v2621_v26 = vunpack.c.l.bf16 %v3003_v16  ;;  %v2622_v27 = vunpack.c.h.bf16 %v3003_v16  ;;  %v281_v16 = vadd.f32 %v3438_v19, %v210_v2  ;;  %v347_v35 = vmax.f32 %v283_v25, 0.0  ;;  %v799_v2 = vld [vmem:[%s4058_s4 + $0x1a0] sm:$0xff]  ;;  %v3013_v25 = vld [vmem:[%s4056_s0 + $0xf8] sm:$0xff]  }
  0x4d   :  { %v275_v31 = vadd.f32 %v3438_v19, %v204_v15  ;;  %v828_v32 = vpack.c.bf16 %v782_v21, %v781_v20  ;;  %v280_v15 = vadd.f32 %v3438_v19, %v209_v1 }
  0x4e   :  { %v205_v37 = vmul.f32 %v2621_v26, %v3424_v13  ;;  %v206_v38 = vmul.f32 %v2622_v27, %v3424_v13  ;;  %v833_v26 = vpack.c.bf16 %v792_v14, %v791_v12 }
  0x4f   :  { %v339_v42 = vmax.f32 %v275_v31, 0.0  ;;  %v344_v27 = vmax.f32 %v280_v15, 0.0 }
  0x50   :  { %v276_v51 = vadd.f32 %v3438_v19, %v205_v37  ;;  %v277_v52 = vadd.f32 %v3438_v19, %v206_v38  ;;  %v794_v37 = vld [vmem:[%s4058_s4 + $0x178] sm:$0xff]  ;;  %v3010_v38 = vld [vmem:[%s4056_s0 + $0xe0] sm:$0xff]  }
  0x51   :  { %v2649_v50 = vunpack.c.l.bf16 %v3010_v38 }
  0x52   :  { %3197 = vmatmul.mubr.bf16.gmra.mxu0 %v375_v39  ;;  %v336_v39 = vmax.f32 %v272_v28, 0.0  ;;  %v340_v63 = vmax.f32 %v276_v51, 0.0  ;;  %v341_v0 = vmax.f32 %v277_v52, 0.0  ;;  %v345_v28 = vmax.f32 %v281_v16, 0.0 }
  0x53   :  { %3277 = vmatmul.mubr.bf16.gmra.mxu1 %v824_v40  ;;  %3200 = vmatprep.mubr.bf16.mxu0 %v376_v41  ;;  %v337_v40 = vmax.f32 %v273_v29, 0.0  ;;  %v338_v41 = vmax.f32 %v274_v30, 0.0  ;;  %v213_v29 = vmul.f32 %v2637_v17, %v3424_v13  ;;  %v214_v30 = vmul.f32 %v2638_v18, %v3424_v13 }
  0x54   :  { %3280 = vmatprep.mubr.bf16.mxu1 %v825_v46  ;;  %v207_v46 = vmul.f32 %v2625_v34, %v3424_v13  ;;  %v383_v11 = vpack.c.bf16 %v341_v0, %v340_v63  ;;  %v2650_v51 = vunpack.c.h.bf16 %v3010_v38  ;;  %v219_v61 = vmul.f32 %v2649_v50, %v3424_v13  ;;  %v3011_v63 = vld [vmem:[%s4056_s0 + $0xe8] sm:$0xff]   ;;  %v3012_v0 = vld [vmem:[%s4056_s0 + $0xf0] sm:$0xff]  }
  0x55   :  { %v381_v55 = vpack.c.bf16 %v337_v40, %v336_v39  ;;  %v382_v57 = vpack.c.bf16 %v339_v42, %v338_v41  ;;  %v385_v39 = vpack.c.bf16 %v345_v28, %v344_v27  ;;  %v795_v40 = vld [vmem:[%s4058_s4 + $0x180] sm:$0xff]  ;;  %v796_v41 = vld [vmem:[%s4058_s4 + $0x188] sm:$0xff]  ;;  %v284_v44 = vadd.f32 %v3438_v19, %v213_v29  ;;  %v802_v27 = vld [vmem:[%s4058_s4 + $0x1b8] sm:$0xff] }
  0x56   :  { %v278_v58 = vadd.f32 %v3438_v19, %v207_v46  ;;  %v285_v45 = vadd.f32 %v3438_v19, %v214_v30  ;;  %v835_v52 = vpack.c.bf16 %v796_v41, %v795_v40  ;;  %v2654_v9 = vunpack.c.h.bf16 %v3011_v63  ;;  %v803_v29 = vld [vmem:[%s4058_s4 + $0x1c0] sm:$0xff]  ;;  %v804_v30 = vld [vmem:[%s4058_s4 + $0x1c8] sm:$0xff] }
  0x57   :  { %v290_v10 = vadd.f32 %v3438_v19, %v219_v61  ;;  %v2657_v12 = vunpack.c.l.bf16 %v3012_v0  ;;  %v2658_v14 = vunpack.c.h.bf16 %v3012_v0 }
  0x58   :  { %v342_v3 = vmax.f32 %v278_v58, 0.0  ;;  %v798_v58 = vld [vmem:[%s4058_s4 + $0x198] sm:$0xff] }
  0x5a   :  { %3201 = vmatmul.mubr.bf16.gmra.mxu0 %v377_v59  ;;  %v279_v59 = vadd.f32 %v3438_v19, %v208_v47 }
  0x5b   :  { %3281 = vmatmul.mubr.bf16.gmra.mxu1 %v826_v4  ;;  %3204 = vmatprep.mubr.bf16.mxu0 %v378_v5  ;;  %v211_v5 = vmul.f32 %v2633_v60, %v3424_v13 }
  0x5c   :  { %3284 = vmatprep.mubr.bf16.mxu1 %v827_v8  ;;  %v343_v4 = vmax.f32 %v279_v59, 0.0  ;;  %v3008_v8 = vld [vmem:[%s4056_s0 + $0xd0] sm:$0xff]  }
  0x5d   :  { %v2641_v20 = vunpack.c.l.bf16 %v3008_v8  ;;  %v2642_v21 = vunpack.c.h.bf16 %v3008_v8  ;;  %v282_v24 = vadd.f32 %v3438_v19, %v211_v5  ;;  %v2653_v8 = vunpack.c.l.bf16 %v3011_v63 }
  0x5f   :  { %v215_v31 = vmul.f32 %v2641_v20, %v3424_v13  ;;  %v346_v34 = vmax.f32 %v282_v24, 0.0  ;;  %v221_v18 = vmul.f32 %v2653_v8, %v3424_v13  ;;  %v222_v20 = vmul.f32 %v2654_v9, %v3424_v13 }
  0x60   :  { %v224_v24 = vmul.f32 %v2658_v14, %v3424_v13 }
  0x61   :  { %v286_v46 = vadd.f32 %v3438_v19, %v215_v31  ;;  %v386_v49 = vpack.c.bf16 %v347_v35, %v346_v34  ;;  %v292_v31 = vadd.f32 %v3438_v19, %v221_v18  ;;  %v2662_v34 = vunpack.c.h.bf16 %v3013_v25 }
  0x62   :  { %3205 = vmatmul.mubr.bf16.gmra.mxu0 %v379_v23  ;;  %v384_v23 = vpack.c.bf16 %v343_v4, %v342_v3  ;;  %v800_v3 = vld [vmem:[%s4058_s4 + $0x1a8] sm:$0xff]  ;;  %v295_v38 = vadd.f32 %v3438_v19, %v224_v24 }
  0x63   :  { %3285 = vmatmul.mubr.bf16.gmra.mxu1 %v828_v32  ;;  %3208 = vmatprep.mubr.bf16.mxu0 %v380_v33  ;;  %v216_v32 = vmul.f32 %v2642_v21, %v3424_v13  ;;  %v3009_v33 = vld [vmem:[%s4056_s0 + $0xd8] sm:$0xff]   ;;  %v350_v59 = vmax.f32 %v286_v46, 0.0  ;;  %v837_v15 = vpack.c.bf16 %v800_v3, %v799_v2  ;;  %v354_v21 = vmax.f32 %v290_v10, 0.0  ;;  %v805_v46 = vld [vmem:[%s4058_s4 + $0x1d0] sm:$0xff] }
  0x64   :  { %3288 = vmatprep.mubr.bf16.mxu1 %v829_v36  ;;  %v793_v36 = vld [vmem:[%s4058_s4 + $0x170] sm:$0xff]  ;;  %v2645_v42 = vunpack.c.l.bf16 %v3009_v33  ;;  %v2646_v43 = vunpack.c.h.bf16 %v3009_v33  ;;  %v2661_v33 = vunpack.c.l.bf16 %v3013_v25  ;;  %v356_v40 = vmax.f32 %v292_v31, 0.0 }
  0x65   :  { %v287_v47 = vadd.f32 %v3438_v19, %v216_v32  ;;  %v834_v48 = vpack.c.bf16 %v794_v37, %v793_v36  ;;  %v293_v32 = vadd.f32 %v3438_v19, %v222_v20 }
  0x66   :  { %v217_v53 = vmul.f32 %v2645_v42, %v3424_v13  ;;  %v218_v54 = vmul.f32 %v2646_v43, %v3424_v13  ;;  %v225_v42 = vmul.f32 %v2661_v33, %v3424_v13  ;;  %v226_v43 = vmul.f32 %v2662_v34, %v3424_v13 }
  0x67   :  { %v351_v60 = vmax.f32 %v287_v47, 0.0  ;;  %v357_v41 = vmax.f32 %v293_v32, 0.0  ;;  %v806_v47 = vld [vmem:[%s4058_s4 + $0x1d8] sm:$0xff] }
  0x68   :  { %v288_v4 = vadd.f32 %v3438_v19, %v217_v53  ;;  %v289_v5 = vadd.f32 %v3438_v19, %v218_v54  ;;  %v296_v50 = vadd.f32 %v3438_v19, %v225_v42 }
  0x69   :  { %v388_v7 = vpack.c.bf16 %v351_v60, %v350_v59 }
  0x6a   :  { %3209 = vmatmul.mubr.bf16.gmra.mxu0 %v381_v55  ;;  %v348_v55 = vmax.f32 %v284_v44, 0.0  ;;  %v352_v16 = vmax.f32 %v288_v4, 0.0  ;;  %v353_v17 = vmax.f32 %v289_v5, 0.0 }
  0x6b   :  { %3289 = vmatmul.mubr.bf16.gmra.mxu1 %v830_v56  ;;  %3212 = vmatprep.mubr.bf16.mxu0 %v382_v57  ;;  %v349_v56 = vmax.f32 %v285_v45, 0.0  ;;  %v797_v57 = vld [vmem:[%s4058_s4 + $0x190] sm:$0xff]  ;;  %v359_v45 = vmax.f32 %v295_v38, 0.0 }
  0x6c   :  { %3292 = vmatprep.mubr.bf16.mxu1 %v831_v62  ;;  %v220_v62 = vmul.f32 %v2650_v51, %v3424_v13  ;;  %v836_v1 = vpack.c.bf16 %v798_v58, %v797_v57  ;;  %v389_v28 = vpack.c.bf16 %v353_v17, %v352_v16  ;;  %v297_v51 = vadd.f32 %v3438_v19, %v226_v43  ;;  %v809_v57 = vld [vmem:[%s4058_s4 + $0x1f0] sm:$0xff]  ;;  %v810_v58 = vld [vmem:[%s4058_s4 + $0x1f8] sm:$0xff] }
  0x6d   :  { %v387_v6 = vpack.c.bf16 %v349_v56, %v348_v55  ;;  %v360_v55 = vmax.f32 %v296_v50, 0.0  ;;  %v842_v60 = vpack.c.bf16 %v810_v58, %v809_v57 }
  0x6e   :  { %v361_v56 = vmax.f32 %v297_v51, 0.0 }
  0x70   :  { %v393_v59 = vpack.c.bf16 %v361_v56, %v360_v55 }
  0x72   :  { %3213 = vmatmul.mubr.bf16.gmra.mxu0 %v383_v11  ;;  %v291_v11 = vadd.f32 %v3438_v19, %v220_v62 }
  0x73   :  { %3293 = vmatmul.mubr.bf16.gmra.mxu1 %v832_v22  ;;  %3216 = vmatprep.mubr.bf16.mxu0 %v384_v23  ;;  %v223_v23 = vmul.f32 %v2657_v12, %v3424_v13  ;;  %v808_v13 = vld [vmem:[%s4058_s4 + $0x1e8] sm:$0xff] }
  0x74   :  { %3296 = vmatprep.mubr.bf16.mxu1 %v833_v26  ;;  %v355_v22 = vmax.f32 %v291_v11, 0.0  ;;  %v801_v26 = vld [vmem:[%s4058_s4 + $0x1b0] sm:$0xff] }
  0x75   :  { %v838_v35 = vpack.c.bf16 %v802_v27, %v801_v26  ;;  %v294_v37 = vadd.f32 %v3438_v19, %v223_v23 }
  0x76   :  { %v390_v36 = vpack.c.bf16 %v355_v22, %v354_v21 }
  0x77   :  { %v358_v44 = vmax.f32 %v294_v37, 0.0 }
  0x79   :  { %v392_v53 = vpack.c.bf16 %v359_v45, %v358_v44 }
  0x7a   :  { %3217 = vmatmul.mubr.bf16.gmra.mxu0 %v385_v39  ;;  %v839_v39 = vpack.c.bf16 %v804_v30, %v803_v29 }
  0x7b   :  { %3297 = vmatmul.mubr.bf16.gmra.mxu1 %v834_v48  ;;  %3220 = vmatprep.mubr.bf16.mxu0 %v386_v49  ;;  %v807_v48 = vld [vmem:[%s4058_s4 + $0x1e0] sm:$0xff]  ;;  %v391_v49 = vpack.c.bf16 %v357_v41, %v356_v40 }
  0x7c   :  { %3300 = vmatprep.mubr.bf16.mxu1 %v835_v52  ;;  %v840_v52 = vpack.c.bf16 %v806_v47, %v805_v46  ;;  %v841_v54 = vpack.c.bf16 %v808_v13, %v807_v48 }
  0x82   :  { %3221 = vmatmul.mubr.bf16.gmra.mxu0 %v387_v6 }
  0x83   :  { %3301 = vmatmul.mubr.bf16.gmra.mxu1 %v836_v1  ;;  %3224 = vmatprep.mubr.bf16.mxu0 %v388_v7 }
  0x84   :  { %3304 = vmatprep.mubr.bf16.mxu1 %v837_v15 }
  0x8a   :  { %3225 = vmatmul.mubr.bf16.gmra.mxu0 %v389_v28 }
  0x8b   :  { %3305 = vmatmul.mubr.bf16.gmra.mxu1 %v838_v35  ;;  %3228 = vmatprep.mubr.bf16.mxu0 %v390_v36 }
  0x8c   :  { %3308 = vmatprep.mubr.bf16.mxu1 %v839_v39 }
  0x92   :  { %3229 = vmatmul.mubr.bf16.gmra.mxu0 %v391_v49 }
  0x93   :  { %3309 = vmatmul.mubr.bf16.gmra.mxu1 %v840_v52  ;;  %3232 = vmatprep.mubr.bf16.mxu0 %v392_v53 }
  0x94   :  { %3312 = vmatprep.mubr.bf16.mxu1 %v841_v54 }
  0x9a   :  { %3233 = vmatmul.mubr.bf16.gmra.mxu0 %v393_v59 }
  0x9b   :  { %3313 = vmatmul.mubr.bf16.gmra.mxu1 %v842_v60 }
  0xe2   :  { %v3174_v19 = vpop.f32.mrf.mxu0 }
  0xe3   :  { %v3254_v61 = vpop.f32.mrf.mxu1  ;;  %v1907_v16 = vmul.f32 %v3174_v19, %v3174_v19 }
  0xe4   :  { %v492_v62 = vpop.f32.mrf.mxu0  ;;  %v2112_v21 = vmul.f32 %v3254_v61, %v3254_v61 }
  0xe5   :  { %v941_v63 = vpop.f32.mrf.mxu1  ;;  %v1905_v5 = vmul.f32 %v492_v62, %v492_v62 }
  0xe6   :  { %v3175_v0 = vpop.f32.mrf.mxu0  ;;  %v2110_v10 = vmul.f32 %v941_v63, %v941_v63 }
  0xe7   :  { %v2671_v1 = vpack.c.bf16 %v3175_v0, %v3174_v19  ;;  %v3255_v2 = vpop.f32.mrf.mxu1  ;;  %v1908_v25 = vmul.f32 %v3175_v0, %v3175_v0 }
  0xe8   :  { %v2831_v3 = vpack.c.bf16 %v3255_v2, %v3254_v61  ;;  %v495_v4 = vpop.f32.mrf.mxu0  ;;  %v2113_v29 = vmul.f32 %v3255_v2, %v3255_v2 }
  0xe9   :  { %3014 = vst [vmem:[%s4060_s6 + $0x8] sm:$0xff] %v2671_v1   ;;  %v2666_v6 = vpack.c.bf16 %v495_v4, %v492_v62  ;;  %v1836_v7 = vadd.f32 %v495_v4, %v492_v62  ;;  %v1906_v8 = vmul.f32 %v495_v4, %v495_v4  ;;  %v944_v9 = vpop.f32.mrf.mxu1 }
  0xea   :  { %3045 = vst [vmem:[%s4061_s8 + $0x8] sm:$0xff] %v2831_v3   ;;  %v2826_v11 = vpack.c.bf16 %v944_v9, %v941_v63  ;;  %v2041_v12 = vadd.f32 %v944_v9, %v941_v63  ;;  %v2111_v14 = vmul.f32 %v944_v9, %v944_v9  ;;  %v3178_v15 = vpop.f32.mrf.mxu0 }
  0xeb   :  { %2667 = vst [vmem:[%s4060_s6] sm:$0xff] %v2666_v6   ;;  %v1837_v17 = vadd.f32 %v3174_v19, %v1836_v7  ;;  %v1969_v18 = vadd.f32 %v1906_v8, %v1905_v5  ;;  %v3258_v20 = vpop.f32.mrf.mxu1  ;;  %v1911_v52 = vmul.f32 %v3178_v15, %v3178_v15 }
  0xec   :  { %2827 = vst [vmem:[%s4061_s8] sm:$0xff] %v2826_v11   ;;  %v2042_v22 = vadd.f32 %v3254_v61, %v2041_v12  ;;  %v2174_v23 = vadd.f32 %v2111_v14, %v2110_v10  ;;  %v508_v24 = vpop.f32.mrf.mxu0  ;;  %v2116_v56 = vmul.f32 %v3258_v20, %v3258_v20 }
  0xed   :  { %v1970_v26 = vadd.f32 %v1969_v18, %v1907_v16  ;;  %v1838_v27 = vadd.f32 %v3175_v0, %v1837_v17  ;;  %v957_v28 = vpop.f32.mrf.mxu1  ;;  %v1909_v34 = vmul.f32 %v508_v24, %v508_v24 }
  0xee   :  { %v2175_v30 = vadd.f32 %v2174_v23, %v2112_v21  ;;  %v2043_v31 = vadd.f32 %v3255_v2, %v2042_v22  ;;  %v3179_v32 = vpop.f32.mrf.mxu0  ;;  %v2114_v39 = vmul.f32 %v957_v28, %v957_v28 }
  0xef   :  { %v1839_v33 = vadd.f32 %v1838_v27, %v508_v24  ;;  %v1971_v35 = vadd.f32 %v1970_v26, %v1908_v25  ;;  %v2681_v36 = vpack.c.bf16 %v3179_v32, %v3178_v15  ;;  %v3259_v37 = vpop.f32.mrf.mxu1  ;;  %v1912_v60 = vmul.f32 %v3179_v32, %v3179_v32 }
  0xf0   :  { %v2044_v38 = vadd.f32 %v2043_v31, %v957_v28  ;;  %v2176_v40 = vadd.f32 %v2175_v30, %v2113_v29  ;;  %v2841_v41 = vpack.c.bf16 %v3259_v37, %v3258_v20  ;;  %v511_v42 = vpop.f32.mrf.mxu0  ;;  %v2117_v63 = vmul.f32 %v3259_v37, %v3259_v37 }
  0xf1   :  { %v1972_v43 = vadd.f32 %v1971_v35, %v1909_v34  ;;  %3016 = vst [vmem:[%s4060_s6 + $0x18] sm:$0xff] %v2681_v36   ;;  %v2676_v44 = vpack.c.bf16 %v511_v42, %v508_v24  ;;  %v1840_v45 = vadd.f32 %v1839_v33, %v511_v42  ;;  %v1910_v46 = vmul.f32 %v511_v42, %v511_v42  ;;  %v960_v47 = vpop.f32.mrf.mxu1 }
  0xf2   :  { %v2177_v48 = vadd.f32 %v2176_v40, %v2114_v39  ;;  %3047 = vst [vmem:[%s4061_s8 + $0x18] sm:$0xff] %v2841_v41   ;;  %v2836_v13 = vpack.c.bf16 %v960_v47, %v957_v28  ;;  %v2045_v49 = vadd.f32 %v2044_v38, %v960_v47  ;;  %v2115_v50 = vmul.f32 %v960_v47, %v960_v47  ;;  %v3182_v51 = vpop.f32.mrf.mxu0 }
  0xf3   :  { %3015 = vst [vmem:[%s4060_s6 + $0x10] sm:$0xff] %v2676_v44   ;;  %v1841_v53 = vadd.f32 %v3178_v15, %v1840_v45  ;;  %v1973_v54 = vadd.f32 %v1972_v43, %v1910_v46  ;;  %v3262_v55 = vpop.f32.mrf.mxu1  ;;  %v1915_v25 = vmul.f32 %v3182_v51, %v3182_v51 }
  0xf4   :  { %3046 = vst [vmem:[%s4061_s8 + $0x10] sm:$0xff] %v2836_v13   ;;  %v2046_v57 = vadd.f32 %v3258_v20, %v2045_v49  ;;  %v2178_v58 = vadd.f32 %v2177_v48, %v2115_v50  ;;  %v524_v59 = vpop.f32.mrf.mxu0  ;;  %v2120_v29 = vmul.f32 %v3262_v55, %v3262_v55 }
  0xf5   :  { %v1974_v19 = vadd.f32 %v1973_v54, %v1911_v52  ;;  %v1842_v61 = vadd.f32 %v3179_v32, %v1841_v53  ;;  %v973_v62 = vpop.f32.mrf.mxu1  ;;  %v1913_v4 = vmul.f32 %v524_v59, %v524_v59 }
  0xf6   :  { %v2179_v0 = vadd.f32 %v2178_v58, %v2116_v56  ;;  %v2047_v1 = vadd.f32 %v3259_v37, %v2046_v57  ;;  %v3183_v2 = vpop.f32.mrf.mxu0  ;;  %v2118_v9 = vmul.f32 %v973_v62, %v973_v62 }
  0xf7   :  { %v1843_v3 = vadd.f32 %v1842_v61, %v524_v59  ;;  %v1975_v5 = vadd.f32 %v1974_v19, %v1912_v60  ;;  %v2691_v6 = vpack.c.bf16 %v3183_v2, %v3182_v51  ;;  %v3263_v7 = vpop.f32.mrf.mxu1  ;;  %v1916_v33 = vmul.f32 %v3183_v2, %v3183_v2 }
  0xf8   :  { %v2048_v8 = vadd.f32 %v2047_v1, %v973_v62  ;;  %v2180_v10 = vadd.f32 %v2179_v0, %v2117_v63  ;;  %v2851_v11 = vpack.c.bf16 %v3263_v7, %v3262_v55  ;;  %v527_v12 = vpop.f32.mrf.mxu0  ;;  %v2121_v37 = vmul.f32 %v3263_v7, %v3263_v7 }
  0xf9   :  { %v1976_v14 = vadd.f32 %v1975_v5, %v1913_v4  ;;  %3018 = vst [vmem:[%s4060_s6 + $0x28] sm:$0xff] %v2691_v6   ;;  %v2686_v15 = vpack.c.bf16 %v527_v12, %v524_v59  ;;  %v1844_v16 = vadd.f32 %v1843_v3, %v527_v12  ;;  %v1914_v17 = vmul.f32 %v527_v12, %v527_v12  ;;  %v976_v18 = vpop.f32.mrf.mxu1 }
  0xfa   :  { %v2181_v20 = vadd.f32 %v2180_v10, %v2118_v9  ;;  %3049 = vst [vmem:[%s4061_s8 + $0x28] sm:$0xff] %v2851_v11   ;;  %v2846_v21 = vpack.c.bf16 %v976_v18, %v973_v62  ;;  %v2049_v22 = vadd.f32 %v2048_v8, %v976_v18  ;;  %v2119_v23 = vmul.f32 %v976_v18, %v976_v18  ;;  %v3186_v24 = vpop.f32.mrf.mxu0 }
  0xfb   :  { %3017 = vst [vmem:[%s4060_s6 + $0x20] sm:$0xff] %v2686_v15   ;;  %v1845_v26 = vadd.f32 %v3182_v51, %v1844_v16  ;;  %v1977_v27 = vadd.f32 %v1976_v14, %v1914_v17  ;;  %v3266_v28 = vpop.f32.mrf.mxu1  ;;  %v1919_v60 = vmul.f32 %v3186_v24, %v3186_v24 }
  0xfc   :  { %3048 = vst [vmem:[%s4061_s8 + $0x20] sm:$0xff] %v2846_v21   ;;  %v2050_v30 = vadd.f32 %v3262_v55, %v2049_v22  ;;  %v2182_v31 = vadd.f32 %v2181_v20, %v2119_v23  ;;  %v540_v32 = vpop.f32.mrf.mxu0  ;;  %v2124_v63 = vmul.f32 %v3266_v28, %v3266_v28 }
  0xfd   :  { %v1978_v34 = vadd.f32 %v1977_v27, %v1915_v25  ;;  %v1846_v35 = vadd.f32 %v3183_v2, %v1845_v26  ;;  %v989_v36 = vpop.f32.mrf.mxu1  ;;  %v1917_v42 = vmul.f32 %v540_v32, %v540_v32 }
  0xfe   :  { %v2183_v38 = vadd.f32 %v2182_v31, %v2120_v29  ;;  %v2051_v39 = vadd.f32 %v3263_v7, %v2050_v30  ;;  %v3187_v40 = vpop.f32.mrf.mxu0  ;;  %v2122_v47 = vmul.f32 %v989_v36, %v989_v36 }
  0xff   :  { %v1847_v41 = vadd.f32 %v1846_v35, %v540_v32  ;;  %v1979_v43 = vadd.f32 %v1978_v34, %v1916_v33  ;;  %v2701_v44 = vpack.c.bf16 %v3187_v40, %v3186_v24  ;;  %v3267_v45 = vpop.f32.mrf.mxu1  ;;  %v1920_v3 = vmul.f32 %v3187_v40, %v3187_v40 }
 0x100   :  { %v2052_v46 = vadd.f32 %v2051_v39, %v989_v36  ;;  %v2184_v48 = vadd.f32 %v2183_v38, %v2121_v37  ;;  %v2861_v13 = vpack.c.bf16 %v3267_v45, %v3266_v28  ;;  %v543_v49 = vpop.f32.mrf.mxu0  ;;  %v2125_v7 = vmul.f32 %v3267_v45, %v3267_v45 }
 0x101   :  { %v1980_v50 = vadd.f32 %v1979_v43, %v1917_v42  ;;  %3020 = vst [vmem:[%s4060_s6 + $0x38] sm:$0xff] %v2701_v44   ;;  %v2696_v51 = vpack.c.bf16 %v543_v49, %v540_v32  ;;  %v1848_v52 = vadd.f32 %v1847_v41, %v543_v49  ;;  %v1918_v53 = vmul.f32 %v543_v49, %v543_v49  ;;  %v992_v54 = vpop.f32.mrf.mxu1 }
 0x102   :  { %v2185_v55 = vadd.f32 %v2184_v48, %v2122_v47  ;;  %3051 = vst [vmem:[%s4061_s8 + $0x38] sm:$0xff] %v2861_v13   ;;  %v2856_v56 = vpack.c.bf16 %v992_v54, %v989_v36  ;;  %v2053_v57 = vadd.f32 %v2052_v46, %v992_v54  ;;  %v2123_v58 = vmul.f32 %v992_v54, %v992_v54  ;;  %v3190_v59 = vpop.f32.mrf.mxu0 }
 0x103   :  { %3019 = vst [vmem:[%s4060_s6 + $0x30] sm:$0xff] %v2696_v51   ;;  %v1849_v19 = vadd.f32 %v3186_v24, %v1848_v52  ;;  %v1981_v61 = vadd.f32 %v1980_v50, %v1918_v53  ;;  %v3270_v62 = vpop.f32.mrf.mxu1  ;;  %v1923_v33 = vmul.f32 %v3190_v59, %v3190_v59 }
 0x104   :  { %3050 = vst [vmem:[%s4061_s8 + $0x30] sm:$0xff] %v2856_v56   ;;  %v2054_v0 = vadd.f32 %v3266_v28, %v2053_v57  ;;  %v2186_v1 = vadd.f32 %v2185_v55, %v2123_v58  ;;  %v556_v2 = vpop.f32.mrf.mxu0  ;;  %v2128_v37 = vmul.f32 %v3270_v62, %v3270_v62 }
 0x105   :  { %v1982_v4 = vadd.f32 %v1981_v61, %v1919_v60  ;;  %v1850_v5 = vadd.f32 %v3187_v40, %v1849_v19  ;;  %v1005_v6 = vpop.f32.mrf.mxu1  ;;  %v1921_v12 = vmul.f32 %v556_v2, %v556_v2 }
 0x106   :  { %v2187_v8 = vadd.f32 %v2186_v1, %v2124_v63  ;;  %v2055_v9 = vadd.f32 %v3267_v45, %v2054_v0  ;;  %v3191_v10 = vpop.f32.mrf.mxu0  ;;  %v2126_v18 = vmul.f32 %v1005_v6, %v1005_v6 }
 0x107   :  { %v1851_v11 = vadd.f32 %v1850_v5, %v556_v2  ;;  %v1983_v14 = vadd.f32 %v1982_v4, %v1920_v3  ;;  %v2711_v15 = vpack.c.bf16 %v3191_v10, %v3190_v59  ;;  %v3271_v16 = vpop.f32.mrf.mxu1  ;;  %v1924_v41 = vmul.f32 %v3191_v10, %v3191_v10 }
 0x108   :  { %v2056_v17 = vadd.f32 %v2055_v9, %v1005_v6  ;;  %v2188_v20 = vadd.f32 %v2187_v8, %v2125_v7  ;;  %v2871_v21 = vpack.c.bf16 %v3271_v16, %v3270_v62  ;;  %v559_v22 = vpop.f32.mrf.mxu0  ;;  %v2129_v45 = vmul.f32 %v3271_v16, %v3271_v16 }
 0x109   :  { %v1984_v23 = vadd.f32 %v1983_v14, %v1921_v12  ;;  %3022 = vst [vmem:[%s4060_s6 + $0x48] sm:$0xff] %v2711_v15   ;;  %v2706_v24 = vpack.c.bf16 %v559_v22, %v556_v2  ;;  %v1852_v25 = vadd.f32 %v1851_v11, %v559_v22  ;;  %v1922_v26 = vmul.f32 %v559_v22, %v559_v22  ;;  %v1008_v27 = vpop.f32.mrf.mxu1 }
 0x10a   :  { %v2189_v28 = vadd.f32 %v2188_v20, %v2126_v18  ;;  %3053 = vst [vmem:[%s4061_s8 + $0x48] sm:$0xff] %v2871_v21   ;;  %v2866_v29 = vpack.c.bf16 %v1008_v27, %v1005_v6  ;;  %v2057_v30 = vadd.f32 %v2056_v17, %v1008_v27  ;;  %v2127_v31 = vmul.f32 %v1008_v27, %v1008_v27  ;;  %v3194_v32 = vpop.f32.mrf.mxu0 }
 0x10b   :  { %3021 = vst [vmem:[%s4060_s6 + $0x40] sm:$0xff] %v2706_v24   ;;  %v1853_v34 = vadd.f32 %v3190_v59, %v1852_v25  ;;  %v1985_v35 = vadd.f32 %v1984_v23, %v1922_v26  ;;  %v3274_v36 = vpop.f32.mrf.mxu1  ;;  %v1927_v3 = vmul.f32 %v3194_v32, %v3194_v32 }
 0x10c   :  { %3052 = vst [vmem:[%s4061_s8 + $0x40] sm:$0xff] %v2866_v29   ;;  %v2058_v38 = vadd.f32 %v3270_v62, %v2057_v30  ;;  %v2190_v39 = vadd.f32 %v2189_v28, %v2127_v31  ;;  %v572_v40 = vpop.f32.mrf.mxu0  ;;  %v2132_v7 = vmul.f32 %v3274_v36, %v3274_v36 }
 0x10d   :  { %v1986_v42 = vadd.f32 %v1985_v35, %v1923_v33  ;;  %v1854_v43 = vadd.f32 %v3191_v10, %v1853_v34  ;;  %v1021_v44 = vpop.f32.mrf.mxu1  ;;  %v1925_v49 = vmul.f32 %v572_v40, %v572_v40 }
 0x10e   :  { %v2191_v46 = vadd.f32 %v2190_v39, %v2128_v37  ;;  %v2059_v47 = vadd.f32 %v3271_v16, %v2058_v38  ;;  %v3195_v48 = vpop.f32.mrf.mxu0  ;;  %v2130_v54 = vmul.f32 %v1021_v44, %v1021_v44 }
 0x10f   :  { %v1855_v13 = vadd.f32 %v1854_v43, %v572_v40  ;;  %v1987_v50 = vadd.f32 %v1986_v42, %v1924_v41  ;;  %v2721_v51 = vpack.c.bf16 %v3195_v48, %v3194_v32  ;;  %v3275_v52 = vpop.f32.mrf.mxu1  ;;  %v1928_v11 = vmul.f32 %v3195_v48, %v3195_v48 }
 0x110   :  { %v2060_v53 = vadd.f32 %v2059_v47, %v1021_v44  ;;  %v2192_v55 = vadd.f32 %v2191_v46, %v2129_v45  ;;  %v2881_v56 = vpack.c.bf16 %v3275_v52, %v3274_v36  ;;  %v575_v57 = vpop.f32.mrf.mxu0  ;;  %v2133_v16 = vmul.f32 %v3275_v52, %v3275_v52 }
 0x111   :  { %v1988_v58 = vadd.f32 %v1987_v50, %v1925_v49  ;;  %3024 = vst [vmem:[%s4060_s6 + $0x58] sm:$0xff] %v2721_v51   ;;  %v2716_v59 = vpack.c.bf16 %v575_v57, %v572_v40  ;;  %v1856_v60 = vadd.f32 %v1855_v13, %v575_v57  ;;  %v1926_v19 = vmul.f32 %v575_v57, %v575_v57  ;;  %v1024_v61 = vpop.f32.mrf.mxu1 }
 0x112   :  { %v2193_v62 = vadd.f32 %v2192_v55, %v2130_v54  ;;  %3055 = vst [vmem:[%s4061_s8 + $0x58] sm:$0xff] %v2881_v56   ;;  %v2876_v63 = vpack.c.bf16 %v1024_v61, %v1021_v44  ;;  %v2061_v0 = vadd.f32 %v2060_v53, %v1024_v61  ;;  %v2131_v1 = vmul.f32 %v1024_v61, %v1024_v61  ;;  %v3198_v2 = vpop.f32.mrf.mxu0 }
 0x113   :  { %3023 = vst [vmem:[%s4060_s6 + $0x50] sm:$0xff] %v2716_v59   ;;  %v1857_v4 = vadd.f32 %v3194_v32, %v1856_v60  ;;  %v1989_v5 = vadd.f32 %v1988_v58, %v1926_v19  ;;  %v3278_v6 = vpop.f32.mrf.mxu1  ;;  %v1931_v41 = vmul.f32 %v3198_v2, %v3198_v2 }
 0x114   :  { %3054 = vst [vmem:[%s4061_s8 + $0x50] sm:$0xff] %v2876_v63   ;;  %v2062_v8 = vadd.f32 %v3274_v36, %v2061_v0  ;;  %v2194_v9 = vadd.f32 %v2193_v62, %v2131_v1  ;;  %v588_v10 = vpop.f32.mrf.mxu0  ;;  %v2136_v45 = vmul.f32 %v3278_v6, %v3278_v6 }
 0x115   :  { %v1990_v12 = vadd.f32 %v1989_v5, %v1927_v3  ;;  %v1858_v14 = vadd.f32 %v3195_v48, %v1857_v4  ;;  %v1037_v15 = vpop.f32.mrf.mxu1  ;;  %v1929_v22 = vmul.f32 %v588_v10, %v588_v10 }
 0x116   :  { %v2195_v17 = vadd.f32 %v2194_v9, %v2132_v7  ;;  %v2063_v18 = vadd.f32 %v3275_v52, %v2062_v8  ;;  %v3199_v20 = vpop.f32.mrf.mxu0  ;;  %v2134_v27 = vmul.f32 %v1037_v15, %v1037_v15 }
 0x117   :  { %v1859_v21 = vadd.f32 %v1858_v14, %v588_v10  ;;  %v1991_v23 = vadd.f32 %v1990_v12, %v1928_v11  ;;  %v2731_v24 = vpack.c.bf16 %v3199_v20, %v3198_v2  ;;  %v3279_v25 = vpop.f32.mrf.mxu1  ;;  %v1932_v13 = vmul.f32 %v3199_v20, %v3199_v20 }
 0x118   :  { %v2064_v26 = vadd.f32 %v2063_v18, %v1037_v15  ;;  %v2196_v28 = vadd.f32 %v2195_v17, %v2133_v16  ;;  %v2891_v29 = vpack.c.bf16 %v3279_v25, %v3278_v6  ;;  %v591_v30 = vpop.f32.mrf.mxu0  ;;  %v2137_v52 = vmul.f32 %v3279_v25, %v3279_v25 }
 0x119   :  { %v1992_v31 = vadd.f32 %v1991_v23, %v1929_v22  ;;  %3026 = vst [vmem:[%s4060_s6 + $0x68] sm:$0xff] %v2731_v24   ;;  %v2726_v32 = vpack.c.bf16 %v591_v30, %v588_v10  ;;  %v1860_v33 = vadd.f32 %v1859_v21, %v591_v30  ;;  %v1930_v34 = vmul.f32 %v591_v30, %v591_v30  ;;  %v1040_v35 = vpop.f32.mrf.mxu1 }
 0x11a   :  { %v2197_v36 = vadd.f32 %v2196_v28, %v2134_v27  ;;  %3057 = vst [vmem:[%s4061_s8 + $0x68] sm:$0xff] %v2891_v29   ;;  %v2886_v37 = vpack.c.bf16 %v1040_v35, %v1037_v15  ;;  %v2065_v38 = vadd.f32 %v2064_v26, %v1040_v35  ;;  %v2135_v39 = vmul.f32 %v1040_v35, %v1040_v35  ;;  %v3202_v40 = vpop.f32.mrf.mxu0 }
 0x11b   :  { %3025 = vst [vmem:[%s4060_s6 + $0x60] sm:$0xff] %v2726_v32   ;;  %v1861_v42 = vadd.f32 %v3198_v2, %v1860_v33  ;;  %v1993_v43 = vadd.f32 %v1992_v31, %v1930_v34  ;;  %v3282_v44 = vpop.f32.mrf.mxu1  ;;  %v1935_v11 = vmul.f32 %v3202_v40, %v3202_v40 }
 0x11c   :  { %3056 = vst [vmem:[%s4061_s8 + $0x60] sm:$0xff] %v2886_v37   ;;  %v2066_v46 = vadd.f32 %v3278_v6, %v2065_v38  ;;  %v2198_v47 = vadd.f32 %v2197_v36, %v2135_v39  ;;  %v604_v48 = vpop.f32.mrf.mxu0  ;;  %v2140_v16 = vmul.f32 %v3282_v44, %v3282_v44 }
 0x11d   :  { %v1994_v49 = vadd.f32 %v1993_v43, %v1931_v41  ;;  %v1862_v50 = vadd.f32 %v3199_v20, %v1861_v42  ;;  %v1053_v51 = vpop.f32.mrf.mxu1  ;;  %v1933_v57 = vmul.f32 %v604_v48, %v604_v48 }
 0x11e   :  { %v2199_v53 = vadd.f32 %v2198_v47, %v2136_v45  ;;  %v2067_v54 = vadd.f32 %v3279_v25, %v2066_v46  ;;  %v3203_v55 = vpop.f32.mrf.mxu0  ;;  %v2138_v61 = vmul.f32 %v1053_v51, %v1053_v51 }
 0x11f   :  { %v1863_v56 = vadd.f32 %v1862_v50, %v604_v48  ;;  %v1995_v58 = vadd.f32 %v1994_v49, %v1932_v13  ;;  %v2741_v59 = vpack.c.bf16 %v3203_v55, %v3202_v40  ;;  %v3283_v60 = vpop.f32.mrf.mxu1  ;;  %v1936_v21 = vmul.f32 %v3203_v55, %v3203_v55 }
 0x120   :  { %v2068_v19 = vadd.f32 %v2067_v54, %v1053_v51  ;;  %v2200_v62 = vadd.f32 %v2199_v53, %v2137_v52  ;;  %v2901_v63 = vpack.c.bf16 %v3283_v60, %v3282_v44  ;;  %v607_v0 = vpop.f32.mrf.mxu0  ;;  %v2141_v25 = vmul.f32 %v3283_v60, %v3283_v60 }
 0x121   :  { %v1996_v1 = vadd.f32 %v1995_v58, %v1933_v57  ;;  %3028 = vst [vmem:[%s4060_s6 + $0x78] sm:$0xff] %v2741_v59   ;;  %v2736_v2 = vpack.c.bf16 %v607_v0, %v604_v48  ;;  %v1864_v3 = vadd.f32 %v1863_v56, %v607_v0  ;;  %v1934_v4 = vmul.f32 %v607_v0, %v607_v0  ;;  %v1056_v5 = vpop.f32.mrf.mxu1 }
 0x122   :  { %v2201_v6 = vadd.f32 %v2200_v62, %v2138_v61  ;;  %3059 = vst [vmem:[%s4061_s8 + $0x78] sm:$0xff] %v2901_v63   ;;  %v2896_v7 = vpack.c.bf16 %v1056_v5, %v1053_v51  ;;  %v2069_v8 = vadd.f32 %v2068_v19, %v1056_v5  ;;  %v2139_v9 = vmul.f32 %v1056_v5, %v1056_v5  ;;  %v3206_v10 = vpop.f32.mrf.mxu0 }
 0x123   :  { %3027 = vst [vmem:[%s4060_s6 + $0x70] sm:$0xff] %v2736_v2   ;;  %v1865_v12 = vadd.f32 %v3202_v40, %v1864_v3  ;;  %v1997_v14 = vadd.f32 %v1996_v1, %v1934_v4  ;;  %v3286_v15 = vpop.f32.mrf.mxu1  ;;  %v1939_v13 = vmul.f32 %v3206_v10, %v3206_v10 }
 0x124   :  { %3058 = vst [vmem:[%s4061_s8 + $0x70] sm:$0xff] %v2896_v7   ;;  %v2070_v17 = vadd.f32 %v3282_v44, %v2069_v8  ;;  %v2202_v18 = vadd.f32 %v2201_v6, %v2139_v9  ;;  %v620_v20 = vpop.f32.mrf.mxu0  ;;  %v2144_v52 = vmul.f32 %v3286_v15, %v3286_v15 }
 0x125   :  { %v1998_v22 = vadd.f32 %v1997_v14, %v1935_v11  ;;  %v1866_v23 = vadd.f32 %v3203_v55, %v1865_v12  ;;  %v1069_v24 = vpop.f32.mrf.mxu1  ;;  %v1937_v30 = vmul.f32 %v620_v20, %v620_v20 }
 0x126   :  { %v2203_v26 = vadd.f32 %v2202_v18, %v2140_v16  ;;  %v2071_v27 = vadd.f32 %v3283_v60, %v2070_v17  ;;  %v3207_v28 = vpop.f32.mrf.mxu0  ;;  %v2142_v35 = vmul.f32 %v1069_v24, %v1069_v24 }
 0x127   :  { %v1867_v29 = vadd.f32 %v1866_v23, %v620_v20  ;;  %v1999_v31 = vadd.f32 %v1998_v22, %v1936_v21  ;;  %v2751_v32 = vpack.c.bf16 %v3207_v28, %v3206_v10  ;;  %v3287_v33 = vpop.f32.mrf.mxu1  ;;  %v1940_v56 = vmul.f32 %v3207_v28, %v3207_v28 }
 0x128   :  { %v2072_v34 = vadd.f32 %v2071_v27, %v1069_v24  ;;  %v2204_v36 = vadd.f32 %v2203_v26, %v2141_v25  ;;  %v2911_v37 = vpack.c.bf16 %v3287_v33, %v3286_v15  ;;  %v623_v38 = vpop.f32.mrf.mxu0  ;;  %v2145_v60 = vmul.f32 %v3287_v33, %v3287_v33 }
 0x129   :  { %v2000_v39 = vadd.f32 %v1999_v31, %v1937_v30  ;;  %3030 = vst [vmem:[%s4060_s6 + $0x88] sm:$0xff] %v2751_v32   ;;  %v2746_v40 = vpack.c.bf16 %v623_v38, %v620_v20  ;;  %v1868_v41 = vadd.f32 %v1867_v29, %v623_v38  ;;  %v1938_v42 = vmul.f32 %v623_v38, %v623_v38  ;;  %v1072_v43 = vpop.f32.mrf.mxu1 }
 0x12a   :  { %v2205_v44 = vadd.f32 %v2204_v36, %v2142_v35  ;;  %3061 = vst [vmem:[%s4061_s8 + $0x88] sm:$0xff] %v2911_v37   ;;  %v2906_v45 = vpack.c.bf16 %v1072_v43, %v1069_v24  ;;  %v2073_v46 = vadd.f32 %v2072_v34, %v1072_v43  ;;  %v2143_v47 = vmul.f32 %v1072_v43, %v1072_v43  ;;  %v3210_v48 = vpop.f32.mrf.mxu0 }
 0x12b   :  { %3029 = vst [vmem:[%s4060_s6 + $0x80] sm:$0xff] %v2746_v40   ;;  %v1869_v49 = vadd.f32 %v3206_v10, %v1868_v41  ;;  %v2001_v50 = vadd.f32 %v2000_v39, %v1938_v42  ;;  %v3290_v51 = vpop.f32.mrf.mxu1  ;;  %v1943_v21 = vmul.f32 %v3210_v48, %v3210_v48 }
 0x12c   :  { %3060 = vst [vmem:[%s4061_s8 + $0x80] sm:$0xff] %v2906_v45   ;;  %v2074_v53 = vadd.f32 %v3286_v15, %v2073_v46  ;;  %v2206_v54 = vadd.f32 %v2205_v44, %v2143_v47  ;;  %v636_v55 = vpop.f32.mrf.mxu0  ;;  %v2148_v25 = vmul.f32 %v3290_v51, %v3290_v51 }
 0x12d   :  { %v2002_v57 = vadd.f32 %v2001_v50, %v1939_v13  ;;  %v1870_v58 = vadd.f32 %v3207_v28, %v1869_v49  ;;  %v1085_v59 = vpop.f32.mrf.mxu1  ;;  %v1941_v0 = vmul.f32 %v636_v55, %v636_v55 }
 0x12e   :  { %v2207_v19 = vadd.f32 %v2206_v54, %v2144_v52  ;;  %v2075_v61 = vadd.f32 %v3287_v33, %v2074_v53  ;;  %v3211_v62 = vpop.f32.mrf.mxu0  ;;  %v2146_v5 = vmul.f32 %v1085_v59, %v1085_v59 }
 0x12f   :  { %v1871_v63 = vadd.f32 %v1870_v58, %v636_v55  ;;  %v2003_v1 = vadd.f32 %v2002_v57, %v1940_v56  ;;  %v2761_v2 = vpack.c.bf16 %v3211_v62, %v3210_v48  ;;  %v3291_v3 = vpop.f32.mrf.mxu1  ;;  %v1944_v29 = vmul.f32 %v3211_v62, %v3211_v62 }
 0x130   :  { %v2076_v4 = vadd.f32 %v2075_v61, %v1085_v59  ;;  %v2208_v6 = vadd.f32 %v2207_v19, %v2145_v60  ;;  %v2921_v7 = vpack.c.bf16 %v3291_v3, %v3290_v51  ;;  %v639_v8 = vpop.f32.mrf.mxu0  ;;  %v2149_v33 = vmul.f32 %v3291_v3, %v3291_v3 }
 0x131   :  { %v2004_v9 = vadd.f32 %v2003_v1, %v1941_v0  ;;  %3032 = vst [vmem:[%s4060_s6 + $0x98] sm:$0xff] %v2761_v2   ;;  %v2756_v10 = vpack.c.bf16 %v639_v8, %v636_v55  ;;  %v1872_v11 = vadd.f32 %v1871_v63, %v639_v8  ;;  %v1942_v12 = vmul.f32 %v639_v8, %v639_v8  ;;  %v1088_v14 = vpop.f32.mrf.mxu1 }
 0x132   :  { %v2209_v15 = vadd.f32 %v2208_v6, %v2146_v5  ;;  %3063 = vst [vmem:[%s4061_s8 + $0x98] sm:$0xff] %v2921_v7   ;;  %v2916_v16 = vpack.c.bf16 %v1088_v14, %v1085_v59  ;;  %v2077_v17 = vadd.f32 %v2076_v4, %v1088_v14  ;;  %v2147_v18 = vmul.f32 %v1088_v14, %v1088_v14  ;;  %v3214_v20 = vpop.f32.mrf.mxu0 }
 0x133   :  { %3031 = vst [vmem:[%s4060_s6 + $0x90] sm:$0xff] %v2756_v10   ;;  %v1873_v22 = vadd.f32 %v3210_v48, %v1872_v11  ;;  %v2005_v23 = vadd.f32 %v2004_v9, %v1942_v12  ;;  %v3294_v24 = vpop.f32.mrf.mxu1  ;;  %v1947_v56 = vmul.f32 %v3214_v20, %v3214_v20 }
 0x134   :  { %3062 = vst [vmem:[%s4061_s8 + $0x90] sm:$0xff] %v2916_v16   ;;  %v2078_v26 = vadd.f32 %v3290_v51, %v2077_v17  ;;  %v2210_v27 = vadd.f32 %v2209_v15, %v2147_v18  ;;  %v652_v28 = vpop.f32.mrf.mxu0  ;;  %v2152_v60 = vmul.f32 %v3294_v24, %v3294_v24 }
 0x135   :  { %v2006_v30 = vadd.f32 %v2005_v23, %v1943_v21  ;;  %v1874_v31 = vadd.f32 %v3211_v62, %v1873_v22  ;;  %v1101_v32 = vpop.f32.mrf.mxu1  ;;  %v1945_v38 = vmul.f32 %v652_v28, %v652_v28 }
 0x136   :  { %v2211_v34 = vadd.f32 %v2210_v27, %v2148_v25  ;;  %v2079_v35 = vadd.f32 %v3291_v3, %v2078_v26  ;;  %v3215_v36 = vpop.f32.mrf.mxu0  ;;  %v2150_v43 = vmul.f32 %v1101_v32, %v1101_v32 }
 0x137   :  { %v1875_v37 = vadd.f32 %v1874_v31, %v652_v28  ;;  %v2007_v39 = vadd.f32 %v2006_v30, %v1944_v29  ;;  %v2771_v40 = vpack.c.bf16 %v3215_v36, %v3214_v20  ;;  %v3295_v41 = vpop.f32.mrf.mxu1  ;;  %v1948_v63 = vmul.f32 %v3215_v36, %v3215_v36 }
 0x138   :  { %v2080_v42 = vadd.f32 %v2079_v35, %v1101_v32  ;;  %v2212_v44 = vadd.f32 %v2211_v34, %v2149_v33  ;;  %v2931_v45 = vpack.c.bf16 %v3295_v41, %v3294_v24  ;;  %v655_v46 = vpop.f32.mrf.mxu0  ;;  %v2153_v3 = vmul.f32 %v3295_v41, %v3295_v41 }
 0x139   :  { %v2008_v47 = vadd.f32 %v2007_v39, %v1945_v38  ;;  %3034 = vst [vmem:[%s4060_s6 + $0xa8] sm:$0xff] %v2771_v40   ;;  %v2766_v48 = vpack.c.bf16 %v655_v46, %v652_v28  ;;  %v1876_v13 = vadd.f32 %v1875_v37, %v655_v46  ;;  %v1946_v49 = vmul.f32 %v655_v46, %v655_v46  ;;  %v1104_v50 = vpop.f32.mrf.mxu1 }
 0x13a   :  { %v2213_v51 = vadd.f32 %v2212_v44, %v2150_v43  ;;  %3065 = vst [vmem:[%s4061_s8 + $0xa8] sm:$0xff] %v2931_v45   ;;  %v2926_v52 = vpack.c.bf16 %v1104_v50, %v1101_v32  ;;  %v2081_v53 = vadd.f32 %v2080_v42, %v1104_v50  ;;  %v2151_v54 = vmul.f32 %v1104_v50, %v1104_v50  ;;  %v3218_v55 = vpop.f32.mrf.mxu0 }
 0x13b   :  { %3033 = vst [vmem:[%s4060_s6 + $0xa0] sm:$0xff] %v2766_v48   ;;  %v1877_v57 = vadd.f32 %v3214_v20, %v1876_v13  ;;  %v2009_v58 = vadd.f32 %v2008_v47, %v1946_v49  ;;  %v3298_v59 = vpop.f32.mrf.mxu1  ;;  %v1951_v29 = vmul.f32 %v3218_v55, %v3218_v55 }
 0x13c   :  { %3064 = vst [vmem:[%s4061_s8 + $0xa0] sm:$0xff] %v2926_v52   ;;  %v2082_v19 = vadd.f32 %v3294_v24, %v2081_v53  ;;  %v2214_v61 = vadd.f32 %v2213_v51, %v2151_v54  ;;  %v668_v62 = vpop.f32.mrf.mxu0  ;;  %v2156_v33 = vmul.f32 %v3298_v59, %v3298_v59 }
 0x13d   :  { %v2010_v0 = vadd.f32 %v2009_v58, %v1947_v56  ;;  %v1878_v1 = vadd.f32 %v3215_v36, %v1877_v57  ;;  %v1117_v2 = vpop.f32.mrf.mxu1  ;;  %v1949_v8 = vmul.f32 %v668_v62, %v668_v62 }
 0x13e   :  { %v2215_v4 = vadd.f32 %v2214_v61, %v2152_v60  ;;  %v2083_v5 = vadd.f32 %v3295_v41, %v2082_v19  ;;  %v3219_v6 = vpop.f32.mrf.mxu0  ;;  %v2154_v14 = vmul.f32 %v1117_v2, %v1117_v2 }
 0x13f   :  { %v1879_v7 = vadd.f32 %v1878_v1, %v668_v62  ;;  %v2011_v9 = vadd.f32 %v2010_v0, %v1948_v63  ;;  %v2781_v10 = vpack.c.bf16 %v3219_v6, %v3218_v55  ;;  %v3299_v11 = vpop.f32.mrf.mxu1  ;;  %v1952_v37 = vmul.f32 %v3219_v6, %v3219_v6 }
 0x140   :  { %v2084_v12 = vadd.f32 %v2083_v5, %v1117_v2  ;;  %v2216_v15 = vadd.f32 %v2215_v4, %v2153_v3  ;;  %v2941_v16 = vpack.c.bf16 %v3299_v11, %v3298_v59  ;;  %v671_v17 = vpop.f32.mrf.mxu0  ;;  %v2157_v41 = vmul.f32 %v3299_v11, %v3299_v11 }
 0x141   :  { %v2012_v18 = vadd.f32 %v2011_v9, %v1949_v8  ;;  %3036 = vst [vmem:[%s4060_s6 + $0xb8] sm:$0xff] %v2781_v10   ;;  %v2776_v20 = vpack.c.bf16 %v671_v17, %v668_v62  ;;  %v1880_v21 = vadd.f32 %v1879_v7, %v671_v17  ;;  %v1950_v22 = vmul.f32 %v671_v17, %v671_v17  ;;  %v1120_v23 = vpop.f32.mrf.mxu1 }
 0x142   :  { %v2217_v24 = vadd.f32 %v2216_v15, %v2154_v14  ;;  %3067 = vst [vmem:[%s4061_s8 + $0xb8] sm:$0xff] %v2941_v16   ;;  %v2936_v25 = vpack.c.bf16 %v1120_v23, %v1117_v2  ;;  %v2085_v26 = vadd.f32 %v2084_v12, %v1120_v23  ;;  %v2155_v27 = vmul.f32 %v1120_v23, %v1120_v23  ;;  %v3222_v28 = vpop.f32.mrf.mxu0 }
 0x143   :  { %3035 = vst [vmem:[%s4060_s6 + $0xb0] sm:$0xff] %v2776_v20   ;;  %v1881_v30 = vadd.f32 %v3218_v55, %v1880_v21  ;;  %v2013_v31 = vadd.f32 %v2012_v18, %v1950_v22  ;;  %v3302_v32 = vpop.f32.mrf.mxu1  ;;  %v1955_v63 = vmul.f32 %v3222_v28, %v3222_v28 }
 0x144   :  { %3066 = vst [vmem:[%s4061_s8 + $0xb0] sm:$0xff] %v2936_v25   ;;  %v2086_v34 = vadd.f32 %v3298_v59, %v2085_v26  ;;  %v2218_v35 = vadd.f32 %v2217_v24, %v2155_v27  ;;  %v684_v36 = vpop.f32.mrf.mxu0  ;;  %v2160_v3 = vmul.f32 %v3302_v32, %v3302_v32 }
 0x145   :  { %v2014_v38 = vadd.f32 %v2013_v31, %v1951_v29  ;;  %v1882_v39 = vadd.f32 %v3219_v6, %v1881_v30  ;;  %v1133_v40 = vpop.f32.mrf.mxu1  ;;  %v1953_v46 = vmul.f32 %v684_v36, %v684_v36 }
 0x146   :  { %v2219_v42 = vadd.f32 %v2218_v35, %v2156_v33  ;;  %v2087_v43 = vadd.f32 %v3299_v11, %v2086_v34  ;;  %v3223_v44 = vpop.f32.mrf.mxu0  ;;  %v2158_v50 = vmul.f32 %v1133_v40, %v1133_v40 }
 0x147   :  { %v1883_v45 = vadd.f32 %v1882_v39, %v684_v36  ;;  %v2015_v47 = vadd.f32 %v2014_v38, %v1952_v37  ;;  %v2791_v48 = vpack.c.bf16 %v3223_v44, %v3222_v28  ;;  %v3303_v13 = vpop.f32.mrf.mxu1  ;;  %v1956_v7 = vmul.f32 %v3223_v44, %v3223_v44 }
 0x148   :  { %v2088_v49 = vadd.f32 %v2087_v43, %v1133_v40  ;;  %v2220_v51 = vadd.f32 %v2219_v42, %v2157_v41  ;;  %v2951_v52 = vpack.c.bf16 %v3303_v13, %v3302_v32  ;;  %v687_v53 = vpop.f32.mrf.mxu0  ;;  %v2161_v11 = vmul.f32 %v3303_v13, %v3303_v13 }
 0x149   :  { %v2016_v54 = vadd.f32 %v2015_v47, %v1953_v46  ;;  %3038 = vst [vmem:[%s4060_s6 + $0xc8] sm:$0xff] %v2791_v48   ;;  %v2786_v55 = vpack.c.bf16 %v687_v53, %v684_v36  ;;  %v1884_v56 = vadd.f32 %v1883_v45, %v687_v53  ;;  %v1954_v57 = vmul.f32 %v687_v53, %v687_v53  ;;  %v1136_v58 = vpop.f32.mrf.mxu1 }
 0x14a   :  { %v2221_v59 = vadd.f32 %v2220_v51, %v2158_v50  ;;  %3069 = vst [vmem:[%s4061_s8 + $0xc8] sm:$0xff] %v2951_v52   ;;  %v2946_v60 = vpack.c.bf16 %v1136_v58, %v1133_v40  ;;  %v2089_v19 = vadd.f32 %v2088_v49, %v1136_v58  ;;  %v2159_v61 = vmul.f32 %v1136_v58, %v1136_v58  ;;  %v3226_v62 = vpop.f32.mrf.mxu0 }
 0x14b   :  { %3037 = vst [vmem:[%s4060_s6 + $0xc0] sm:$0xff] %v2786_v55   ;;  %v1885_v0 = vadd.f32 %v3222_v28, %v1884_v56  ;;  %v2017_v1 = vadd.f32 %v2016_v54, %v1954_v57  ;;  %v3306_v2 = vpop.f32.mrf.mxu1  ;;  %v1959_v37 = vmul.f32 %v3226_v62, %v3226_v62 }
 0x14c   :  { %3068 = vst [vmem:[%s4061_s8 + $0xc0] sm:$0xff] %v2946_v60   ;;  %v2090_v4 = vadd.f32 %v3302_v32, %v2089_v19  ;;  %v2222_v5 = vadd.f32 %v2221_v59, %v2159_v61  ;;  %v700_v6 = vpop.f32.mrf.mxu0  ;;  %v2164_v41 = vmul.f32 %v3306_v2, %v3306_v2 }
 0x14d   :  { %v2018_v8 = vadd.f32 %v2017_v1, %v1955_v63  ;;  %v1886_v9 = vadd.f32 %v3223_v44, %v1885_v0  ;;  %v1149_v10 = vpop.f32.mrf.mxu1  ;;  %v1957_v17 = vmul.f32 %v700_v6, %v700_v6 }
 0x14e   :  { %v2223_v12 = vadd.f32 %v2222_v5, %v2160_v3  ;;  %v2091_v14 = vadd.f32 %v3303_v13, %v2090_v4  ;;  %v3227_v15 = vpop.f32.mrf.mxu0  ;;  %v2162_v23 = vmul.f32 %v1149_v10, %v1149_v10 }
 0x14f   :  { %v1887_v16 = vadd.f32 %v1886_v9, %v700_v6  ;;  %v2019_v18 = vadd.f32 %v2018_v8, %v1956_v7  ;;  %v2801_v20 = vpack.c.bf16 %v3227_v15, %v3226_v62  ;;  %v3307_v21 = vpop.f32.mrf.mxu1  ;;  %v1960_v45 = vmul.f32 %v3227_v15, %v3227_v15 }
 0x150   :  { %v2092_v22 = vadd.f32 %v2091_v14, %v1149_v10  ;;  %v2224_v24 = vadd.f32 %v2223_v12, %v2161_v11  ;;  %v2961_v25 = vpack.c.bf16 %v3307_v21, %v3306_v2  ;;  %v703_v26 = vpop.f32.mrf.mxu0  ;;  %v2165_v13 = vmul.f32 %v3307_v21, %v3307_v21 }
 0x151   :  { %v2020_v27 = vadd.f32 %v2019_v18, %v1957_v17  ;;  %3040 = vst [vmem:[%s4060_s6 + $0xd8] sm:$0xff] %v2801_v20   ;;  %v2796_v28 = vpack.c.bf16 %v703_v26, %v700_v6  ;;  %v1888_v29 = vadd.f32 %v1887_v16, %v703_v26  ;;  %v1958_v30 = vmul.f32 %v703_v26, %v703_v26  ;;  %v1152_v31 = vpop.f32.mrf.mxu1 }
 0x152   :  { %v2225_v32 = vadd.f32 %v2224_v24, %v2162_v23  ;;  %3071 = vst [vmem:[%s4061_s8 + $0xd8] sm:$0xff] %v2961_v25   ;;  %v2956_v33 = vpack.c.bf16 %v1152_v31, %v1149_v10  ;;  %v2093_v34 = vadd.f32 %v2092_v22, %v1152_v31  ;;  %v2163_v35 = vmul.f32 %v1152_v31, %v1152_v31  ;;  %v3230_v36 = vpop.f32.mrf.mxu0 }
 0x153   :  { %3039 = vst [vmem:[%s4060_s6 + $0xd0] sm:$0xff] %v2796_v28   ;;  %v1889_v38 = vadd.f32 %v3226_v62, %v1888_v29  ;;  %v2021_v39 = vadd.f32 %v2020_v27, %v1958_v30  ;;  %v3310_v40 = vpop.f32.mrf.mxu1  ;;  %v1963_v7 = vmul.f32 %v3230_v36, %v3230_v36 }
 0x154   :  { %3070 = vst [vmem:[%s4061_s8 + $0xd0] sm:$0xff] %v2956_v33   ;;  %v2094_v42 = vadd.f32 %v3306_v2, %v2093_v34  ;;  %v2226_v43 = vadd.f32 %v2225_v32, %v2163_v35  ;;  %v716_v44 = vpop.f32.mrf.mxu0  ;;  %v2168_v11 = vmul.f32 %v3310_v40, %v3310_v40 }
 0x155   :  { %v2022_v46 = vadd.f32 %v2021_v39, %v1959_v37  ;;  %v1890_v47 = vadd.f32 %v3227_v15, %v1889_v38  ;;  %v1165_v48 = vpop.f32.mrf.mxu1  ;;  %v1961_v53 = vmul.f32 %v716_v44, %v716_v44 }
 0x156   :  { %v2227_v49 = vadd.f32 %v2226_v43, %v2164_v41  ;;  %v2095_v50 = vadd.f32 %v3307_v21, %v2094_v42  ;;  %v3231_v51 = vpop.f32.mrf.mxu0  ;;  %v2166_v58 = vmul.f32 %v1165_v48, %v1165_v48 }
 0x157   :  { %v1891_v52 = vadd.f32 %v1890_v47, %v716_v44  ;;  %v2023_v54 = vadd.f32 %v2022_v46, %v1960_v45  ;;  %v2811_v55 = vpack.c.bf16 %v3231_v51, %v3230_v36  ;;  %v3311_v56 = vpop.f32.mrf.mxu1  ;;  %v1964_v16 = vmul.f32 %v3231_v51, %v3231_v51 }
 0x158   :  { %v2096_v57 = vadd.f32 %v2095_v50, %v1165_v48  ;;  %v2228_v59 = vadd.f32 %v2227_v49, %v2165_v13  ;;  %v2971_v60 = vpack.c.bf16 %v3311_v56, %v3310_v40  ;;  %v719_v19 = vpop.f32.mrf.mxu0  ;;  %v2169_v21 = vmul.f32 %v3311_v56, %v3311_v56 }
 0x159   :  { %v2024_v61 = vadd.f32 %v2023_v54, %v1961_v53  ;;  %3042 = vst [vmem:[%s4060_s6 + $0xe8] sm:$0xff] %v2811_v55   ;;  %v2806_v62 = vpack.c.bf16 %v719_v19, %v716_v44  ;;  %v1892_v63 = vadd.f32 %v1891_v52, %v719_v19  ;;  %v1962_v0 = vmul.f32 %v719_v19, %v719_v19  ;;  %v1168_v1 = vpop.f32.mrf.mxu1 }
 0x15a   :  { %v2229_v2 = vadd.f32 %v2228_v59, %v2166_v58  ;;  %3073 = vst [vmem:[%s4061_s8 + $0xe8] sm:$0xff] %v2971_v60   ;;  %v2966_v3 = vpack.c.bf16 %v1168_v1, %v1165_v48  ;;  %v2097_v4 = vadd.f32 %v2096_v57, %v1168_v1  ;;  %v2167_v5 = vmul.f32 %v1168_v1, %v1168_v1  ;;  %v3234_v6 = vpop.f32.mrf.mxu0 }
 0x15b   :  { %3041 = vst [vmem:[%s4060_s6 + $0xe0] sm:$0xff] %v2806_v62   ;;  %v1893_v8 = vadd.f32 %v3230_v36, %v1892_v63  ;;  %v2025_v9 = vadd.f32 %v2024_v61, %v1962_v0  ;;  %v3314_v10 = vpop.f32.mrf.mxu1  ;;  %v1967_v44 = vmul.f32 %v3234_v6, %v3234_v6 }
 0x15c   :  { %3072 = vst [vmem:[%s4061_s8 + $0xe0] sm:$0xff] %v2966_v3   ;;  %v2098_v12 = vadd.f32 %v3310_v40, %v2097_v4  ;;  %v2230_v14 = vadd.f32 %v2229_v2, %v2167_v5  ;;  %v732_v15 = vpop.f32.mrf.mxu0  ;;  %v2172_v47 = vmul.f32 %v3314_v10, %v3314_v10 }
 0x15d   :  { %v2026_v17 = vadd.f32 %v2025_v9, %v1963_v7  ;;  %v1894_v18 = vadd.f32 %v3231_v51, %v1893_v8  ;;  %v1181_v20 = vpop.f32.mrf.mxu1  ;;  %v1965_v26 = vmul.f32 %v732_v15, %v732_v15 }
 0x15e   :  { %v2231_v22 = vadd.f32 %v2230_v14, %v2168_v11  ;;  %v2099_v23 = vadd.f32 %v3311_v56, %v2098_v12  ;;  %v3235_v24 = vpop.f32.mrf.mxu0  ;;  %v2170_v31 = vmul.f32 %v1181_v20, %v1181_v20 }
 0x15f   :  { %v1895_v25 = vadd.f32 %v1894_v18, %v732_v15  ;;  %v2027_v27 = vadd.f32 %v2026_v17, %v1964_v16  ;;  %v2821_v28 = vpack.c.bf16 %v3235_v24, %v3234_v6  ;;  %v3315_v29 = vpop.f32.mrf.mxu1  ;;  %v1968_v49 = vmul.f32 %v3235_v24, %v3235_v24 }
 0x160   :  { %v2100_v30 = vadd.f32 %v2099_v23, %v1181_v20  ;;  %v2232_v32 = vadd.f32 %v2231_v22, %v2169_v21  ;;  %v2981_v33 = vpack.c.bf16 %v3315_v29, %v3314_v10  ;;  %v735_v34 = vpop.f32.mrf.mxu0  ;;  %v2173_v52 = vmul.f32 %v3315_v29, %v3315_v29 }
 0x161   :  { %v2028_v35 = vadd.f32 %v2027_v27, %v1965_v26  ;;  %3044 = vst [vmem:[%s4060_s6 + $0xf8] sm:$0xff] %v2821_v28   ;;  %v2816_v36 = vpack.c.bf16 %v735_v34, %v732_v15  ;;  %v1896_v37 = vadd.f32 %v1895_v25, %v735_v34  ;;  %v1966_v38 = vmul.f32 %v735_v34, %v735_v34  ;;  %v1184_v39 = vpop.f32.mrf.mxu1 }
 0x162   :  { %v2233_v40 = vadd.f32 %v2232_v32, %v2170_v31  ;;  %3075 = vst [vmem:[%s4061_s8 + $0xf8] sm:$0xff] %v2981_v33   ;;  %v2976_v41 = vpack.c.bf16 %v1184_v39, %v1181_v20  ;;  %v2101_v42 = vadd.f32 %v2100_v30, %v1184_v39  ;;  %v2171_v43 = vmul.f32 %v1184_v39, %v1184_v39 }
 0x163   :  { %3043 = vst [vmem:[%s4060_s6 + $0xf0] sm:$0xff] %v2816_v36   ;;  %v1897_v45 = vadd.f32 %v3234_v6, %v1896_v37  ;;  %v2029_v46 = vadd.f32 %v2028_v35, %v1966_v38 }
 0x164   :  { %3074 = vst [vmem:[%s4061_s8 + $0xf0] sm:$0xff] %v2976_v41   ;;  %v2102_v48 = vadd.f32 %v3314_v10, %v2101_v42  ;;  %v2234_v13 = vadd.f32 %v2233_v40, %v2171_v43 }
 0x165   :  { %v1898_v50 = vadd.f32 %v3235_v24, %v1897_v45  ;;  %v2030_v51 = vadd.f32 %v2029_v46, %v1967_v44 }
 0x166   :  { %v2103_v53 = vadd.f32 %v3315_v29, %v2102_v48  ;;  %v2235_v54 = vadd.f32 %v2234_v13, %v2172_v47 }
 0x167   :  { %v1899_v55 = vrot.slane %v1898_v50, 4  ;;  %v2031_v56 = vadd.f32 %v2030_v51, %v1968_v49 }
 0x168   :  { %v2104_v57 = vrot.slane %v2103_v53, 4  ;;  %v2236_v58 = vadd.f32 %v2235_v54, %v2173_v52 }
 0x169   :  { %v1900_v59 = vadd.f32 %v1899_v55, %v1898_v50  ;;  %v2032_v60 = vrot.slane %v2031_v56, 4 }
 0x16a   :  { %v2105_v19 = vadd.f32 %v2104_v57, %v2103_v53  ;;  %v2237_v61 = vrot.slane %v2236_v58, 4 }
 0x16b   :  { %v1901_v62 = vrot.slane %v1900_v59, 2  ;;  %v2033_v63 = vadd.f32 %v2032_v60, %v2031_v56 }
 0x16c   :  { %v2106_v0 = vrot.slane %v2105_v19, 2  ;;  %v2238_v1 = vadd.f32 %v2237_v61, %v2236_v58 }
 0x16d   :  { %v1902_v2 = vadd.f32 %v1901_v62, %v1900_v59  ;;  %v2034_v3 = vrot.slane %v2033_v63, 2 }
 0x16e   :  { %v2107_v4 = vadd.f32 %v2106_v0, %v2105_v19  ;;  %v2239_v5 = vrot.slane %v2238_v1, 2 }
 0x16f   :  { %v1903_v6 = vrot.slane %v1902_v2, 1  ;;  %v2035_v7 = vadd.f32 %v2034_v3, %v2033_v63 }
 0x170   :  { %v2108_v8 = vrot.slane %v2107_v4, 1  ;;  %v2240_v9 = vadd.f32 %v2239_v5, %v2238_v1 }
 0x171   :  { %v2036_v10 = vrot.slane %v2035_v7, 1  ;;  %v1904_v12 = vadd.f32 %v1903_v6, %v1902_v2 }
 0x172   :  { %v2241_v11 = vrot.slane %v2240_v9, 1  ;;  %v2109_v15 = vadd.f32 %v2108_v8, %v2107_v4 }
 0x173   :  { %v2037_v14 = vadd.f32 %v2036_v10, %v2035_v7 }
 0x174   :  { %v2242_v16 = vadd.f32 %v2241_v11, %v2240_v9 }
 0x175   :  { %v2039_v17 = vsel %vm2038_vm0, %v1904_v12, %v2037_v14 }
 0x176   :  { %2040 = vst [vmem:[%s4062_s7] sm:$0x3] %v2039_v17  ;;  %v2243_v18 = vsel %vm2038_vm0, %v2109_v15, %v2242_v16 }
 0x177   :  { %2244 = vst [vmem:[%s4063_s9] sm:$0x3] %v2243_v18 }

</bundles_post_ra>
